<compile_context>
chip_gen: v7x
topology: tpu7x:2x2x1
jax: 0.10.0
libtpu: 0.0.40
codegen_flags: <defaults>
</compile_context>

<pallas_src>
import functools
import math

import jax
import jax.numpy as jnp
from jax import lax
from jax.experimental import pallas as pl
from jax.experimental.pallas import tpu as pltpu

KW = 49      # taps (conv1 along W, conv2 along H)
PAD = 24
C = 64       # hidden channels
CP = 2 * C   # lane-packed channels: 2 adjacent W columns share one 128-lane vreg
SUB = 128    # rows per vreg-resident accumulator sub-tile in kernel 2


# --------------------------- kernel 1: conv1 + tanh ---------------------------
def _conv1_kernel(x_ref, band_ref, b1_ref, out_ref, *, TH1, H):
    # x_ref   : (1, TH1, Wp2)   H- and W- zero padded single-channel input rows
    # band_ref: (Wp2, W*C)      band[p, w*C + c] = w1[p - w, c] (0 elsewhere)
    # b1_ref  : (1, W*C)        bias tiled along w
    # out_ref : (1, TH1, W*C)   tanh(conv1) for valid rows; halo rows zeroed
    i = pl.program_id(1)
    row0 = i * TH1
    y = jnp.dot(x_ref[0], band_ref[...],
                preferred_element_type=jnp.float32)                # MXU (TH1, W*C)
    y = jnp.tanh(y + b1_ref[...])
    rows = row0 + lax.broadcasted_iota(jnp.int32, (TH1, 1), 0)
    valid = jnp.logical_and(rows >= PAD, rows < PAD + H)
    out_ref[...] = jnp.where(valid, y, 0.0)[None]


# -------------------- kernel 2: conv2 + tanh + conv3 (1x1) --------------------
def _conv23_kernel(x2_hbm, w2b_ref, b2_ref, w3_ref, out_ref, win_ref, sem,
                   *, TH2, WP, n_j, img_rows, n_sub):
    # x2_hbm : (N*Hp*WP, 128) HBM ref -- lane-packed conv1 output (pairs of w)
    # w2b_ref: (49, 128, 128)  block-diagonal conv2 weights (w2[k] twice)
    # b2_ref : (1, 128)        [b2, b2]
    # w3_ref : (2, 128)        row p holds w3 in lanes [p*64, p*64+64)
    # out_ref: (1, 2, TH2*WP)  lane-dense output rows (even / odd W columns)
    # win_ref: (2, (TH2+48)*WP, 128)  double-buffered halo'd input window
    M2 = TH2 * WP
    WIN = (TH2 + 2 * PAD) * WP
    n = pl.program_id(0)
    j = pl.program_id(1)
    slot = j % 2

    def window_copy(jj, buf_slot):
        off = n * img_rows + jj * M2
        return pltpu.make_async_copy(x2_hbm.at[pl.ds(off, WIN)],
                                     win_ref.at[buf_slot],
                                     sem.at[buf_slot])

    @pl.when(j == 0)                      # prime the pipeline for this image
    def _():
        window_copy(0, 0).start()

    @pl.when(j + 1 < n_j)                 # prefetch next row tile of same image
    def _():
        window_copy(j + 1, 1 - slot).start()

    window_copy(j, slot).wait()

    # 49 taps, K=128 block-diagonal matmuls, accumulated in vregs per sub-tile.
    for s in range(n_sub):
        r0 = s * SUB
        acc = jnp.dot(win_ref[slot, r0:r0 + SUB, :], w2b_ref[0],
                      preferred_element_type=jnp.float32)          # (SUB, 128)
        for k in range(1, KW):
            o = r0 + k * WP
            acc = acc + jnp.dot(win_ref[slot, o:o + SUB, :], w2b_ref[k],
                                preferred_element_type=jnp.float32)
        h2 = jnp.tanh(acc + b2_ref[...])                           # (SUB, 128)
        # conv3 (1x1, no bias) per lane half: lane-dense (2, SUB) rows
        row = lax.dot_general(w3_ref[...], h2, (((1,), (1,)), ((), ())),
                              preferred_element_type=jnp.float32)
        out_ref[0, :, r0:r0 + SUB] = row


# ------------------------------- host-side glue -------------------------------
def _vmem_capacity():
    try:
        return int(pltpu.get_tpu_info().vmem_capacity_bytes)
    except Exception:
        return 64 * 1024 * 1024            # v7x-safe fallback


def _make_band(w1kc, W):
    # band[p, w*C + c] = w1[p - w, c] for 0 <= p - w < 49, else 0
    Wp2 = W + 2 * PAD
    p = jnp.arange(Wp2)[:, None]
    w = jnp.arange(W)[None, :]
    idx = p - w
    valid = jnp.logical_and(idx >= 0, idx < KW)
    w1e = jnp.concatenate([w1kc, jnp.zeros((1, C), w1kc.dtype)], axis=0)
    band = w1e[jnp.where(valid, idx, KW)]                          # (Wp2, W, C)
    return band.reshape(Wp2, W * C)


def _pick_tiles(H, W, vmem_cap):
    Hp, Wp2, WP = H + 2 * PAD, W + 2 * PAD, W // 2
    budget = (vmem_cap * 7) // 16          # headroom for compiler scratch/spills

    # kernel 1: prefer a single tile covering all padded rows.
    def k1_bytes(t):
        return (2 * Wp2 * W * C + 2 * t * Wp2 + 2 * t * W * C + W * C) * 4
    TH1 = None
    for t in [Hp] + [t for t in (256, 128, 64, 32, 16, 8) if Hp % t == 0]:
        if k1_bytes(t) <= budget:
            TH1 = t
            break
    # TODO(synk): tile W (per-tile band slab) when the banded conv1 matrix alone
    #             exceeds the VMEM budget at very large W.
    assert TH1 is not None, "W too large for the banded conv1 formulation"

    # kernel 2: largest row tile whose double-buffered halo window + packed
    # weights fit VMEM; cap the unrolled sub-tile count at 4.
    w2b_bytes = 2 * KW * CP * CP * 4
    def k2_bytes(t):
        return w2b_bytes + (2 * (t + 2 * PAD) * WP * CP + 4 * t * WP) * 4
    TH2 = None
    for t in (256, 128, 64, 32, 16, 8):
        if H % t or (t * W) % (2 * SUB) or (t * W) > 8 * SUB:
            continue
        if k2_bytes(t) <= budget:
            TH2 = t
            break
    assert TH2 is not None, \
        "need a divisor t of H with (t * W) % 256 == 0 that fits VMEM"
    return TH1, TH2


def deconv_forward(x_nchw, params):
    w1kc, b1, w2b, b2p, w3p = params
    N, cin, H, W = x_nchw.shape
    assert cin == 1 and H % 8 == 0 and W % 16 == 0
    Hp, Wp2, WP = H + 2 * PAD, W + 2 * PAD, W // 2
    vmem_cap = _vmem_capacity()
    vmem_limit = (vmem_cap * 3) // 4
    TH1, TH2 = _pick_tiles(H, W, vmem_cap)
    n_i, n_j = Hp // TH1, H // TH2
    M2 = TH2 * WP
    n_sub = M2 // SUB
    img_rows = Hp * WP

    # tiny single-channel input: zero-pad H and W in plain JAX
    xp = jnp.pad(x_nchw[:, 0], ((0, 0), (PAD, PAD), (PAD, PAD)))   # (N, Hp, Wp2)
    band = _make_band(w1kc, W)                                     # (Wp2, W*C)
    b1t = jnp.tile(b1, W).reshape(1, W * C)                        # (1, W*C)

    # ---- conv1 + tanh, written directly into the H-padded channels-last layout
    h1 = pl.pallas_call(
        functools.partial(_conv1_kernel, TH1=TH1, H=H),
        out_shape=jax.ShapeDtypeStruct((N, Hp, W * C), jnp.float32),
        grid=(N, n_i),
        in_specs=[
            pl.BlockSpec((1, TH1, Wp2), lambda n, i: (n, i, 0)),
            pl.BlockSpec((Wp2, W * C), lambda n, i: (0, 0)),
            pl.BlockSpec((1, W * C), lambda n, i: (0, 0)),
        ],
        out_specs=pl.BlockSpec((1, TH1, W * C), lambda n, i: (n, i, 0)),
        compiler_params=pltpu.CompilerParams(
            dimension_semantics=("parallel", "parallel"),
            vmem_limit_bytes=vmem_limit),
    )(xp, band, b1t)

    # (N, Hp, W*C) -> (N*Hp*(W/2), 128): pure row-major collapse (free); lanes
    # now hold [col w even: 64ch | col w odd: 64ch] -- fully lane-dense vregs.
    x2 = h1.reshape(N * Hp * WP, CP)

    # ---- conv2 + tanh + conv3, H-tiled, halo windows fetched via manual DMA
    out2 = pl.pallas_call(
        functools.partial(_conv23_kernel, TH2=TH2, WP=WP, n_j=n_j,
                          img_rows=img_rows, n_sub=n_sub),
        out_shape=jax.ShapeDtypeStruct((N, 2, H * WP), jnp.float32),
        grid=(N, n_j),
        in_specs=[
            pl.BlockSpec(memory_space=pl.ANY),
            pl.BlockSpec((KW, CP, CP), lambda n, j: (0, 0, 0)),
            pl.BlockSpec((1, CP), lambda n, j: (0, 0)),
            pl.BlockSpec((2, CP), lambda n, j: (0, 0)),
        ],
        out_specs=pl.BlockSpec((1, 2, M2), lambda n, j: (n, 0, j)),
        scratch_shapes=[
            pltpu.VMEM((2, (TH2 + 2 * PAD) * WP, CP), jnp.float32),
            pltpu.SemaphoreType.DMA((2,)),
        ],
        compiler_params=pltpu.CompilerParams(
            dimension_semantics=("parallel", "arbitrary"),
            vmem_limit_bytes=vmem_limit),
    )(x2, w2b, b2p, w3p)

    # un-interleave even/odd W columns (tiny, host side)
    return out2.reshape(N, 2, H, WP).transpose(0, 2, 3, 1).reshape(N, 1, H, W)


# ---------------- deterministic parameter init (torch layouts) ----------------
def init_torch_params(key):
    ks = jax.random.split(key, 5)

    def xavier(k, shape):  # shape = (out_c, in_c, kh, kw)
        fan_out = shape[0] * shape[2] * shape[3]
        fan_in = shape[1] * shape[2] * shape[3]
        a = math.sqrt(6.0 / (fan_in + fan_out))
        return jax.random.uniform(k, shape, jnp.float32, -a, a)

    w1_t = xavier(ks[0], (C, 1, 1, KW))
    b1_t = jax.random.uniform(ks[1], (C,), jnp.float32, -0.05, 0.05)
    w2_t = xavier(ks[2], (C, C, KW, 1))
    b2_t = jax.random.uniform(ks[3], (C,), jnp.float32, -0.05, 0.05)
    w3_t = xavier(ks[4], (1, C, 1, 1))
    return (w1_t, b1_t, w2_t, b2_t, w3_t)


def to_kernel_layout(tp):
    w1_t, b1_t, w2_t, b2_t, w3_t = tp
    w1kc = jnp.transpose(w1_t[:, 0, 0, :])                 # (49, C): w1kc[k, c]
    w2 = jnp.transpose(w2_t[:, :, :, 0], (2, 1, 0))        # (49, ci, co)
    w2b = jnp.zeros((KW, CP, CP), jnp.float32)             # block-diagonal pack
    w2b = w2b.at[:, :C, :C].set(w2).at[:, C:, C:].set(w2)
    b2p = jnp.concatenate([b2_t, b2_t]).reshape(1, CP)
    w3 = w3_t.reshape(C)
    w3p = jnp.zeros((2, CP), jnp.float32)
    w3p = w3p.at[0, :C].set(w3).at[1, C:].set(w3)
    return (w1kc, b1_t, w2b, b2p, w3p)


def ref_forward(x, w1_t, b1_t, w2_t, b2_t, w3_t):
    dn = ('NCHW', 'OIHW', 'NCHW')
    p = lax.Precision.HIGHEST
    y = lax.conv_general_dilated(x, w1_t, (1, 1), ((0, 0), (PAD, PAD)),
                                 dimension_numbers=dn, precision=p)
    y = jnp.tanh(y + b1_t[None, :, None, None])
    y = lax.conv_general_dilated(y, w2_t, (1, 1), ((PAD, PAD), (0, 0)),
                                 dimension_numbers=dn, precision=p)
    y = jnp.tanh(y + b2_t[None, :, None, None])
    y = lax.conv_general_dilated(y, w3_t, (1, 1), ((0, 0), (0, 0)),
                                 dimension_numbers=dn, precision=p)
    return y


if __name__ == "__main__":
    key = jax.random.PRNGKey(0)
    kx, kp = jax.random.split(key)
    N, H, W = 2, 16, 16
    x = jax.random.normal(kx, (N, 1, H, W), jnp.float32)

    torch_params = init_torch_params(kp)
    params = to_kernel_layout(torch_params)

    out = jax.jit(deconv_forward)(x, params)
    out = jax.block_until_ready(out)
    assert out.shape == (N, 1, H, W)

    ref = ref_forward(x, *torch_params)
    if not jnp.allclose(out, ref, atol=2e-3, rtol=2e-3):
        raise AssertionError(
            f"mismatch vs lax.conv reference, max err "
            f"{float(jnp.max(jnp.abs(out - ref)))}")

    print("KERNEL_OK")
</pallas_src>

<mosaic_0001>
module attributes {stable_mosaic.version = 11 : i64} {
  func.func @_conv1_kernel(%arg0: i32, %arg1: i32, %arg2: memref<1x64x64xf32, #tpu.memory_space<vmem>>, %arg3: memref<64x1024xf32, #tpu.memory_space<vmem>>, %arg4: memref<1x1024xf32, #tpu.memory_space<vmem>>, %arg5: memref<1x64x1024xf32, #tpu.memory_space<vmem>>) attributes {dimension_semantics = [#tpu.dimension_semantics<parallel>, #tpu.dimension_semantics<parallel>], iteration_bounds = array<i64: 2, 1>, scalar_prefetch = 0 : i64, scratch_operands = 0 : i64, tpu.core_type = #tpu.core_type<tc>, window_params = [{transform_indices = @transform_0, window_bounds = array<i64: 1, 64, 64>}, {pipeline_mode = #tpu.pipeline_mode<synchronous>, transform_indices = @transform_1, window_bounds = array<i64: 64, 1024>}, {pipeline_mode = #tpu.pipeline_mode<synchronous>, transform_indices = @transform_2, window_bounds = array<i64: 1, 1024>}, {transform_indices = @transform_3, window_bounds = array<i64: 1, 64, 1024>}]} {
    %c64_i32 = arith.constant 64 : i32
    %0 = arith.muli %arg1, %c64_i32 : i32
    %c0 = arith.constant 0 : index
    %c0_0 = arith.constant 0 : index
    %c0_1 = arith.constant 0 : index
    %1 = vector.load %arg2[%c0, %c0_0, %c0_1] : memref<1x64x64xf32, #tpu.memory_space<vmem>>, vector<1x64x64xf32>
    %2 = vector.shape_cast %1 : vector<1x64x64xf32> to vector<64x64xf32>
    %c0_2 = arith.constant 0 : index
    %c0_3 = arith.constant 0 : index
    %3 = vector.load %arg3[%c0_2, %c0_3] : memref<64x1024xf32, #tpu.memory_space<vmem>>, vector<64x1024xf32>
    %cst = arith.constant dense<0.000000e+00> : vector<64x1024xf32>
    %4 = tpu.matmul %2, %3, %cst {dimension_numbers = #tpu.dot_dimension_numbers<[1], [0], [0], [1], [0, 0, 1, 1], [], []>} : vector<64x64xf32>, vector<64x1024xf32>, vector<64x1024xf32> -> vector<64x1024xf32>
    %c0_4 = arith.constant 0 : index
    %c0_5 = arith.constant 0 : index
    %5 = vector.load %arg4[%c0_4, %c0_5] : memref<1x1024xf32, #tpu.memory_space<vmem>>, vector<1x1024xf32>
    %6 = vector.broadcast %5 : vector<1x1024xf32> to vector<64x1024xf32>
    %7 = arith.addf %4, %6 : vector<64x1024xf32>
    %8 = math.tanh %7 : vector<64x1024xf32>
    %9 = tpu.iota {dimensions = array<i32: 0>} : vector<64x1xi32>
    %10 = vector.broadcast %0 : i32 to vector<64x1xi32>
    %11 = arith.addi %10, %9 : vector<64x1xi32>
    %c24_i32 = arith.constant 24 : i32
    %12 = vector.broadcast %c24_i32 : i32 to vector<64x1xi32>
    %13 = arith.cmpi sge, %11, %12 : vector<64x1xi32>
    %c40_i32 = arith.constant 40 : i32
    %14 = vector.broadcast %c40_i32 : i32 to vector<64x1xi32>
    %15 = arith.cmpi slt, %11, %14 : vector<64x1xi32>
    %16 = arith.andi %13, %15 : vector<64x1xi1>
    %cst_6 = arith.constant 0.000000e+00 : f32
    %17 = vector.shape_cast %16 : vector<64x1xi1> to vector<64x1xi1>
    %18 = vector.broadcast %17 : vector<64x1xi1> to vector<64x1024xi1>
    %19 = vector.broadcast %cst_6 : f32 to vector<64x1024xf32>
    %20 = arith.select %18, %8, %19 : vector<64x1024xi1>, vector<64x1024xf32>
    %21 = vector.shape_cast %20 : vector<64x1024xf32> to vector<1x64x1024xf32>
    %c0_7 = arith.constant 0 : index
    %c0_8 = arith.constant 0 : index
    %c0_9 = arith.constant 0 : index
    %22 = vector.load %arg5[%c0_7, %c0_8, %c0_9] : memref<1x64x1024xf32, #tpu.memory_space<vmem>>, vector<1x64x1024xf32>
    tpu.vector_store %arg5[%c0_7, %c0_8, %c0_9], %21 {strides = array<i32>} : memref<1x64x1024xf32, #tpu.memory_space<vmem>>, vector<1x64x1024xf32>,
    return
  }
  func.func @transform_0(%arg0: i32, %arg1: i32) -> (i32, i32, i32) {
    %c0_i32 = arith.constant 0 : i32
    %c0_i32_0 = arith.constant 0 : i32
    return %arg0, %arg1, %c0_i32 : i32, i32, i32
  }
  func.func @transform_1(%arg0: i32, %arg1: i32) -> (i32, i32) {
    %c0_i32 = arith.constant 0 : i32
    %c0_i32_0 = arith.constant 0 : i32
    %c0_i32_1 = arith.constant 0 : i32
    return %c0_i32, %c0_i32_0 : i32, i32
  }
  func.func @transform_2(%arg0: i32, %arg1: i32) -> (i32, i32) {
    %c0_i32 = arith.constant 0 : i32
    %c0_i32_0 = arith.constant 0 : i32
    %c0_i32_1 = arith.constant 0 : i32
    return %c0_i32, %c0_i32_0 : i32, i32
  }
  func.func @transform_3(%arg0: i32, %arg1: i32) -> (i32, i32, i32) {
    %c0_i32 = arith.constant 0 : i32
    %c0_i32_0 = arith.constant 0 : i32
    return %arg0, %arg1, %c0_i32 : i32, i32, i32
  }
}

module attributes {stable_mosaic.version = 11 : i64} {
  func.func @_conv23_kernel(%arg0: i32, %arg1: i32, %arg2: memref<1024x128xf32, #tpu.memory_space<any>>, %arg3: memref<49x128x128xf32, #tpu.memory_space<vmem>>, %arg4: memref<1x128xf32, #tpu.memory_space<vmem>>, %arg5: memref<2x128xf32, #tpu.memory_space<vmem>>, %arg6: memref<1x2x128xf32, #tpu.memory_space<vmem>>, %arg7: memref<2x512x128xf32, #tpu.memory_space<vmem>>, %arg8: memref<2x!tpu.dma_semaphore, #tpu.memory_space<semaphore_mem>>) attributes {dimension_semantics = [#tpu.dimension_semantics<parallel>, #tpu.dimension_semantics<arbitrary>], iteration_bounds = array<i64: 2, 1>, scalar_prefetch = 0 : i64, scratch_operands = 2 : i64, tpu.core_type = #tpu.core_type<tc>, window_params = [{}, {pipeline_mode = #tpu.pipeline_mode<synchronous>, transform_indices = @transform_1, window_bounds = array<i64: 49, 128, 128>}, {pipeline_mode = #tpu.pipeline_mode<synchronous>, transform_indices = @transform_2, window_bounds = array<i64: 1, 128>}, {pipeline_mode = #tpu.pipeline_mode<synchronous>, transform_indices = @transform_3, window_bounds = array<i64: 2, 128>}, {transform_indices = @transform_4, window_bounds = array<i64: 1, 2, 128>}]} {
    %c2_i32 = arith.constant 2 : i32
    %c0_i32 = arith.constant 0 : i32
    %0 = arith.cmpi eq, %c2_i32, %c0_i32 : i32
    %c1_i32 = arith.constant 1 : i32
    %1 = arith.select %0, %c1_i32, %c2_i32 : i32
    %2 = arith.remsi %arg1, %1 : i32
    %c0_i32_0 = arith.constant 0 : i32
    %3 = arith.cmpi ne, %2, %c0_i32_0 : i32
    %c0_i32_1 = arith.constant 0 : i32
    %4 = arith.cmpi slt, %2, %c0_i32_1 : i32
    %c0_i32_2 = arith.constant 0 : i32
    %5 = arith.cmpi slt, %1, %c0_i32_2 : i32
    %6 = arith.xori %4, %5 : i1
    %7 = arith.andi %6, %3 : i1
    %8 = arith.addi %2, %1 : i32
    %9 = arith.select %7, %8, %2 : i32
    %c0_i32_3 = arith.constant 0 : i32
    %10 = arith.cmpi eq, %arg1, %c0_i32_3 : i32
    %11 = arith.extui %10 : i1 to i32
    %c0_i32_4 = arith.constant 0 : i32
    %12 = arith.cmpi ne, %11, %c0_i32_4 : i32
    scf.if %12 {
      %c512_i32_221 = arith.constant 512 : i32
      %376 = arith.muli %arg0, %c512_i32_221 : i32
      %c0_i32_222 = arith.constant 0 : i32
      %377 = arith.addi %376, %c0_i32_222 : i32
      %c0_i32_223 = arith.constant 0 : i32
      %c0_i32_224 = arith.constant 0 : i32
      %c0_i32_225 = arith.constant 0 : i32
      %378 = tpu.memref_slice %arg2[%377, %c0_i32_225] : memref<1024x128xf32, #tpu.memory_space<any>> -> memref<512x128xf32, #tpu.memory_space<any>>
      %c0_i32_226 = arith.constant 0 : i32
      %c0_i32_227 = arith.constant 0 : i32
      %379 = tpu.memref_slice %arg7[%c0_i32_223, %c0_i32_226, %c0_i32_227] : memref<2x512x128xf32, #tpu.memory_space<vmem>> -> memref<1x512x128xf32, #tpu.memory_space<vmem>>
      %380 = tpu.memref_squeeze %379 : memref<1x512x128xf32, #tpu.memory_space<vmem>> -> memref<512x128xf32, #tpu.memory_space<vmem>>
      %381 = tpu.memref_slice %arg8[%c0_i32_224] : memref<2x!tpu.dma_semaphore, #tpu.memory_space<semaphore_mem>> -> memref<1x!tpu.dma_semaphore, #tpu.memory_space<semaphore_mem>>
      %382 = tpu.memref_squeeze %381 : memref<1x!tpu.dma_semaphore, #tpu.memory_space<semaphore_mem>> -> memref<!tpu.dma_semaphore, #tpu.memory_space<semaphore_mem>>
      tpu.enqueue_dma source(%378 : memref<512x128xf32, #tpu.memory_space<any>>) target(%380 : memref<512x128xf32, #tpu.memory_space<vmem>>) target_semaphore(%382 : memref<!tpu.dma_semaphore, #tpu.memory_space<semaphore_mem>>)
    } else {
    }
    %c1_i32_5 = arith.constant 1 : i32
    %13 = arith.addi %arg1, %c1_i32_5 : i32
    %c1_i32_6 = arith.constant 1 : i32
    %14 = arith.cmpi slt, %13, %c1_i32_6 : i32
    %15 = arith.extui %14 : i1 to i32
    %c0_i32_7 = arith.constant 0 : i32
    %16 = arith.cmpi ne, %15, %c0_i32_7 : i32
    scf.if %16 {
      %c1_i32_221 = arith.constant 1 : i32
      %376 = arith.addi %arg1, %c1_i32_221 : i32
      %c1_i32_222 = arith.constant 1 : i32
      %377 = arith.subi %c1_i32_222, %9 : i32
      %c512_i32_223 = arith.constant 512 : i32
      %378 = arith.muli %arg0, %c512_i32_223 : i32
      %c128_i32_224 = arith.constant 128 : i32
      %379 = arith.muli %376, %c128_i32_224 : i32
      %380 = arith.addi %378, %379 : i32
      %c0_i32_225 = arith.constant 0 : i32
      %381 = tpu.memref_slice %arg2[%380, %c0_i32_225] : memref<1024x128xf32, #tpu.memory_space<any>> -> memref<512x128xf32, #tpu.memory_space<any>>
      %c0_i32_226 = arith.constant 0 : i32
      %c0_i32_227 = arith.constant 0 : i32
      %382 = tpu.memref_slice %arg7[%377, %c0_i32_226, %c0_i32_227] : memref<2x512x128xf32, #tpu.memory_space<vmem>> -> memref<1x512x128xf32, #tpu.memory_space<vmem>>
      %383 = tpu.memref_squeeze %382 : memref<1x512x128xf32, #tpu.memory_space<vmem>> -> memref<512x128xf32, #tpu.memory_space<vmem>>
      %384 = tpu.memref_slice %arg8[%377] : memref<2x!tpu.dma_semaphore, #tpu.memory_space<semaphore_mem>> -> memref<1x!tpu.dma_semaphore, #tpu.memory_space<semaphore_mem>>
      %385 = tpu.memref_squeeze %384 : memref<1x!tpu.dma_semaphore, #tpu.memory_space<semaphore_mem>> -> memref<!tpu.dma_semaphore, #tpu.memory_space<semaphore_mem>>
      tpu.enqueue_dma source(%381 : memref<512x128xf32, #tpu.memory_space<any>>) target(%383 : memref<512x128xf32, #tpu.memory_space<vmem>>) target_semaphore(%385 : memref<!tpu.dma_semaphore, #tpu.memory_space<semaphore_mem>>)
    } else {
    }
    %c512_i32 = arith.constant 512 : i32
    %17 = arith.muli %arg0, %c512_i32 : i32
    %c128_i32 = arith.constant 128 : i32
    %18 = arith.muli %arg1, %c128_i32 : i32
    %19 = arith.addi %17, %18 : i32
    %c0_i32_8 = arith.constant 0 : i32
    %20 = tpu.memref_slice %arg2[%19, %c0_i32_8] : memref<1024x128xf32, #tpu.memory_space<any>> -> memref<512x128xf32, #tpu.memory_space<any>>
    %c0_i32_9 = arith.constant 0 : i32
    %c0_i32_10 = arith.constant 0 : i32
    %21 = tpu.memref_slice %arg7[%9, %c0_i32_9, %c0_i32_10] : memref<2x512x128xf32, #tpu.memory_space<vmem>> -> memref<1x512x128xf32, #tpu.memory_space<vmem>>
    %22 = tpu.memref_squeeze %21 : memref<1x512x128xf32, #tpu.memory_space<vmem>> -> memref<512x128xf32, #tpu.memory_space<vmem>>
    %23 = tpu.memref_slice %arg8[%9] : memref<2x!tpu.dma_semaphore, #tpu.memory_space<semaphore_mem>> -> memref<1x!tpu.dma_semaphore, #tpu.memory_space<semaphore_mem>>
    %24 = tpu.memref_squeeze %23 : memref<1x!tpu.dma_semaphore, #tpu.memory_space<semaphore_mem>> -> memref<!tpu.dma_semaphore, #tpu.memory_space<semaphore_mem>>
    tpu.wait_dma2 semaphore(%24 : memref<!tpu.dma_semaphore, #tpu.memory_space<semaphore_mem>>) src(%20 : memref<512x128xf32, #tpu.memory_space<any>>) dst(%22 : memref<512x128xf32, #tpu.memory_space<vmem>>)
    %25 = arith.index_cast %9 : i32 to index
    %c0 = arith.constant 0 : index
    %c0_11 = arith.constant 0 : index
    %26 = vector.load %arg7[%25, %c0, %c0_11] : memref<2x512x128xf32, #tpu.memory_space<vmem>>, vector<1x128x128xf32>
    %27 = vector.shape_cast %26 : vector<1x128x128xf32> to vector<128x128xf32>
    %c0_12 = arith.constant 0 : index
    %c0_13 = arith.constant 0 : index
    %c0_14 = arith.constant 0 : index
    %28 = vector.load %arg3[%c0_12, %c0_13, %c0_14] : memref<49x128x128xf32, #tpu.memory_space<vmem>>, vector<1x128x128xf32>
    %29 = vector.shape_cast %28 : vector<1x128x128xf32> to vector<128x128xf32>
    %cst = arith.constant dense<0.000000e+00> : vector<128x128xf32>
    %30 = tpu.matmul %27, %29, %cst {dimension_numbers = #tpu.dot_dimension_numbers<[1], [0], [0], [1], [0, 0, 1, 1], [], []>} : vector<128x128xf32>, vector<128x128xf32>, vector<128x128xf32> -> vector<128x128xf32>
    %31 = arith.index_cast %9 : i32 to index
    %c8 = arith.constant 8 : index
    %c0_15 = arith.constant 0 : index
    %32 = vector.load %arg7[%31, %c8, %c0_15] : memref<2x512x128xf32, #tpu.memory_space<vmem>>, vector<1x128x128xf32>
    %33 = vector.shape_cast %32 : vector<1x128x128xf32> to vector<128x128xf32>
    %c1 = arith.constant 1 : index
    %c0_16 = arith.constant 0 : index
    %c0_17 = arith.constant 0 : index
    %34 = vector.load %arg3[%c1, %c0_16, %c0_17] : memref<49x128x128xf32, #tpu.memory_space<vmem>>, vector<1x128x128xf32>
    %35 = vector.shape_cast %34 : vector<1x128x128xf32> to vector<128x128xf32>
    %cst_18 = arith.constant dense<0.000000e+00> : vector<128x128xf32>
    %36 = tpu.matmul %33, %35, %cst_18 {dimension_numbers = #tpu.dot_dimension_numbers<[1], [0], [0], [1], [0, 0, 1, 1], [], []>} : vector<128x128xf32>, vector<128x128xf32>, vector<128x128xf32> -> vector<128x128xf32>
    %37 = arith.addf %30, %36 : vector<128x128xf32>
    %38 = arith.index_cast %9 : i32 to index
    %c16 = arith.constant 16 : index
    %c0_19 = arith.constant 0 : index
    %39 = vector.load %arg7[%38, %c16, %c0_19] : memref<2x512x128xf32, #tpu.memory_space<vmem>>, vector<1x128x128xf32>
    %40 = vector.shape_cast %39 : vector<1x128x128xf32> to vector<128x128xf32>
    %c2 = arith.constant 2 : index
    %c0_20 = arith.constant 0 : index
    %c0_21 = arith.constant 0 : index
    %41 = vector.load %arg3[%c2, %c0_20, %c0_21] : memref<49x128x128xf32, #tpu.memory_space<vmem>>, vector<1x128x128xf32>
    %42 = vector.shape_cast %41 : vector<1x128x128xf32> to vector<128x128xf32>
    %cst_22 = arith.constant dense<0.000000e+00> : vector<128x128xf32>
    %43 = tpu.matmul %40, %42, %cst_22 {dimension_numbers = #tpu.dot_dimension_numbers<[1], [0], [0], [1], [0, 0, 1, 1], [], []>} : vector<128x128xf32>, vector<128x128xf32>, vector<128x128xf32> -> vector<128x128xf32>
    %44 = arith.addf %37, %43 : vector<128x128xf32>
    %45 = arith.index_cast %9 : i32 to index
    %c24 = arith.constant 24 : index
    %c0_23 = arith.constant 0 : index
    %46 = vector.load %arg7[%45, %c24, %c0_23] : memref<2x512x128xf32, #tpu.memory_space<vmem>>, vector<1x128x128xf32>
    %47 = vector.shape_cast %46 : vector<1x128x128xf32> to vector<128x128xf32>
    %c3 = arith.constant 3 : index
    %c0_24 = arith.constant 0 : index
    %c0_25 = arith.constant 0 : index
    %48 = vector.load %arg3[%c3, %c0_24, %c0_25] : memref<49x128x128xf32, #tpu.memory_space<vmem>>, vector<1x128x128xf32>
    %49 = vector.shape_cast %48 : vector<1x128x128xf32> to vector<128x128xf32>
    %cst_26 = arith.constant dense<0.000000e+00> : vector<128x128xf32>
    %50 = tpu.matmul %47, %49, %cst_26 {dimension_numbers = #tpu.dot_dimension_numbers<[1], [0], [0], [1], [0, 0, 1, 1], [], []>} : vector<128x128xf32>, vector<128x128xf32>, vector<128x128xf32> -> vector<128x128xf32>
    %51 = arith.addf %44, %50 : vector<128x128xf32>
    %52 = arith.index_cast %9 : i32 to index
    %c32 = arith.constant 32 : index
    %c0_27 = arith.constant 0 : index
    %53 = vector.load %arg7[%52, %c32, %c0_27] : memref<2x512x128xf32, #tpu.memory_space<vmem>>, vector<1x128x128xf32>
    %54 = vector.shape_cast %53 : vector<1x128x128xf32> to vector<128x128xf32>
    %c4 = arith.constant 4 : index
    %c0_28 = arith.constant 0 : index
    %c0_29 = arith.constant 0 : index
    %55 = vector.load %arg3[%c4, %c0_28, %c0_29] : memref<49x128x128xf32, #tpu.memory_space<vmem>>, vector<1x128x128xf32>
    %56 = vector.shape_cast %55 : vector<1x128x128xf32> to vector<128x128xf32>
    %cst_30 = arith.constant dense<0.000000e+00> : vector<128x128xf32>
    %57 = tpu.matmul %54, %56, %cst_30 {dimension_numbers = #tpu.dot_dimension_numbers<[1], [0], [0], [1], [0, 0, 1, 1], [], []>} : vector<128x128xf32>, vector<128x128xf32>, vector<128x128xf32> -> vector<128x128xf32>
    %58 = arith.addf %51, %57 : vector<128x128xf32>
    %59 = arith.index_cast %9 : i32 to index
    %c40 = arith.constant 40 : index
    %c0_31 = arith.constant 0 : index
    %60 = vector.load %arg7[%59, %c40, %c0_31] : memref<2x512x128xf32, #tpu.memory_space<vmem>>, vector<1x128x128xf32>
    %61 = vector.shape_cast %60 : vector<1x128x128xf32> to vector<128x128xf32>
    %c5 = arith.constant 5 : index
    %c0_32 = arith.constant 0 : index
    %c0_33 = arith.constant 0 : index
    %62 = vector.load %arg3[%c5, %c0_32, %c0_33] : memref<49x128x128xf32, #tpu.memory_space<vmem>>, vector<1x128x128xf32>
    %63 = vector.shape_cast %62 : vector<1x128x128xf32> to vector<128x128xf32>
    %cst_34 = arith.constant dense<0.000000e+00> : vector<128x128xf32>
    %64 = tpu.matmul %61, %63, %cst_34 {dimension_numbers = #tpu.dot_dimension_numbers<[1], [0], [0], [1], [0, 0, 1, 1], [], []>} : vector<128x128xf32>, vector<128x128xf32>, vector<128x128xf32> -> vector<128x128xf32>
    %65 = arith.addf %58, %64 : vector<128x128xf32>
    %66 = arith.index_cast %9 : i32 to index
    %c48 = arith.constant 48 : index
    %c0_35 = arith.constant 0 : index
    %67 = vector.load %arg7[%66, %c48, %c0_35] : memref<2x512x128xf32, #tpu.memory_space<vmem>>, vector<1x128x128xf32>
    %68 = vector.shape_cast %67 : vector<1x128x128xf32> to vector<128x128xf32>
    %c6 = arith.constant 6 : index
    %c0_36 = arith.constant 0 : index
    %c0_37 = arith.constant 0 : index
    %69 = vector.load %arg3[%c6, %c0_36, %c0_37] : memref<49x128x128xf32, #tpu.memory_space<vmem>>, vector<1x128x128xf32>
    %70 = vector.shape_cast %69 : vector<1x128x128xf32> to vector<128x128xf32>
    %cst_38 = arith.constant dense<0.000000e+00> : vector<128x128xf32>
    %71 = tpu.matmul %68, %70, %cst_38 {dimension_numbers = #tpu.dot_dimension_numbers<[1], [0], [0], [1], [0, 0, 1, 1], [], []>} : vector<128x128xf32>, vector<128x128xf32>, vector<128x128xf32> -> vector<128x128xf32>
    %72 = arith.addf %65, %71 : vector<128x128xf32>
    %73 = arith.index_cast %9 : i32 to index
    %c56 = arith.constant 56 : index
    %c0_39 = arith.constant 0 : index
    %74 = vector.load %arg7[%73, %c56, %c0_39] : memref<2x512x128xf32, #tpu.memory_space<vmem>>, vector<1x128x128xf32>
    %75 = vector.shape_cast %74 : vector<1x128x128xf32> to vector<128x128xf32>
    %c7 = arith.constant 7 : index
    %c0_40 = arith.constant 0 : index
    %c0_41 = arith.constant 0 : index
    %76 = vector.load %arg3[%c7, %c0_40, %c0_41] : memref<49x128x128xf32, #tpu.memory_space<vmem>>, vector<1x128x128xf32>
    %77 = vector.shape_cast %76 : vector<1x128x128xf32> to vector<128x128xf32>
    %cst_42 = arith.constant dense<0.000000e+00> : vector<128x128xf32>
    %78 = tpu.matmul %75, %77, %cst_42 {dimension_numbers = #tpu.dot_dimension_numbers<[1], [0], [0], [1], [0, 0, 1, 1], [], []>} : vector<128x128xf32>, vector<128x128xf32>, vector<128x128xf32> -> vector<128x128xf32>
    %79 = arith.addf %72, %78 : vector<128x128xf32>
    %80 = arith.index_cast %9 : i32 to index
    %c64 = arith.constant 64 : index
    %c0_43 = arith.constant 0 : index
    %81 = vector.load %arg7[%80, %c64, %c0_43] : memref<2x512x128xf32, #tpu.memory_space<vmem>>, vector<1x128x128xf32>
    %82 = vector.shape_cast %81 : vector<1x128x128xf32> to vector<128x128xf32>
    %c8_44 = arith.constant 8 : index
    %c0_45 = arith.constant 0 : index
    %c0_46 = arith.constant 0 : index
    %83 = vector.load %arg3[%c8_44, %c0_45, %c0_46] : memref<49x128x128xf32, #tpu.memory_space<vmem>>, vector<1x128x128xf32>
    %84 = vector.shape_cast %83 : vector<1x128x128xf32> to vector<128x128xf32>
    %cst_47 = arith.constant dense<0.000000e+00> : vector<128x128xf32>
    %85 = tpu.matmul %82, %84, %cst_47 {dimension_numbers = #tpu.dot_dimension_numbers<[1], [0], [0], [1], [0, 0, 1, 1], [], []>} : vector<128x128xf32>, vector<128x128xf32>, vector<128x128xf32> -> vector<128x128xf32>
    %86 = arith.addf %79, %85 : vector<128x128xf32>
    %87 = arith.index_cast %9 : i32 to index
    %c72 = arith.constant 72 : index
    %c0_48 = arith.constant 0 : index
    %88 = vector.load %arg7[%87, %c72, %c0_48] : memref<2x512x128xf32, #tpu.memory_space<vmem>>, vector<1x128x128xf32>
    %89 = vector.shape_cast %88 : vector<1x128x128xf32> to vector<128x128xf32>
    %c9 = arith.constant 9 : index
    %c0_49 = arith.constant 0 : index
    %c0_50 = arith.constant 0 : index
    %90 = vector.load %arg3[%c9, %c0_49, %c0_50] : memref<49x128x128xf32, #tpu.memory_space<vmem>>, vector<1x128x128xf32>
    %91 = vector.shape_cast %90 : vector<1x128x128xf32> to vector<128x128xf32>
    %cst_51 = arith.constant dense<0.000000e+00> : vector<128x128xf32>
    %92 = tpu.matmul %89, %91, %cst_51 {dimension_numbers = #tpu.dot_dimension_numbers<[1], [0], [0], [1], [0, 0, 1, 1], [], []>} : vector<128x128xf32>, vector<128x128xf32>, vector<128x128xf32> -> vector<128x128xf32>
    %93 = arith.addf %86, %92 : vector<128x128xf32>
    %94 = arith.index_cast %9 : i32 to index
    %c80 = arith.constant 80 : index
    %c0_52 = arith.constant 0 : index
    %95 = vector.load %arg7[%94, %c80, %c0_52] : memref<2x512x128xf32, #tpu.memory_space<vmem>>, vector<1x128x128xf32>
    %96 = vector.shape_cast %95 : vector<1x128x128xf32> to vector<128x128xf32>
    %c10 = arith.constant 10 : index
    %c0_53 = arith.constant 0 : index
    %c0_54 = arith.constant 0 : index
    %97 = vector.load %arg3[%c10, %c0_53, %c0_54] : memref<49x128x128xf32, #tpu.memory_space<vmem>>, vector<1x128x128xf32>
    %98 = vector.shape_cast %97 : vector<1x128x128xf32> to vector<128x128xf32>
    %cst_55 = arith.constant dense<0.000000e+00> : vector<128x128xf32>
    %99 = tpu.matmul %96, %98, %cst_55 {dimension_numbers = #tpu.dot_dimension_numbers<[1], [0], [0], [1], [0, 0, 1, 1], [], []>} : vector<128x128xf32>, vector<128x128xf32>, vector<128x128xf32> -> vector<128x128xf32>
    %100 = arith.addf %93, %99 : vector<128x128xf32>
    %101 = arith.index_cast %9 : i32 to index
    %c88 = arith.constant 88 : index
    %c0_56 = arith.constant 0 : index
    %102 = vector.load %arg7[%101, %c88, %c0_56] : memref<2x512x128xf32, #tpu.memory_space<vmem>>, vector<1x128x128xf32>
    %103 = vector.shape_cast %102 : vector<1x128x128xf32> to vector<128x128xf32>
    %c11 = arith.constant 11 : index
    %c0_57 = arith.constant 0 : index
    %c0_58 = arith.constant 0 : index
    %104 = vector.load %arg3[%c11, %c0_57, %c0_58] : memref<49x128x128xf32, #tpu.memory_space<vmem>>, vector<1x128x128xf32>
    %105 = vector.shape_cast %104 : vector<1x128x128xf32> to vector<128x128xf32>
    %cst_59 = arith.constant dense<0.000000e+00> : vector<128x128xf32>
    %106 = tpu.matmul %103, %105, %cst_59 {dimension_numbers = #tpu.dot_dimension_numbers<[1], [0], [0], [1], [0, 0, 1, 1], [], []>} : vector<128x128xf32>, vector<128x128xf32>, vector<128x128xf32> -> vector<128x128xf32>
    %107 = arith.addf %100, %106 : vector<128x128xf32>
    %108 = arith.index_cast %9 : i32 to index
    %c96 = arith.constant 96 : index
    %c0_60 = arith.constant 0 : index
    %109 = vector.load %arg7[%108, %c96, %c0_60] : memref<2x512x128xf32, #tpu.memory_space<vmem>>, vector<1x128x128xf32>
    %110 = vector.shape_cast %109 : vector<1x128x128xf32> to vector<128x128xf32>
    %c12 = arith.constant 12 : index
    %c0_61 = arith.constant 0 : index
    %c0_62 = arith.constant 0 : index
    %111 = vector.load %arg3[%c12, %c0_61, %c0_62] : memref<49x128x128xf32, #tpu.memory_space<vmem>>, vector<1x128x128xf32>
    %112 = vector.shape_cast %111 : vector<1x128x128xf32> to vector<128x128xf32>
    %cst_63 = arith.constant dense<0.000000e+00> : vector<128x128xf32>
    %113 = tpu.matmul %110, %112, %cst_63 {dimension_numbers = #tpu.dot_dimension_numbers<[1], [0], [0], [1], [0, 0, 1, 1], [], []>} : vector<128x128xf32>, vector<128x128xf32>, vector<128x128xf32> -> vector<128x128xf32>
    %114 = arith.addf %107, %113 : vector<128x128xf32>
    %115 = arith.index_cast %9 : i32 to index
    %c104 = arith.constant 104 : index
    %c0_64 = arith.constant 0 : index
    %116 = vector.load %arg7[%115, %c104, %c0_64] : memref<2x512x128xf32, #tpu.memory_space<vmem>>, vector<1x128x128xf32>
    %117 = vector.shape_cast %116 : vector<1x128x128xf32> to vector<128x128xf32>
    %c13 = arith.constant 13 : index
    %c0_65 = arith.constant 0 : index
    %c0_66 = arith.constant 0 : index
    %118 = vector.load %arg3[%c13, %c0_65, %c0_66] : memref<49x128x128xf32, #tpu.memory_space<vmem>>, vector<1x128x128xf32>
    %119 = vector.shape_cast %118 : vector<1x128x128xf32> to vector<128x128xf32>
    %cst_67 = arith.constant dense<0.000000e+00> : vector<128x128xf32>
    %120 = tpu.matmul %117, %119, %cst_67 {dimension_numbers = #tpu.dot_dimension_numbers<[1], [0], [0], [1], [0, 0, 1, 1], [], []>} : vector<128x128xf32>, vector<128x128xf32>, vector<128x128xf32> -> vector<128x128xf32>
    %121 = arith.addf %114, %120 : vector<128x128xf32>
    %122 = arith.index_cast %9 : i32 to index
    %c112 = arith.constant 112 : index
    %c0_68 = arith.constant 0 : index
    %123 = vector.load %arg7[%122, %c112, %c0_68] : memref<2x512x128xf32, #tpu.memory_space<vmem>>, vector<1x128x128xf32>
    %124 = vector.shape_cast %123 : vector<1x128x128xf32> to vector<128x128xf32>
    %c14 = arith.constant 14 : index
    %c0_69 = arith.constant 0 : index
    %c0_70 = arith.constant 0 : index
    %125 = vector.load %arg3[%c14, %c0_69, %c0_70] : memref<49x128x128xf32, #tpu.memory_space<vmem>>, vector<1x128x128xf32>
    %126 = vector.shape_cast %125 : vector<1x128x128xf32> to vector<128x128xf32>
    %cst_71 = arith.constant dense<0.000000e+00> : vector<128x128xf32>
    %127 = tpu.matmul %124, %126, %cst_71 {dimension_numbers = #tpu.dot_dimension_numbers<[1], [0], [0], [1], [0, 0, 1, 1], [], []>} : vector<128x128xf32>, vector<128x128xf32>, vector<128x128xf32> -> vector<128x128xf32>
    %128 = arith.addf %121, %127 : vector<128x128xf32>
    %129 = arith.index_cast %9 : i32 to index
    %c120 = arith.constant 120 : index
    %c0_72 = arith.constant 0 : index
    %130 = vector.load %arg7[%129, %c120, %c0_72] : memref<2x512x128xf32, #tpu.memory_space<vmem>>, vector<1x128x128xf32>
    %131 = vector.shape_cast %130 : vector<1x128x128xf32> to vector<128x128xf32>
    %c15 = arith.constant 15 : index
    %c0_73 = arith.constant 0 : index
    %c0_74 = arith.constant 0 : index
    %132 = vector.load %arg3[%c15, %c0_73, %c0_74] : memref<49x128x128xf32, #tpu.memory_space<vmem>>, vector<1x128x128xf32>
    %133 = vector.shape_cast %132 : vector<1x128x128xf32> to vector<128x128xf32>
    %cst_75 = arith.constant dense<0.000000e+00> : vector<128x128xf32>
    %134 = tpu.matmul %131, %133, %cst_75 {dimension_numbers = #tpu.dot_dimension_numbers<[1], [0], [0], [1], [0, 0, 1, 1], [], []>} : vector<128x128xf32>, vector<128x128xf32>, vector<128x128xf32> -> vector<128x128xf32>
    %135 = arith.addf %128, %134 : vector<128x128xf32>
    %136 = arith.index_cast %9 : i32 to index
    %c128 = arith.constant 128 : index
    %c0_76 = arith.constant 0 : index
    %137 = vector.load %arg7[%136, %c128, %c0_76] : memref<2x512x128xf32, #tpu.memory_space<vmem>>, vector<1x128x128xf32>
    %138 = vector.shape_cast %137 : vector<1x128x128xf32> to vector<128x128xf32>
    %c16_77 = arith.constant 16 : index
    %c0_78 = arith.constant 0 : index
    %c0_79 = arith.constant 0 : index
    %139 = vector.load %arg3[%c16_77, %c0_78, %c0_79] : memref<49x128x128xf32, #tpu.memory_space<vmem>>, vector<1x128x128xf32>
    %140 = vector.shape_cast %139 : vector<1x128x128xf32> to vector<128x128xf32>
    %cst_80 = arith.constant dense<0.000000e+00> : vector<128x128xf32>
    %141 = tpu.matmul %138, %140, %cst_80 {dimension_numbers = #tpu.dot_dimension_numbers<[1], [0], [0], [1], [0, 0, 1, 1], [], []>} : vector<128x128xf32>, vector<128x128xf32>, vector<128x128xf32> -> vector<128x128xf32>
    %142 = arith.addf %135, %141 : vector<128x128xf32>
    %143 = arith.index_cast %9 : i32 to index
    %c136 = arith.constant 136 : index
    %c0_81 = arith.constant 0 : index
    %144 = vector.load %arg7[%143, %c136, %c0_81] : memref<2x512x128xf32, #tpu.memory_space<vmem>>, vector<1x128x128xf32>
    %145 = vector.shape_cast %144 : vector<1x128x128xf32> to vector<128x128xf32>
    %c17 = arith.constant 17 : index
    %c0_82 = arith.constant 0 : index
    %c0_83 = arith.constant 0 : index
    %146 = vector.load %arg3[%c17, %c0_82, %c0_83] : memref<49x128x128xf32, #tpu.memory_space<vmem>>, vector<1x128x128xf32>
    %147 = vector.shape_cast %146 : vector<1x128x128xf32> to vector<128x128xf32>
    %cst_84 = arith.constant dense<0.000000e+00> : vector<128x128xf32>
    %148 = tpu.matmul %145, %147, %cst_84 {dimension_numbers = #tpu.dot_dimension_numbers<[1], [0], [0], [1], [0, 0, 1, 1], [], []>} : vector<128x128xf32>, vector<128x128xf32>, vector<128x128xf32> -> vector<128x128xf32>
    %149 = arith.addf %142, %148 : vector<128x128xf32>
    %150 = arith.index_cast %9 : i32 to index
    %c144 = arith.constant 144 : index
    %c0_85 = arith.constant 0 : index
    %151 = vector.load %arg7[%150, %c144, %c0_85] : memref<2x512x128xf32, #tpu.memory_space<vmem>>, vector<1x128x128xf32>
    %152 = vector.shape_cast %151 : vector<1x128x128xf32> to vector<128x128xf32>
    %c18 = arith.constant 18 : index
    %c0_86 = arith.constant 0 : index
    %c0_87 = arith.constant 0 : index
    %153 = vector.load %arg3[%c18, %c0_86, %c0_87] : memref<49x128x128xf32, #tpu.memory_space<vmem>>, vector<1x128x128xf32>
    %154 = vector.shape_cast %153 : vector<1x128x128xf32> to vector<128x128xf32>
    %cst_88 = arith.constant dense<0.000000e+00> : vector<128x128xf32>
    %155 = tpu.matmul %152, %154, %cst_88 {dimension_numbers = #tpu.dot_dimension_numbers<[1], [0], [0], [1], [0, 0, 1, 1], [], []>} : vector<128x128xf32>, vector<128x128xf32>, vector<128x128xf32> -> vector<128x128xf32>
    %156 = arith.addf %149, %155 : vector<128x128xf32>
    %157 = arith.index_cast %9 : i32 to index
    %c152 = arith.constant 152 : index
    %c0_89 = arith.constant 0 : index
    %158 = vector.load %arg7[%157, %c152, %c0_89] : memref<2x512x128xf32, #tpu.memory_space<vmem>>, vector<1x128x128xf32>
    %159 = vector.shape_cast %158 : vector<1x128x128xf32> to vector<128x128xf32>
    %c19 = arith.constant 19 : index
    %c0_90 = arith.constant 0 : index
    %c0_91 = arith.constant 0 : index
    %160 = vector.load %arg3[%c19, %c0_90, %c0_91] : memref<49x128x128xf32, #tpu.memory_space<vmem>>, vector<1x128x128xf32>
    %161 = vector.shape_cast %160 : vector<1x128x128xf32> to vector<128x128xf32>
    %cst_92 = arith.constant dense<0.000000e+00> : vector<128x128xf32>
    %162 = tpu.matmul %159, %161, %cst_92 {dimension_numbers = #tpu.dot_dimension_numbers<[1], [0], [0], [1], [0, 0, 1, 1], [], []>} : vector<128x128xf32>, vector<128x128xf32>, vector<128x128xf32> -> vector<128x128xf32>
    %163 = arith.addf %156, %162 : vector<128x128xf32>
    %164 = arith.index_cast %9 : i32 to index
    %c160 = arith.constant 160 : index
    %c0_93 = arith.constant 0 : index
    %165 = vector.load %arg7[%164, %c160, %c0_93] : memref<2x512x128xf32, #tpu.memory_space<vmem>>, vector<1x128x128xf32>
    %166 = vector.shape_cast %165 : vector<1x128x128xf32> to vector<128x128xf32>
    %c20 = arith.constant 20 : index
    %c0_94 = arith.constant 0 : index
    %c0_95 = arith.constant 0 : index
    %167 = vector.load %arg3[%c20, %c0_94, %c0_95] : memref<49x128x128xf32, #tpu.memory_space<vmem>>, vector<1x128x128xf32>
    %168 = vector.shape_cast %167 : vector<1x128x128xf32> to vector<128x128xf32>
    %cst_96 = arith.constant dense<0.000000e+00> : vector<128x128xf32>
    %169 = tpu.matmul %166, %168, %cst_96 {dimension_numbers = #tpu.dot_dimension_numbers<[1], [0], [0], [1], [0, 0, 1, 1], [], []>} : vector<128x128xf32>, vector<128x128xf32>, vector<128x128xf32> -> vector<128x128xf32>
    %170 = arith.addf %163, %169 : vector<128x128xf32>
    %171 = arith.index_cast %9 : i32 to index
    %c168 = arith.constant 168 : index
    %c0_97 = arith.constant 0 : index
    %172 = vector.load %arg7[%171, %c168, %c0_97] : memref<2x512x128xf32, #tpu.memory_space<vmem>>, vector<1x128x128xf32>
    %173 = vector.shape_cast %172 : vector<1x128x128xf32> to vector<128x128xf32>
    %c21 = arith.constant 21 : index
    %c0_98 = arith.constant 0 : index
    %c0_99 = arith.constant 0 : index
    %174 = vector.load %arg3[%c21, %c0_98, %c0_99] : memref<49x128x128xf32, #tpu.memory_space<vmem>>, vector<1x128x128xf32>
    %175 = vector.shape_cast %174 : vector<1x128x128xf32> to vector<128x128xf32>
    %cst_100 = arith.constant dense<0.000000e+00> : vector<128x128xf32>
    %176 = tpu.matmul %173, %175, %cst_100 {dimension_numbers = #tpu.dot_dimension_numbers<[1], [0], [0], [1], [0, 0, 1, 1], [], []>} : vector<128x128xf32>, vector<128x128xf32>, vector<128x128xf32> -> vector<128x128xf32>
    %177 = arith.addf %170, %176 : vector<128x128xf32>
    %178 = arith.index_cast %9 : i32 to index
    %c176 = arith.constant 176 : index
    %c0_101 = arith.constant 0 : index
    %179 = vector.load %arg7[%178, %c176, %c0_101] : memref<2x512x128xf32, #tpu.memory_space<vmem>>, vector<1x128x128xf32>
    %180 = vector.shape_cast %179 : vector<1x128x128xf32> to vector<128x128xf32>
    %c22 = arith.constant 22 : index
    %c0_102 = arith.constant 0 : index
    %c0_103 = arith.constant 0 : index
    %181 = vector.load %arg3[%c22, %c0_102, %c0_103] : memref<49x128x128xf32, #tpu.memory_space<vmem>>, vector<1x128x128xf32>
    %182 = vector.shape_cast %181 : vector<1x128x128xf32> to vector<128x128xf32>
    %cst_104 = arith.constant dense<0.000000e+00> : vector<128x128xf32>
    %183 = tpu.matmul %180, %182, %cst_104 {dimension_numbers = #tpu.dot_dimension_numbers<[1], [0], [0], [1], [0, 0, 1, 1], [], []>} : vector<128x128xf32>, vector<128x128xf32>, vector<128x128xf32> -> vector<128x128xf32>
    %184 = arith.addf %177, %183 : vector<128x128xf32>
    %185 = arith.index_cast %9 : i32 to index
    %c184 = arith.constant 184 : index
    %c0_105 = arith.constant 0 : index
    %186 = vector.load %arg7[%185, %c184, %c0_105] : memref<2x512x128xf32, #tpu.memory_space<vmem>>, vector<1x128x128xf32>
    %187 = vector.shape_cast %186 : vector<1x128x128xf32> to vector<128x128xf32>
    %c23 = arith.constant 23 : index
    %c0_106 = arith.constant 0 : index
    %c0_107 = arith.constant 0 : index
    %188 = vector.load %arg3[%c23, %c0_106, %c0_107] : memref<49x128x128xf32, #tpu.memory_space<vmem>>, vector<1x128x128xf32>
    %189 = vector.shape_cast %188 : vector<1x128x128xf32> to vector<128x128xf32>
    %cst_108 = arith.constant dense<0.000000e+00> : vector<128x128xf32>
    %190 = tpu.matmul %187, %189, %cst_108 {dimension_numbers = #tpu.dot_dimension_numbers<[1], [0], [0], [1], [0, 0, 1, 1], [], []>} : vector<128x128xf32>, vector<128x128xf32>, vector<128x128xf32> -> vector<128x128xf32>
    %191 = arith.addf %184, %190 : vector<128x128xf32>
    %192 = arith.index_cast %9 : i32 to index
    %c192 = arith.constant 192 : index
    %c0_109 = arith.constant 0 : index
    %193 = vector.load %arg7[%192, %c192, %c0_109] : memref<2x512x128xf32, #tpu.memory_space<vmem>>, vector<1x128x128xf32>
    %194 = vector.shape_cast %193 : vector<1x128x128xf32> to vector<128x128xf32>
    %c24_110 = arith.constant 24 : index
    %c0_111 = arith.constant 0 : index
    %c0_112 = arith.constant 0 : index
    %195 = vector.load %arg3[%c24_110, %c0_111, %c0_112] : memref<49x128x128xf32, #tpu.memory_space<vmem>>, vector<1x128x128xf32>
    %196 = vector.shape_cast %195 : vector<1x128x128xf32> to vector<128x128xf32>
    %cst_113 = arith.constant dense<0.000000e+00> : vector<128x128xf32>
    %197 = tpu.matmul %194, %196, %cst_113 {dimension_numbers = #tpu.dot_dimension_numbers<[1], [0], [0], [1], [0, 0, 1, 1], [], []>} : vector<128x128xf32>, vector<128x128xf32>, vector<128x128xf32> -> vector<128x128xf32>
    %198 = arith.addf %191, %197 : vector<128x128xf32>
    %199 = arith.index_cast %9 : i32 to index
    %c200 = arith.constant 200 : index
    %c0_114 = arith.constant 0 : index
    %200 = vector.load %arg7[%199, %c200, %c0_114] : memref<2x512x128xf32, #tpu.memory_space<vmem>>, vector<1x128x128xf32>
    %201 = vector.shape_cast %200 : vector<1x128x128xf32> to vector<128x128xf32>
    %c25 = arith.constant 25 : index
    %c0_115 = arith.constant 0 : index
    %c0_116 = arith.constant 0 : index
    %202 = vector.load %arg3[%c25, %c0_115, %c0_116] : memref<49x128x128xf32, #tpu.memory_space<vmem>>, vector<1x128x128xf32>
    %203 = vector.shape_cast %202 : vector<1x128x128xf32> to vector<128x128xf32>
    %cst_117 = arith.constant dense<0.000000e+00> : vector<128x128xf32>
    %204 = tpu.matmul %201, %203, %cst_117 {dimension_numbers = #tpu.dot_dimension_numbers<[1], [0], [0], [1], [0, 0, 1, 1], [], []>} : vector<128x128xf32>, vector<128x128xf32>, vector<128x128xf32> -> vector<128x128xf32>
    %205 = arith.addf %198, %204 : vector<128x128xf32>
    %206 = arith.index_cast %9 : i32 to index
    %c208 = arith.constant 208 : index
    %c0_118 = arith.constant 0 : index
    %207 = vector.load %arg7[%206, %c208, %c0_118] : memref<2x512x128xf32, #tpu.memory_space<vmem>>, vector<1x128x128xf32>
    %208 = vector.shape_cast %207 : vector<1x128x128xf32> to vector<128x128xf32>
    %c26 = arith.constant 26 : index
    %c0_119 = arith.constant 0 : index
    %c0_120 = arith.constant 0 : index
    %209 = vector.load %arg3[%c26, %c0_119, %c0_120] : memref<49x128x128xf32, #tpu.memory_space<vmem>>, vector<1x128x128xf32>
    %210 = vector.shape_cast %209 : vector<1x128x128xf32> to vector<128x128xf32>
    %cst_121 = arith.constant dense<0.000000e+00> : vector<128x128xf32>
    %211 = tpu.matmul %208, %210, %cst_121 {dimension_numbers = #tpu.dot_dimension_numbers<[1], [0], [0], [1], [0, 0, 1, 1], [], []>} : vector<128x128xf32>, vector<128x128xf32>, vector<128x128xf32> -> vector<128x128xf32>
    %212 = arith.addf %205, %211 : vector<128x128xf32>
    %213 = arith.index_cast %9 : i32 to index
    %c216 = arith.constant 216 : index
    %c0_122 = arith.constant 0 : index
    %214 = vector.load %arg7[%213, %c216, %c0_122] : memref<2x512x128xf32, #tpu.memory_space<vmem>>, vector<1x128x128xf32>
    %215 = vector.shape_cast %214 : vector<1x128x128xf32> to vector<128x128xf32>
    %c27 = arith.constant 27 : index
    %c0_123 = arith.constant 0 : index
    %c0_124 = arith.constant 0 : index
    %216 = vector.load %arg3[%c27, %c0_123, %c0_124] : memref<49x128x128xf32, #tpu.memory_space<vmem>>, vector<1x128x128xf32>
    %217 = vector.shape_cast %216 : vector<1x128x128xf32> to vector<128x128xf32>
    %cst_125 = arith.constant dense<0.000000e+00> : vector<128x128xf32>
    %218 = tpu.matmul %215, %217, %cst_125 {dimension_numbers = #tpu.dot_dimension_numbers<[1], [0], [0], [1], [0, 0, 1, 1], [], []>} : vector<128x128xf32>, vector<128x128xf32>, vector<128x128xf32> -> vector<128x128xf32>
    %219 = arith.addf %212, %218 : vector<128x128xf32>
    %220 = arith.index_cast %9 : i32 to index
    %c224 = arith.constant 224 : index
    %c0_126 = arith.constant 0 : index
    %221 = vector.load %arg7[%220, %c224, %c0_126] : memref<2x512x128xf32, #tpu.memory_space<vmem>>, vector<1x128x128xf32>
    %222 = vector.shape_cast %221 : vector<1x128x128xf32> to vector<128x128xf32>
    %c28 = arith.constant 28 : index
    %c0_127 = arith.constant 0 : index
    %c0_128 = arith.constant 0 : index
    %223 = vector.load %arg3[%c28, %c0_127, %c0_128] : memref<49x128x128xf32, #tpu.memory_space<vmem>>, vector<1x128x128xf32>
    %224 = vector.shape_cast %223 : vector<1x128x128xf32> to vector<128x128xf32>
    %cst_129 = arith.constant dense<0.000000e+00> : vector<128x128xf32>
    %225 = tpu.matmul %222, %224, %cst_129 {dimension_numbers = #tpu.dot_dimension_numbers<[1], [0], [0], [1], [0, 0, 1, 1], [], []>} : vector<128x128xf32>, vector<128x128xf32>, vector<128x128xf32> -> vector<128x128xf32>
    %226 = arith.addf %219, %225 : vector<128x128xf32>
    %227 = arith.index_cast %9 : i32 to index
    %c232 = arith.constant 232 : index
    %c0_130 = arith.constant 0 : index
    %228 = vector.load %arg7[%227, %c232, %c0_130] : memref<2x512x128xf32, #tpu.memory_space<vmem>>, vector<1x128x128xf32>
    %229 = vector.shape_cast %228 : vector<1x128x128xf32> to vector<128x128xf32>
    %c29 = arith.constant 29 : index
    %c0_131 = arith.constant 0 : index
    %c0_132 = arith.constant 0 : index
    %230 = vector.load %arg3[%c29, %c0_131, %c0_132] : memref<49x128x128xf32, #tpu.memory_space<vmem>>, vector<1x128x128xf32>
    %231 = vector.shape_cast %230 : vector<1x128x128xf32> to vector<128x128xf32>
    %cst_133 = arith.constant dense<0.000000e+00> : vector<128x128xf32>
    %232 = tpu.matmul %229, %231, %cst_133 {dimension_numbers = #tpu.dot_dimension_numbers<[1], [0], [0], [1], [0, 0, 1, 1], [], []>} : vector<128x128xf32>, vector<128x128xf32>, vector<128x128xf32> -> vector<128x128xf32>
    %233 = arith.addf %226, %232 : vector<128x128xf32>
    %234 = arith.index_cast %9 : i32 to index
    %c240 = arith.constant 240 : index
    %c0_134 = arith.constant 0 : index
    %235 = vector.load %arg7[%234, %c240, %c0_134] : memref<2x512x128xf32, #tpu.memory_space<vmem>>, vector<1x128x128xf32>
    %236 = vector.shape_cast %235 : vector<1x128x128xf32> to vector<128x128xf32>
    %c30 = arith.constant 30 : index
    %c0_135 = arith.constant 0 : index
    %c0_136 = arith.constant 0 : index
    %237 = vector.load %arg3[%c30, %c0_135, %c0_136] : memref<49x128x128xf32, #tpu.memory_space<vmem>>, vector<1x128x128xf32>
    %238 = vector.shape_cast %237 : vector<1x128x128xf32> to vector<128x128xf32>
    %cst_137 = arith.constant dense<0.000000e+00> : vector<128x128xf32>
    %239 = tpu.matmul %236, %238, %cst_137 {dimension_numbers = #tpu.dot_dimension_numbers<[1], [0], [0], [1], [0, 0, 1, 1], [], []>} : vector<128x128xf32>, vector<128x128xf32>, vector<128x128xf32> -> vector<128x128xf32>
    %240 = arith.addf %233, %239 : vector<128x128xf32>
    %241 = arith.index_cast %9 : i32 to index
    %c248 = arith.constant 248 : index
    %c0_138 = arith.constant 0 : index
    %242 = vector.load %arg7[%241, %c248, %c0_138] : memref<2x512x128xf32, #tpu.memory_space<vmem>>, vector<1x128x128xf32>
    %243 = vector.shape_cast %242 : vector<1x128x128xf32> to vector<128x128xf32>
    %c31 = arith.constant 31 : index
    %c0_139 = arith.constant 0 : index
    %c0_140 = arith.constant 0 : index
    %244 = vector.load %arg3[%c31, %c0_139, %c0_140] : memref<49x128x128xf32, #tpu.memory_space<vmem>>, vector<1x128x128xf32>
    %245 = vector.shape_cast %244 : vector<1x128x128xf32> to vector<128x128xf32>
    %cst_141 = arith.constant dense<0.000000e+00> : vector<128x128xf32>
    %246 = tpu.matmul %243, %245, %cst_141 {dimension_numbers = #tpu.dot_dimension_numbers<[1], [0], [0], [1], [0, 0, 1, 1], [], []>} : vector<128x128xf32>, vector<128x128xf32>, vector<128x128xf32> -> vector<128x128xf32>
    %247 = arith.addf %240, %246 : vector<128x128xf32>
    %248 = arith.index_cast %9 : i32 to index
    %c256 = arith.constant 256 : index
    %c0_142 = arith.constant 0 : index
    %249 = vector.load %arg7[%248, %c256, %c0_142] : memref<2x512x128xf32, #tpu.memory_space<vmem>>, vector<1x128x128xf32>
    %250 = vector.shape_cast %249 : vector<1x128x128xf32> to vector<128x128xf32>
    %c32_143 = arith.constant 32 : index
    %c0_144 = arith.constant 0 : index
    %c0_145 = arith.constant 0 : index
    %251 = vector.load %arg3[%c32_143, %c0_144, %c0_145] : memref<49x128x128xf32, #tpu.memory_space<vmem>>, vector<1x128x128xf32>
    %252 = vector.shape_cast %251 : vector<1x128x128xf32> to vector<128x128xf32>
    %cst_146 = arith.constant dense<0.000000e+00> : vector<128x128xf32>
    %253 = tpu.matmul %250, %252, %cst_146 {dimension_numbers = #tpu.dot_dimension_numbers<[1], [0], [0], [1], [0, 0, 1, 1], [], []>} : vector<128x128xf32>, vector<128x128xf32>, vector<128x128xf32> -> vector<128x128xf32>
    %254 = arith.addf %247, %253 : vector<128x128xf32>
    %255 = arith.index_cast %9 : i32 to index
    %c264 = arith.constant 264 : index
    %c0_147 = arith.constant 0 : index
    %256 = vector.load %arg7[%255, %c264, %c0_147] : memref<2x512x128xf32, #tpu.memory_space<vmem>>, vector<1x128x128xf32>
    %257 = vector.shape_cast %256 : vector<1x128x128xf32> to vector<128x128xf32>
    %c33 = arith.constant 33 : index
    %c0_148 = arith.constant 0 : index
    %c0_149 = arith.constant 0 : index
    %258 = vector.load %arg3[%c33, %c0_148, %c0_149] : memref<49x128x128xf32, #tpu.memory_space<vmem>>, vector<1x128x128xf32>
    %259 = vector.shape_cast %258 : vector<1x128x128xf32> to vector<128x128xf32>
    %cst_150 = arith.constant dense<0.000000e+00> : vector<128x128xf32>
    %260 = tpu.matmul %257, %259, %cst_150 {dimension_numbers = #tpu.dot_dimension_numbers<[1], [0], [0], [1], [0, 0, 1, 1], [], []>} : vector<128x128xf32>, vector<128x128xf32>, vector<128x128xf32> -> vector<128x128xf32>
    %261 = arith.addf %254, %260 : vector<128x128xf32>
    %262 = arith.index_cast %9 : i32 to index
    %c272 = arith.constant 272 : index
    %c0_151 = arith.constant 0 : index
    %263 = vector.load %arg7[%262, %c272, %c0_151] : memref<2x512x128xf32, #tpu.memory_space<vmem>>, vector<1x128x128xf32>
    %264 = vector.shape_cast %263 : vector<1x128x128xf32> to vector<128x128xf32>
    %c34 = arith.constant 34 : index
    %c0_152 = arith.constant 0 : index
    %c0_153 = arith.constant 0 : index
    %265 = vector.load %arg3[%c34, %c0_152, %c0_153] : memref<49x128x128xf32, #tpu.memory_space<vmem>>, vector<1x128x128xf32>
    %266 = vector.shape_cast %265 : vector<1x128x128xf32> to vector<128x128xf32>
    %cst_154 = arith.constant dense<0.000000e+00> : vector<128x128xf32>
    %267 = tpu.matmul %264, %266, %cst_154 {dimension_numbers = #tpu.dot_dimension_numbers<[1], [0], [0], [1], [0, 0, 1, 1], [], []>} : vector<128x128xf32>, vector<128x128xf32>, vector<128x128xf32> -> vector<128x128xf32>
    %268 = arith.addf %261, %267 : vector<128x128xf32>
    %269 = arith.index_cast %9 : i32 to index
    %c280 = arith.constant 280 : index
    %c0_155 = arith.constant 0 : index
    %270 = vector.load %arg7[%269, %c280, %c0_155] : memref<2x512x128xf32, #tpu.memory_space<vmem>>, vector<1x128x128xf32>
    %271 = vector.shape_cast %270 : vector<1x128x128xf32> to vector<128x128xf32>
    %c35 = arith.constant 35 : index
    %c0_156 = arith.constant 0 : index
    %c0_157 = arith.constant 0 : index
    %272 = vector.load %arg3[%c35, %c0_156, %c0_157] : memref<49x128x128xf32, #tpu.memory_space<vmem>>, vector<1x128x128xf32>
    %273 = vector.shape_cast %272 : vector<1x128x128xf32> to vector<128x128xf32>
    %cst_158 = arith.constant dense<0.000000e+00> : vector<128x128xf32>
    %274 = tpu.matmul %271, %273, %cst_158 {dimension_numbers = #tpu.dot_dimension_numbers<[1], [0], [0], [1], [0, 0, 1, 1], [], []>} : vector<128x128xf32>, vector<128x128xf32>, vector<128x128xf32> -> vector<128x128xf32>
    %275 = arith.addf %268, %274 : vector<128x128xf32>
    %276 = arith.index_cast %9 : i32 to index
    %c288 = arith.constant 288 : index
    %c0_159 = arith.constant 0 : index
    %277 = vector.load %arg7[%276, %c288, %c0_159] : memref<2x512x128xf32, #tpu.memory_space<vmem>>, vector<1x128x128xf32>
    %278 = vector.shape_cast %277 : vector<1x128x128xf32> to vector<128x128xf32>
    %c36 = arith.constant 36 : index
    %c0_160 = arith.constant 0 : index
    %c0_161 = arith.constant 0 : index
    %279 = vector.load %arg3[%c36, %c0_160, %c0_161] : memref<49x128x128xf32, #tpu.memory_space<vmem>>, vector<1x128x128xf32>
    %280 = vector.shape_cast %279 : vector<1x128x128xf32> to vector<128x128xf32>
    %cst_162 = arith.constant dense<0.000000e+00> : vector<128x128xf32>
    %281 = tpu.matmul %278, %280, %cst_162 {dimension_numbers = #tpu.dot_dimension_numbers<[1], [0], [0], [1], [0, 0, 1, 1], [], []>} : vector<128x128xf32>, vector<128x128xf32>, vector<128x128xf32> -> vector<128x128xf32>
    %282 = arith.addf %275, %281 : vector<128x128xf32>
    %283 = arith.index_cast %9 : i32 to index
    %c296 = arith.constant 296 : index
    %c0_163 = arith.constant 0 : index
    %284 = vector.load %arg7[%283, %c296, %c0_163] : memref<2x512x128xf32, #tpu.memory_space<vmem>>, vector<1x128x128xf32>
    %285 = vector.shape_cast %284 : vector<1x128x128xf32> to vector<128x128xf32>
    %c37 = arith.constant 37 : index
    %c0_164 = arith.constant 0 : index
    %c0_165 = arith.constant 0 : index
    %286 = vector.load %arg3[%c37, %c0_164, %c0_165] : memref<49x128x128xf32, #tpu.memory_space<vmem>>, vector<1x128x128xf32>
    %287 = vector.shape_cast %286 : vector<1x128x128xf32> to vector<128x128xf32>
    %cst_166 = arith.constant dense<0.000000e+00> : vector<128x128xf32>
    %288 = tpu.matmul %285, %287, %cst_166 {dimension_numbers = #tpu.dot_dimension_numbers<[1], [0], [0], [1], [0, 0, 1, 1], [], []>} : vector<128x128xf32>, vector<128x128xf32>, vector<128x128xf32> -> vector<128x128xf32>
    %289 = arith.addf %282, %288 : vector<128x128xf32>
    %290 = arith.index_cast %9 : i32 to index
    %c304 = arith.constant 304 : index
    %c0_167 = arith.constant 0 : index
    %291 = vector.load %arg7[%290, %c304, %c0_167] : memref<2x512x128xf32, #tpu.memory_space<vmem>>, vector<1x128x128xf32>
    %292 = vector.shape_cast %291 : vector<1x128x128xf32> to vector<128x128xf32>
    %c38 = arith.constant 38 : index
    %c0_168 = arith.constant 0 : index
    %c0_169 = arith.constant 0 : index
    %293 = vector.load %arg3[%c38, %c0_168, %c0_169] : memref<49x128x128xf32, #tpu.memory_space<vmem>>, vector<1x128x128xf32>
    %294 = vector.shape_cast %293 : vector<1x128x128xf32> to vector<128x128xf32>
    %cst_170 = arith.constant dense<0.000000e+00> : vector<128x128xf32>
    %295 = tpu.matmul %292, %294, %cst_170 {dimension_numbers = #tpu.dot_dimension_numbers<[1], [0], [0], [1], [0, 0, 1, 1], [], []>} : vector<128x128xf32>, vector<128x128xf32>, vector<128x128xf32> -> vector<128x128xf32>
    %296 = arith.addf %289, %295 : vector<128x128xf32>
    %297 = arith.index_cast %9 : i32 to index
    %c312 = arith.constant 312 : index
    %c0_171 = arith.constant 0 : index
    %298 = vector.load %arg7[%297, %c312, %c0_171] : memref<2x512x128xf32, #tpu.memory_space<vmem>>, vector<1x128x128xf32>
    %299 = vector.shape_cast %298 : vector<1x128x128xf32> to vector<128x128xf32>
    %c39 = arith.constant 39 : index
    %c0_172 = arith.constant 0 : index
    %c0_173 = arith.constant 0 : index
    %300 = vector.load %arg3[%c39, %c0_172, %c0_173] : memref<49x128x128xf32, #tpu.memory_space<vmem>>, vector<1x128x128xf32>
    %301 = vector.shape_cast %300 : vector<1x128x128xf32> to vector<128x128xf32>
    %cst_174 = arith.constant dense<0.000000e+00> : vector<128x128xf32>
    %302 = tpu.matmul %299, %301, %cst_174 {dimension_numbers = #tpu.dot_dimension_numbers<[1], [0], [0], [1], [0, 0, 1, 1], [], []>} : vector<128x128xf32>, vector<128x128xf32>, vector<128x128xf32> -> vector<128x128xf32>
    %303 = arith.addf %296, %302 : vector<128x128xf32>
    %304 = arith.index_cast %9 : i32 to index
    %c320 = arith.constant 320 : index
    %c0_175 = arith.constant 0 : index
    %305 = vector.load %arg7[%304, %c320, %c0_175] : memref<2x512x128xf32, #tpu.memory_space<vmem>>, vector<1x128x128xf32>
    %306 = vector.shape_cast %305 : vector<1x128x128xf32> to vector<128x128xf32>
    %c40_176 = arith.constant 40 : index
    %c0_177 = arith.constant 0 : index
    %c0_178 = arith.constant 0 : index
    %307 = vector.load %arg3[%c40_176, %c0_177, %c0_178] : memref<49x128x128xf32, #tpu.memory_space<vmem>>, vector<1x128x128xf32>
    %308 = vector.shape_cast %307 : vector<1x128x128xf32> to vector<128x128xf32>
    %cst_179 = arith.constant dense<0.000000e+00> : vector<128x128xf32>
    %309 = tpu.matmul %306, %308, %cst_179 {dimension_numbers = #tpu.dot_dimension_numbers<[1], [0], [0], [1], [0, 0, 1, 1], [], []>} : vector<128x128xf32>, vector<128x128xf32>, vector<128x128xf32> -> vector<128x128xf32>
    %310 = arith.addf %303, %309 : vector<128x128xf32>
    %311 = arith.index_cast %9 : i32 to index
    %c328 = arith.constant 328 : index
    %c0_180 = arith.constant 0 : index
    %312 = vector.load %arg7[%311, %c328, %c0_180] : memref<2x512x128xf32, #tpu.memory_space<vmem>>, vector<1x128x128xf32>
    %313 = vector.shape_cast %312 : vector<1x128x128xf32> to vector<128x128xf32>
    %c41 = arith.constant 41 : index
    %c0_181 = arith.constant 0 : index
    %c0_182 = arith.constant 0 : index
    %314 = vector.load %arg3[%c41, %c0_181, %c0_182] : memref<49x128x128xf32, #tpu.memory_space<vmem>>, vector<1x128x128xf32>
    %315 = vector.shape_cast %314 : vector<1x128x128xf32> to vector<128x128xf32>
    %cst_183 = arith.constant dense<0.000000e+00> : vector<128x128xf32>
    %316 = tpu.matmul %313, %315, %cst_183 {dimension_numbers = #tpu.dot_dimension_numbers<[1], [0], [0], [1], [0, 0, 1, 1], [], []>} : vector<128x128xf32>, vector<128x128xf32>, vector<128x128xf32> -> vector<128x128xf32>
    %317 = arith.addf %310, %316 : vector<128x128xf32>
    %318 = arith.index_cast %9 : i32 to index
    %c336 = arith.constant 336 : index
    %c0_184 = arith.constant 0 : index
    %319 = vector.load %arg7[%318, %c336, %c0_184] : memref<2x512x128xf32, #tpu.memory_space<vmem>>, vector<1x128x128xf32>
    %320 = vector.shape_cast %319 : vector<1x128x128xf32> to vector<128x128xf32>
    %c42 = arith.constant 42 : index
    %c0_185 = arith.constant 0 : index
    %c0_186 = arith.constant 0 : index
    %321 = vector.load %arg3[%c42, %c0_185, %c0_186] : memref<49x128x128xf32, #tpu.memory_space<vmem>>, vector<1x128x128xf32>
    %322 = vector.shape_cast %321 : vector<1x128x128xf32> to vector<128x128xf32>
    %cst_187 = arith.constant dense<0.000000e+00> : vector<128x128xf32>
    %323 = tpu.matmul %320, %322, %cst_187 {dimension_numbers = #tpu.dot_dimension_numbers<[1], [0], [0], [1], [0, 0, 1, 1], [], []>} : vector<128x128xf32>, vector<128x128xf32>, vector<128x128xf32> -> vector<128x128xf32>
    %324 = arith.addf %317, %323 : vector<128x128xf32>
    %325 = arith.index_cast %9 : i32 to index
    %c344 = arith.constant 344 : index
    %c0_188 = arith.constant 0 : index
    %326 = vector.load %arg7[%325, %c344, %c0_188] : memref<2x512x128xf32, #tpu.memory_space<vmem>>, vector<1x128x128xf32>
    %327 = vector.shape_cast %326 : vector<1x128x128xf32> to vector<128x128xf32>
    %c43 = arith.constant 43 : index
    %c0_189 = arith.constant 0 : index
    %c0_190 = arith.constant 0 : index
    %328 = vector.load %arg3[%c43, %c0_189, %c0_190] : memref<49x128x128xf32, #tpu.memory_space<vmem>>, vector<1x128x128xf32>
    %329 = vector.shape_cast %328 : vector<1x128x128xf32> to vector<128x128xf32>
    %cst_191 = arith.constant dense<0.000000e+00> : vector<128x128xf32>
    %330 = tpu.matmul %327, %329, %cst_191 {dimension_numbers = #tpu.dot_dimension_numbers<[1], [0], [0], [1], [0, 0, 1, 1], [], []>} : vector<128x128xf32>, vector<128x128xf32>, vector<128x128xf32> -> vector<128x128xf32>
    %331 = arith.addf %324, %330 : vector<128x128xf32>
    %332 = arith.index_cast %9 : i32 to index
    %c352 = arith.constant 352 : index
    %c0_192 = arith.constant 0 : index
    %333 = vector.load %arg7[%332, %c352, %c0_192] : memref<2x512x128xf32, #tpu.memory_space<vmem>>, vector<1x128x128xf32>
    %334 = vector.shape_cast %333 : vector<1x128x128xf32> to vector<128x128xf32>
    %c44 = arith.constant 44 : index
    %c0_193 = arith.constant 0 : index
    %c0_194 = arith.constant 0 : index
    %335 = vector.load %arg3[%c44, %c0_193, %c0_194] : memref<49x128x128xf32, #tpu.memory_space<vmem>>, vector<1x128x128xf32>
    %336 = vector.shape_cast %335 : vector<1x128x128xf32> to vector<128x128xf32>
    %cst_195 = arith.constant dense<0.000000e+00> : vector<128x128xf32>
    %337 = tpu.matmul %334, %336, %cst_195 {dimension_numbers = #tpu.dot_dimension_numbers<[1], [0], [0], [1], [0, 0, 1, 1], [], []>} : vector<128x128xf32>, vector<128x128xf32>, vector<128x128xf32> -> vector<128x128xf32>
    %338 = arith.addf %331, %337 : vector<128x128xf32>
    %339 = arith.index_cast %9 : i32 to index
    %c360 = arith.constant 360 : index
    %c0_196 = arith.constant 0 : index
    %340 = vector.load %arg7[%339, %c360, %c0_196] : memref<2x512x128xf32, #tpu.memory_space<vmem>>, vector<1x128x128xf32>
    %341 = vector.shape_cast %340 : vector<1x128x128xf32> to vector<128x128xf32>
    %c45 = arith.constant 45 : index
    %c0_197 = arith.constant 0 : index
    %c0_198 = arith.constant 0 : index
    %342 = vector.load %arg3[%c45, %c0_197, %c0_198] : memref<49x128x128xf32, #tpu.memory_space<vmem>>, vector<1x128x128xf32>
    %343 = vector.shape_cast %342 : vector<1x128x128xf32> to vector<128x128xf32>
    %cst_199 = arith.constant dense<0.000000e+00> : vector<128x128xf32>
    %344 = tpu.matmul %341, %343, %cst_199 {dimension_numbers = #tpu.dot_dimension_numbers<[1], [0], [0], [1], [0, 0, 1, 1], [], []>} : vector<128x128xf32>, vector<128x128xf32>, vector<128x128xf32> -> vector<128x128xf32>
    %345 = arith.addf %338, %344 : vector<128x128xf32>
    %346 = arith.index_cast %9 : i32 to index
    %c368 = arith.constant 368 : index
    %c0_200 = arith.constant 0 : index
    %347 = vector.load %arg7[%346, %c368, %c0_200] : memref<2x512x128xf32, #tpu.memory_space<vmem>>, vector<1x128x128xf32>
    %348 = vector.shape_cast %347 : vector<1x128x128xf32> to vector<128x128xf32>
    %c46 = arith.constant 46 : index
    %c0_201 = arith.constant 0 : index
    %c0_202 = arith.constant 0 : index
    %349 = vector.load %arg3[%c46, %c0_201, %c0_202] : memref<49x128x128xf32, #tpu.memory_space<vmem>>, vector<1x128x128xf32>
    %350 = vector.shape_cast %349 : vector<1x128x128xf32> to vector<128x128xf32>
    %cst_203 = arith.constant dense<0.000000e+00> : vector<128x128xf32>
    %351 = tpu.matmul %348, %350, %cst_203 {dimension_numbers = #tpu.dot_dimension_numbers<[1], [0], [0], [1], [0, 0, 1, 1], [], []>} : vector<128x128xf32>, vector<128x128xf32>, vector<128x128xf32> -> vector<128x128xf32>
    %352 = arith.addf %345, %351 : vector<128x128xf32>
    %353 = arith.index_cast %9 : i32 to index
    %c376 = arith.constant 376 : index
    %c0_204 = arith.constant 0 : index
    %354 = vector.load %arg7[%353, %c376, %c0_204] : memref<2x512x128xf32, #tpu.memory_space<vmem>>, vector<1x128x128xf32>
    %355 = vector.shape_cast %354 : vector<1x128x128xf32> to vector<128x128xf32>
    %c47 = arith.constant 47 : index
    %c0_205 = arith.constant 0 : index
    %c0_206 = arith.constant 0 : index
    %356 = vector.load %arg3[%c47, %c0_205, %c0_206] : memref<49x128x128xf32, #tpu.memory_space<vmem>>, vector<1x128x128xf32>
    %357 = vector.shape_cast %356 : vector<1x128x128xf32> to vector<128x128xf32>
    %cst_207 = arith.constant dense<0.000000e+00> : vector<128x128xf32>
    %358 = tpu.matmul %355, %357, %cst_207 {dimension_numbers = #tpu.dot_dimension_numbers<[1], [0], [0], [1], [0, 0, 1, 1], [], []>} : vector<128x128xf32>, vector<128x128xf32>, vector<128x128xf32> -> vector<128x128xf32>
    %359 = arith.addf %352, %358 : vector<128x128xf32>
    %360 = arith.index_cast %9 : i32 to index
    %c384 = arith.constant 384 : index
    %c0_208 = arith.constant 0 : index
    %361 = vector.load %arg7[%360, %c384, %c0_208] : memref<2x512x128xf32, #tpu.memory_space<vmem>>, vector<1x128x128xf32>
    %362 = vector.shape_cast %361 : vector<1x128x128xf32> to vector<128x128xf32>
    %c48_209 = arith.constant 48 : index
    %c0_210 = arith.constant 0 : index
    %c0_211 = arith.constant 0 : index
    %363 = vector.load %arg3[%c48_209, %c0_210, %c0_211] : memref<49x128x128xf32, #tpu.memory_space<vmem>>, vector<1x128x128xf32>
    %364 = vector.shape_cast %363 : vector<1x128x128xf32> to vector<128x128xf32>
    %cst_212 = arith.constant dense<0.000000e+00> : vector<128x128xf32>
    %365 = tpu.matmul %362, %364, %cst_212 {dimension_numbers = #tpu.dot_dimension_numbers<[1], [0], [0], [1], [0, 0, 1, 1], [], []>} : vector<128x128xf32>, vector<128x128xf32>, vector<128x128xf32> -> vector<128x128xf32>
    %366 = arith.addf %359, %365 : vector<128x128xf32>
    %c0_213 = arith.constant 0 : index
    %c0_214 = arith.constant 0 : index
    %367 = vector.load %arg4[%c0_213, %c0_214] : memref<1x128xf32, #tpu.memory_space<vmem>>, vector<1x128xf32>
    %368 = vector.broadcast %367 : vector<1x128xf32> to vector<128x128xf32>
    %369 = arith.addf %366, %368 : vector<128x128xf32>
    %370 = math.tanh %369 : vector<128x128xf32>
    %c0_215 = arith.constant 0 : index
    %c0_216 = arith.constant 0 : index
    %371 = vector.load %arg5[%c0_215, %c0_216] : memref<2x128xf32, #tpu.memory_space<vmem>>, vector<2x128xf32>
    %cst_217 = arith.constant dense<0.000000e+00> : vector<2x128xf32>
    %372 = tpu.matmul %371, %370, %cst_217 {dimension_numbers = #tpu.dot_dimension_numbers<[1], [1], [0], [0], [0, 0, 1, 0], [], []>} : vector<2x128xf32>, vector<128x128xf32>, vector<2x128xf32> -> vector<2x128xf32>
    %c0_218 = arith.constant 0 : index
    %c0_219 = arith.constant 0 : index
    %c0_220 = arith.constant 0 : index
    %373 = vector.load %arg6[%c0_218, %c0_219, %c0_220] : memref<1x2x128xf32, #tpu.memory_space<vmem>>, vector<1x2x128xf32>
    %374 = vector.shape_cast %373 : vector<1x2x128xf32> to vector<2x128xf32>
    %375 = vector.shape_cast %372 : vector<2x128xf32> to vector<1x2x128xf32>
    tpu.vector_store %arg6[%c0_218, %c0_219, %c0_220], %375 {strides = array<i32>} : memref<1x2x128xf32, #tpu.memory_space<vmem>>, vector<1x2x128xf32>,
    return
  }
  func.func @transform_1(%arg0: i32, %arg1: i32) -> (i32, i32, i32) {
    %c0_i32 = arith.constant 0 : i32
    %c0_i32_0 = arith.constant 0 : i32
    %c0_i32_1 = arith.constant 0 : i32
    %c0_i32_2 = arith.constant 0 : i32
    return %c0_i32, %c0_i32_0, %c0_i32_1 : i32, i32, i32
  }
  func.func @transform_2(%arg0: i32, %arg1: i32) -> (i32, i32) {
    %c0_i32 = arith.constant 0 : i32
    %c0_i32_0 = arith.constant 0 : i32
    %c0_i32_1 = arith.constant 0 : i32
    return %c0_i32, %c0_i32_0 : i32, i32
  }
  func.func @transform_3(%arg0: i32, %arg1: i32) -> (i32, i32) {
    %c0_i32 = arith.constant 0 : i32
    %c0_i32_0 = arith.constant 0 : i32
    %c0_i32_1 = arith.constant 0 : i32
    return %c0_i32, %c0_i32_0 : i32, i32
  }
  func.func @transform_4(%arg0: i32, %arg1: i32) -> (i32, i32, i32) {
    %c0_i32 = arith.constant 0 : i32
    %c0_i32_0 = arith.constant 0 : i32
    return %arg0, %c0_i32, %arg1 : i32, i32, i32
  }
}

</mosaic_0001>

<bundles_post_ra>
// kernel: tile.8
= control target key start
LH: loop header
LB: loop body
LE: loop exit
PB: predicated region body
PF: predicated region fallthrough
CT: control target
= control target key end

     0   :  { %2 = vsyncpa [#allocation1], 0  ;;  %s47_s6 = smov [#allocation0]   ;;  %s76_s0 = inlined_call_operand.hbm [shape: f32[64], index: 0, kind: input, shape index: {}]   ;;  %s77_s1 = inlined_call_operand.vmem [shape: f32[16,64], index: 1, kind: output, shape index: {}]  }
   0x1   :  { %s9_s7 = sshll.u32 %s47_s6, 4  ;;  %s23_s10 = scalar_lea.hbm %s76_s0, 16  ;;  %s10_s7 = int_to_ptr.vmem [resolvable:$true] %s9_s7 }
   0x2   :  { %p24_p0 = scmp.ne.s32.totalorder %s76_s0, %s23_s10  ;;  %p27_p1 = scmp.lt.u32.totalorder %s23_s10, %s76_s0 }
   0x4   :  { %p29_p2 = pnand %p27_p1, %p24_p0 }
   0x6   :  { %32 = shalt.err (!%p29_p2)
}
   0x7   :  { %s33_s15 = scalar_lea.vmem %s10_s7, 16  ;;  %s37_s16 = scalar_lea.vmem %s10_s7, 32 }
   0x8   :  { %p34_p3 = scmp.ne.s32.totalorder %s10_s7, %s33_s15  ;;  %p38_p4 = scmp.lt.s32.totalorder %s10_s7, %s10_s7 }
   0x9   :  { %p39_p5 = scmp.lt.s32.totalorder %s37_s16, %s33_s15 }
   0xb   :  { %p40_p6 = por %p39_p5, %p38_p4 }
   0xd   :  { %p41_p7 = pnand %p40_p6, %p34_p3 }
   0xf   :  { %44 = shalt.err (!%p41_p7)
}
  0x10   :  { %12 = dma.hbm_to_vmem [thread:$0]  %s76_s0, 16, %s10_s7, [#allocation1]  }
  0x11   :  { %45 = dma.done.wait [#allocation1], 16  }
  0x12   :  { %46 = vsyncadd [#allocation1], 4294967280  ;;  %v16_v0 = vld [vmem:[#allocation0] ss:$0 sm:$0xff] }
  0x13   :  { %17 = vst [vmem:[%s77_s1] sm:$0xff] %v16_v0  ;;  %21 = vst [vmem:[%s77_s1 + $0x8] sm:$0xff] %v16_v0 }
  0x14   :  { %20 = vsyncpa [#allocation1], 1 }

// kernel: tile.9
= control target key start
LH: loop header
LB: loop body
LE: loop exit
PB: predicated region body
PF: predicated region fallthrough
CT: control target
= control target key end

     0   :  { %vm3_vm0 = vcmask 523264   ;;  %vm10_vm1 = vcmask 1048064   ;;  %s116_s0 = inlined_call_operand.vmem [shape: f32[16,64], index: 0, kind: input, shape index: {}]   ;;  %s117_s1 = inlined_call_operand.vmem [shape: f32[1,1024], index: 1, kind: output, shape index: {}]  }
   0x1   :  { %v66_v0 = vld [vmem:[%s116_s0 + $0x1] ss:$2 sm:$0xff]   ;;  %v2_v1 = vld [vmem:[%s116_s0] ss:$2 sm:$0xff]   ;;  %s75_s0 = smov 64  }
   0x2   :  { %8 = vrot.lane.b32.xlu0 %v66_v0, %s75_s0  ;;  %4 = vst.msk [vmem:[#allocation0] ss:$8 sm:$0xf] %vm3_vm0, %v2_v1   ;;  %5 = vst.msk [vmem:[#allocation0] ss:$8 sm:$0xf0] %vm3_vm0, %v2_v1  }
  0x74   :  { %v9_v2 = vpop.permute.xlu0 %8  }
  0x75   :  { %11 = vst.msk [vmem:[#allocation0] ss:$8 sm:$0xf] %vm10_vm1, %v9_v2   ;;  %12 = vst.msk [vmem:[#allocation0] ss:$8 sm:$0xf0] %vm10_vm1, %v9_v2  }
  0x7c   :  { %v16_v3 = vld [vmem:[#allocation0] sm:$0x1]  ;;  %v20_v4 = vld [vmem:[#allocation0 + $0x8] sm:$0x1]  ;;  %v25_v5 = vld [vmem:[#allocation0 + $0x10] sm:$0x1] }
  0x7d   :  { %18 = vst [vmem:[%s117_s1] sm:$0x1] %v16_v3  ;;  %67 = vst [vmem:[%s117_s1 + $0x1] sm:$0x1] %v20_v4  ;;  %v31_v6 = vld [vmem:[#allocation0 + $0x18] sm:$0x1] }
  0x7e   :  { %68 = vst [vmem:[%s117_s1 + $0x2] sm:$0x1] %v25_v5  ;;  %v37_v7 = vld [vmem:[#allocation0 + $0x20] sm:$0x1]  ;;  %v43_v8 = vld [vmem:[#allocation0 + $0x28] sm:$0x1] }
  0x7f   :  { %69 = vst [vmem:[%s117_s1 + $0x3] sm:$0x1] %v31_v6  ;;  %70 = vst [vmem:[%s117_s1 + $0x4] sm:$0x1] %v37_v7  ;;  %v49_v9 = vld [vmem:[#allocation0 + $0x30] sm:$0x1] }
  0x80   :  { %71 = vst [vmem:[%s117_s1 + $0x5] sm:$0x1] %v43_v8  ;;  %v55_v10 = vld [vmem:[#allocation0 + $0x38] sm:$0x1]  ;;  %72 = vst [vmem:[%s117_s1 + $0x6] sm:$0x1] %v49_v9 }
  0x81   :  { %73 = vst [vmem:[%s117_s1 + $0x7] sm:$0x1] %v55_v10 }

// kernel: deconv_forward.2
= control target key start
LH: loop header
LB: loop body
LE: loop exit
PB: predicated region body
PF: predicated region fallthrough
CT: control target
= control target key end

     0   :  { %s1358_s12 = smov 0   ;;  %s1360_s13 = smov 0   ;;  %s1840_s0 = inlined_call_operand.vmem [shape: f32[2,64,64], index: 0, kind: input, shape index: {}]   ;;  %s1841_s1 = inlined_call_operand.vmem [shape: f32[64,1024], index: 1, kind: input, shape index: {}]   ;;  %s1842_s2 = inlined_call_operand.vmem [shape: f32[1,1024], index: 2, kind: input, shape index: {}]   ;;  %s1843_s3 = inlined_call_operand.vmem [shape: f32[2,64,1024], index: 3, kind: output, shape index: {}]  }
   0x1   :  { %s1362_s14 = smov 0  }
   0x2 LB: > { %s25_s15 = sadd.s32 1, %s1331_s13  ;;  %p1151_p0 = scmp.ge.s32.totalorder %s1335_s14, 1  ;;  %s1335_s14 = sphi %s1362_s14, %s13_s14   ;;  %s1331_s13 = sphi %s1360_s13, %s1845_s13   ;;  %s1327_s12 = sphi %s1358_s12, %s1844_s12  }
   0x3   : > { %p27_p1 = scmp.ge.s32.totalorder %s25_s15, 2  ;;  %p158_p2 = scmp.lt.s32.totalorder %s1335_s14, 3 }
   0x5   : > { %s1847_s15 = smov (%p27_p1, %s25_s15), 0  ;;  %p159_p3 = pnand %p1151_p0, %p158_p2 }
   0x6   : > { %v222_v0 = vld [vmem:[%s1841_s1 + $0x8] sm:$0xff] (!%p159_p3)  ;;  %v224_v2 = vld [vmem:[%s1841_s1 + $0x18] sm:$0xff] (!%p159_p3)  ;;  %p192_p4 = scmp.lt.s32.totalorder (!%p159_p3), %s1327_s12, 1  ;;  %v221_v5 = vld [vmem:[%s1841_s1] sm:$0xff] (!%p159_p3)  ;;  %v1337_v7 = vmov (!%p159_p3), 0.0   ;;  %vm327_vm0 = vcmask (!%p159_p3), 523264  }
   0x7   : > { %162 = sbr.rel (%p159_p3) target bundleno = 303 (0x12f), region = 32  ;;  %v230_v1 = vld [vmem:[%s1841_s1 + $0x48] sm:$0xff] (!%p159_p3)  ;;  %v232_v4 = vld [vmem:[%s1841_s1 + $0x58] sm:$0xff] (!%p159_p3)  ;;  %v229_v6 = vld [vmem:[%s1841_s1 + $0x40] sm:$0xff] (!%p159_p3)  ;;  %416 = vmatprep.mubr.f32.mxu0 (!%p159_p3), %v1337_v7  ;;  %529 = vmatprep.mubr.f32.mxu1 (!%p159_p3), %v1337_v7 }
   0x8   : > { %v1192_v3 = vpack.c.bf16 (!%p159_p3), %v230_v1, %v222_v0  ;;  %v1208_v8 = vpack.c.bf16 (!%p159_p3), %v232_v4, %v224_v2  ;;  %v1194_v9 = vpack.c.bf16 (!%p159_p3), %v229_v6, %v221_v5  ;;  %v223_v10 = vld [vmem:[%s1841_s1 + $0x10] sm:$0xff] (!%p159_p3)  ;;  %v238_v12 = vld [vmem:[%s1841_s1 + $0x88] sm:$0xff] (!%p159_p3)  ;;  %v240_v15 = vld [vmem:[%s1841_s1 + $0x98] sm:$0xff] (!%p159_p3) }
   0x9   : > { %v231_v11 = vld [vmem:[%s1841_s1 + $0x50] sm:$0xff] (!%p159_p3)  ;;  %v246_v14 = vld [vmem:[%s1841_s1 + $0xc8] sm:$0xff] (!%p159_p3)  ;;  %v248_v16 = vld [vmem:[%s1841_s1 + $0xd8] sm:$0xff] (!%p159_p3) }
   0xa   : > { %1193 = vmatprep.subr.bf16.mxu0 (!%p159_p3), %v1192_v3  ;;  %v1210_v13 = vpack.c.bf16 (!%p159_p3), %v231_v11, %v223_v10  ;;  %1209 = vmatprep.subr.bf16.mxu1 (!%p159_p3), %v1208_v8  ;;  %v1196_v17 = vpack.c.bf16 (!%p159_p3), %v246_v14, %v238_v12  ;;  %v1212_v18 = vpack.c.bf16 (!%p159_p3), %v248_v16, %v240_v15  ;;  %v1419_v19 = vld [vmem:[%s1841_s1 + $0x80] sm:$0xff] (!%p159_p3)  ;;  %v1429_v21 = vld [vmem:[%s1841_s1 + $0x90] sm:$0xff] (!%p159_p3)  ;;  %v1442_v24 = vld [vmem:[%s1841_s1 + $0x108] sm:$0xff] (!%p159_p3) }
   0xb   : > { %1195 = vmatpush1.bf16.msra.mxu0 (!%p159_p3), %v1194_v9  ;;  %v1424_v20 = vld [vmem:[%s1841_s1 + $0xc0] sm:$0xff] (!%p159_p3)  ;;  %v1437_v23 = vld [vmem:[%s1841_s1 + $0xd0] sm:$0xff] (!%p159_p3)  ;;  %v1447_v25 = vld [vmem:[%s1841_s1 + $0x148] sm:$0xff] (!%p159_p3) }
   0xc   : > { %1211 = vmatpush1.bf16.msra.mxu1 (!%p159_p3), %v1210_v13  ;;  %v1198_v22 = vpack.c.bf16 (!%p159_p3), %v1424_v20, %v1419_v19  ;;  %1197 = vmatprep.subr.bf16.mxu0 (!%p159_p3), %v1196_v17  ;;  %v1214_v26 = vpack.c.bf16 (!%p159_p3), %v1437_v23, %v1429_v21  ;;  %v1200_v27 = vpack.c.bf16 (!%p159_p3), %v1447_v25, %v1442_v24  ;;  %v1461_v28 = vld [vmem:[%s1841_s1 + $0x118] sm:$0xff] (!%p159_p3)  ;;  %v1471_v30 = vld [vmem:[%s1841_s1 + $0x100] sm:$0xff] (!%p159_p3)  ;;  %v255_v33 = vld [vmem:[%s1841_s1 + $0x110] sm:$0xff] (!%p159_p3) }
   0xd   : > { %1213 = vmatprep.subr.bf16.mxu1 (!%p159_p3), %v1212_v18  ;;  %v1466_v29 = vld [vmem:[%s1841_s1 + $0x158] sm:$0xff] (!%p159_p3)  ;;  %v261_v32 = vld [vmem:[%s1841_s1 + $0x140] sm:$0xff] (!%p159_p3)  ;;  %v263_v34 = vld [vmem:[%s1841_s1 + $0x150] sm:$0xff] (!%p159_p3) }
   0xe   : > { %s1849_s12 = smov (!%p192_p4, %s1327_s12), 1  ;;  %v1216_v31 = vpack.c.bf16 %v1466_v29, %v1461_v28  ;;  %v1202_v35 = vpack.c.bf16 %v261_v32, %v1471_v30  ;;  %v270_v36 = vld [vmem:[%s1841_s1 + $0x188] sm:$0xff]  ;;  %v272_v38 = vld [vmem:[%s1841_s1 + $0x198] sm:$0xff]  ;;  %v1218_v39 = vpack.c.bf16 %v263_v34, %v255_v33  ;;  %v269_v42 = vld [vmem:[%s1841_s1 + $0x180] sm:$0xff] }
   0xf   : > { %s1191_s23 = sshll.u32 %s1849_s12, 9  ;;  %1199 = vmatpush1.bf16.msra.mxu0 %v1198_v22  ;;  %v278_v37 = vld [vmem:[%s1841_s1 + $0x1c8] sm:$0xff]  ;;  %v280_v41 = vld [vmem:[%s1841_s1 + $0x1d8] sm:$0xff]  ;;  %v277_v43 = vld [vmem:[%s1841_s1 + $0x1c0] sm:$0xff]  ;;  %s1190_s16 = sshll.u32 %s1849_s12, 6 }
  0x10   : > { %s1452_s5 = scalar_lea.vmem %s1843_s3, %s1191_s23  ;;  %1215 = vmatpush1.bf16.msra.mxu1 %v1214_v26  ;;  %1201 = vmatprep.subr.bf16.mxu0 %v1200_v27  ;;  %v1204_v40 = vpack.c.bf16 %v278_v37, %v270_v36  ;;  %v1220_v44 = vpack.c.bf16 %v280_v41, %v272_v38  ;;  %v271_v45 = vld [vmem:[%s1841_s1 + $0x190] sm:$0xff]  ;;  %v226_v47 = vld [vmem:[%s1841_s1 + $0x28] sm:$0xff]  ;;  %v228_v49 = vld [vmem:[%s1841_s1 + $0x38] sm:$0xff]  ;;  %v1206_v50 = vpack.c.bf16 %v277_v43, %v269_v42  ;;  %s1624_s26 = scalar_lea.vmem %s1840_s0, %s1190_s16  ;;  %v287_v42 = vlaneseq }
  0x11   : > { %990 = vst [vmem:[%s1452_s5] sm:$0xff] %v1337_v7  ;;  %991 = vst [vmem:[%s1452_s5 + $0x8] sm:$0xff] %v1337_v7  ;;  %1217 = vmatprep.subr.bf16.mxu1 %v1216_v31  ;;  %v279_v46 = vld [vmem:[%s1841_s1 + $0x1d0] sm:$0xff]  ;;  %v234_v48 = vld [vmem:[%s1841_s1 + $0x68] sm:$0xff] }
  0x12   : > { %992 = vst [vmem:[%s1452_s5 + $0x10] sm:$0xff] %v1337_v7  ;;  %993 = vst [vmem:[%s1452_s5 + $0x18] sm:$0xff] %v1337_v7  ;;  %v236_v51 = vld [vmem:[%s1841_s1 + $0x78] sm:$0xff]  ;;  %v1222_v52 = vpack.c.bf16 %v279_v46, %v271_v45  ;;  %v1224_v53 = vpack.c.bf16 %v234_v48, %v226_v47  ;;  %v225_v54 = vld [vmem:[%s1841_s1 + $0x20] sm:$0xff]  ;;  %v1792_v46 = vshrl.u32 %v287_v42, 7 }
  0x13   : > { %994 = vst [vmem:[%s1452_s5 + $0x20] sm:$0xff] %v1337_v7  ;;  %995 = vst [vmem:[%s1452_s5 + $0x28] sm:$0xff] %v1337_v7  ;;  %1203 = vmatpush1.bf16.msra.mxu0 %v1202_v35  ;;  %v233_v55 = vld [vmem:[%s1841_s1 + $0x60] sm:$0xff]  ;;  %v1240_v56 = vpack.c.bf16 %v236_v51, %v228_v49  ;;  %v227_v57 = vld [vmem:[%s1841_s1 + $0x30] sm:$0xff] }
  0x14   : > { %996 = vst [vmem:[%s1452_s5 + $0x30] sm:$0xff] %v1337_v7  ;;  %997 = vst [vmem:[%s1452_s5 + $0x38] sm:$0xff] %v1337_v7  ;;  %1219 = vmatpush1.bf16.msra.mxu1 %v1218_v39  ;;  %1205 = vmatprep.subr.bf16.mxu0 %v1204_v40  ;;  %v235_v58 = vld [vmem:[%s1841_s1 + $0x70] sm:$0xff]  ;;  %v242_v59 = vld [vmem:[%s1841_s1 + $0xa8] sm:$0xff]  ;;  %v1226_v62 = vpack.c.bf16 %v233_v55, %v225_v54  ;;  %v289_v51 = vsub.s32 0, %v1792_v46  ;;  %v293_v54 = vsub.s32 1, %v1792_v46 }
  0x15   : > { %998 = vst [vmem:[%s1452_s5 + $0x40] sm:$0xff] %v1337_v7  ;;  %999 = vst [vmem:[%s1452_s5 + $0x48] sm:$0xff] %v1337_v7  ;;  %1221 = vmatprep.subr.bf16.mxu1 %v1220_v44  ;;  %v250_v60 = vld [vmem:[%s1841_s1 + $0xe8] sm:$0xff]  ;;  %v1645_v61 = vld [vmem:[%s1624_s26] sm:$0xff]  ;;  %v1242_v1 = vpack.c.bf16 %v235_v58, %v227_v57  ;;  %v301_v55 = vsub.s32 3, %v1792_v46 }
  0x16   : > { %1000 = vst [vmem:[%s1452_s5 + $0x50] sm:$0xff] %v1337_v7  ;;  %1001 = vst [vmem:[%s1452_s5 + $0x58] sm:$0xff] %v1337_v7  ;;  %v244_v63 = vld [vmem:[%s1841_s1 + $0xb8] sm:$0xff]  ;;  %v1228_v2 = vpack.c.bf16 %v250_v60, %v242_v59  ;;  %v241_v3 = vld [vmem:[%s1841_s1 + $0xa0] sm:$0xff] }
  0x17   : > { %1002 = vst [vmem:[%s1452_s5 + $0x60] sm:$0xff] %v1337_v7  ;;  %1003 = vst [vmem:[%s1452_s5 + $0x68] sm:$0xff] %v1337_v7  ;;  %1207 = vmatpush1.bf16.msra.mxu0 %v1206_v50  ;;  %v252_v0 = vld [vmem:[%s1841_s1 + $0xf8] sm:$0xff]  ;;  %v249_v4 = vld [vmem:[%s1841_s1 + $0xe0] sm:$0xff] }
  0x18   : > { %1004 = vst [vmem:[%s1452_s5 + $0x70] sm:$0xff] %v1337_v7  ;;  %1005 = vst [vmem:[%s1452_s5 + $0x78] sm:$0xff] %v1337_v7  ;;  %1223 = vmatpush1.bf16.msra.mxu1 %v1222_v52  ;;  %1225 = vmatprep.subr.bf16.mxu0 %v1224_v53  ;;  %v243_v5 = vld [vmem:[%s1841_s1 + $0xb0] sm:$0xff]  ;;  %v1244_v6 = vpack.c.bf16 %v252_v0, %v244_v63  ;;  %v258_v9 = vld [vmem:[%s1841_s1 + $0x128] sm:$0xff]  ;;  %v1230_v14 = vpack.c.bf16 %v249_v4, %v241_v3  ;;  %v297_v53 = vsub.s32 2, %v1792_v46 }
  0x19   : > { %1006 = vst [vmem:[%s1452_s5 + $0x80] sm:$0xff] %v1337_v7  ;;  %1007 = vst [vmem:[%s1452_s5 + $0x88] sm:$0xff] %v1337_v7  ;;  %1241 = vmatprep.subr.bf16.mxu1 %v1240_v56  ;;  %v251_v8 = vld [vmem:[%s1841_s1 + $0xf0] sm:$0xff]  ;;  %v266_v10 = vld [vmem:[%s1841_s1 + $0x168] sm:$0xff] }
  0x1a   : > { %1008 = vst [vmem:[%s1452_s5 + $0x90] sm:$0xff] %v1337_v7  ;;  %1009 = vst [vmem:[%s1452_s5 + $0x98] sm:$0xff] %v1337_v7  ;;  %1156 = vmatmul.mubr.msk.f32.vlgmr.msra.gmra.mrb[0].mxu0 %vm327_vm0, %v1645_v61  ;;  %v1676_v11 = vld [vmem:[%s1624_s26 + $0x8] sm:$0xff]  ;;  %v260_v12 = vld [vmem:[%s1841_s1 + $0x138] sm:$0xff]  ;;  %v1246_v15 = vpack.c.bf16 %v251_v8, %v243_v5  ;;  %v1232_v16 = vpack.c.bf16 %v266_v10, %v258_v9 }
  0x1b   : > { %1010 = vst [vmem:[%s1452_s5 + $0xa0] sm:$0xff] %v1337_v7  ;;  %1011 = vst [vmem:[%s1452_s5 + $0xa8] sm:$0xff] %v1337_v7  ;;  %1164 = vmatmul.mubr.msk.f32.vlgmr.msra.gmra.mrb[0].mxu1 %vm327_vm0, %v1645_v61  ;;  %1227 = vmatpush1.bf16.msra.mxu0 %v1226_v62  ;;  %v268_v13 = vld [vmem:[%s1841_s1 + $0x178] sm:$0xff]  ;;  %v257_v17 = vld [vmem:[%s1841_s1 + $0x120] sm:$0xff] }
  0x1c   : > { %1012 = vst [vmem:[%s1452_s5 + $0xb0] sm:$0xff] %v1337_v7  ;;  %1013 = vst [vmem:[%s1452_s5 + $0xb8] sm:$0xff] %v1337_v7  ;;  %1243 = vmatpush1.bf16.msra.mxu1 %v1242_v1  ;;  %422 = vmatprep.mubr.f32.mxu0 %v1337_v7  ;;  %v265_v18 = vld [vmem:[%s1841_s1 + $0x160] sm:$0xff]  ;;  %v259_v19 = vld [vmem:[%s1841_s1 + $0x130] sm:$0xff]  ;;  %v1248_v20 = vpack.c.bf16 %v268_v13, %v260_v12 }
  0x1d   : > { %1030 = vst [vmem:[%s1452_s5 + $0x140] sm:$0xff] %v1337_v7  ;;  %1031 = vst [vmem:[%s1452_s5 + $0x148] sm:$0xff] %v1337_v7  ;;  %535 = vmatprep.mubr.f32.mxu1 %v1337_v7  ;;  %1229 = vmatprep.subr.bf16.mxu0 %v1228_v2  ;;  %v267_v21 = vld [vmem:[%s1841_s1 + $0x170] sm:$0xff]  ;;  %v274_v22 = vld [vmem:[%s1841_s1 + $0x1a8] sm:$0xff]  ;;  %v1234_v27 = vpack.c.bf16 %v265_v18, %v257_v17 }
  0x1e   : > { %1032 = vst [vmem:[%s1452_s5 + $0x150] sm:$0xff] %v1337_v7  ;;  %1033 = vst [vmem:[%s1452_s5 + $0x158] sm:$0xff] %v1337_v7  ;;  %1157 = vmatmul.mubr.msk.f32.gmra.mrb[2].mxu0 %vm327_vm0, %v1676_v11  ;;  %1245 = vmatprep.subr.bf16.mxu1 %v1244_v6  ;;  %v282_v23 = vld [vmem:[%s1841_s1 + $0x1e8] sm:$0xff]  ;;  %v215_v24 = vld [vmem:[%s1624_s26 + $0x10] sm:$0xff]  ;;  %v1250_v28 = vpack.c.bf16 %v267_v21, %v259_v19 }
  0x1f   : > { %1034 = vst [vmem:[%s1452_s5 + $0x160] sm:$0xff] %v1337_v7  ;;  %1035 = vst [vmem:[%s1452_s5 + $0x168] sm:$0xff] %v1337_v7  ;;  %1165 = vmatmul.mubr.msk.f32.gmra.mrb[2].mxu1 %vm327_vm0, %v1676_v11  ;;  %428 = vmatprep.mubr.f32.mxu0 %v1337_v7  ;;  %v276_v25 = vld [vmem:[%s1841_s1 + $0x1b8] sm:$0xff]  ;;  %v1236_v29 = vpack.c.bf16 %v282_v23, %v274_v22  ;;  %v273_v30 = vld [vmem:[%s1841_s1 + $0x1a0] sm:$0xff] }
  0x20   : > { %1036 = vst [vmem:[%s1452_s5 + $0x170] sm:$0xff] %v1337_v7  ;;  %1037 = vst [vmem:[%s1452_s5 + $0x178] sm:$0xff] %v1337_v7  ;;  %v284_v26 = vld [vmem:[%s1841_s1 + $0x1f8] sm:$0xff]  ;;  %541 = vmatprep.mubr.f32.mxu1 %v1337_v7  ;;  %1231 = vmatpush1.bf16.msra.mxu0 %v1230_v14  ;;  %v281_v31 = vld [vmem:[%s1841_s1 + $0x1e0] sm:$0xff] }
  0x21   : > { %1038 = vst [vmem:[%s1452_s5 + $0x180] sm:$0xff] %v1337_v7  ;;  %1039 = vst [vmem:[%s1452_s5 + $0x188] sm:$0xff] %v1337_v7  ;;  %1247 = vmatpush1.bf16.msra.mxu1 %v1246_v15  ;;  %1233 = vmatprep.subr.bf16.mxu0 %v1232_v16  ;;  %v1252_v32 = vpack.c.bf16 %v284_v26, %v276_v25  ;;  %v275_v33 = vld [vmem:[%s1841_s1 + $0x1b0] sm:$0xff]  ;;  %v216_v35 = vld [vmem:[%s1624_s26 + $0x18] sm:$0xff]  ;;  %v1238_v36 = vpack.c.bf16 %v281_v31, %v273_v30 }
  0x22   : > { %1040 = vst [vmem:[%s1452_s5 + $0x190] sm:$0xff] %v1337_v7  ;;  %1041 = vst [vmem:[%s1452_s5 + $0x198] sm:$0xff] %v1337_v7  ;;  %1158 = vmatmul.mubr.msk.f32.gmra.mrb[4].mxu0 %vm327_vm0, %v215_v24  ;;  %1249 = vmatprep.subr.bf16.mxu1 %v1248_v20  ;;  %v283_v34 = vld [vmem:[%s1841_s1 + $0x1f0] sm:$0xff]  ;;  %v217_v38 = vld [vmem:[%s1624_s26 + $0x20] sm:$0xff] }
  0x23   : > { %1042 = vst [vmem:[%s1452_s5 + $0x1a0] sm:$0xff] %v1337_v7  ;;  %1043 = vst [vmem:[%s1452_s5 + $0x1a8] sm:$0xff] %v1337_v7  ;;  %1166 = vmatmul.mubr.msk.f32.gmra.mrb[4].mxu1 %vm327_vm0, %v215_v24  ;;  %434 = vmatprep.mubr.f32.mxu0 %v1337_v7  ;;  %v1254_v37 = vpack.c.bf16 %v283_v34, %v275_v33  ;;  %v218_v39 = vld [vmem:[%s1624_s26 + $0x28] sm:$0xff]  ;;  %v219_v40 = vld [vmem:[%s1624_s26 + $0x30] sm:$0xff] }
  0x24   : > { %1044 = vst [vmem:[%s1452_s5 + $0x1b0] sm:$0xff] %v1337_v7  ;;  %1045 = vst [vmem:[%s1452_s5 + $0x1b8] sm:$0xff] %v1337_v7  ;;  %547 = vmatprep.mubr.f32.mxu1 %v1337_v7  ;;  %1235 = vmatpush1.bf16.msra.mxu0 %v1234_v27  ;;  %v220_v41 = vld [vmem:[%s1624_s26 + $0x38] sm:$0xff] }
  0x25   : > { %1046 = vst [vmem:[%s1452_s5 + $0x1c0] sm:$0xff] %v1337_v7  ;;  %1047 = vst [vmem:[%s1452_s5 + $0x1c8] sm:$0xff] %v1337_v7  ;;  %1251 = vmatpush1.bf16.msra.mxu1 %v1250_v28  ;;  %1237 = vmatprep.subr.bf16.mxu0 %v1236_v29 }
  0x26   : > { %1048 = vst [vmem:[%s1452_s5 + $0x1d0] sm:$0xff] %v1337_v7  ;;  %1049 = vst [vmem:[%s1452_s5 + $0x1d8] sm:$0xff] %v1337_v7  ;;  %1159 = vmatmul.mubr.msk.f32.gmra.mrb[6].mxu0 %vm327_vm0, %v216_v35  ;;  %1253 = vmatprep.subr.bf16.mxu1 %v1252_v32 }
  0x27   : > { %1050 = vst [vmem:[%s1452_s5 + $0x1e0] sm:$0xff] %v1337_v7  ;;  %1051 = vst [vmem:[%s1452_s5 + $0x1e8] sm:$0xff] %v1337_v7  ;;  %1167 = vmatmul.mubr.msk.f32.gmra.mrb[6].mxu1 %vm327_vm0, %v216_v35  ;;  %440 = vmatprep.mubr.f32.mxu0 %v1337_v7 }
  0x28   : > { %1052 = vst [vmem:[%s1452_s5 + $0x1f0] sm:$0xff] %v1337_v7  ;;  %1053 = vst [vmem:[%s1452_s5 + $0x1f8] sm:$0xff] %v1337_v7  ;;  %553 = vmatprep.mubr.f32.mxu1 %v1337_v7  ;;  %1239 = vmatpush1.bf16.msra.mxu0 %v1238_v36 }
  0x29   : > { %1255 = vmatpush1.bf16.msra.mxu1 %v1254_v37 }
  0x2a   : > { %1160 = vmatmul.mubr.msk.f32.gmra.mrb[8].mxu0 %vm327_vm0, %v217_v38 }
  0x2b   : > { %1168 = vmatmul.mubr.msk.f32.gmra.mrb[8].mxu1 %vm327_vm0, %v217_v38  ;;  %446 = vmatprep.mubr.f32.mxu0 %v1337_v7 }
  0x2c   : > { %559 = vmatprep.mubr.f32.mxu1 %v1337_v7 }
  0x2e   : > { %1161 = vmatmul.mubr.msk.f32.gmra.mrb[10].mxu0 %vm327_vm0, %v218_v39 }
  0x2f   : > { %1169 = vmatmul.mubr.msk.f32.gmra.mrb[10].mxu1 %vm327_vm0, %v218_v39  ;;  %452 = vmatprep.mubr.f32.mxu0 %v1337_v7 }
  0x30   : > { %565 = vmatprep.mubr.f32.mxu1 %v1337_v7 }
  0x32   : > { %1162 = vmatmul.mubr.msk.f32.gmra.mrb[12].mxu0 %vm327_vm0, %v219_v40 }
  0x33   : > { %1170 = vmatmul.mubr.msk.f32.gmra.mrb[12].mxu1 %vm327_vm0, %v219_v40  ;;  %458 = vmatprep.mubr.f32.mxu0 %v1337_v7 }
  0x34   : > { %571 = vmatprep.mubr.f32.mxu1 %v1337_v7 }
  0x36   : > { %1163 = vmatmul.mubr.msk.f32.gmra.mrb[14].mxu0 %vm327_vm0, %v220_v41 }
  0x37   : > { %1171 = vmatmul.mubr.msk.f32.gmra.mrb[14].mxu1 %vm327_vm0, %v220_v41  ;;  %642 = vmatprep.mubr.f32.mxu0 %v1337_v7 }
  0x38   : > { %755 = vmatprep.mubr.f32.mxu1 %v1337_v7 }
  0x3a   : > { %1172 = vmatmul.mubr.msk.f32.vlgmr.msra.gmra.mrb[16].mxu0 %vm327_vm0, %v1645_v61 }
  0x3b   : > { %1180 = vmatmul.mubr.msk.f32.vlgmr.msra.gmra.mrb[16].mxu1 %vm327_vm0, %v1645_v61  ;;  %648 = vmatprep.mubr.f32.mxu0 %v1337_v7 }
  0x3c   : > { %761 = vmatprep.mubr.f32.mxu1 %v1337_v7 }
  0x3e   : > { %1173 = vmatmul.mubr.msk.f32.gmra.mrb[18].mxu0 %vm327_vm0, %v1676_v11 }
  0x3f   : > { %1181 = vmatmul.mubr.msk.f32.gmra.mrb[18].mxu1 %vm327_vm0, %v1676_v11  ;;  %654 = vmatprep.mubr.f32.mxu0 %v1337_v7 }
  0x40   : > { %767 = vmatprep.mubr.f32.mxu1 %v1337_v7 }
  0x42   : > { %1174 = vmatmul.mubr.msk.f32.gmra.mrb[20].mxu0 %vm327_vm0, %v215_v24 }
  0x43   : > { %1182 = vmatmul.mubr.msk.f32.gmra.mrb[20].mxu1 %vm327_vm0, %v215_v24  ;;  %660 = vmatprep.mubr.f32.mxu0 %v1337_v7 }
  0x44   : > { %773 = vmatprep.mubr.f32.mxu1 %v1337_v7 }
  0x46   : > { %1175 = vmatmul.mubr.msk.f32.gmra.mrb[22].mxu0 %vm327_vm0, %v216_v35 }
  0x47   : > { %1183 = vmatmul.mubr.msk.f32.gmra.mrb[22].mxu1 %vm327_vm0, %v216_v35  ;;  %666 = vmatprep.mubr.f32.mxu0 %v1337_v7 }
  0x48   : > { %779 = vmatprep.mubr.f32.mxu1 %v1337_v7 }
  0x4a   : > { %1176 = vmatmul.mubr.msk.f32.gmra.mrb[24].mxu0 %vm327_vm0, %v217_v38 }
  0x4b   : > { %1184 = vmatmul.mubr.msk.f32.gmra.mrb[24].mxu1 %vm327_vm0, %v217_v38  ;;  %672 = vmatprep.mubr.f32.mxu0 %v1337_v7 }
  0x4c   : > { %785 = vmatprep.mubr.f32.mxu1 %v1337_v7 }
  0x4e   : > { %1177 = vmatmul.mubr.msk.f32.gmra.mrb[26].mxu0 %vm327_vm0, %v218_v39 }
  0x4f   : > { %1185 = vmatmul.mubr.msk.f32.gmra.mrb[26].mxu1 %vm327_vm0, %v218_v39  ;;  %678 = vmatprep.mubr.f32.mxu0 %v1337_v7 }
  0x50   : > { %791 = vmatprep.mubr.f32.mxu1 %v1337_v7 }
  0x52   : > { %1178 = vmatmul.mubr.msk.f32.gmra.mrb[28].mxu0 %vm327_vm0, %v219_v40 }
  0x53   : > { %1186 = vmatmul.mubr.msk.f32.gmra.mrb[28].mxu1 %vm327_vm0, %v219_v40  ;;  %684 = vmatprep.mubr.f32.mxu0 %v1337_v7 }
  0x54   : > { %797 = vmatprep.mubr.f32.mxu1 %v1337_v7  ;;  %v1798_v7 = vld [vmem:[%s1842_s2] sm:$0xff] }
  0x55   : > { %v290_v59 = vrot.slane %v1798_v7, %v289_v51  ;;  %v298_v61 = vrot.slane %v1798_v7, %v297_v53  ;;  %v294_v62 = vrot.slane %v1798_v7, %v293_v54  ;;  %v302_v63 = vrot.slane %v1798_v7, %v301_v55 }
  0x56   : > { %1179 = vmatmul.mubr.msk.f32.gmra.mrb[30].mxu0 %vm327_vm0, %v220_v41 }
  0x57   : > { %1187 = vmatmul.mubr.msk.f32.gmra.mrb[30].mxu1 %vm327_vm0, %v220_v41 }
  0xed   : > { %v418_v43 = vpop.f32.mrb[0].mxu0 }
  0xee   : > { %v531_v44 = vpop.f32.mrb[0].mxu1  ;;  %v420_v45 = vpop.f32.mrb[1].mxu0 }
  0xef   : > { %v533_v47 = vpop.f32.mrb[1].mxu1  ;;  %v305_v44 = vsub.s32 4, %v1792_v46 }
  0xf0   : > { %v313_v47 = vsub.s32 6, %v1792_v46 }
  0xf1   : > { %v424_v48 = vpop.f32.mrb[2].mxu0  ;;  %v306_v53 = vrot.slane %v1798_v7, %v305_v44 }
  0xf2   : > { %v537_v49 = vpop.f32.mrb[2].mxu1  ;;  %v426_v50 = vpop.f32.mrb[3].mxu0  ;;  %v309_v48 = vsub.s32 5, %v1792_v46  ;;  %v314_v55 = vrot.slane %v1798_v7, %v313_v47 }
  0xf3   : > { %v539_v52 = vpop.f32.mrb[3].mxu1  ;;  %v317_v49 = vsub.s32 7, %v1792_v46 }
  0xf5   : > { %v430_v56 = vpop.f32.mrb[4].mxu0 }
  0xf6   : > { %v543_v57 = vpop.f32.mrb[4].mxu1  ;;  %v432_v58 = vpop.f32.mrb[5].mxu0  ;;  %v310_v56 = vrot.slane %v1798_v7, %v309_v48 }
  0xf7   : > { %v545_v60 = vpop.f32.mrb[5].mxu1  ;;  %v318_v57 = vrot.slane %v1798_v7, %v317_v49 }
  0xf9   : > { %v436_v0 = vpop.f32.mrb[6].mxu0 }
  0xfa   : > { %v437_v1 = vadd.f32 %v436_v0, %v290_v59  ;;  %v549_v2 = vpop.f32.mrb[6].mxu1  ;;  %v438_v3 = vpop.f32.mrb[7].mxu0 }
  0xfb   : > { %v550_v4 = vadd.f32 %v549_v2, %v298_v61  ;;  %v439_v5 = vadd.f32 %v438_v3, %v294_v62  ;;  %v551_v6 = vpop.f32.mrb[7].mxu1 }
  0xfc   : > { %1281 = vtanh.f32 %v437_v1  ;;  %v552_v8 = vadd.f32 %v551_v6, %v302_v63 }
  0xfd   : > { %1283 = vtanh.f32 %v550_v4  ;;  %v442_v9 = vpop.f32.mrb[8].mxu0 }
  0xfe   : > { %1285 = vtanh.f32 %v439_v5  ;;  %v443_v10 = vadd.f32 %v442_v9, %v290_v59  ;;  %v555_v11 = vpop.f32.mrb[8].mxu1  ;;  %v444_v12 = vpop.f32.mrb[9].mxu0 }
  0xff   : > { %1287 = vtanh.f32 %v552_v8  ;;  %v556_v13 = vadd.f32 %v555_v11, %v298_v61  ;;  %v445_v14 = vadd.f32 %v444_v12, %v294_v62  ;;  %v557_v15 = vpop.f32.mrb[9].mxu1 }
 0x100   : > { %1289 = vtanh.f32 %v443_v10  ;;  %v558_v16 = vadd.f32 %v557_v15, %v302_v63 }
 0x101   : > { %1291 = vtanh.f32 %v556_v13  ;;  %v448_v17 = vpop.f32.mrb[10].mxu0 }
 0x102   : > { %1293 = vtanh.f32 %v445_v14  ;;  %v561_v18 = vpop.f32.mrb[10].mxu1  ;;  %v450_v19 = vpop.f32.mrb[11].mxu0 }
 0x103   : > { %1295 = vtanh.f32 %v558_v16  ;;  %v563_v20 = vpop.f32.mrb[11].mxu1 }
 0x105   : > { %v454_v21 = vpop.f32.mrb[12].mxu0 }
 0x106   : > { %v1282_v22 = vpop.eup %1281  ;;  %v567_v23 = vpop.f32.mrb[12].mxu1 }
 0x107   : > { %v456_v24 = vpop.f32.mrb[13].mxu0  ;;  %v1284_v25 = vpop.eup %1283  ;;  %1014 = vst [vmem:[%s1452_s5 + $0xc0] sm:$0xff] %v1282_v22 }
 0x108   : > { %v569_v26 = vpop.f32.mrb[13].mxu1  ;;  %v1286_v27 = vpop.eup %1285  ;;  %1016 = vst [vmem:[%s1452_s5 + $0xd0] sm:$0xff] %v1284_v25 }
 0x109   : > { %v1288_v28 = vpop.eup %1287  ;;  %1015 = vst [vmem:[%s1452_s5 + $0xc8] sm:$0xff] %v1286_v27  ;;  %v460_v29 = vpop.f32.mrb[14].mxu0 }
 0x10a   : > { %v1290_v30 = vpop.eup %1289  ;;  %1017 = vst [vmem:[%s1452_s5 + $0xd8] sm:$0xff] %v1288_v28  ;;  %v573_v31 = vpop.f32.mrb[14].mxu1 }
 0x10b   : > { %v462_v32 = vpop.f32.mrb[15].mxu0  ;;  %v1292_v33 = vpop.eup %1291  ;;  %1022 = vst [vmem:[%s1452_s5 + $0x100] sm:$0xff] %v1290_v30 }
 0x10c   : > { %v575_v34 = vpop.f32.mrb[15].mxu1  ;;  %v1294_v35 = vpop.eup %1293  ;;  %1024 = vst [vmem:[%s1452_s5 + $0x110] sm:$0xff] %v1292_v33 }
 0x10d   : > { %v1296_v36 = vpop.eup %1295  ;;  %1023 = vst [vmem:[%s1452_s5 + $0x108] sm:$0xff] %v1294_v35  ;;  %v644_v37 = vpop.f32.mrb[16].mxu0 }
 0x10e   : > { %1025 = vst [vmem:[%s1452_s5 + $0x118] sm:$0xff] %v1296_v36  ;;  %v757_v38 = vpop.f32.mrb[16].mxu1  ;;  %v646_v39 = vpop.f32.mrb[17].mxu0 }
 0x10f   : > { %v759_v40 = vpop.f32.mrb[17].mxu1 }
 0x111   : > { %v650_v41 = vpop.f32.mrb[18].mxu0 }
 0x112   : > { %v763_v42 = vpop.f32.mrb[18].mxu1  ;;  %v652_v43 = vpop.f32.mrb[19].mxu0 }
 0x113   : > { %v765_v45 = vpop.f32.mrb[19].mxu1 }
 0x115   : > { %v656_v50 = vpop.f32.mrb[20].mxu0 }
 0x116   : > { %v769_v51 = vpop.f32.mrb[20].mxu1  ;;  %v658_v52 = vpop.f32.mrb[21].mxu0 }
 0x117   : > { %v771_v54 = vpop.f32.mrb[21].mxu1 }
 0x119   : > { %v662_v58 = vpop.f32.mrb[22].mxu0 }
 0x11a   : > { %v663_v59 = vadd.f32 %v662_v58, %v306_v53  ;;  %v775_v60 = vpop.f32.mrb[22].mxu1  ;;  %v664_v61 = vpop.f32.mrb[23].mxu0 }
 0x11b   : > { %v776_v62 = vadd.f32 %v775_v60, %v314_v55  ;;  %v665_v63 = vadd.f32 %v664_v61, %v310_v56  ;;  %v777_v0 = vpop.f32.mrb[23].mxu1 }
 0x11c   : > { %1297 = vtanh.f32 %v663_v59  ;;  %v778_v46 = vadd.f32 %v777_v0, %v318_v57 }
 0x11d   : > { %1299 = vtanh.f32 %v776_v62  ;;  %v668_v1 = vpop.f32.mrb[24].mxu0 }
 0x11e   : > { %1301 = vtanh.f32 %v665_v63  ;;  %v669_v2 = vadd.f32 %v668_v1, %v306_v53  ;;  %v781_v3 = vpop.f32.mrb[24].mxu1  ;;  %v670_v4 = vpop.f32.mrb[25].mxu0 }
 0x11f   : > { %1303 = vtanh.f32 %v778_v46  ;;  %v782_v5 = vadd.f32 %v781_v3, %v314_v55  ;;  %v671_v6 = vadd.f32 %v670_v4, %v310_v56  ;;  %v783_v7 = vpop.f32.mrb[25].mxu1 }
 0x120   : > { %1305 = vtanh.f32 %v669_v2  ;;  %v784_v8 = vadd.f32 %v783_v7, %v318_v57 }
 0x121   : > { %1307 = vtanh.f32 %v782_v5  ;;  %v674_v9 = vpop.f32.mrb[26].mxu0 }
 0x122   : > { %1309 = vtanh.f32 %v671_v6  ;;  %v787_v10 = vpop.f32.mrb[26].mxu1  ;;  %v676_v11 = vpop.f32.mrb[27].mxu0 }
 0x123   : > { %1311 = vtanh.f32 %v784_v8  ;;  %v789_v12 = vpop.f32.mrb[27].mxu1 }
 0x125   : > { %v680_v13 = vpop.f32.mrb[28].mxu0 }
 0x126   : > { %v1298_v14 = vpop.eup %1297  ;;  %v793_v15 = vpop.f32.mrb[28].mxu1 }
 0x127   : > { %v682_v16 = vpop.f32.mrb[29].mxu0  ;;  %v1300_v17 = vpop.eup %1299  ;;  %1018 = vst [vmem:[%s1452_s5 + $0xe0] sm:$0xff] %v1298_v14 }
 0x128   : > { %v795_v18 = vpop.f32.mrb[29].mxu1  ;;  %v1302_v19 = vpop.eup %1301  ;;  %1020 = vst [vmem:[%s1452_s5 + $0xf0] sm:$0xff] %v1300_v17 }
 0x129   : > { %v1304_v20 = vpop.eup %1303  ;;  %1019 = vst [vmem:[%s1452_s5 + $0xe8] sm:$0xff] %v1302_v19  ;;  %v686_v21 = vpop.f32.mrb[30].mxu0 }
 0x12a   : > { %v1306_v22 = vpop.eup %1305  ;;  %1021 = vst [vmem:[%s1452_s5 + $0xf8] sm:$0xff] %v1304_v20  ;;  %v799_v23 = vpop.f32.mrb[30].mxu1 }
 0x12b   : > { %v688_v24 = vpop.f32.mrb[31].mxu0  ;;  %v1308_v25 = vpop.eup %1307  ;;  %1026 = vst [vmem:[%s1452_s5 + $0x120] sm:$0xff] %v1306_v22 }
 0x12c   : > { %v801_v26 = vpop.f32.mrb[31].mxu1  ;;  %v1310_v27 = vpop.eup %1309  ;;  %1028 = vst [vmem:[%s1452_s5 + $0x130] sm:$0xff] %v1308_v25 }
 0x12d   : > { %v1312_v28 = vpop.eup %1311  ;;  %1027 = vst [vmem:[%s1452_s5 + $0x128] sm:$0xff] %v1310_v27 }
 0x12e   : > { %1029 = vst [vmem:[%s1452_s5 + $0x138] sm:$0xff] %v1312_v28 }
 0x12f PF: > { %s13_s14 = sadd.s32 1, %s1335_s14   ;;  %s1844_s12 = smov %s1331_s13 }
 0x130   : > { %p10_p5 = scmp.ge.s32.totalorder %s13_s14, 4   ;;  %s1845_s13 = smov %s1847_s15 }
 0x132   :  { %12 = sbr.rel (!%p10_p5) target bundleno = 2 (0x2), region = 62 }

// kernel: deconv_forward.3
= control target key start
LH: loop header
LB: loop body
LE: loop exit
PB: predicated region body
PF: predicated region fallthrough
CT: control target
= control target key end

     0   :  { %s17960_s15 = smov 0   ;;  %s17962_s16 = smov 0   ;;  %s21370_s0 = inlined_call_operand.vmem [shape: f32[1024,128], index: 0, kind: input, shape index: {}]   ;;  %s21371_s1 = inlined_call_operand.vmem [shape: f32[49,128,128], index: 1, kind: input, shape index: {}]   ;;  %s21372_s2 = inlined_call_operand.vmem [shape: f32[1,128], index: 2, kind: input, shape index: {}]   ;;  %s21373_s3 = inlined_call_operand.vmem [shape: f32[2,128], index: 3, kind: input, shape index: {}]   ;;  %s21374_s4 = inlined_call_operand.vmem [shape: f32[2,2,128], index: 4, kind: output, shape index: {}]  }
   0x1   :  { %s17964_s17 = smov 0  }
   0x2 LB: > { %s26_s18 = sadd.s32 1, %s17926_s16  ;;  %p10216_p0 = scmp.ge.s32.totalorder %s17930_s17, 1  ;;  %s17930_s17 = sphi %s17964_s17, %s14_s17   ;;  %s17926_s16 = sphi %s17962_s16, %s21414_s16   ;;  %s17922_s15 = sphi %s17960_s15, %s21413_s15  }
   0x3   : > { %p28_p1 = scmp.ge.s32.totalorder %s26_s18, 2  ;;  %p142_p2 = scmp.lt.s32.totalorder %s17930_s17, 3 }
   0x5   : > { %s21416_s18 = smov (%p28_p1, %s26_s18), 0  ;;  %p143_p3 = pnand %p10216_p0, %p142_p2 }
   0x7   : > { %146 = sbr.rel (%p143_p3) target bundleno = 1353 (0x549), region = 32 }
   0xe   : > { %p163_p4 = scmp.lt.s32.totalorder %s17922_s15, 1  ;;  %s10218_s19 = sshll.u32 %s17922_s15, 9 }
   0xf   : > { %s17981_s22 = scalar_lea.vmem %s21370_s0, %s10218_s19 }
  0x10   : > { %s21418_s15 = smov (!%p163_p4, %s17922_s15), 1  ;;  %v17984_v0 = vld [vmem:[%s17981_s22] sm:$0xff]  ;;  %v17987_v1 = vld [vmem:[%s17981_s22 + $0x8] sm:$0xff]  ;;  %v17990_v2 = vld [vmem:[%s17981_s22 + $0x10] sm:$0xff] }
  0x11   : > { %v17993_v3 = vld [vmem:[%s17981_s22 + $0x18] sm:$0xff]  ;;  %v17996_v4 = vld [vmem:[%s17981_s22 + $0x20] sm:$0xff]  ;;  %v17999_v5 = vld [vmem:[%s17981_s22 + $0x28] sm:$0xff]  ;;  %s10217_s23 = sshll.u32 %s21418_s15, 1 }
  0x12   : > { %v18002_v6 = vld [vmem:[%s17981_s22 + $0x30] sm:$0xff]  ;;  %v18005_v7 = vld [vmem:[%s17981_s22 + $0x38] sm:$0xff]  ;;  %v18008_v8 = vld [vmem:[%s17981_s22 + $0x40] sm:$0xff]  ;;  %s18013_s26 = scalar_lea.vmem %s21374_s4, %s10217_s23 }
  0x13   : > { %v18016_v9 = vld [vmem:[%s17981_s22 + $0x48] sm:$0xff]  ;;  %v18019_v10 = vld [vmem:[%s17981_s22 + $0x50] sm:$0xff]  ;;  %v18022_v11 = vld [vmem:[%s17981_s22 + $0x58] sm:$0xff] }
  0x14   : > { %v18025_v12 = vld [vmem:[%s17981_s22 + $0x60] sm:$0xff]  ;;  %v18028_v13 = vld [vmem:[%s17981_s22 + $0x68] sm:$0xff]  ;;  %v18031_v14 = vld [vmem:[%s17981_s22 + $0x70] sm:$0xff] }
  0x15   : > { %v18034_v15 = vld [vmem:[%s17981_s22 + $0x78] sm:$0xff]  ;;  %v18037_v16 = vld [vmem:[%s17981_s22 + $0x80] sm:$0xff]  ;;  %v18040_v17 = vld [vmem:[%s17981_s22 + $0x88] sm:$0xff] }
  0x16   : > { %v18043_v18 = vld [vmem:[%s17981_s22 + $0x90] sm:$0xff]  ;;  %v18046_v19 = vld [vmem:[%s17981_s22 + $0x98] sm:$0xff]  ;;  %v18049_v20 = vld [vmem:[%s17981_s22 + $0xa0] sm:$0xff] }
  0x17   : > { %v18052_v21 = vld [vmem:[%s17981_s22 + $0xa8] sm:$0xff]  ;;  %v18055_v22 = vld [vmem:[%s17981_s22 + $0xb0] sm:$0xff]  ;;  %v18058_v23 = vld [vmem:[%s17981_s22 + $0xb8] sm:$0xff] }
  0x18   : > { %v18061_v24 = vld [vmem:[%s17981_s22 + $0xc0] sm:$0xff]  ;;  %v18064_v25 = vld [vmem:[%s17981_s22 + $0xc8] sm:$0xff]  ;;  %v18067_v26 = vld [vmem:[%s17981_s22 + $0xd0] sm:$0xff] }
  0x19   : > { %v18070_v27 = vld [vmem:[%s17981_s22 + $0xd8] sm:$0xff]  ;;  %v18073_v28 = vld [vmem:[%s17981_s22 + $0xe0] sm:$0xff]  ;;  %v18076_v29 = vld [vmem:[%s17981_s22 + $0xe8] sm:$0xff] }
  0x1a   : > { %v18079_v30 = vld [vmem:[%s17981_s22 + $0xf0] sm:$0xff]  ;;  %v18082_v31 = vld [vmem:[%s17981_s22 + $0xf8] sm:$0xff]  ;;  %v18085_v32 = vld [vmem:[%s17981_s22 + $0x100] sm:$0xff] }
  0x1b   : > { %v18088_v33 = vld [vmem:[%s17981_s22 + $0x108] sm:$0xff]  ;;  %v18091_v34 = vld [vmem:[%s17981_s22 + $0x110] sm:$0xff]  ;;  %v18094_v35 = vld [vmem:[%s17981_s22 + $0x118] sm:$0xff] }
  0x1c   : > { %v18097_v36 = vld [vmem:[%s17981_s22 + $0x120] sm:$0xff]  ;;  %v18100_v37 = vld [vmem:[%s17981_s22 + $0x128] sm:$0xff]  ;;  %v18103_v38 = vld [vmem:[%s17981_s22 + $0x130] sm:$0xff] }
  0x1d   : > { %v18106_v39 = vld [vmem:[%s17981_s22 + $0x138] sm:$0xff]  ;;  %v18109_v40 = vld [vmem:[%s17981_s22 + $0x140] sm:$0xff]  ;;  %v18112_v41 = vld [vmem:[%s17981_s22 + $0x148] sm:$0xff] }
  0x1e   : > { %v18115_v42 = vld [vmem:[%s17981_s22 + $0x150] sm:$0xff]  ;;  %v18118_v43 = vld [vmem:[%s17981_s22 + $0x158] sm:$0xff]  ;;  %v18121_v44 = vld [vmem:[%s17981_s22 + $0x160] sm:$0xff] }
  0x1f   : > { %v18124_v45 = vld [vmem:[%s17981_s22 + $0x168] sm:$0xff]  ;;  %v18127_v46 = vld [vmem:[%s17981_s22 + $0x170] sm:$0xff]  ;;  %v18130_v47 = vld [vmem:[%s17981_s22 + $0x178] sm:$0xff] }
  0x20   : > { %v18133_v48 = vld [vmem:[%s17981_s22 + $0x180] sm:$0xff]  ;;  %v18136_v49 = vld [vmem:[%s17981_s22 + $0x188] sm:$0xff]  ;;  %v18139_v50 = vld [vmem:[%s17981_s22 + $0x190] sm:$0xff] }
  0x21   : > { %v18142_v51 = vld [vmem:[%s17981_s22 + $0x198] sm:$0xff]  ;;  %v18145_v52 = vld [vmem:[%s17981_s22 + $0x1a0] sm:$0xff]  ;;  %v18148_v53 = vld [vmem:[%s17981_s22 + $0x1a8] sm:$0xff] }
  0x22   : > { %21387 = vst [vmem:[#allocation7_spill] sm:$0xff] %v18142_v51  ;;  %21388 = vst [vmem:[#allocation8_spill] sm:$0xff] %v18145_v52  ;;  %v18151_v54 = vld [vmem:[%s17981_s22 + $0x1b0] sm:$0xff]  ;;  %v18154_v55 = vld [vmem:[%s17981_s22 + $0x1b8] sm:$0xff] }
  0x23   : > { %21389 = vst [vmem:[#allocation9_spill] sm:$0xff] %v18148_v53  ;;  %21390 = vst [vmem:[#allocation10_spill] sm:$0xff] %v18151_v54  ;;  %v18157_v56 = vld [vmem:[%s17981_s22 + $0x1c0] sm:$0xff]  ;;  %v18160_v57 = vld [vmem:[%s17981_s22 + $0x1c8] sm:$0xff] }
  0x24   : > { %21391 = vst [vmem:[#allocation11_spill] sm:$0xff] %v18154_v55  ;;  %21392 = vst [vmem:[#allocation12_spill] sm:$0xff] %v18157_v56  ;;  %v18163_v58 = vld [vmem:[%s17981_s22 + $0x1d0] sm:$0xff]  ;;  %v18166_v59 = vld [vmem:[%s17981_s22 + $0x1d8] sm:$0xff] }
  0x25   : > { %21393 = vst [vmem:[#allocation13_spill] sm:$0xff] %v18160_v57  ;;  %21394 = vst [vmem:[#allocation14_spill] sm:$0xff] %v18163_v58  ;;  %v18169_v60 = vld [vmem:[%s17981_s22 + $0x1e0] sm:$0xff]  ;;  %v18172_v61 = vld [vmem:[%s17981_s22 + $0x1e8] sm:$0xff] }
  0x26   : > { %21395 = vst [vmem:[#allocation15_spill] sm:$0xff] %v18166_v59  ;;  %21396 = vst [vmem:[#allocation16_spill] sm:$0xff] %v18169_v60  ;;  %v18175_v62 = vld [vmem:[%s17981_s22 + $0x1f0] sm:$0xff]  ;;  %v18178_v63 = vld [vmem:[%s17981_s22 + $0x1f8] sm:$0xff] }
  0x27   : > { %21397 = vst [vmem:[#allocation17_spill] sm:$0xff] %v18172_v61  ;;  %21398 = vst [vmem:[#allocation18_spill] sm:$0xff] %v18175_v62 }
  0x28   : > { %21399 = vst [vmem:[#allocation19_spill] sm:$0xff] %v18178_v63 }
  0x29   : > { %355 = vsyncadd [#allocation3], 8192 }
  0x2a   : > { %17918 = dma.done.wait [#allocation3], 8192 }
  0x2b   : > { %17919 = vsyncadd [#allocation3], 4294959104  ;;  %12740 = vmatprep.mubr.f32.mxu1 %v17987_v1  ;;  %14084 = vmatprep.mubr.f32.mxu0 %v18061_v24  ;;  %v10350_v58 = vld [vmem:[%s21371_s1 + $0x80] sm:$0xff]  ;;  %v10351_v60 = vld [vmem:[%s21371_s1 + $0x88] sm:$0xff]  ;;  %vm17933_vm0 = vmmov 0  }
  0x2c   : > { %v10718_v62 = vld [vmem:[%s21371_s1 + $0xc00] sm:$0xff]  ;;  %v15487_v63 = vpack.c.bf16 %v10351_v60, %v10350_v58  ;;  %v10719_v61 = vld [vmem:[%s21371_s1 + $0xc08] sm:$0xff]  ;;  %v10352_v59 = vld [vmem:[%s21371_s1 + $0x90] sm:$0xff] }
  0x2d   : > { %v10353_v57 = vld [vmem:[%s21371_s1 + $0x98] sm:$0xff]  ;;  %v16255_v56 = vpack.c.bf16 %v10719_v61, %v10718_v62  ;;  %v10720_v54 = vld [vmem:[%s21371_s1 + $0xc10] sm:$0xff]  ;;  %v10354_v60 = vld [vmem:[%s21371_s1 + $0xa0] sm:$0xff] }
  0x2e   : > { %v15491_v55 = vpack.c.bf16 %v10353_v57, %v10352_v59  ;;  %v10721_v58 = vld [vmem:[%s21371_s1 + $0xc18] sm:$0xff]  ;;  %15488 = vmatprep.subr.bf16.mxu1 %v15487_v63  ;;  %v10355_v52 = vld [vmem:[%s21371_s1 + $0xa8] sm:$0xff]  ;;  %v10722_v57 = vld [vmem:[%s21371_s1 + $0xc20] sm:$0xff] }
  0x2f   : > { %v16259_v53 = vpack.c.bf16 %v10721_v58, %v10720_v54  ;;  %v10723_v59 = vld [vmem:[%s21371_s1 + $0xc28] sm:$0xff]  ;;  %16256 = vmatprep.subr.bf16.mxu0 %v16255_v56  ;;  %15490 = vmatpush3.bf16.msra.mxu1 %v15487_v63  ;;  %v15495_v61 = vpack.c.bf16 %v10355_v52, %v10354_v60  ;;  %v10356_v54 = vld [vmem:[%s21371_s1 + $0xb0] sm:$0xff]  ;;  %v10357_v58 = vld [vmem:[%s21371_s1 + $0xb8] sm:$0xff] }
  0x30   : > { %16258 = vmatpush3.bf16.msra.mxu0 %v16255_v56  ;;  %15492 = vmatprep.subr.bf16.mxu1 %v15491_v55  ;;  %v16263_v62 = vpack.c.bf16 %v10723_v59, %v10722_v57  ;;  %v10724_v51 = vld [vmem:[%s21371_s1 + $0xc30] sm:$0xff]  ;;  %v10725_v56 = vld [vmem:[%s21371_s1 + $0xc38] sm:$0xff]  ;;  %v15499_v52 = vpack.c.bf16 %v10357_v58, %v10356_v54  ;;  %v10358_v60 = vld [vmem:[%s21371_s1 + $0xc0] sm:$0xff] }
  0x31   : > { %16260 = vmatprep.subr.bf16.mxu0 %v16259_v53  ;;  %v16267_v63 = vpack.c.bf16 %v10725_v56, %v10724_v51  ;;  %v10359_v57 = vld [vmem:[%s21371_s1 + $0xc8] sm:$0xff]  ;;  %v10726_v59 = vld [vmem:[%s21371_s1 + $0xc40] sm:$0xff]  ;;  %v10360_v54 = vld [vmem:[%s21371_s1 + $0xd0] sm:$0xff] }
  0x32   : > { %v15503_v51 = vpack.c.bf16 %v10359_v57, %v10358_v60  ;;  %v10361_v58 = vld [vmem:[%s21371_s1 + $0xd8] sm:$0xff]  ;;  %v10728_v56 = vld [vmem:[%s21371_s1 + $0xc50] sm:$0xff]  ;;  %v10362_v57 = vld [vmem:[%s21371_s1 + $0xe0] sm:$0xff] }
  0x33   : > { %15494 = vmatpush3.bf16.msra.mxu1 %v15491_v55 }
  0x34   : > { %16262 = vmatpush3.bf16.msra.mxu0 %v16259_v53  ;;  %15496 = vmatprep.subr.bf16.mxu1 %v15495_v61  ;;  %v10727_v53 = vld [vmem:[%s21371_s1 + $0xc48] sm:$0xff] }
  0x35   : > { %16264 = vmatprep.subr.bf16.mxu0 %v16263_v62  ;;  %v16271_v55 = vpack.c.bf16 %v10727_v53, %v10726_v59  ;;  %v10363_v59 = vld [vmem:[%s21371_s1 + $0xe8] sm:$0xff]  ;;  %v10730_v53 = vld [vmem:[%s21371_s1 + $0xc60] sm:$0xff] }
  0x37   : > { %15498 = vmatpush3.bf16.msra.mxu1 %v15495_v61  ;;  %v10729_v61 = vld [vmem:[%s21371_s1 + $0xc58] sm:$0xff] }
  0x38   : > { %16266 = vmatpush3.bf16.msra.mxu0 %v16263_v62  ;;  %15500 = vmatprep.subr.bf16.mxu1 %v15499_v52  ;;  %v15507_v62 = vpack.c.bf16 %v10361_v58, %v10360_v54  ;;  %v16275_v60 = vpack.c.bf16 %v10729_v61, %v10728_v56  ;;  %v10364_v58 = vld [vmem:[%s21371_s1 + $0xf0] sm:$0xff]  ;;  %v10365_v56 = vld [vmem:[%s21371_s1 + $0xf8] sm:$0xff] }
  0x39   : > { %16268 = vmatprep.subr.bf16.mxu0 %v16267_v63  ;;  %v10732_v61 = vld [vmem:[%s21371_s1 + $0xc70] sm:$0xff] }
  0x3b   : > { %15502 = vmatpush3.bf16.msra.mxu1 %v15499_v52  ;;  %v10731_v52 = vld [vmem:[%s21371_s1 + $0xc68] sm:$0xff] }
  0x3c   : > { %16270 = vmatpush3.bf16.msra.mxu0 %v16267_v63  ;;  %15504 = vmatprep.subr.bf16.mxu1 %v15503_v51  ;;  %v15511_v63 = vpack.c.bf16 %v10363_v59, %v10362_v57  ;;  %v16279_v54 = vpack.c.bf16 %v10731_v52, %v10730_v53  ;;  %v559_v59 = vld [vmem:[%s21371_s1] sm:$0xff]  ;;  %v560_v53 = vld [vmem:[%s21371_s1 + $0x8] sm:$0xff] }
  0x3d   : > { %16272 = vmatprep.subr.bf16.mxu0 %v16271_v55  ;;  %v10734_v52 = vld [vmem:[%s21371_s1 + $0xc80] sm:$0xff] }
  0x3f   : > { %15506 = vmatpush3.bf16.msra.mxu1 %v15503_v51  ;;  %v10733_v51 = vld [vmem:[%s21371_s1 + $0xc78] sm:$0xff] }
  0x40   : > { %16274 = vmatpush3.bf16.msra.mxu0 %v16271_v55  ;;  %15508 = vmatprep.subr.bf16.mxu1 %v15507_v62  ;;  %v15515_v55 = vpack.c.bf16 %v10365_v56, %v10364_v58  ;;  %v16283_v57 = vpack.c.bf16 %v10733_v51, %v10732_v61  ;;  %v561_v56 = vld [vmem:[%s21371_s1 + $0x10] sm:$0xff]  ;;  %v562_v61 = vld [vmem:[%s21371_s1 + $0x18] sm:$0xff] }
  0x41   : > { %16276 = vmatprep.subr.bf16.mxu0 %v16275_v60  ;;  %v10736_v51 = vld [vmem:[%s21371_s1 + $0xc90] sm:$0xff] }
  0x43   : > { %15510 = vmatpush3.bf16.msra.mxu1 %v15507_v62  ;;  %v10735_v62 = vld [vmem:[%s21371_s1 + $0xc88] sm:$0xff] }
  0x44   : > { %16278 = vmatpush3.bf16.msra.mxu0 %v16275_v60  ;;  %15512 = vmatprep.subr.bf16.mxu1 %v15511_v63  ;;  %v15519_v60 = vpack.c.bf16 %v560_v53, %v559_v59  ;;  %v16287_v58 = vpack.c.bf16 %v10735_v62, %v10734_v52  ;;  %v563_v53 = vld [vmem:[%s21371_s1 + $0x20] sm:$0xff]  ;;  %v10739_v52 = vld [vmem:[%s21371_s1 + $0xca8] sm:$0xff] }
  0x45   : > { %16280 = vmatprep.subr.bf16.mxu0 %v16279_v54 }
  0x47   : > { %15514 = vmatpush3.bf16.msra.mxu1 %v15511_v63  ;;  %v10737_v63 = vld [vmem:[%s21371_s1 + $0xc98] sm:$0xff] }
  0x48   : > { %16282 = vmatpush3.bf16.msra.mxu0 %v16279_v54  ;;  %15516 = vmatprep.subr.bf16.mxu1 %v15515_v55  ;;  %v15523_v54 = vpack.c.bf16 %v562_v61, %v561_v56  ;;  %v16291_v59 = vpack.c.bf16 %v10737_v63, %v10736_v51  ;;  %v566_v61 = vld [vmem:[%s21371_s1 + $0x38] sm:$0xff] }
  0x49   : > { %16284 = vmatprep.subr.bf16.mxu0 %v16283_v57  ;;  %v10741_v51 = vld [vmem:[%s21371_s1 + $0xcb8] sm:$0xff] }
  0x4b   : > { %15518 = vmatpush3.bf16.msra.mxu1 %v15515_v55  ;;  %v564_v55 = vld [vmem:[%s21371_s1 + $0x28] sm:$0xff] }
  0x4c   : > { %16286 = vmatpush3.bf16.msra.mxu0 %v16283_v57  ;;  %15520 = vmatprep.subr.bf16.mxu1 %v15519_v60  ;;  %v10738_v57 = vld [vmem:[%s21371_s1 + $0xca0] sm:$0xff]  ;;  %v15527_v62 = vpack.c.bf16 %v564_v55, %v563_v53  ;;  %v568_v55 = vld [vmem:[%s21371_s1 + $0x48] sm:$0xff] }
  0x4d   : > { %16288 = vmatprep.subr.bf16.mxu0 %v16287_v58  ;;  %v16295_v56 = vpack.c.bf16 %v10739_v52, %v10738_v57  ;;  %v10743_v57 = vld [vmem:[%s21371_s1 + $0xcc8] sm:$0xff] }
  0x4e   : > { %12741 = vmatmul.mubr.f32.vlgmr.msra.gmra.mrb[0].mxu1 %v17990_v2 }
  0x4f   : > { %14085 = vmatmul.mubr.f32.vlgmr.msra.gmra.mrb[0].mxu0 %v18064_v25  ;;  %15522 = vmatpush3.bf16.msra.mxu1 %v15519_v60  ;;  %v565_v60 = vld [vmem:[%s21371_s1 + $0x30] sm:$0xff] }
  0x50   : > { %16290 = vmatpush3.bf16.msra.mxu0 %v16287_v58  ;;  %12743 = vmatprep.mubr.f32.mxu1 %v17993_v3  ;;  %v10740_v58 = vld [vmem:[%s21371_s1 + $0xcb0] sm:$0xff]  ;;  %v15531_v63 = vpack.c.bf16 %v566_v61, %v565_v60  ;;  %v570_v61 = vld [vmem:[%s21371_s1 + $0x58] sm:$0xff] }
  0x51   : > { %14087 = vmatprep.mubr.f32.mxu0 %v18067_v26  ;;  %15524 = vmatprep.subr.bf16.mxu1 %v15523_v54  ;;  %v16299_v53 = vpack.c.bf16 %v10741_v51, %v10740_v58  ;;  %v10745_v58 = vld [vmem:[%s21371_s1 + $0xcd8] sm:$0xff] }
  0x52   : > { %12744 = vmatmul.mubr.f32.gmra.mrb[2].mxu1 %v17996_v4  ;;  %16292 = vmatprep.subr.bf16.mxu0 %v16291_v59 }
  0x53   : > { %14088 = vmatmul.mubr.f32.gmra.mrb[2].mxu0 %v18070_v27  ;;  %15526 = vmatpush3.bf16.msra.mxu1 %v15523_v54  ;;  %v567_v54 = vld [vmem:[%s21371_s1 + $0x40] sm:$0xff] }
  0x54   : > { %16294 = vmatpush3.bf16.msra.mxu0 %v16291_v59  ;;  %12746 = vmatprep.mubr.f32.mxu1 %v17999_v5  ;;  %v10742_v59 = vld [vmem:[%s21371_s1 + $0xcc0] sm:$0xff]  ;;  %v15535_v52 = vpack.c.bf16 %v568_v55, %v567_v54  ;;  %v572_v55 = vld [vmem:[%s21371_s1 + $0x68] sm:$0xff] }
  0x55   : > { %14090 = vmatprep.mubr.f32.mxu0 %v18073_v28  ;;  %15528 = vmatprep.subr.bf16.mxu1 %v15527_v62  ;;  %v16303_v60 = vpack.c.bf16 %v10743_v57, %v10742_v59  ;;  %v10747_v59 = vld [vmem:[%s21371_s1 + $0xce8] sm:$0xff] }
  0x56   : > { %12747 = vmatmul.mubr.f32.gmra.mrb[4].mxu1 %v18002_v6  ;;  %16296 = vmatprep.subr.bf16.mxu0 %v16295_v56 }
  0x57   : > { %14091 = vmatmul.mubr.f32.gmra.mrb[4].mxu0 %v18076_v29  ;;  %15530 = vmatpush3.bf16.msra.mxu1 %v15527_v62  ;;  %v569_v62 = vld [vmem:[%s21371_s1 + $0x50] sm:$0xff] }
  0x58   : > { %16298 = vmatpush3.bf16.msra.mxu0 %v16295_v56  ;;  %12749 = vmatprep.mubr.f32.mxu1 %v18005_v7  ;;  %v10744_v56 = vld [vmem:[%s21371_s1 + $0xcd0] sm:$0xff]  ;;  %v15539_v51 = vpack.c.bf16 %v570_v61, %v569_v62  ;;  %v574_v61 = vld [vmem:[%s21371_s1 + $0x78] sm:$0xff] }
  0x59   : > { %14093 = vmatprep.mubr.f32.mxu0 %v18079_v30  ;;  %15532 = vmatprep.subr.bf16.mxu1 %v15531_v63  ;;  %v16307_v54 = vpack.c.bf16 %v10745_v58, %v10744_v56  ;;  %v10749_v56 = vld [vmem:[%s21371_s1 + $0xcf8] sm:$0xff] }
  0x5a   : > { %12750 = vmatmul.mubr.f32.gmra.mrb[6].mxu1 %v18008_v8  ;;  %16300 = vmatprep.subr.bf16.mxu0 %v16299_v53 }
  0x5b   : > { %14094 = vmatmul.mubr.f32.gmra.mrb[6].mxu0 %v18082_v31  ;;  %15534 = vmatpush3.bf16.msra.mxu1 %v15531_v63  ;;  %v571_v63 = vld [vmem:[%s21371_s1 + $0x60] sm:$0xff] }
  0x5c   : > { %16302 = vmatpush3.bf16.msra.mxu0 %v16299_v53  ;;  %12752 = vmatprep.mubr.f32.mxu1 %v18016_v9  ;;  %v10746_v53 = vld [vmem:[%s21371_s1 + $0xce0] sm:$0xff]  ;;  %v15543_v57 = vpack.c.bf16 %v572_v55, %v571_v63  ;;  %v10367_v55 = vld [vmem:[%s21371_s1 + $0x108] sm:$0xff] }
  0x5d   : > { %14096 = vmatprep.mubr.f32.mxu0 %v18085_v32  ;;  %15536 = vmatprep.subr.bf16.mxu1 %v15535_v52  ;;  %v16311_v62 = vpack.c.bf16 %v10747_v59, %v10746_v53  ;;  %v10751_v53 = vld [vmem:[%s21371_s1 + $0xd08] sm:$0xff] }
  0x5e   : > { %12753 = vmatmul.mubr.f32.gmra.mrb[8].mxu1 %v18019_v10  ;;  %16304 = vmatprep.subr.bf16.mxu0 %v16303_v60 }
  0x5f   : > { %14097 = vmatmul.mubr.f32.gmra.mrb[8].mxu0 %v18088_v33  ;;  %15538 = vmatpush3.bf16.msra.mxu1 %v15535_v52  ;;  %v573_v52 = vld [vmem:[%s21371_s1 + $0x70] sm:$0xff] }
  0x60   : > { %16306 = vmatpush3.bf16.msra.mxu0 %v16303_v60  ;;  %12755 = vmatprep.mubr.f32.mxu1 %v18022_v11  ;;  %v10748_v60 = vld [vmem:[%s21371_s1 + $0xcf0] sm:$0xff]  ;;  %v15547_v58 = vpack.c.bf16 %v574_v61, %v573_v52  ;;  %v10369_v61 = vld [vmem:[%s21371_s1 + $0x118] sm:$0xff] }
  0x61   : > { %14099 = vmatprep.mubr.f32.mxu0 %v18091_v34  ;;  %15540 = vmatprep.subr.bf16.mxu1 %v15539_v51  ;;  %v16315_v63 = vpack.c.bf16 %v10749_v56, %v10748_v60  ;;  %v10753_v60 = vld [vmem:[%s21371_s1 + $0xd18] sm:$0xff] }
  0x62   : > { %12756 = vmatmul.mubr.f32.gmra.mrb[10].mxu1 %v18025_v12  ;;  %16308 = vmatprep.subr.bf16.mxu0 %v16307_v54 }
  0x63   : > { %14100 = vmatmul.mubr.f32.gmra.mrb[10].mxu0 %v18094_v35  ;;  %15542 = vmatpush3.bf16.msra.mxu1 %v15539_v51  ;;  %v10366_v51 = vld [vmem:[%s21371_s1 + $0x100] sm:$0xff] }
  0x64   : > { %16310 = vmatpush3.bf16.msra.mxu0 %v16307_v54  ;;  %12758 = vmatprep.mubr.f32.mxu1 %v18028_v13  ;;  %v10750_v54 = vld [vmem:[%s21371_s1 + $0xd00] sm:$0xff]  ;;  %v15551_v59 = vpack.c.bf16 %v10367_v55, %v10366_v51  ;;  %v10371_v55 = vld [vmem:[%s21371_s1 + $0x128] sm:$0xff] }
  0x65   : > { %14102 = vmatprep.mubr.f32.mxu0 %v18097_v36  ;;  %15544 = vmatprep.subr.bf16.mxu1 %v15543_v57  ;;  %v16319_v52 = vpack.c.bf16 %v10751_v53, %v10750_v54  ;;  %v10372_v53 = vld [vmem:[%s21371_s1 + $0x130] sm:$0xff] }
  0x66   : > { %12759 = vmatmul.mubr.f32.gmra.mrb[12].mxu1 %v18031_v14  ;;  %16312 = vmatprep.subr.bf16.mxu0 %v16311_v62 }
  0x67   : > { %14103 = vmatmul.mubr.f32.gmra.mrb[12].mxu0 %v18100_v37  ;;  %15546 = vmatpush3.bf16.msra.mxu1 %v15543_v57  ;;  %v10368_v57 = vld [vmem:[%s21371_s1 + $0x110] sm:$0xff] }
  0x68   : > { %16314 = vmatpush3.bf16.msra.mxu0 %v16311_v62  ;;  %12761 = vmatprep.mubr.f32.mxu1 %v18034_v15  ;;  %v10752_v62 = vld [vmem:[%s21371_s1 + $0xd10] sm:$0xff]  ;;  %v15555_v56 = vpack.c.bf16 %v10369_v61, %v10368_v57  ;;  %v10757_v57 = vld [vmem:[%s21371_s1 + $0xd38] sm:$0xff] }
  0x69   : > { %14105 = vmatprep.mubr.f32.mxu0 %v18103_v38  ;;  %15548 = vmatprep.subr.bf16.mxu1 %v15547_v58  ;;  %v16323_v51 = vpack.c.bf16 %v10753_v60, %v10752_v62  ;;  %v10374_v60 = vld [vmem:[%s21371_s1 + $0x140] sm:$0xff] }
  0x6a   : > { %12762 = vmatmul.mubr.f32.gmra.mrb[14].mxu1 %v18037_v16  ;;  %16316 = vmatprep.subr.bf16.mxu0 %v16315_v63 }
  0x6b   : > { %14106 = vmatmul.mubr.f32.gmra.mrb[14].mxu0 %v18106_v39  ;;  %15550 = vmatpush3.bf16.msra.mxu1 %v15547_v58  ;;  %v10370_v58 = vld [vmem:[%s21371_s1 + $0x120] sm:$0xff] }
  0x6c   : > { %16318 = vmatpush3.bf16.msra.mxu0 %v16315_v63  ;;  %12796 = vmatprep.mubr.f32.mxu1 %v17984_v0  ;;  %v10754_v0 = vld [vmem:[%s21371_s1 + $0xd20] sm:$0xff]  ;;  %v15559_v63 = vpack.c.bf16 %v10371_v55, %v10370_v58  ;;  %v10759_v58 = vld [vmem:[%s21371_s1 + $0xd48] sm:$0xff] }
  0x6d   : > { %14140 = vmatprep.mubr.f32.mxu0 %v18064_v25  ;;  %15552 = vmatprep.subr.bf16.mxu1 %v15551_v59 }
  0x6e   : > { %12797 = vmatmul.mubr.f32.vlgmr.msra.gmra.mrb[0].mxu1 %v17987_v1  ;;  %16320 = vmatprep.subr.bf16.mxu0 %v16319_v52  ;;  %v10755_v1 = vld [vmem:[%s21371_s1 + $0xd28] sm:$0xff] }
  0x6f   : > { %14141 = vmatmul.mubr.f32.vlgmr.msra.gmra.mrb[0].mxu0 %v18067_v26  ;;  %15554 = vmatpush3.bf16.msra.mxu1 %v15551_v59  ;;  %v16327_v54 = vpack.c.bf16 %v10755_v1, %v10754_v0  ;;  %v10373_v59 = vld [vmem:[%s21371_s1 + $0x138] sm:$0xff]  ;;  %v10376_v1 = vld [vmem:[%s21371_s1 + $0x150] sm:$0xff] }
  0x70   : > { %16322 = vmatpush3.bf16.msra.mxu0 %v16319_v52  ;;  %12799 = vmatprep.mubr.f32.mxu1 %v17990_v2  ;;  %v10756_v52 = vld [vmem:[%s21371_s1 + $0xd30] sm:$0xff]  ;;  %v15563_v61 = vpack.c.bf16 %v10373_v59, %v10372_v53  ;;  %v10761_v53 = vld [vmem:[%s21371_s1 + $0xd58] sm:$0xff] }
  0x71   : > { %14143 = vmatprep.mubr.f32.mxu0 %v18070_v27  ;;  %15556 = vmatprep.subr.bf16.mxu1 %v15555_v56  ;;  %v16331_v62 = vpack.c.bf16 %v10757_v57, %v10756_v52  ;;  %v10378_v57 = vld [vmem:[%s21371_s1 + $0x160] sm:$0xff] }
  0x72   : > { %12800 = vmatmul.mubr.f32.gmra.mrb[2].mxu1 %v17993_v3  ;;  %16324 = vmatprep.subr.bf16.mxu0 %v16323_v51 }
  0x73   : > { %14144 = vmatmul.mubr.f32.gmra.mrb[2].mxu0 %v18073_v28  ;;  %15558 = vmatpush3.bf16.msra.mxu1 %v15555_v56  ;;  %v10375_v56 = vld [vmem:[%s21371_s1 + $0x148] sm:$0xff] }
  0x74   : > { %16326 = vmatpush3.bf16.msra.mxu0 %v16323_v51  ;;  %12802 = vmatprep.mubr.f32.mxu1 %v17996_v4  ;;  %v10758_v51 = vld [vmem:[%s21371_s1 + $0xd40] sm:$0xff]  ;;  %v15567_v55 = vpack.c.bf16 %v10375_v56, %v10374_v60  ;;  %v10763_v60 = vld [vmem:[%s21371_s1 + $0xd68] sm:$0xff] }
  0x75   : > { %14146 = vmatprep.mubr.f32.mxu0 %v18076_v29  ;;  %15560 = vmatprep.subr.bf16.mxu1 %v15559_v63  ;;  %v16335_v0 = vpack.c.bf16 %v10759_v58, %v10758_v51  ;;  %v10380_v58 = vld [vmem:[%s21371_s1 + $0x170] sm:$0xff] }
  0x76   : > { %12803 = vmatmul.mubr.f32.gmra.mrb[4].mxu1 %v17999_v5  ;;  %16328 = vmatprep.subr.bf16.mxu0 %v16327_v54 }
  0x77   : > { %14147 = vmatmul.mubr.f32.gmra.mrb[4].mxu0 %v18079_v30  ;;  %15562 = vmatpush3.bf16.msra.mxu1 %v15559_v63  ;;  %v10377_v63 = vld [vmem:[%s21371_s1 + $0x158] sm:$0xff] }
  0x78   : > { %16330 = vmatpush3.bf16.msra.mxu0 %v16327_v54  ;;  %12805 = vmatprep.mubr.f32.mxu1 %v18002_v6  ;;  %v10760_v54 = vld [vmem:[%s21371_s1 + $0xd50] sm:$0xff]  ;;  %v15571_v59 = vpack.c.bf16 %v10377_v63, %v10376_v1  ;;  %v10765_v1 = vld [vmem:[%s21371_s1 + $0xd78] sm:$0xff] }
  0x79   : > { %14149 = vmatprep.mubr.f32.mxu0 %v18082_v31  ;;  %15564 = vmatprep.subr.bf16.mxu1 %v15563_v61  ;;  %v16339_v52 = vpack.c.bf16 %v10761_v53, %v10760_v54  ;;  %v10382_v53 = vld [vmem:[%s21371_s1 + $0x180] sm:$0xff] }
  0x7a   : > { %12806 = vmatmul.mubr.f32.gmra.mrb[6].mxu1 %v18005_v7  ;;  %16332 = vmatprep.subr.bf16.mxu0 %v16331_v62 }
  0x7b   : > { %14150 = vmatmul.mubr.f32.gmra.mrb[6].mxu0 %v18085_v32  ;;  %15566 = vmatpush3.bf16.msra.mxu1 %v15563_v61  ;;  %v10379_v61 = vld [vmem:[%s21371_s1 + $0x168] sm:$0xff] }
  0x7c   : > { %16334 = vmatpush3.bf16.msra.mxu0 %v16331_v62  ;;  %12808 = vmatprep.mubr.f32.mxu1 %v18008_v8  ;;  %v10762_v62 = vld [vmem:[%s21371_s1 + $0xd60] sm:$0xff]  ;;  %v15575_v56 = vpack.c.bf16 %v10379_v61, %v10378_v57  ;;  %v10767_v57 = vld [vmem:[%s21371_s1 + $0xd88] sm:$0xff] }
  0x7d   : > { %14152 = vmatprep.mubr.f32.mxu0 %v18088_v33  ;;  %15568 = vmatprep.subr.bf16.mxu1 %v15567_v55  ;;  %v16343_v51 = vpack.c.bf16 %v10763_v60, %v10762_v62  ;;  %v10384_v60 = vld [vmem:[%s21371_s1 + $0x190] sm:$0xff] }
  0x7e   : > { %12809 = vmatmul.mubr.f32.gmra.mrb[8].mxu1 %v18016_v9  ;;  %16336 = vmatprep.subr.bf16.mxu0 %v16335_v0 }
  0x7f   : > { %14153 = vmatmul.mubr.f32.gmra.mrb[8].mxu0 %v18091_v34  ;;  %15570 = vmatpush3.bf16.msra.mxu1 %v15567_v55  ;;  %v10381_v55 = vld [vmem:[%s21371_s1 + $0x178] sm:$0xff] }
  0x80   : > { %16338 = vmatpush3.bf16.msra.mxu0 %v16335_v0  ;;  %12811 = vmatprep.mubr.f32.mxu1 %v18019_v10  ;;  %v10764_v0 = vld [vmem:[%s21371_s1 + $0xd70] sm:$0xff]  ;;  %v15579_v63 = vpack.c.bf16 %v10381_v55, %v10380_v58  ;;  %v10769_v58 = vld [vmem:[%s21371_s1 + $0xd98] sm:$0xff] }
  0x81   : > { %14155 = vmatprep.mubr.f32.mxu0 %v18094_v35  ;;  %15572 = vmatprep.subr.bf16.mxu1 %v15571_v59  ;;  %v16347_v54 = vpack.c.bf16 %v10765_v1, %v10764_v0  ;;  %v10386_v1 = vld [vmem:[%s21371_s1 + $0x1a0] sm:$0xff] }
  0x82   : > { %12812 = vmatmul.mubr.f32.gmra.mrb[10].mxu1 %v18022_v11  ;;  %16340 = vmatprep.subr.bf16.mxu0 %v16339_v52 }
  0x83   : > { %14156 = vmatmul.mubr.f32.gmra.mrb[10].mxu0 %v18097_v36  ;;  %15574 = vmatpush3.bf16.msra.mxu1 %v15571_v59  ;;  %v10383_v59 = vld [vmem:[%s21371_s1 + $0x188] sm:$0xff] }
  0x84   : > { %16342 = vmatpush3.bf16.msra.mxu0 %v16339_v52  ;;  %12814 = vmatprep.mubr.f32.mxu1 %v18025_v12  ;;  %v10766_v52 = vld [vmem:[%s21371_s1 + $0xd80] sm:$0xff]  ;;  %v15583_v61 = vpack.c.bf16 %v10383_v59, %v10382_v53 }
  0x85   : > { %14158 = vmatprep.mubr.f32.mxu0 %v18100_v37  ;;  %15576 = vmatprep.subr.bf16.mxu1 %v15575_v56  ;;  %v16351_v62 = vpack.c.bf16 %v10767_v57, %v10766_v52  ;;  %v10388_v52 = vld [vmem:[%s21371_s1 + $0x1b0] sm:$0xff]  ;;  %v10389_v57 = vld [vmem:[%s21371_s1 + $0x1b8] sm:$0xff] }
  0x86   : > { %12815 = vmatmul.mubr.f32.gmra.mrb[12].mxu1 %v18028_v13  ;;  %16344 = vmatprep.subr.bf16.mxu0 %v16343_v51 }
  0x87   : > { %14159 = vmatmul.mubr.f32.gmra.mrb[12].mxu0 %v18103_v38  ;;  %15578 = vmatpush3.bf16.msra.mxu1 %v15575_v56  ;;  %v10385_v56 = vld [vmem:[%s21371_s1 + $0x198] sm:$0xff] }
  0x88   : > { %16346 = vmatpush3.bf16.msra.mxu0 %v16343_v51  ;;  %12817 = vmatprep.mubr.f32.mxu1 %v18031_v14  ;;  %v10768_v51 = vld [vmem:[%s21371_s1 + $0xd90] sm:$0xff]  ;;  %v15587_v55 = vpack.c.bf16 %v10385_v56, %v10384_v60  ;;  %v15595_v60 = vpack.c.bf16 %v10389_v57, %v10388_v52 }
  0x89   : > { %14161 = vmatprep.mubr.f32.mxu0 %v18106_v39  ;;  %15580 = vmatprep.subr.bf16.mxu1 %v15579_v63  ;;  %v16355_v0 = vpack.c.bf16 %v10769_v58, %v10768_v51  ;;  %v10390_v51 = vld [vmem:[%s21371_s1 + $0x1c0] sm:$0xff]  ;;  %v10391_v58 = vld [vmem:[%s21371_s1 + $0x1c8] sm:$0xff] }
  0x8a   : > { %12818 = vmatmul.mubr.f32.gmra.mrb[14].mxu1 %v18034_v15  ;;  %16348 = vmatprep.subr.bf16.mxu0 %v16347_v54 }
  0x8b   : > { %14162 = vmatmul.mubr.f32.gmra.mrb[14].mxu0 %v18109_v40  ;;  %15582 = vmatpush3.bf16.msra.mxu1 %v15579_v63  ;;  %v10387_v63 = vld [vmem:[%s21371_s1 + $0x1a8] sm:$0xff] }
  0x8c   : > { %16350 = vmatpush3.bf16.msra.mxu0 %v16347_v54  ;;  %12852 = vmatprep.mubr.f32.mxu1 %v17990_v2  ;;  %v10770_v2 = vld [vmem:[%s21371_s1 + $0xda0] sm:$0xff]  ;;  %v10771_v54 = vld [vmem:[%s21371_s1 + $0xda8] sm:$0xff]  ;;  %v15591_v53 = vpack.c.bf16 %v10387_v63, %v10386_v1  ;;  %v15599_v1 = vpack.c.bf16 %v10391_v58, %v10390_v51 }
  0x8d   : > { %14196 = vmatprep.mubr.f32.mxu0 %v18067_v26  ;;  %15584 = vmatprep.subr.bf16.mxu1 %v15583_v61  ;;  %v16359_v59 = vpack.c.bf16 %v10771_v54, %v10770_v2  ;;  %v10392_v2 = vld [vmem:[%s21371_s1 + $0x1d0] sm:$0xff]  ;;  %v10393_v54 = vld [vmem:[%s21371_s1 + $0x1d8] sm:$0xff] }
  0x8e   : > { %12853 = vmatmul.mubr.f32.vlgmr.msra.gmra.mrb[0].mxu1 %v17993_v3  ;;  %16352 = vmatprep.subr.bf16.mxu0 %v16351_v62  ;;  %v15603_v52 = vpack.c.bf16 %v10393_v54, %v10392_v2 }
  0x8f   : > { %14197 = vmatmul.mubr.f32.vlgmr.msra.gmra.mrb[0].mxu0 %v18070_v27  ;;  %15586 = vmatpush3.bf16.msra.mxu1 %v15583_v61  ;;  %v10772_v61 = vld [vmem:[%s21371_s1 + $0xdb0] sm:$0xff] }
  0x90   : > { %16354 = vmatpush3.bf16.msra.mxu0 %v16351_v62  ;;  %12855 = vmatprep.mubr.f32.mxu1 %v17996_v4  ;;  %v10773_v62 = vld [vmem:[%s21371_s1 + $0xdb8] sm:$0xff] }
  0x91   : > { %14199 = vmatprep.mubr.f32.mxu0 %v18073_v28  ;;  %15588 = vmatprep.subr.bf16.mxu1 %v15587_v55  ;;  %v16363_v56 = vpack.c.bf16 %v10773_v62, %v10772_v61  ;;  %v10394_v61 = vld [vmem:[%s21371_s1 + $0x1e0] sm:$0xff]  ;;  %v10395_v62 = vld [vmem:[%s21371_s1 + $0x1e8] sm:$0xff] }
  0x92   : > { %12856 = vmatmul.mubr.f32.gmra.mrb[2].mxu1 %v17999_v5  ;;  %16356 = vmatprep.subr.bf16.mxu0 %v16355_v0  ;;  %v15607_v51 = vpack.c.bf16 %v10395_v62, %v10394_v61 }
  0x93   : > { %14200 = vmatmul.mubr.f32.gmra.mrb[2].mxu0 %v18076_v29  ;;  %15590 = vmatpush3.bf16.msra.mxu1 %v15587_v55  ;;  %v10774_v55 = vld [vmem:[%s21371_s1 + $0xdc0] sm:$0xff] }
  0x94   : > { %16358 = vmatpush3.bf16.msra.mxu0 %v16355_v0  ;;  %12858 = vmatprep.mubr.f32.mxu1 %v18002_v6  ;;  %v10775_v0 = vld [vmem:[%s21371_s1 + $0xdc8] sm:$0xff] }
  0x95   : > { %14202 = vmatprep.mubr.f32.mxu0 %v18079_v30  ;;  %15592 = vmatprep.subr.bf16.mxu1 %v15591_v53  ;;  %v16367_v63 = vpack.c.bf16 %v10775_v0, %v10774_v55  ;;  %v10396_v55 = vld [vmem:[%s21371_s1 + $0x1f0] sm:$0xff]  ;;  %v10397_v0 = vld [vmem:[%s21371_s1 + $0x1f8] sm:$0xff] }
  0x96   : > { %12859 = vmatmul.mubr.f32.gmra.mrb[4].mxu1 %v18005_v7  ;;  %16360 = vmatprep.subr.bf16.mxu0 %v16359_v59  ;;  %v15611_v2 = vpack.c.bf16 %v10397_v0, %v10396_v55 }
  0x97   : > { %14203 = vmatmul.mubr.f32.gmra.mrb[4].mxu0 %v18082_v31  ;;  %15594 = vmatpush3.bf16.msra.mxu1 %v15591_v53  ;;  %v10776_v53 = vld [vmem:[%s21371_s1 + $0xdd0] sm:$0xff] }
  0x98   : > { %16362 = vmatpush3.bf16.msra.mxu0 %v16359_v59  ;;  %12861 = vmatprep.mubr.f32.mxu1 %v18008_v8  ;;  %v10777_v59 = vld [vmem:[%s21371_s1 + $0xdd8] sm:$0xff] }
  0x99   : > { %14205 = vmatprep.mubr.f32.mxu0 %v18085_v32  ;;  %15596 = vmatprep.subr.bf16.mxu1 %v15595_v60  ;;  %v16371_v57 = vpack.c.bf16 %v10777_v59, %v10776_v53  ;;  %v10398_v53 = vld [vmem:[%s21371_s1 + $0x200] sm:$0xff]  ;;  %v10399_v59 = vld [vmem:[%s21371_s1 + $0x208] sm:$0xff] }
  0x9a   : > { %12862 = vmatmul.mubr.f32.gmra.mrb[6].mxu1 %v18016_v9  ;;  %16364 = vmatprep.subr.bf16.mxu0 %v16363_v56  ;;  %v15615_v61 = vpack.c.bf16 %v10399_v59, %v10398_v53  ;;  %v10404_v59 = vld [vmem:[%s21371_s1 + $0x230] sm:$0xff] }
  0x9b   : > { %14206 = vmatmul.mubr.f32.gmra.mrb[6].mxu0 %v18088_v33  ;;  %15598 = vmatpush3.bf16.msra.mxu1 %v15595_v60  ;;  %v10778_v60 = vld [vmem:[%s21371_s1 + $0xde0] sm:$0xff] }
  0x9c   : > { %16366 = vmatpush3.bf16.msra.mxu0 %v16363_v56  ;;  %12864 = vmatprep.mubr.f32.mxu1 %v18019_v10  ;;  %v10779_v56 = vld [vmem:[%s21371_s1 + $0xde8] sm:$0xff] }
  0x9d   : > { %14208 = vmatprep.mubr.f32.mxu0 %v18091_v34  ;;  %15600 = vmatprep.subr.bf16.mxu1 %v15599_v1  ;;  %v16375_v58 = vpack.c.bf16 %v10779_v56, %v10778_v60  ;;  %v10400_v60 = vld [vmem:[%s21371_s1 + $0x210] sm:$0xff]  ;;  %v10401_v56 = vld [vmem:[%s21371_s1 + $0x218] sm:$0xff] }
  0x9e   : > { %12865 = vmatmul.mubr.f32.gmra.mrb[8].mxu1 %v18022_v11  ;;  %16368 = vmatprep.subr.bf16.mxu0 %v16367_v63  ;;  %v15619_v55 = vpack.c.bf16 %v10401_v56, %v10400_v60  ;;  %v10406_v56 = vld [vmem:[%s21371_s1 + $0x240] sm:$0xff] }
  0x9f   : > { %14209 = vmatmul.mubr.f32.gmra.mrb[8].mxu0 %v18094_v35  ;;  %15602 = vmatpush3.bf16.msra.mxu1 %v15599_v1  ;;  %v10780_v1 = vld [vmem:[%s21371_s1 + $0xdf0] sm:$0xff] }
  0xa0   : > { %16370 = vmatpush3.bf16.msra.mxu0 %v16367_v63  ;;  %12867 = vmatprep.mubr.f32.mxu1 %v18025_v12  ;;  %v10781_v63 = vld [vmem:[%s21371_s1 + $0xdf8] sm:$0xff] }
  0xa1   : > { %14211 = vmatprep.mubr.f32.mxu0 %v18097_v36  ;;  %15604 = vmatprep.subr.bf16.mxu1 %v15603_v52  ;;  %v16379_v54 = vpack.c.bf16 %v10781_v63, %v10780_v1  ;;  %v10402_v1 = vld [vmem:[%s21371_s1 + $0x220] sm:$0xff]  ;;  %v10403_v63 = vld [vmem:[%s21371_s1 + $0x228] sm:$0xff] }
  0xa2   : > { %12868 = vmatmul.mubr.f32.gmra.mrb[10].mxu1 %v18028_v13  ;;  %16372 = vmatprep.subr.bf16.mxu0 %v16371_v57 }
  0xa3   : > { %14212 = vmatmul.mubr.f32.gmra.mrb[10].mxu0 %v18100_v37  ;;  %15606 = vmatpush3.bf16.msra.mxu1 %v15603_v52  ;;  %v10782_v52 = vld [vmem:[%s21371_s1 + $0xe00] sm:$0xff] }
  0xa4   : > { %16374 = vmatpush3.bf16.msra.mxu0 %v16371_v57  ;;  %12870 = vmatprep.mubr.f32.mxu1 %v18031_v14  ;;  %v10783_v57 = vld [vmem:[%s21371_s1 + $0xe08] sm:$0xff] }
  0xa5   : > { %14214 = vmatprep.mubr.f32.mxu0 %v18103_v38  ;;  %15608 = vmatprep.subr.bf16.mxu1 %v15607_v51  ;;  %v16383_v62 = vpack.c.bf16 %v10783_v57, %v10782_v52  ;;  %v10405_v52 = vld [vmem:[%s21371_s1 + $0x238] sm:$0xff]  ;;  %v10788_v57 = vld [vmem:[%s21371_s1 + $0xe30] sm:$0xff] }
  0xa6   : > { %12871 = vmatmul.mubr.f32.gmra.mrb[12].mxu1 %v18034_v15  ;;  %16376 = vmatprep.subr.bf16.mxu0 %v16375_v58 }
  0xa7   : > { %14215 = vmatmul.mubr.f32.gmra.mrb[12].mxu0 %v18106_v39  ;;  %15610 = vmatpush3.bf16.msra.mxu1 %v15607_v51  ;;  %v10784_v51 = vld [vmem:[%s21371_s1 + $0xe10] sm:$0xff] }
  0xa8   : > { %16378 = vmatpush3.bf16.msra.mxu0 %v16375_v58  ;;  %12873 = vmatprep.mubr.f32.mxu1 %v18037_v16  ;;  %v10785_v58 = vld [vmem:[%s21371_s1 + $0xe18] sm:$0xff] }
  0xa9   : > { %14217 = vmatprep.mubr.f32.mxu0 %v18109_v40  ;;  %15612 = vmatprep.subr.bf16.mxu1 %v15611_v2  ;;  %v16387_v0 = vpack.c.bf16 %v10785_v58, %v10784_v51  ;;  %v10407_v51 = vld [vmem:[%s21371_s1 + $0x248] sm:$0xff]  ;;  %v10790_v58 = vld [vmem:[%s21371_s1 + $0xe40] sm:$0xff] }
  0xaa   : > { %12874 = vmatmul.mubr.f32.gmra.mrb[14].mxu1 %v18040_v17  ;;  %16380 = vmatprep.subr.bf16.mxu0 %v16379_v54 }
  0xab   : > { %14218 = vmatmul.mubr.f32.gmra.mrb[14].mxu0 %v18112_v41  ;;  %15614 = vmatpush3.bf16.msra.mxu1 %v15611_v2  ;;  %v10787_v2 = vld [vmem:[%s21371_s1 + $0xe28] sm:$0xff] }
  0xac   : > { %16382 = vmatpush3.bf16.msra.mxu0 %v16379_v54  ;;  %12908 = vmatprep.mubr.f32.mxu1 %v17993_v3  ;;  %v10786_v3 = vld [vmem:[%s21371_s1 + $0xe20] sm:$0xff]  ;;  %v15623_v54 = vpack.c.bf16 %v10403_v63, %v10402_v1  ;;  %v10408_v63 = vld [vmem:[%s21371_s1 + $0x250] sm:$0xff] }
  0xad   : > { %14252 = vmatprep.mubr.f32.mxu0 %v18070_v27  ;;  %15616 = vmatprep.subr.bf16.mxu1 %v15615_v61  ;;  %v16391_v53 = vpack.c.bf16 %v10787_v2, %v10786_v3  ;;  %v10409_v3 = vld [vmem:[%s21371_s1 + $0x258] sm:$0xff]  ;;  %v10792_v2 = vld [vmem:[%s21371_s1 + $0xe50] sm:$0xff] }
  0xae   : > { %12909 = vmatmul.mubr.f32.vlgmr.msra.gmra.mrb[0].mxu1 %v17996_v4  ;;  %16384 = vmatprep.subr.bf16.mxu0 %v16383_v62 }
  0xaf   : > { %14253 = vmatmul.mubr.f32.vlgmr.msra.gmra.mrb[0].mxu0 %v18073_v28  ;;  %15618 = vmatpush3.bf16.msra.mxu1 %v15615_v61  ;;  %v10789_v61 = vld [vmem:[%s21371_s1 + $0xe38] sm:$0xff] }
  0xb0   : > { %16386 = vmatpush3.bf16.msra.mxu0 %v16383_v62  ;;  %12911 = vmatprep.mubr.f32.mxu1 %v17999_v5  ;;  %v15627_v62 = vpack.c.bf16 %v10405_v52, %v10404_v59  ;;  %v16395_v60 = vpack.c.bf16 %v10789_v61, %v10788_v57  ;;  %v10410_v52 = vld [vmem:[%s21371_s1 + $0x260] sm:$0xff]  ;;  %v10411_v57 = vld [vmem:[%s21371_s1 + $0x268] sm:$0xff] }
  0xb1   : > { %14255 = vmatprep.mubr.f32.mxu0 %v18076_v29  ;;  %15620 = vmatprep.subr.bf16.mxu1 %v15619_v55  ;;  %v10794_v61 = vld [vmem:[%s21371_s1 + $0xe60] sm:$0xff] }
  0xb2   : > { %12912 = vmatmul.mubr.f32.gmra.mrb[2].mxu1 %v18002_v6  ;;  %16388 = vmatprep.subr.bf16.mxu0 %v16387_v0 }
  0xb3   : > { %14256 = vmatmul.mubr.f32.gmra.mrb[2].mxu0 %v18079_v30  ;;  %15622 = vmatpush3.bf16.msra.mxu1 %v15619_v55  ;;  %v10791_v55 = vld [vmem:[%s21371_s1 + $0xe48] sm:$0xff] }
  0xb4   : > { %16390 = vmatpush3.bf16.msra.mxu0 %v16387_v0  ;;  %12914 = vmatprep.mubr.f32.mxu1 %v18005_v7  ;;  %v15631_v0 = vpack.c.bf16 %v10407_v51, %v10406_v56  ;;  %v16399_v1 = vpack.c.bf16 %v10791_v55, %v10790_v58  ;;  %v10412_v51 = vld [vmem:[%s21371_s1 + $0x270] sm:$0xff]  ;;  %v10413_v58 = vld [vmem:[%s21371_s1 + $0x278] sm:$0xff] }
  0xb5   : > { %14258 = vmatprep.mubr.f32.mxu0 %v18082_v31  ;;  %15624 = vmatprep.subr.bf16.mxu1 %v15623_v54  ;;  %v10796_v55 = vld [vmem:[%s21371_s1 + $0xe70] sm:$0xff] }
  0xb6   : > { %12915 = vmatmul.mubr.f32.gmra.mrb[4].mxu1 %v18008_v8  ;;  %16392 = vmatprep.subr.bf16.mxu0 %v16391_v53 }
  0xb7   : > { %14259 = vmatmul.mubr.f32.gmra.mrb[4].mxu0 %v18085_v32  ;;  %15626 = vmatpush3.bf16.msra.mxu1 %v15623_v54  ;;  %v10793_v54 = vld [vmem:[%s21371_s1 + $0xe58] sm:$0xff] }
  0xb8   : > { %16394 = vmatpush3.bf16.msra.mxu0 %v16391_v53  ;;  %12917 = vmatprep.mubr.f32.mxu1 %v18016_v9  ;;  %v15635_v53 = vpack.c.bf16 %v10409_v3, %v10408_v63  ;;  %v16403_v59 = vpack.c.bf16 %v10793_v54, %v10792_v2  ;;  %v10414_v3 = vld [vmem:[%s21371_s1 + $0x280] sm:$0xff]  ;;  %v10415_v2 = vld [vmem:[%s21371_s1 + $0x288] sm:$0xff] }
  0xb9   : > { %14261 = vmatprep.mubr.f32.mxu0 %v18088_v33  ;;  %15628 = vmatprep.subr.bf16.mxu1 %v15627_v62  ;;  %v10798_v54 = vld [vmem:[%s21371_s1 + $0xe80] sm:$0xff] }
  0xba   : > { %12918 = vmatmul.mubr.f32.gmra.mrb[6].mxu1 %v18019_v10  ;;  %16396 = vmatprep.subr.bf16.mxu0 %v16395_v60 }
  0xbb   : > { %14262 = vmatmul.mubr.f32.gmra.mrb[6].mxu0 %v18091_v34  ;;  %15630 = vmatpush3.bf16.msra.mxu1 %v15627_v62  ;;  %v10795_v62 = vld [vmem:[%s21371_s1 + $0xe68] sm:$0xff] }
  0xbc   : > { %16398 = vmatpush3.bf16.msra.mxu0 %v16395_v60  ;;  %12920 = vmatprep.mubr.f32.mxu1 %v18022_v11  ;;  %v15639_v60 = vpack.c.bf16 %v10411_v57, %v10410_v52  ;;  %v16407_v56 = vpack.c.bf16 %v10795_v62, %v10794_v61  ;;  %v10416_v57 = vld [vmem:[%s21371_s1 + $0x290] sm:$0xff]  ;;  %v10417_v61 = vld [vmem:[%s21371_s1 + $0x298] sm:$0xff] }
  0xbd   : > { %14264 = vmatprep.mubr.f32.mxu0 %v18094_v35  ;;  %15632 = vmatprep.subr.bf16.mxu1 %v15631_v0  ;;  %v10800_v62 = vld [vmem:[%s21371_s1 + $0xe90] sm:$0xff] }
  0xbe   : > { %12921 = vmatmul.mubr.f32.gmra.mrb[8].mxu1 %v18025_v12  ;;  %16400 = vmatprep.subr.bf16.mxu0 %v16399_v1 }
  0xbf   : > { %14265 = vmatmul.mubr.f32.gmra.mrb[8].mxu0 %v18097_v36  ;;  %15634 = vmatpush3.bf16.msra.mxu1 %v15631_v0  ;;  %v10797_v0 = vld [vmem:[%s21371_s1 + $0xe78] sm:$0xff] }
  0xc0   : > { %16402 = vmatpush3.bf16.msra.mxu0 %v16399_v1  ;;  %12923 = vmatprep.mubr.f32.mxu1 %v18028_v13  ;;  %v15643_v1 = vpack.c.bf16 %v10413_v58, %v10412_v51  ;;  %v16411_v63 = vpack.c.bf16 %v10797_v0, %v10796_v55  ;;  %v10418_v58 = vld [vmem:[%s21371_s1 + $0x2a0] sm:$0xff]  ;;  %v10419_v55 = vld [vmem:[%s21371_s1 + $0x2a8] sm:$0xff] }
  0xc1   : > { %14267 = vmatprep.mubr.f32.mxu0 %v18100_v37  ;;  %15636 = vmatprep.subr.bf16.mxu1 %v15635_v53  ;;  %v10803_v0 = vld [vmem:[%s21371_s1 + $0xea8] sm:$0xff] }
  0xc2   : > { %12924 = vmatmul.mubr.f32.gmra.mrb[10].mxu1 %v18031_v14  ;;  %16404 = vmatprep.subr.bf16.mxu0 %v16403_v59 }
  0xc3   : > { %14268 = vmatmul.mubr.f32.gmra.mrb[10].mxu0 %v18103_v38  ;;  %15638 = vmatpush3.bf16.msra.mxu1 %v15635_v53  ;;  %v10799_v53 = vld [vmem:[%s21371_s1 + $0xe88] sm:$0xff] }
  0xc4   : > { %16406 = vmatpush3.bf16.msra.mxu0 %v16403_v59  ;;  %12926 = vmatprep.mubr.f32.mxu1 %v18034_v15  ;;  %v15647_v59 = vpack.c.bf16 %v10415_v2, %v10414_v3  ;;  %v16415_v52 = vpack.c.bf16 %v10799_v53, %v10798_v54  ;;  %v10420_v3 = vld [vmem:[%s21371_s1 + $0x2b0] sm:$0xff]  ;;  %v10421_v2 = vld [vmem:[%s21371_s1 + $0x2b8] sm:$0xff] }
  0xc5   : > { %14270 = vmatprep.mubr.f32.mxu0 %v18106_v39  ;;  %15640 = vmatprep.subr.bf16.mxu1 %v15639_v60  ;;  %v10804_v54 = vld [vmem:[%s21371_s1 + $0xeb0] sm:$0xff]  ;;  %v10805_v53 = vld [vmem:[%s21371_s1 + $0xeb8] sm:$0xff] }
  0xc6   : > { %12927 = vmatmul.mubr.f32.gmra.mrb[12].mxu1 %v18037_v16  ;;  %16408 = vmatprep.subr.bf16.mxu0 %v16407_v56 }
  0xc7   : > { %14271 = vmatmul.mubr.f32.gmra.mrb[12].mxu0 %v18109_v40  ;;  %15642 = vmatpush3.bf16.msra.mxu1 %v15639_v60  ;;  %v10801_v60 = vld [vmem:[%s21371_s1 + $0xe98] sm:$0xff] }
  0xc8   : > { %16410 = vmatpush3.bf16.msra.mxu0 %v16407_v56  ;;  %12929 = vmatprep.mubr.f32.mxu1 %v18040_v17  ;;  %v15651_v56 = vpack.c.bf16 %v10417_v61, %v10416_v57  ;;  %v16419_v51 = vpack.c.bf16 %v10801_v60, %v10800_v62  ;;  %v10422_v57 = vld [vmem:[%s21371_s1 + $0x2c0] sm:$0xff]  ;;  %v10423_v61 = vld [vmem:[%s21371_s1 + $0x2c8] sm:$0xff] }
  0xc9   : > { %14273 = vmatprep.mubr.f32.mxu0 %v18112_v41  ;;  %15644 = vmatprep.subr.bf16.mxu1 %v15643_v1  ;;  %v10806_v62 = vld [vmem:[%s21371_s1 + $0xec0] sm:$0xff]  ;;  %v10807_v60 = vld [vmem:[%s21371_s1 + $0xec8] sm:$0xff] }
  0xca   : > { %12930 = vmatmul.mubr.f32.gmra.mrb[14].mxu1 %v18043_v18  ;;  %16412 = vmatprep.subr.bf16.mxu0 %v16411_v63 }
  0xcb   : > { %14274 = vmatmul.mubr.f32.gmra.mrb[14].mxu0 %v18115_v42  ;;  %15646 = vmatpush3.bf16.msra.mxu1 %v15643_v1  ;;  %v15655_v1 = vpack.c.bf16 %v10419_v55, %v10418_v58  ;;  %v10424_v58 = vld [vmem:[%s21371_s1 + $0x2d0] sm:$0xff]  ;;  %v10425_v55 = vld [vmem:[%s21371_s1 + $0x2d8] sm:$0xff] }
  0xcc   : > { %16414 = vmatpush3.bf16.msra.mxu0 %v16411_v63  ;;  %12964 = vmatprep.mubr.f32.mxu1 %v17996_v4  ;;  %v10802_v4 = vld [vmem:[%s21371_s1 + $0xea0] sm:$0xff] }
  0xcd   : > { %14308 = vmatprep.mubr.f32.mxu0 %v18073_v28  ;;  %15648 = vmatprep.subr.bf16.mxu1 %v15647_v59  ;;  %v16423_v63 = vpack.c.bf16 %v10803_v0, %v10802_v4  ;;  %v10808_v4 = vld [vmem:[%s21371_s1 + $0xed0] sm:$0xff]  ;;  %v10809_v0 = vld [vmem:[%s21371_s1 + $0xed8] sm:$0xff] }
  0xce   : > { %12965 = vmatmul.mubr.f32.vlgmr.msra.gmra.mrb[0].mxu1 %v17999_v5  ;;  %16416 = vmatprep.subr.bf16.mxu0 %v16415_v52 }
  0xcf   : > { %14309 = vmatmul.mubr.f32.vlgmr.msra.gmra.mrb[0].mxu0 %v18076_v29  ;;  %15650 = vmatpush3.bf16.msra.mxu1 %v15647_v59  ;;  %v15659_v59 = vpack.c.bf16 %v10421_v2, %v10420_v3  ;;  %v10426_v3 = vld [vmem:[%s21371_s1 + $0x2e0] sm:$0xff]  ;;  %v10427_v2 = vld [vmem:[%s21371_s1 + $0x2e8] sm:$0xff] }
  0xd0   : > { %16418 = vmatpush3.bf16.msra.mxu0 %v16415_v52  ;;  %12967 = vmatprep.mubr.f32.mxu1 %v18002_v6  ;;  %v16427_v52 = vpack.c.bf16 %v10805_v53, %v10804_v54  ;;  %v10810_v54 = vld [vmem:[%s21371_s1 + $0xee0] sm:$0xff]  ;;  %v10811_v53 = vld [vmem:[%s21371_s1 + $0xee8] sm:$0xff] }
  0xd1   : > { %14311 = vmatprep.mubr.f32.mxu0 %v18079_v30  ;;  %15652 = vmatprep.subr.bf16.mxu1 %v15651_v56 }
  0xd2   : > { %12968 = vmatmul.mubr.f32.gmra.mrb[2].mxu1 %v18005_v7  ;;  %16420 = vmatprep.subr.bf16.mxu0 %v16419_v51 }
  0xd3   : > { %14312 = vmatmul.mubr.f32.gmra.mrb[2].mxu0 %v18082_v31  ;;  %15654 = vmatpush3.bf16.msra.mxu1 %v15651_v56  ;;  %v15663_v56 = vpack.c.bf16 %v10423_v61, %v10422_v57  ;;  %v10428_v57 = vld [vmem:[%s21371_s1 + $0x2f0] sm:$0xff]  ;;  %v10429_v61 = vld [vmem:[%s21371_s1 + $0x2f8] sm:$0xff] }
  0xd4   : > { %16422 = vmatpush3.bf16.msra.mxu0 %v16419_v51  ;;  %12970 = vmatprep.mubr.f32.mxu1 %v18008_v8  ;;  %v16431_v51 = vpack.c.bf16 %v10807_v60, %v10806_v62  ;;  %v10812_v62 = vld [vmem:[%s21371_s1 + $0xef0] sm:$0xff]  ;;  %v10813_v60 = vld [vmem:[%s21371_s1 + $0xef8] sm:$0xff] }
  0xd5   : > { %14314 = vmatprep.mubr.f32.mxu0 %v18085_v32  ;;  %15656 = vmatprep.subr.bf16.mxu1 %v15655_v1 }
  0xd6   : > { %12971 = vmatmul.mubr.f32.gmra.mrb[4].mxu1 %v18016_v9  ;;  %16424 = vmatprep.subr.bf16.mxu0 %v16423_v63 }
  0xd7   : > { %14315 = vmatmul.mubr.f32.gmra.mrb[4].mxu0 %v18088_v33  ;;  %15658 = vmatpush3.bf16.msra.mxu1 %v15655_v1  ;;  %v15667_v1 = vpack.c.bf16 %v10425_v55, %v10424_v58  ;;  %v10430_v58 = vld [vmem:[%s21371_s1 + $0x300] sm:$0xff]  ;;  %v10431_v55 = vld [vmem:[%s21371_s1 + $0x308] sm:$0xff] }
  0xd8   : > { %16426 = vmatpush3.bf16.msra.mxu0 %v16423_v63  ;;  %12973 = vmatprep.mubr.f32.mxu1 %v18019_v10  ;;  %v16435_v63 = vpack.c.bf16 %v10809_v0, %v10808_v4  ;;  %v10814_v4 = vld [vmem:[%s21371_s1 + $0xf00] sm:$0xff]  ;;  %v10815_v0 = vld [vmem:[%s21371_s1 + $0xf08] sm:$0xff] }
  0xd9   : > { %14317 = vmatprep.mubr.f32.mxu0 %v18091_v34  ;;  %15660 = vmatprep.subr.bf16.mxu1 %v15659_v59 }
  0xda   : > { %12974 = vmatmul.mubr.f32.gmra.mrb[6].mxu1 %v18022_v11  ;;  %16428 = vmatprep.subr.bf16.mxu0 %v16427_v52 }
  0xdb   : > { %14318 = vmatmul.mubr.f32.gmra.mrb[6].mxu0 %v18094_v35  ;;  %15662 = vmatpush3.bf16.msra.mxu1 %v15659_v59  ;;  %v15671_v59 = vpack.c.bf16 %v10427_v2, %v10426_v3  ;;  %v10432_v3 = vld [vmem:[%s21371_s1 + $0x310] sm:$0xff]  ;;  %v10433_v2 = vld [vmem:[%s21371_s1 + $0x318] sm:$0xff] }
  0xdc   : > { %16430 = vmatpush3.bf16.msra.mxu0 %v16427_v52  ;;  %12976 = vmatprep.mubr.f32.mxu1 %v18025_v12  ;;  %v16439_v52 = vpack.c.bf16 %v10811_v53, %v10810_v54  ;;  %v10816_v54 = vld [vmem:[%s21371_s1 + $0xf10] sm:$0xff]  ;;  %v10817_v53 = vld [vmem:[%s21371_s1 + $0xf18] sm:$0xff] }
  0xdd   : > { %14320 = vmatprep.mubr.f32.mxu0 %v18097_v36  ;;  %15664 = vmatprep.subr.bf16.mxu1 %v15663_v56 }
  0xde   : > { %12977 = vmatmul.mubr.f32.gmra.mrb[8].mxu1 %v18028_v13  ;;  %16432 = vmatprep.subr.bf16.mxu0 %v16431_v51 }
  0xdf   : > { %14321 = vmatmul.mubr.f32.gmra.mrb[8].mxu0 %v18100_v37  ;;  %15666 = vmatpush3.bf16.msra.mxu1 %v15663_v56  ;;  %v15675_v56 = vpack.c.bf16 %v10429_v61, %v10428_v57  ;;  %v10434_v57 = vld [vmem:[%s21371_s1 + $0x320] sm:$0xff]  ;;  %v10435_v61 = vld [vmem:[%s21371_s1 + $0x328] sm:$0xff] }
  0xe0   : > { %16434 = vmatpush3.bf16.msra.mxu0 %v16431_v51  ;;  %12979 = vmatprep.mubr.f32.mxu1 %v18031_v14  ;;  %v16443_v51 = vpack.c.bf16 %v10813_v60, %v10812_v62  ;;  %v10819_v62 = vld [vmem:[%s21371_s1 + $0xf28] sm:$0xff]  ;;  %v15687_v60 = vpack.c.bf16 %v10435_v61, %v10434_v57  ;;  %v10441_v57 = vld [vmem:[%s21371_s1 + $0x358] sm:$0xff]  ;;  %v10824_v61 = vld [vmem:[%s21371_s1 + $0xf50] sm:$0xff] }
  0xe1   : > { %14323 = vmatprep.mubr.f32.mxu0 %v18103_v38  ;;  %15668 = vmatprep.subr.bf16.mxu1 %v15667_v1 }
  0xe2   : > { %12980 = vmatmul.mubr.f32.gmra.mrb[10].mxu1 %v18034_v15  ;;  %16436 = vmatprep.subr.bf16.mxu0 %v16435_v63 }
  0xe3   : > { %14324 = vmatmul.mubr.f32.gmra.mrb[10].mxu0 %v18106_v39  ;;  %15670 = vmatpush3.bf16.msra.mxu1 %v15667_v1  ;;  %v15679_v1 = vpack.c.bf16 %v10431_v55, %v10430_v58  ;;  %v10437_v58 = vld [vmem:[%s21371_s1 + $0x338] sm:$0xff]  ;;  %v10820_v55 = vld [vmem:[%s21371_s1 + $0xf30] sm:$0xff] }
  0xe4   : > { %16438 = vmatpush3.bf16.msra.mxu0 %v16435_v63  ;;  %12982 = vmatprep.mubr.f32.mxu1 %v18037_v16  ;;  %v16447_v63 = vpack.c.bf16 %v10815_v0, %v10814_v4  ;;  %v10821_v4 = vld [vmem:[%s21371_s1 + $0xf38] sm:$0xff] }
  0xe5   : > { %14326 = vmatprep.mubr.f32.mxu0 %v18109_v40  ;;  %15672 = vmatprep.subr.bf16.mxu1 %v15671_v59 }
  0xe6   : > { %12983 = vmatmul.mubr.f32.gmra.mrb[12].mxu1 %v18040_v17  ;;  %16440 = vmatprep.subr.bf16.mxu0 %v16439_v52 }
  0xe7   : > { %14327 = vmatmul.mubr.f32.gmra.mrb[12].mxu0 %v18112_v41  ;;  %15674 = vmatpush3.bf16.msra.mxu1 %v15671_v59  ;;  %v15683_v59 = vpack.c.bf16 %v10433_v2, %v10432_v3  ;;  %v10439_v3 = vld [vmem:[%s21371_s1 + $0x348] sm:$0xff]  ;;  %v10822_v2 = vld [vmem:[%s21371_s1 + $0xf40] sm:$0xff] }
  0xe8   : > { %16442 = vmatpush3.bf16.msra.mxu0 %v16439_v52  ;;  %12985 = vmatprep.mubr.f32.mxu1 %v18043_v18  ;;  %v16451_v52 = vpack.c.bf16 %v10817_v53, %v10816_v54  ;;  %v10823_v54 = vld [vmem:[%s21371_s1 + $0xf48] sm:$0xff] }
  0xe9   : > { %14329 = vmatprep.mubr.f32.mxu0 %v18115_v42  ;;  %15676 = vmatprep.subr.bf16.mxu1 %v15675_v56 }
  0xea   : > { %12986 = vmatmul.mubr.f32.gmra.mrb[14].mxu1 %v18046_v19  ;;  %16444 = vmatprep.subr.bf16.mxu0 %v16443_v51 }
  0xeb   : > { %14330 = vmatmul.mubr.f32.gmra.mrb[14].mxu0 %v18118_v43  ;;  %15678 = vmatpush3.bf16.msra.mxu1 %v15675_v56 }
  0xec   : > { %16446 = vmatpush3.bf16.msra.mxu0 %v16443_v51  ;;  %13020 = vmatprep.mubr.f32.mxu1 %v17999_v5  ;;  %v10818_v5 = vld [vmem:[%s21371_s1 + $0xf20] sm:$0xff]  ;;  %v10436_v51 = vld [vmem:[%s21371_s1 + $0x330] sm:$0xff] }
  0xed   : > { %14364 = vmatprep.mubr.f32.mxu0 %v18076_v29  ;;  %15680 = vmatprep.subr.bf16.mxu1 %v15679_v1  ;;  %v16455_v56 = vpack.c.bf16 %v10819_v62, %v10818_v5  ;;  %v15691_v0 = vpack.c.bf16 %v10437_v58, %v10436_v51  ;;  %v10825_v5 = vld [vmem:[%s21371_s1 + $0xf58] sm:$0xff]  ;;  %v10443_v51 = vld [vmem:[%s21371_s1 + $0x368] sm:$0xff]  ;;  %v10826_v58 = vld [vmem:[%s21371_s1 + $0xf60] sm:$0xff] }
  0xee   : > { %13021 = vmatmul.mubr.f32.vlgmr.msra.gmra.mrb[0].mxu1 %v18002_v6  ;;  %16448 = vmatprep.subr.bf16.mxu0 %v16447_v63 }
  0xef   : > { %14365 = vmatmul.mubr.f32.vlgmr.msra.gmra.mrb[0].mxu0 %v18079_v30  ;;  %15682 = vmatpush3.bf16.msra.mxu1 %v15679_v1  ;;  %v16459_v1 = vpack.c.bf16 %v10821_v4, %v10820_v55  ;;  %v10827_v55 = vld [vmem:[%s21371_s1 + $0xf68] sm:$0xff] }
  0xf0   : > { %16450 = vmatpush3.bf16.msra.mxu0 %v16447_v63  ;;  %13023 = vmatprep.mubr.f32.mxu1 %v18005_v7  ;;  %v10438_v63 = vld [vmem:[%s21371_s1 + $0x340] sm:$0xff] }
  0xf1   : > { %14367 = vmatprep.mubr.f32.mxu0 %v18082_v31  ;;  %15684 = vmatprep.subr.bf16.mxu1 %v15683_v59  ;;  %v15695_v53 = vpack.c.bf16 %v10439_v3, %v10438_v63  ;;  %v10445_v63 = vld [vmem:[%s21371_s1 + $0x378] sm:$0xff]  ;;  %v10828_v3 = vld [vmem:[%s21371_s1 + $0xf70] sm:$0xff] }
  0xf2   : > { %13024 = vmatmul.mubr.f32.gmra.mrb[2].mxu1 %v18008_v8  ;;  %16452 = vmatprep.subr.bf16.mxu0 %v16451_v52 }
  0xf3   : > { %14368 = vmatmul.mubr.f32.gmra.mrb[2].mxu0 %v18085_v32  ;;  %15686 = vmatpush3.bf16.msra.mxu1 %v15683_v59  ;;  %v16463_v59 = vpack.c.bf16 %v10823_v54, %v10822_v2  ;;  %v10829_v2 = vld [vmem:[%s21371_s1 + $0xf78] sm:$0xff] }
  0xf4   : > { %16454 = vmatpush3.bf16.msra.mxu0 %v16451_v52  ;;  %13026 = vmatprep.mubr.f32.mxu1 %v18016_v9  ;;  %v10440_v52 = vld [vmem:[%s21371_s1 + $0x350] sm:$0xff] }
  0xf5   : > { %14370 = vmatprep.mubr.f32.mxu0 %v18088_v33  ;;  %15688 = vmatprep.subr.bf16.mxu1 %v15687_v60  ;;  %v15699_v62 = vpack.c.bf16 %v10441_v57, %v10440_v52  ;;  %v10447_v52 = vld [vmem:[%s21371_s1 + $0x388] sm:$0xff]  ;;  %v10830_v57 = vld [vmem:[%s21371_s1 + $0xf80] sm:$0xff] }
  0xf6   : > { %13027 = vmatmul.mubr.f32.gmra.mrb[4].mxu1 %v18019_v10  ;;  %16456 = vmatprep.subr.bf16.mxu0 %v16455_v56 }
  0xf7   : > { %14371 = vmatmul.mubr.f32.gmra.mrb[4].mxu0 %v18091_v34  ;;  %15690 = vmatpush3.bf16.msra.mxu1 %v15687_v60  ;;  %v16467_v60 = vpack.c.bf16 %v10825_v5, %v10824_v61  ;;  %v10831_v61 = vld [vmem:[%s21371_s1 + $0xf88] sm:$0xff] }
  0xf8   : > { %16458 = vmatpush3.bf16.msra.mxu0 %v16455_v56  ;;  %13029 = vmatprep.mubr.f32.mxu1 %v18022_v11  ;;  %v10442_v56 = vld [vmem:[%s21371_s1 + $0x360] sm:$0xff] }
  0xf9   : > { %14373 = vmatprep.mubr.f32.mxu0 %v18094_v35  ;;  %15692 = vmatprep.subr.bf16.mxu1 %v15691_v0  ;;  %v15703_v4 = vpack.c.bf16 %v10443_v51, %v10442_v56  ;;  %v10449_v56 = vld [vmem:[%s21371_s1 + $0x398] sm:$0xff]  ;;  %v10832_v51 = vld [vmem:[%s21371_s1 + $0xf90] sm:$0xff] }
  0xfa   : > { %13030 = vmatmul.mubr.f32.gmra.mrb[6].mxu1 %v18025_v12  ;;  %16460 = vmatprep.subr.bf16.mxu0 %v16459_v1 }
  0xfb   : > { %14374 = vmatmul.mubr.f32.gmra.mrb[6].mxu0 %v18097_v36  ;;  %15694 = vmatpush3.bf16.msra.mxu1 %v15691_v0  ;;  %v16471_v0 = vpack.c.bf16 %v10827_v55, %v10826_v58  ;;  %v10833_v58 = vld [vmem:[%s21371_s1 + $0xf98] sm:$0xff] }
  0xfc   : > { %16462 = vmatpush3.bf16.msra.mxu0 %v16459_v1  ;;  %13032 = vmatprep.mubr.f32.mxu1 %v18028_v13  ;;  %v10444_v1 = vld [vmem:[%s21371_s1 + $0x370] sm:$0xff] }
  0xfd   : > { %14376 = vmatprep.mubr.f32.mxu0 %v18100_v37  ;;  %15696 = vmatprep.subr.bf16.mxu1 %v15695_v53  ;;  %v15707_v54 = vpack.c.bf16 %v10445_v63, %v10444_v1  ;;  %v10451_v1 = vld [vmem:[%s21371_s1 + $0x3a8] sm:$0xff] }
  0xfe   : > { %13033 = vmatmul.mubr.f32.gmra.mrb[8].mxu1 %v18031_v14  ;;  %16464 = vmatprep.subr.bf16.mxu0 %v16463_v59  ;;  %v10835_v63 = vld [vmem:[%s21371_s1 + $0xfa8] sm:$0xff] }
  0xff   : > { %14377 = vmatmul.mubr.f32.gmra.mrb[8].mxu0 %v18103_v38  ;;  %15698 = vmatpush3.bf16.msra.mxu1 %v15695_v53  ;;  %v16475_v53 = vpack.c.bf16 %v10829_v2, %v10828_v3 }
 0x100   : > { %16466 = vmatpush3.bf16.msra.mxu0 %v16463_v59  ;;  %13035 = vmatprep.mubr.f32.mxu1 %v18034_v15  ;;  %v10446_v59 = vld [vmem:[%s21371_s1 + $0x380] sm:$0xff] }
 0x101   : > { %14379 = vmatprep.mubr.f32.mxu0 %v18106_v39  ;;  %15700 = vmatprep.subr.bf16.mxu1 %v15699_v62  ;;  %v15711_v5 = vpack.c.bf16 %v10447_v52, %v10446_v59  ;;  %v10836_v59 = vld [vmem:[%s21371_s1 + $0xfb0] sm:$0xff]  ;;  %v10837_v52 = vld [vmem:[%s21371_s1 + $0xfb8] sm:$0xff] }
 0x102   : > { %13036 = vmatmul.mubr.f32.gmra.mrb[10].mxu1 %v18037_v16  ;;  %16468 = vmatprep.subr.bf16.mxu0 %v16467_v60 }
 0x103   : > { %14380 = vmatmul.mubr.f32.gmra.mrb[10].mxu0 %v18109_v40  ;;  %15702 = vmatpush3.bf16.msra.mxu1 %v15699_v62  ;;  %v16479_v62 = vpack.c.bf16 %v10831_v61, %v10830_v57  ;;  %v16491_v61 = vpack.c.bf16 %v10837_v52, %v10836_v59 }
 0x104   : > { %16470 = vmatpush3.bf16.msra.mxu0 %v16467_v60  ;;  %13038 = vmatprep.mubr.f32.mxu1 %v18040_v17  ;;  %v10448_v60 = vld [vmem:[%s21371_s1 + $0x390] sm:$0xff] }
 0x105   : > { %14382 = vmatprep.mubr.f32.mxu0 %v18112_v41  ;;  %15704 = vmatprep.subr.bf16.mxu1 %v15703_v4  ;;  %v15715_v55 = vpack.c.bf16 %v10449_v56, %v10448_v60  ;;  %v10838_v60 = vld [vmem:[%s21371_s1 + $0xfc0] sm:$0xff]  ;;  %v10839_v56 = vld [vmem:[%s21371_s1 + $0xfc8] sm:$0xff] }
 0x106   : > { %13039 = vmatmul.mubr.f32.gmra.mrb[12].mxu1 %v18043_v18  ;;  %16472 = vmatprep.subr.bf16.mxu0 %v16471_v0 }
 0x107   : > { %14383 = vmatmul.mubr.f32.gmra.mrb[12].mxu0 %v18115_v42  ;;  %15706 = vmatpush3.bf16.msra.mxu1 %v15703_v4  ;;  %v16483_v4 = vpack.c.bf16 %v10833_v58, %v10832_v51  ;;  %v16495_v58 = vpack.c.bf16 %v10839_v56, %v10838_v60 }
 0x108   : > { %16474 = vmatpush3.bf16.msra.mxu0 %v16471_v0  ;;  %13041 = vmatprep.mubr.f32.mxu1 %v18046_v19  ;;  %v10450_v0 = vld [vmem:[%s21371_s1 + $0x3a0] sm:$0xff] }
 0x109   : > { %14385 = vmatprep.mubr.f32.mxu0 %v18118_v43  ;;  %15708 = vmatprep.subr.bf16.mxu1 %v15707_v54  ;;  %v15719_v3 = vpack.c.bf16 %v10451_v1, %v10450_v0  ;;  %v10840_v0 = vld [vmem:[%s21371_s1 + $0xfd0] sm:$0xff]  ;;  %v10841_v1 = vld [vmem:[%s21371_s1 + $0xfd8] sm:$0xff] }
 0x10a   : > { %13042 = vmatmul.mubr.f32.gmra.mrb[14].mxu1 %v18049_v20  ;;  %16476 = vmatprep.subr.bf16.mxu0 %v16475_v53 }
 0x10b   : > { %14386 = vmatmul.mubr.f32.gmra.mrb[14].mxu0 %v18121_v44  ;;  %15710 = vmatpush3.bf16.msra.mxu1 %v15707_v54  ;;  %v10452_v54 = vld [vmem:[%s21371_s1 + $0x3b0] sm:$0xff] }
 0x10c   : > { %16478 = vmatpush3.bf16.msra.mxu0 %v16475_v53  ;;  %13076 = vmatprep.mubr.f32.mxu1 %v18002_v6  ;;  %v10834_v6 = vld [vmem:[%s21371_s1 + $0xfa0] sm:$0xff]  ;;  %v10453_v53 = vld [vmem:[%s21371_s1 + $0x3b8] sm:$0xff] }
 0x10d   : > { %14420 = vmatprep.mubr.f32.mxu0 %v18079_v30  ;;  %15712 = vmatprep.subr.bf16.mxu1 %v15711_v5  ;;  %v16487_v2 = vpack.c.bf16 %v10835_v63, %v10834_v6  ;;  %v15723_v57 = vpack.c.bf16 %v10453_v53, %v10452_v54  ;;  %v16499_v63 = vpack.c.bf16 %v10841_v1, %v10840_v0  ;;  %v10842_v54 = vld [vmem:[%s21371_s1 + $0xfe0] sm:$0xff]  ;;  %v10843_v53 = vld [vmem:[%s21371_s1 + $0xfe8] sm:$0xff] }
 0x10e   : > { %13077 = vmatmul.mubr.f32.vlgmr.msra.gmra.mrb[0].mxu1 %v18005_v7  ;;  %16480 = vmatprep.subr.bf16.mxu0 %v16479_v62  ;;  %v16503_v52 = vpack.c.bf16 %v10843_v53, %v10842_v54 }
 0x10f   : > { %14421 = vmatmul.mubr.f32.vlgmr.msra.gmra.mrb[0].mxu0 %v18082_v31  ;;  %15714 = vmatpush3.bf16.msra.mxu1 %v15711_v5  ;;  %v10454_v5 = vld [vmem:[%s21371_s1 + $0x3c0] sm:$0xff] }
 0x110   : > { %16482 = vmatpush3.bf16.msra.mxu0 %v16479_v62  ;;  %13079 = vmatprep.mubr.f32.mxu1 %v18008_v8  ;;  %v10455_v62 = vld [vmem:[%s21371_s1 + $0x3c8] sm:$0xff] }
 0x111   : > { %14423 = vmatprep.mubr.f32.mxu0 %v18085_v32  ;;  %15716 = vmatprep.subr.bf16.mxu1 %v15715_v55  ;;  %v15727_v51 = vpack.c.bf16 %v10455_v62, %v10454_v5  ;;  %v10844_v5 = vld [vmem:[%s21371_s1 + $0xff0] sm:$0xff]  ;;  %v10845_v62 = vld [vmem:[%s21371_s1 + $0xff8] sm:$0xff] }
 0x112   : > { %13080 = vmatmul.mubr.f32.gmra.mrb[2].mxu1 %v18016_v9  ;;  %16484 = vmatprep.subr.bf16.mxu0 %v16483_v4  ;;  %v16507_v56 = vpack.c.bf16 %v10845_v62, %v10844_v5  ;;  %v10468_v62 = vld [vmem:[%s21371_s1 + $0x430] sm:$0xff] }
 0x113   : > { %14424 = vmatmul.mubr.f32.gmra.mrb[2].mxu0 %v18088_v33  ;;  %15718 = vmatpush3.bf16.msra.mxu1 %v15715_v55  ;;  %v10456_v55 = vld [vmem:[%s21371_s1 + $0x3d0] sm:$0xff] }
 0x114   : > { %16486 = vmatpush3.bf16.msra.mxu0 %v16483_v4  ;;  %13082 = vmatprep.mubr.f32.mxu1 %v18019_v10  ;;  %v10457_v4 = vld [vmem:[%s21371_s1 + $0x3d8] sm:$0xff] }
 0x115   : > { %14426 = vmatprep.mubr.f32.mxu0 %v18091_v34  ;;  %15720 = vmatprep.subr.bf16.mxu1 %v15719_v3  ;;  %v15731_v6 = vpack.c.bf16 %v10457_v4, %v10456_v55  ;;  %v10846_v55 = vld [vmem:[%s21371_s1 + $0x1000] sm:$0xff]  ;;  %v10847_v4 = vld [vmem:[%s21371_s1 + $0x1008] sm:$0xff] }
 0x116   : > { %13083 = vmatmul.mubr.f32.gmra.mrb[4].mxu1 %v18022_v11  ;;  %16488 = vmatprep.subr.bf16.mxu0 %v16487_v2  ;;  %v16511_v1 = vpack.c.bf16 %v10847_v4, %v10846_v55  ;;  %v10470_v4 = vld [vmem:[%s21371_s1 + $0x440] sm:$0xff] }
 0x117   : > { %14427 = vmatmul.mubr.f32.gmra.mrb[4].mxu0 %v18094_v35  ;;  %15722 = vmatpush3.bf16.msra.mxu1 %v15719_v3  ;;  %v10458_v3 = vld [vmem:[%s21371_s1 + $0x3e0] sm:$0xff] }
 0x118   : > { %16490 = vmatpush3.bf16.msra.mxu0 %v16487_v2  ;;  %13085 = vmatprep.mubr.f32.mxu1 %v18025_v12  ;;  %v10459_v2 = vld [vmem:[%s21371_s1 + $0x3e8] sm:$0xff] }
 0x119   : > { %14429 = vmatprep.mubr.f32.mxu0 %v18097_v36  ;;  %15724 = vmatprep.subr.bf16.mxu1 %v15723_v57  ;;  %v15735_v59 = vpack.c.bf16 %v10459_v2, %v10458_v3  ;;  %v10848_v3 = vld [vmem:[%s21371_s1 + $0x1010] sm:$0xff]  ;;  %v10849_v2 = vld [vmem:[%s21371_s1 + $0x1018] sm:$0xff] }
 0x11a   : > { %13086 = vmatmul.mubr.f32.gmra.mrb[6].mxu1 %v18028_v13  ;;  %16492 = vmatprep.subr.bf16.mxu0 %v16491_v61  ;;  %v16515_v53 = vpack.c.bf16 %v10849_v2, %v10848_v3  ;;  %v10472_v2 = vld [vmem:[%s21371_s1 + $0x450] sm:$0xff] }
 0x11b   : > { %14430 = vmatmul.mubr.f32.gmra.mrb[6].mxu0 %v18100_v37  ;;  %15726 = vmatpush3.bf16.msra.mxu1 %v15723_v57  ;;  %v10460_v57 = vld [vmem:[%s21371_s1 + $0x3f0] sm:$0xff] }
 0x11c   : > { %16494 = vmatpush3.bf16.msra.mxu0 %v16491_v61  ;;  %13088 = vmatprep.mubr.f32.mxu1 %v18031_v14  ;;  %v10461_v61 = vld [vmem:[%s21371_s1 + $0x3f8] sm:$0xff] }
 0x11d   : > { %14432 = vmatprep.mubr.f32.mxu0 %v18103_v38  ;;  %15728 = vmatprep.subr.bf16.mxu1 %v15727_v51  ;;  %v15739_v60 = vpack.c.bf16 %v10461_v61, %v10460_v57  ;;  %v10851_v57 = vld [vmem:[%s21371_s1 + $0x1028] sm:$0xff] }
 0x11e   : > { %13089 = vmatmul.mubr.f32.gmra.mrb[8].mxu1 %v18034_v15  ;;  %16496 = vmatprep.subr.bf16.mxu0 %v16495_v58 }
 0x11f   : > { %14433 = vmatmul.mubr.f32.gmra.mrb[8].mxu0 %v18106_v39  ;;  %15730 = vmatpush3.bf16.msra.mxu1 %v15727_v51  ;;  %v10462_v51 = vld [vmem:[%s21371_s1 + $0x400] sm:$0xff] }
 0x120   : > { %16498 = vmatpush3.bf16.msra.mxu0 %v16495_v58  ;;  %13091 = vmatprep.mubr.f32.mxu1 %v18037_v16  ;;  %v10463_v58 = vld [vmem:[%s21371_s1 + $0x408] sm:$0xff] }
 0x121   : > { %14435 = vmatprep.mubr.f32.mxu0 %v18109_v40  ;;  %15732 = vmatprep.subr.bf16.mxu1 %v15731_v6  ;;  %v15743_v0 = vpack.c.bf16 %v10463_v58, %v10462_v51  ;;  %v10853_v51 = vld [vmem:[%s21371_s1 + $0x1038] sm:$0xff] }
 0x122   : > { %13092 = vmatmul.mubr.f32.gmra.mrb[10].mxu1 %v18040_v17  ;;  %16500 = vmatprep.subr.bf16.mxu0 %v16499_v63 }
 0x123   : > { %14436 = vmatmul.mubr.f32.gmra.mrb[10].mxu0 %v18112_v41  ;;  %15734 = vmatpush3.bf16.msra.mxu1 %v15731_v6  ;;  %v10464_v6 = vld [vmem:[%s21371_s1 + $0x410] sm:$0xff] }
 0x124   : > { %16502 = vmatpush3.bf16.msra.mxu0 %v16499_v63  ;;  %13094 = vmatprep.mubr.f32.mxu1 %v18043_v18  ;;  %v10465_v63 = vld [vmem:[%s21371_s1 + $0x418] sm:$0xff] }
 0x125   : > { %14438 = vmatprep.mubr.f32.mxu0 %v18115_v42  ;;  %15736 = vmatprep.subr.bf16.mxu1 %v15735_v59  ;;  %v15747_v54 = vpack.c.bf16 %v10465_v63, %v10464_v6  ;;  %v10855_v6 = vld [vmem:[%s21371_s1 + $0x1048] sm:$0xff] }
 0x126   : > { %13095 = vmatmul.mubr.f32.gmra.mrb[12].mxu1 %v18046_v19  ;;  %16504 = vmatprep.subr.bf16.mxu0 %v16503_v52 }
 0x127   : > { %14439 = vmatmul.mubr.f32.gmra.mrb[12].mxu0 %v18118_v43  ;;  %15738 = vmatpush3.bf16.msra.mxu1 %v15735_v59  ;;  %v10466_v59 = vld [vmem:[%s21371_s1 + $0x420] sm:$0xff] }
 0x128   : > { %16506 = vmatpush3.bf16.msra.mxu0 %v16503_v52  ;;  %13097 = vmatprep.mubr.f32.mxu1 %v18049_v20  ;;  %v10467_v52 = vld [vmem:[%s21371_s1 + $0x428] sm:$0xff] }
 0x129   : > { %14441 = vmatprep.mubr.f32.mxu0 %v18121_v44  ;;  %15740 = vmatprep.subr.bf16.mxu1 %v15739_v60  ;;  %v15751_v61 = vpack.c.bf16 %v10467_v52, %v10466_v59  ;;  %v10857_v59 = vld [vmem:[%s21371_s1 + $0x1058] sm:$0xff] }
 0x12a   : > { %13098 = vmatmul.mubr.f32.gmra.mrb[14].mxu1 %v18052_v21  ;;  %16508 = vmatprep.subr.bf16.mxu0 %v16507_v56 }
 0x12b   : > { %14442 = vmatmul.mubr.f32.gmra.mrb[14].mxu0 %v18124_v45  ;;  %15742 = vmatpush3.bf16.msra.mxu1 %v15739_v60  ;;  %v10469_v60 = vld [vmem:[%s21371_s1 + $0x438] sm:$0xff] }
 0x12c   : > { %16510 = vmatpush3.bf16.msra.mxu0 %v16507_v56  ;;  %13132 = vmatprep.mubr.f32.mxu1 %v18005_v7  ;;  %v10850_v7 = vld [vmem:[%s21371_s1 + $0x1020] sm:$0xff]  ;;  %v10852_v56 = vld [vmem:[%s21371_s1 + $0x1030] sm:$0xff]  ;;  %v15755_v58 = vpack.c.bf16 %v10469_v60, %v10468_v62  ;;  %v10859_v62 = vld [vmem:[%s21371_s1 + $0x1068] sm:$0xff] }
 0x12d   : > { %14476 = vmatprep.mubr.f32.mxu0 %v18082_v31  ;;  %15744 = vmatprep.subr.bf16.mxu1 %v15743_v0  ;;  %v16519_v5 = vpack.c.bf16 %v10851_v57, %v10850_v7  ;;  %v16523_v55 = vpack.c.bf16 %v10853_v51, %v10852_v56  ;;  %v10474_v57 = vld [vmem:[%s21371_s1 + $0x460] sm:$0xff]  ;;  %v10476_v51 = vld [vmem:[%s21371_s1 + $0x470] sm:$0xff] }
 0x12e   : > { %13133 = vmatmul.mubr.f32.vlgmr.msra.gmra.mrb[0].mxu1 %v18008_v8  ;;  %16512 = vmatprep.subr.bf16.mxu0 %v16511_v1 }
 0x12f   : > { %14477 = vmatmul.mubr.f32.vlgmr.msra.gmra.mrb[0].mxu0 %v18085_v32  ;;  %15746 = vmatpush3.bf16.msra.mxu1 %v15743_v0  ;;  %v10471_v0 = vld [vmem:[%s21371_s1 + $0x448] sm:$0xff] }
 0x130   : > { %16514 = vmatpush3.bf16.msra.mxu0 %v16511_v1  ;;  %13135 = vmatprep.mubr.f32.mxu1 %v18016_v9  ;;  %v10854_v1 = vld [vmem:[%s21371_s1 + $0x1040] sm:$0xff]  ;;  %v15759_v63 = vpack.c.bf16 %v10471_v0, %v10470_v4  ;;  %v10861_v4 = vld [vmem:[%s21371_s1 + $0x1078] sm:$0xff] }
 0x131   : > { %14479 = vmatprep.mubr.f32.mxu0 %v18088_v33  ;;  %15748 = vmatprep.subr.bf16.mxu1 %v15747_v54  ;;  %v16527_v3 = vpack.c.bf16 %v10855_v6, %v10854_v1  ;;  %v10478_v6 = vld [vmem:[%s21371_s1 + $0x480] sm:$0xff] }
 0x132   : > { %13136 = vmatmul.mubr.f32.gmra.mrb[2].mxu1 %v18019_v10  ;;  %16516 = vmatprep.subr.bf16.mxu0 %v16515_v53 }
 0x133   : > { %14480 = vmatmul.mubr.f32.gmra.mrb[2].mxu0 %v18091_v34  ;;  %15750 = vmatpush3.bf16.msra.mxu1 %v15747_v54  ;;  %v10473_v54 = vld [vmem:[%s21371_s1 + $0x458] sm:$0xff] }
 0x134   : > { %16518 = vmatpush3.bf16.msra.mxu0 %v16515_v53  ;;  %13138 = vmatprep.mubr.f32.mxu1 %v18022_v11  ;;  %v10856_v53 = vld [vmem:[%s21371_s1 + $0x1050] sm:$0xff]  ;;  %v15763_v52 = vpack.c.bf16 %v10473_v54, %v10472_v2  ;;  %v10863_v2 = vld [vmem:[%s21371_s1 + $0x1088] sm:$0xff] }
 0x135   : > { %14482 = vmatprep.mubr.f32.mxu0 %v18094_v35  ;;  %15752 = vmatprep.subr.bf16.mxu1 %v15751_v61  ;;  %v16531_v7 = vpack.c.bf16 %v10857_v59, %v10856_v53  ;;  %v10480_v59 = vld [vmem:[%s21371_s1 + $0x490] sm:$0xff] }
 0x136   : > { %13139 = vmatmul.mubr.f32.gmra.mrb[4].mxu1 %v18025_v12  ;;  %16520 = vmatprep.subr.bf16.mxu0 %v16519_v5 }
 0x137   : > { %14483 = vmatmul.mubr.f32.gmra.mrb[4].mxu0 %v18097_v36  ;;  %15754 = vmatpush3.bf16.msra.mxu1 %v15751_v61  ;;  %v10475_v61 = vld [vmem:[%s21371_s1 + $0x468] sm:$0xff] }
 0x138   : > { %16522 = vmatpush3.bf16.msra.mxu0 %v16519_v5  ;;  %13141 = vmatprep.mubr.f32.mxu1 %v18028_v13  ;;  %v10858_v5 = vld [vmem:[%s21371_s1 + $0x1060] sm:$0xff]  ;;  %v15767_v60 = vpack.c.bf16 %v10475_v61, %v10474_v57  ;;  %v10865_v57 = vld [vmem:[%s21371_s1 + $0x1098] sm:$0xff] }
 0x139   : > { %14485 = vmatprep.mubr.f32.mxu0 %v18100_v37  ;;  %15756 = vmatprep.subr.bf16.mxu1 %v15755_v58  ;;  %v16535_v56 = vpack.c.bf16 %v10859_v62, %v10858_v5  ;;  %v10482_v62 = vld [vmem:[%s21371_s1 + $0x4a0] sm:$0xff] }
 0x13a   : > { %13142 = vmatmul.mubr.f32.gmra.mrb[6].mxu1 %v18031_v14  ;;  %16524 = vmatprep.subr.bf16.mxu0 %v16523_v55 }
 0x13b   : > { %14486 = vmatmul.mubr.f32.gmra.mrb[6].mxu0 %v18103_v38  ;;  %15758 = vmatpush3.bf16.msra.mxu1 %v15755_v58  ;;  %v10477_v58 = vld [vmem:[%s21371_s1 + $0x478] sm:$0xff] }
 0x13c   : > { %16526 = vmatpush3.bf16.msra.mxu0 %v16523_v55  ;;  %13144 = vmatprep.mubr.f32.mxu1 %v18034_v15  ;;  %v10860_v55 = vld [vmem:[%s21371_s1 + $0x1070] sm:$0xff]  ;;  %v15771_v0 = vpack.c.bf16 %v10477_v58, %v10476_v51 }
 0x13d   : > { %14488 = vmatprep.mubr.f32.mxu0 %v18106_v39  ;;  %15760 = vmatprep.subr.bf16.mxu1 %v15759_v63  ;;  %v16539_v1 = vpack.c.bf16 %v10861_v4, %v10860_v55  ;;  %v10484_v55 = vld [vmem:[%s21371_s1 + $0x4b0] sm:$0xff]  ;;  %v10485_v4 = vld [vmem:[%s21371_s1 + $0x4b8] sm:$0xff] }
 0x13e   : > { %13145 = vmatmul.mubr.f32.gmra.mrb[8].mxu1 %v18037_v16  ;;  %16528 = vmatprep.subr.bf16.mxu0 %v16527_v3 }
 0x13f   : > { %14489 = vmatmul.mubr.f32.gmra.mrb[8].mxu0 %v18109_v40  ;;  %15762 = vmatpush3.bf16.msra.mxu1 %v15759_v63  ;;  %v10479_v63 = vld [vmem:[%s21371_s1 + $0x488] sm:$0xff] }
 0x140   : > { %16530 = vmatpush3.bf16.msra.mxu0 %v16527_v3  ;;  %13147 = vmatprep.mubr.f32.mxu1 %v18040_v17  ;;  %v10862_v3 = vld [vmem:[%s21371_s1 + $0x1080] sm:$0xff]  ;;  %v15775_v54 = vpack.c.bf16 %v10479_v63, %v10478_v6  ;;  %v15787_v6 = vpack.c.bf16 %v10485_v4, %v10484_v55 }
 0x141   : > { %14491 = vmatprep.mubr.f32.mxu0 %v18112_v41  ;;  %15764 = vmatprep.subr.bf16.mxu1 %v15763_v52  ;;  %v16543_v53 = vpack.c.bf16 %v10863_v2, %v10862_v3  ;;  %v10486_v3 = vld [vmem:[%s21371_s1 + $0x4c0] sm:$0xff]  ;;  %v10487_v2 = vld [vmem:[%s21371_s1 + $0x4c8] sm:$0xff] }
 0x142   : > { %13148 = vmatmul.mubr.f32.gmra.mrb[10].mxu1 %v18043_v18  ;;  %16532 = vmatprep.subr.bf16.mxu0 %v16531_v7 }
 0x143   : > { %14492 = vmatmul.mubr.f32.gmra.mrb[10].mxu0 %v18115_v42  ;;  %15766 = vmatpush3.bf16.msra.mxu1 %v15763_v52  ;;  %v10481_v52 = vld [vmem:[%s21371_s1 + $0x498] sm:$0xff] }
 0x144   : > { %16534 = vmatpush3.bf16.msra.mxu0 %v16531_v7  ;;  %13150 = vmatprep.mubr.f32.mxu1 %v18046_v19  ;;  %v10864_v7 = vld [vmem:[%s21371_s1 + $0x1090] sm:$0xff]  ;;  %v15779_v61 = vpack.c.bf16 %v10481_v52, %v10480_v59  ;;  %v15791_v59 = vpack.c.bf16 %v10487_v2, %v10486_v3 }
 0x145   : > { %14494 = vmatprep.mubr.f32.mxu0 %v18118_v43  ;;  %15768 = vmatprep.subr.bf16.mxu1 %v15767_v60  ;;  %v16547_v5 = vpack.c.bf16 %v10865_v57, %v10864_v7  ;;  %v10488_v7 = vld [vmem:[%s21371_s1 + $0x4d0] sm:$0xff]  ;;  %v10489_v57 = vld [vmem:[%s21371_s1 + $0x4d8] sm:$0xff] }
 0x146   : > { %13151 = vmatmul.mubr.f32.gmra.mrb[12].mxu1 %v18049_v20  ;;  %16536 = vmatprep.subr.bf16.mxu0 %v16535_v56 }
 0x147   : > { %14495 = vmatmul.mubr.f32.gmra.mrb[12].mxu0 %v18121_v44  ;;  %15770 = vmatpush3.bf16.msra.mxu1 %v15767_v60  ;;  %v10483_v60 = vld [vmem:[%s21371_s1 + $0x4a8] sm:$0xff] }
 0x148   : > { %16538 = vmatpush3.bf16.msra.mxu0 %v16535_v56  ;;  %13153 = vmatprep.mubr.f32.mxu1 %v18052_v21  ;;  %v10867_v56 = vld [vmem:[%s21371_s1 + $0x10a8] sm:$0xff]  ;;  %v15783_v51 = vpack.c.bf16 %v10483_v60, %v10482_v62  ;;  %v15795_v62 = vpack.c.bf16 %v10489_v57, %v10488_v7 }
 0x149   : > { %14497 = vmatprep.mubr.f32.mxu0 %v18124_v45  ;;  %15772 = vmatprep.subr.bf16.mxu1 %v15771_v0 }
 0x14a   : > { %13154 = vmatmul.mubr.f32.gmra.mrb[14].mxu1 %v18055_v22  ;;  %16540 = vmatprep.subr.bf16.mxu0 %v16539_v1 }
 0x14b   : > { %14498 = vmatmul.mubr.f32.gmra.mrb[14].mxu0 %v18127_v46  ;;  %15774 = vmatpush3.bf16.msra.mxu1 %v15771_v0  ;;  %v10868_v0 = vld [vmem:[%s21371_s1 + $0x10b0] sm:$0xff] }
 0x14c   : > { %16542 = vmatpush3.bf16.msra.mxu0 %v16539_v1  ;;  %13188 = vmatprep.mubr.f32.mxu1 %v18008_v8  ;;  %v10866_v8 = vld [vmem:[%s21371_s1 + $0x10a0] sm:$0xff]  ;;  %v10869_v1 = vld [vmem:[%s21371_s1 + $0x10b8] sm:$0xff] }
 0x14d   : > { %14532 = vmatprep.mubr.f32.mxu0 %v18085_v32  ;;  %15776 = vmatprep.subr.bf16.mxu1 %v15775_v54  ;;  %v16551_v58 = vpack.c.bf16 %v10867_v56, %v10866_v8  ;;  %v16555_v63 = vpack.c.bf16 %v10869_v1, %v10868_v0  ;;  %v10490_v8 = vld [vmem:[%s21371_s1 + $0x4e0] sm:$0xff]  ;;  %v10491_v56 = vld [vmem:[%s21371_s1 + $0x4e8] sm:$0xff]  ;;  %v10492_v0 = vld [vmem:[%s21371_s1 + $0x4f0] sm:$0xff] }
 0x14e   : > { %13189 = vmatmul.mubr.f32.vlgmr.msra.gmra.mrb[0].mxu1 %v18016_v9  ;;  %16544 = vmatprep.subr.bf16.mxu0 %v16543_v53  ;;  %v15799_v55 = vpack.c.bf16 %v10491_v56, %v10490_v8  ;;  %v10493_v1 = vld [vmem:[%s21371_s1 + $0x4f8] sm:$0xff] }
 0x14f   : > { %14533 = vmatmul.mubr.f32.vlgmr.msra.gmra.mrb[0].mxu0 %v18088_v33  ;;  %15778 = vmatpush3.bf16.msra.mxu1 %v15775_v54  ;;  %v10870_v54 = vld [vmem:[%s21371_s1 + $0x10c0] sm:$0xff]  ;;  %v15803_v3 = vpack.c.bf16 %v10493_v1, %v10492_v0  ;;  %v10500_v1 = vld [vmem:[%s21371_s1 + $0x530] sm:$0xff] }
 0x150   : > { %16546 = vmatpush3.bf16.msra.mxu0 %v16543_v53  ;;  %13191 = vmatprep.mubr.f32.mxu1 %v18019_v10  ;;  %v10871_v53 = vld [vmem:[%s21371_s1 + $0x10c8] sm:$0xff] }
 0x151   : > { %14535 = vmatprep.mubr.f32.mxu0 %v18091_v34  ;;  %15780 = vmatprep.subr.bf16.mxu1 %v15779_v61  ;;  %v16559_v52 = vpack.c.bf16 %v10871_v53, %v10870_v54  ;;  %v10494_v54 = vld [vmem:[%s21371_s1 + $0x500] sm:$0xff]  ;;  %v10495_v53 = vld [vmem:[%s21371_s1 + $0x508] sm:$0xff] }
 0x152   : > { %13192 = vmatmul.mubr.f32.gmra.mrb[2].mxu1 %v18022_v11  ;;  %16548 = vmatprep.subr.bf16.mxu0 %v16547_v5  ;;  %v15807_v7 = vpack.c.bf16 %v10495_v53, %v10494_v54  ;;  %v10502_v53 = vld [vmem:[%s21371_s1 + $0x540] sm:$0xff] }
 0x153   : > { %14536 = vmatmul.mubr.f32.gmra.mrb[2].mxu0 %v18094_v35  ;;  %15782 = vmatpush3.bf16.msra.mxu1 %v15779_v61  ;;  %v10872_v61 = vld [vmem:[%s21371_s1 + $0x10d0] sm:$0xff] }
 0x154   : > { %16550 = vmatpush3.bf16.msra.mxu0 %v16547_v5  ;;  %13194 = vmatprep.mubr.f32.mxu1 %v18025_v12  ;;  %v10873_v5 = vld [vmem:[%s21371_s1 + $0x10d8] sm:$0xff] }
 0x155   : > { %14538 = vmatprep.mubr.f32.mxu0 %v18097_v36  ;;  %15784 = vmatprep.subr.bf16.mxu1 %v15783_v51  ;;  %v16563_v60 = vpack.c.bf16 %v10873_v5, %v10872_v61  ;;  %v10496_v61 = vld [vmem:[%s21371_s1 + $0x510] sm:$0xff]  ;;  %v10497_v5 = vld [vmem:[%s21371_s1 + $0x518] sm:$0xff] }
 0x156   : > { %13195 = vmatmul.mubr.f32.gmra.mrb[4].mxu1 %v18028_v13  ;;  %16552 = vmatprep.subr.bf16.mxu0 %v16551_v58  ;;  %v15811_v8 = vpack.c.bf16 %v10497_v5, %v10496_v61  ;;  %v10504_v5 = vld [vmem:[%s21371_s1 + $0x550] sm:$0xff] }
 0x157   : > { %14539 = vmatmul.mubr.f32.gmra.mrb[4].mxu0 %v18100_v37  ;;  %15786 = vmatpush3.bf16.msra.mxu1 %v15783_v51  ;;  %v10874_v51 = vld [vmem:[%s21371_s1 + $0x10e0] sm:$0xff] }
 0x158   : > { %16554 = vmatpush3.bf16.msra.mxu0 %v16551_v58  ;;  %13197 = vmatprep.mubr.f32.mxu1 %v18031_v14  ;;  %v10875_v58 = vld [vmem:[%s21371_s1 + $0x10e8] sm:$0xff] }
 0x159   : > { %14541 = vmatprep.mubr.f32.mxu0 %v18103_v38  ;;  %15788 = vmatprep.subr.bf16.mxu1 %v15787_v6  ;;  %v16567_v4 = vpack.c.bf16 %v10875_v58, %v10874_v51  ;;  %v10498_v51 = vld [vmem:[%s21371_s1 + $0x520] sm:$0xff]  ;;  %v10499_v58 = vld [vmem:[%s21371_s1 + $0x528] sm:$0xff] }
 0x15a   : > { %13198 = vmatmul.mubr.f32.gmra.mrb[6].mxu1 %v18034_v15  ;;  %16556 = vmatprep.subr.bf16.mxu0 %v16555_v63 }
 0x15b   : > { %14542 = vmatmul.mubr.f32.gmra.mrb[6].mxu0 %v18106_v39  ;;  %15790 = vmatpush3.bf16.msra.mxu1 %v15787_v6  ;;  %v10876_v6 = vld [vmem:[%s21371_s1 + $0x10f0] sm:$0xff] }
 0x15c   : > { %16558 = vmatpush3.bf16.msra.mxu0 %v16555_v63  ;;  %13200 = vmatprep.mubr.f32.mxu1 %v18037_v16  ;;  %v10877_v63 = vld [vmem:[%s21371_s1 + $0x10f8] sm:$0xff] }
 0x15d   : > { %14544 = vmatprep.mubr.f32.mxu0 %v18109_v40  ;;  %15792 = vmatprep.subr.bf16.mxu1 %v15791_v59  ;;  %v16571_v2 = vpack.c.bf16 %v10877_v63, %v10876_v6  ;;  %v10501_v6 = vld [vmem:[%s21371_s1 + $0x538] sm:$0xff]  ;;  %v10884_v63 = vld [vmem:[%s21371_s1 + $0x1130] sm:$0xff] }
 0x15e   : > { %13201 = vmatmul.mubr.f32.gmra.mrb[8].mxu1 %v18040_v17  ;;  %16560 = vmatprep.subr.bf16.mxu0 %v16559_v52 }
 0x15f   : > { %14545 = vmatmul.mubr.f32.gmra.mrb[8].mxu0 %v18112_v41  ;;  %15794 = vmatpush3.bf16.msra.mxu1 %v15791_v59  ;;  %v10878_v59 = vld [vmem:[%s21371_s1 + $0x1100] sm:$0xff] }
 0x160   : > { %16562 = vmatpush3.bf16.msra.mxu0 %v16559_v52  ;;  %13203 = vmatprep.mubr.f32.mxu1 %v18043_v18  ;;  %v10879_v52 = vld [vmem:[%s21371_s1 + $0x1108] sm:$0xff] }
 0x161   : > { %14547 = vmatprep.mubr.f32.mxu0 %v18115_v42  ;;  %15796 = vmatprep.subr.bf16.mxu1 %v15795_v62  ;;  %v16575_v57 = vpack.c.bf16 %v10879_v52, %v10878_v59  ;;  %v10503_v59 = vld [vmem:[%s21371_s1 + $0x548] sm:$0xff]  ;;  %v10886_v52 = vld [vmem:[%s21371_s1 + $0x1140] sm:$0xff] }
 0x162   : > { %13204 = vmatmul.mubr.f32.gmra.mrb[10].mxu1 %v18046_v19  ;;  %16564 = vmatprep.subr.bf16.mxu0 %v16563_v60 }
 0x163   : > { %14548 = vmatmul.mubr.f32.gmra.mrb[10].mxu0 %v18118_v43  ;;  %15798 = vmatpush3.bf16.msra.mxu1 %v15795_v62  ;;  %v10880_v62 = vld [vmem:[%s21371_s1 + $0x1110] sm:$0xff] }
 0x164   : > { %16566 = vmatpush3.bf16.msra.mxu0 %v16563_v60  ;;  %13206 = vmatprep.mubr.f32.mxu1 %v18049_v20  ;;  %v10881_v60 = vld [vmem:[%s21371_s1 + $0x1118] sm:$0xff] }
 0x165   : > { %14550 = vmatprep.mubr.f32.mxu0 %v18121_v44  ;;  %15800 = vmatprep.subr.bf16.mxu1 %v15799_v55  ;;  %v16579_v56 = vpack.c.bf16 %v10881_v60, %v10880_v62  ;;  %v10505_v62 = vld [vmem:[%s21371_s1 + $0x558] sm:$0xff]  ;;  %v10888_v60 = vld [vmem:[%s21371_s1 + $0x1150] sm:$0xff] }
 0x166   : > { %13207 = vmatmul.mubr.f32.gmra.mrb[12].mxu1 %v18052_v21  ;;  %16568 = vmatprep.subr.bf16.mxu0 %v16567_v4 }
 0x167   : > { %14551 = vmatmul.mubr.f32.gmra.mrb[12].mxu0 %v18124_v45  ;;  %15802 = vmatpush3.bf16.msra.mxu1 %v15799_v55  ;;  %v10883_v55 = vld [vmem:[%s21371_s1 + $0x1128] sm:$0xff] }
 0x168   : > { %16570 = vmatpush3.bf16.msra.mxu0 %v16567_v4  ;;  %13209 = vmatprep.mubr.f32.mxu1 %v18055_v22  ;;  %v15815_v4 = vpack.c.bf16 %v10499_v58, %v10498_v51  ;;  %v10506_v58 = vld [vmem:[%s21371_s1 + $0x560] sm:$0xff] }
 0x169   : > { %14553 = vmatprep.mubr.f32.mxu0 %v18127_v46  ;;  %15804 = vmatprep.subr.bf16.mxu1 %v15803_v3 }
 0x16a   : > { %13210 = vmatmul.mubr.f32.gmra.mrb[14].mxu1 %v18058_v23  ;;  %16572 = vmatprep.subr.bf16.mxu0 %v16571_v2 }
 0x16b   : > { %14554 = vmatmul.mubr.f32.gmra.mrb[14].mxu0 %v18130_v47  ;;  %15806 = vmatpush3.bf16.msra.mxu1 %v15803_v3  ;;  %v10885_v3 = vld [vmem:[%s21371_s1 + $0x1138] sm:$0xff] }
 0x16c   : > { %16574 = vmatpush3.bf16.msra.mxu0 %v16571_v2  ;;  %13244 = vmatprep.mubr.f32.mxu1 %v18016_v9  ;;  %v10882_v9 = vld [vmem:[%s21371_s1 + $0x1120] sm:$0xff]  ;;  %v15819_v2 = vpack.c.bf16 %v10501_v6, %v10500_v1  ;;  %v16587_v54 = vpack.c.bf16 %v10885_v3, %v10884_v63  ;;  %v10508_v6 = vld [vmem:[%s21371_s1 + $0x570] sm:$0xff]  ;;  %v10509_v63 = vld [vmem:[%s21371_s1 + $0x578] sm:$0xff] }
 0x16d   : > { %14588 = vmatprep.mubr.f32.mxu0 %v18088_v33  ;;  %15808 = vmatprep.subr.bf16.mxu1 %v15807_v7  ;;  %v16583_v0 = vpack.c.bf16 %v10883_v55, %v10882_v9  ;;  %v10507_v9 = vld [vmem:[%s21371_s1 + $0x568] sm:$0xff]  ;;  %v10890_v55 = vld [vmem:[%s21371_s1 + $0x1160] sm:$0xff]  ;;  %v10892_v3 = vld [vmem:[%s21371_s1 + $0x1170] sm:$0xff] }
 0x16e   : > { %13245 = vmatmul.mubr.f32.vlgmr.msra.gmra.mrb[0].mxu1 %v18019_v10  ;;  %16576 = vmatprep.subr.bf16.mxu0 %v16575_v57 }
 0x16f   : > { %14589 = vmatmul.mubr.f32.vlgmr.msra.gmra.mrb[0].mxu0 %v18091_v34  ;;  %15810 = vmatpush3.bf16.msra.mxu1 %v15807_v7  ;;  %v10887_v7 = vld [vmem:[%s21371_s1 + $0x1148] sm:$0xff] }
 0x170   : > { %16578 = vmatpush3.bf16.msra.mxu0 %v16575_v57  ;;  %13247 = vmatprep.mubr.f32.mxu1 %v18022_v11  ;;  %v15823_v57 = vpack.c.bf16 %v10503_v59, %v10502_v53  ;;  %v16591_v61 = vpack.c.bf16 %v10887_v7, %v10886_v52  ;;  %v10510_v59 = vld [vmem:[%s21371_s1 + $0x580] sm:$0xff]  ;;  %v10511_v52 = vld [vmem:[%s21371_s1 + $0x588] sm:$0xff] }
 0x171   : > { %14591 = vmatprep.mubr.f32.mxu0 %v18094_v35  ;;  %15812 = vmatprep.subr.bf16.mxu1 %v15811_v8  ;;  %v10894_v7 = vld [vmem:[%s21371_s1 + $0x1180] sm:$0xff] }
 0x172   : > { %13248 = vmatmul.mubr.f32.gmra.mrb[2].mxu1 %v18025_v12  ;;  %16580 = vmatprep.subr.bf16.mxu0 %v16579_v56 }
 0x173   : > { %14592 = vmatmul.mubr.f32.gmra.mrb[2].mxu0 %v18097_v36  ;;  %15814 = vmatpush3.bf16.msra.mxu1 %v15811_v8  ;;  %v10889_v8 = vld [vmem:[%s21371_s1 + $0x1158] sm:$0xff] }
 0x174   : > { %16582 = vmatpush3.bf16.msra.mxu0 %v16579_v56  ;;  %13250 = vmatprep.mubr.f32.mxu1 %v18028_v13  ;;  %v15827_v56 = vpack.c.bf16 %v10505_v62, %v10504_v5  ;;  %v16595_v51 = vpack.c.bf16 %v10889_v8, %v10888_v60  ;;  %v10512_v62 = vld [vmem:[%s21371_s1 + $0x590] sm:$0xff]  ;;  %v10513_v60 = vld [vmem:[%s21371_s1 + $0x598] sm:$0xff] }
 0x175   : > { %14594 = vmatprep.mubr.f32.mxu0 %v18100_v37  ;;  %15816 = vmatprep.subr.bf16.mxu1 %v15815_v4  ;;  %v10896_v8 = vld [vmem:[%s21371_s1 + $0x1190] sm:$0xff] }
 0x176   : > { %13251 = vmatmul.mubr.f32.gmra.mrb[4].mxu1 %v18031_v14  ;;  %16584 = vmatprep.subr.bf16.mxu0 %v16583_v0 }
 0x177   : > { %14595 = vmatmul.mubr.f32.gmra.mrb[4].mxu0 %v18103_v38  ;;  %15818 = vmatpush3.bf16.msra.mxu1 %v15815_v4  ;;  %v10891_v4 = vld [vmem:[%s21371_s1 + $0x1168] sm:$0xff] }
 0x178   : > { %16586 = vmatpush3.bf16.msra.mxu0 %v16583_v0  ;;  %13253 = vmatprep.mubr.f32.mxu1 %v18034_v15  ;;  %v15831_v0 = vpack.c.bf16 %v10507_v9, %v10506_v58  ;;  %v16599_v1 = vpack.c.bf16 %v10891_v4, %v10890_v55  ;;  %v10514_v9 = vld [vmem:[%s21371_s1 + $0x5a0] sm:$0xff]  ;;  %v10515_v55 = vld [vmem:[%s21371_s1 + $0x5a8] sm:$0xff] }
 0x179   : > { %14597 = vmatprep.mubr.f32.mxu0 %v18106_v39  ;;  %15820 = vmatprep.subr.bf16.mxu1 %v15819_v2  ;;  %v10899_v4 = vld [vmem:[%s21371_s1 + $0x11a8] sm:$0xff] }
 0x17a   : > { %13254 = vmatmul.mubr.f32.gmra.mrb[6].mxu1 %v18037_v16  ;;  %16588 = vmatprep.subr.bf16.mxu0 %v16587_v54 }
 0x17b   : > { %14598 = vmatmul.mubr.f32.gmra.mrb[6].mxu0 %v18109_v40  ;;  %15822 = vmatpush3.bf16.msra.mxu1 %v15819_v2  ;;  %v10893_v2 = vld [vmem:[%s21371_s1 + $0x1178] sm:$0xff] }
 0x17c   : > { %16590 = vmatpush3.bf16.msra.mxu0 %v16587_v54  ;;  %13256 = vmatprep.mubr.f32.mxu1 %v18040_v17  ;;  %v15835_v54 = vpack.c.bf16 %v10509_v63, %v10508_v6  ;;  %v16603_v53 = vpack.c.bf16 %v10893_v2, %v10892_v3  ;;  %v10516_v6 = vld [vmem:[%s21371_s1 + $0x5b0] sm:$0xff]  ;;  %v10517_v63 = vld [vmem:[%s21371_s1 + $0x5b8] sm:$0xff] }
 0x17d   : > { %14600 = vmatprep.mubr.f32.mxu0 %v18112_v41  ;;  %15824 = vmatprep.subr.bf16.mxu1 %v15823_v57  ;;  %v10900_v3 = vld [vmem:[%s21371_s1 + $0x11b0] sm:$0xff]  ;;  %v10901_v2 = vld [vmem:[%s21371_s1 + $0x11b8] sm:$0xff] }
 0x17e   : > { %13257 = vmatmul.mubr.f32.gmra.mrb[8].mxu1 %v18043_v18  ;;  %16592 = vmatprep.subr.bf16.mxu0 %v16591_v61 }
 0x17f   : > { %14601 = vmatmul.mubr.f32.gmra.mrb[8].mxu0 %v18115_v42  ;;  %15826 = vmatpush3.bf16.msra.mxu1 %v15823_v57  ;;  %v10895_v57 = vld [vmem:[%s21371_s1 + $0x1188] sm:$0xff] }
 0x180   : > { %16594 = vmatpush3.bf16.msra.mxu0 %v16591_v61  ;;  %13259 = vmatprep.mubr.f32.mxu1 %v18046_v19  ;;  %v15839_v61 = vpack.c.bf16 %v10511_v52, %v10510_v59  ;;  %v16607_v5 = vpack.c.bf16 %v10895_v57, %v10894_v7  ;;  %v10518_v59 = vld [vmem:[%s21371_s1 + $0x5c0] sm:$0xff]  ;;  %v10519_v52 = vld [vmem:[%s21371_s1 + $0x5c8] sm:$0xff] }
 0x181   : > { %14603 = vmatprep.mubr.f32.mxu0 %v18118_v43  ;;  %15828 = vmatprep.subr.bf16.mxu1 %v15827_v56  ;;  %v10902_v7 = vld [vmem:[%s21371_s1 + $0x11c0] sm:$0xff]  ;;  %v10903_v57 = vld [vmem:[%s21371_s1 + $0x11c8] sm:$0xff] }
 0x182   : > { %13260 = vmatmul.mubr.f32.gmra.mrb[10].mxu1 %v18049_v20  ;;  %16596 = vmatprep.subr.bf16.mxu0 %v16595_v51 }
 0x183   : > { %14604 = vmatmul.mubr.f32.gmra.mrb[10].mxu0 %v18121_v44  ;;  %15830 = vmatpush3.bf16.msra.mxu1 %v15827_v56  ;;  %v10897_v56 = vld [vmem:[%s21371_s1 + $0x1198] sm:$0xff] }
 0x184   : > { %16598 = vmatpush3.bf16.msra.mxu0 %v16595_v51  ;;  %13262 = vmatprep.mubr.f32.mxu1 %v18052_v21  ;;  %v15843_v51 = vpack.c.bf16 %v10513_v60, %v10512_v62  ;;  %v16611_v58 = vpack.c.bf16 %v10897_v56, %v10896_v8  ;;  %v10520_v62 = vld [vmem:[%s21371_s1 + $0x5d0] sm:$0xff]  ;;  %v10521_v60 = vld [vmem:[%s21371_s1 + $0x5d8] sm:$0xff] }
 0x185   : > { %14606 = vmatprep.mubr.f32.mxu0 %v18124_v45  ;;  %15832 = vmatprep.subr.bf16.mxu1 %v15831_v0  ;;  %v10904_v8 = vld [vmem:[%s21371_s1 + $0x11d0] sm:$0xff]  ;;  %v10905_v56 = vld [vmem:[%s21371_s1 + $0x11d8] sm:$0xff] }
 0x186   : > { %13263 = vmatmul.mubr.f32.gmra.mrb[12].mxu1 %v18055_v22  ;;  %16600 = vmatprep.subr.bf16.mxu0 %v16599_v1 }
 0x187   : > { %14607 = vmatmul.mubr.f32.gmra.mrb[12].mxu0 %v18127_v46  ;;  %15834 = vmatpush3.bf16.msra.mxu1 %v15831_v0  ;;  %v15847_v0 = vpack.c.bf16 %v10515_v55, %v10514_v9  ;;  %v10522_v9 = vld [vmem:[%s21371_s1 + $0x5e0] sm:$0xff]  ;;  %v10523_v55 = vld [vmem:[%s21371_s1 + $0x5e8] sm:$0xff] }
 0x188   : > { %16602 = vmatpush3.bf16.msra.mxu0 %v16599_v1  ;;  %13265 = vmatprep.mubr.f32.mxu1 %v18058_v23 }
 0x189   : > { %14609 = vmatprep.mubr.f32.mxu0 %v18130_v47  ;;  %15836 = vmatprep.subr.bf16.mxu1 %v15835_v54 }
 0x18a   : > { %13266 = vmatmul.mubr.f32.gmra.mrb[14].mxu1 %v18061_v24  ;;  %16604 = vmatprep.subr.bf16.mxu0 %v16603_v53 }
 0x18b   : > { %14610 = vmatmul.mubr.f32.gmra.mrb[14].mxu0 %v18133_v48  ;;  %15838 = vmatpush3.bf16.msra.mxu1 %v15835_v54  ;;  %v15851_v54 = vpack.c.bf16 %v10517_v63, %v10516_v6  ;;  %v10524_v6 = vld [vmem:[%s21371_s1 + $0x5f0] sm:$0xff]  ;;  %v10525_v63 = vld [vmem:[%s21371_s1 + $0x5f8] sm:$0xff] }
 0x18c   : > { %16606 = vmatpush3.bf16.msra.mxu0 %v16603_v53  ;;  %13300 = vmatprep.mubr.f32.mxu1 %v18019_v10  ;;  %v10898_v10 = vld [vmem:[%s21371_s1 + $0x11a0] sm:$0xff]  ;;  %v16619_v53 = vpack.c.bf16 %v10901_v2, %v10900_v3  ;;  %v10908_v3 = vld [vmem:[%s21371_s1 + $0x11f0] sm:$0xff]  ;;  %v10909_v2 = vld [vmem:[%s21371_s1 + $0x11f8] sm:$0xff] }
 0x18d   : > { %14644 = vmatprep.mubr.f32.mxu0 %v18091_v34  ;;  %15840 = vmatprep.subr.bf16.mxu1 %v15839_v61  ;;  %v16615_v1 = vpack.c.bf16 %v10899_v4, %v10898_v10  ;;  %v10906_v10 = vld [vmem:[%s21371_s1 + $0x11e0] sm:$0xff]  ;;  %v10907_v4 = vld [vmem:[%s21371_s1 + $0x11e8] sm:$0xff] }
 0x18e   : > { %13301 = vmatmul.mubr.f32.vlgmr.msra.gmra.mrb[0].mxu1 %v18022_v11  ;;  %16608 = vmatprep.subr.bf16.mxu0 %v16607_v5 }
 0x18f   : > { %14645 = vmatmul.mubr.f32.vlgmr.msra.gmra.mrb[0].mxu0 %v18094_v35  ;;  %15842 = vmatpush3.bf16.msra.mxu1 %v15839_v61  ;;  %v15855_v61 = vpack.c.bf16 %v10519_v52, %v10518_v59  ;;  %v10526_v59 = vld [vmem:[%s21371_s1 + $0x600] sm:$0xff]  ;;  %v10527_v52 = vld [vmem:[%s21371_s1 + $0x608] sm:$0xff] }
 0x190   : > { %16610 = vmatpush3.bf16.msra.mxu0 %v16607_v5  ;;  %13303 = vmatprep.mubr.f32.mxu1 %v18025_v12  ;;  %v16623_v5 = vpack.c.bf16 %v10903_v57, %v10902_v7  ;;  %v10910_v7 = vld [vmem:[%s21371_s1 + $0x1200] sm:$0xff]  ;;  %v10911_v57 = vld [vmem:[%s21371_s1 + $0x1208] sm:$0xff] }
 0x191   : > { %14647 = vmatprep.mubr.f32.mxu0 %v18097_v36  ;;  %15844 = vmatprep.subr.bf16.mxu1 %v15843_v51 }
 0x192   : > { %13304 = vmatmul.mubr.f32.gmra.mrb[2].mxu1 %v18028_v13  ;;  %16612 = vmatprep.subr.bf16.mxu0 %v16611_v58 }
 0x193   : > { %14648 = vmatmul.mubr.f32.gmra.mrb[2].mxu0 %v18100_v37  ;;  %15846 = vmatpush3.bf16.msra.mxu1 %v15843_v51  ;;  %v15859_v51 = vpack.c.bf16 %v10521_v60, %v10520_v62  ;;  %v10528_v62 = vld [vmem:[%s21371_s1 + $0x610] sm:$0xff]  ;;  %v10529_v60 = vld [vmem:[%s21371_s1 + $0x618] sm:$0xff] }
 0x194   : > { %16614 = vmatpush3.bf16.msra.mxu0 %v16611_v58  ;;  %13306 = vmatprep.mubr.f32.mxu1 %v18031_v14  ;;  %v16627_v58 = vpack.c.bf16 %v10905_v56, %v10904_v8  ;;  %v10912_v8 = vld [vmem:[%s21371_s1 + $0x1210] sm:$0xff]  ;;  %v10913_v56 = vld [vmem:[%s21371_s1 + $0x1218] sm:$0xff] }
 0x195   : > { %14650 = vmatprep.mubr.f32.mxu0 %v18103_v38  ;;  %15848 = vmatprep.subr.bf16.mxu1 %v15847_v0 }
 0x196   : > { %13307 = vmatmul.mubr.f32.gmra.mrb[4].mxu1 %v18034_v15  ;;  %16616 = vmatprep.subr.bf16.mxu0 %v16615_v1 }
 0x197   : > { %14651 = vmatmul.mubr.f32.gmra.mrb[4].mxu0 %v18106_v39  ;;  %15850 = vmatpush3.bf16.msra.mxu1 %v15847_v0  ;;  %v15863_v0 = vpack.c.bf16 %v10523_v55, %v10522_v9  ;;  %v10530_v9 = vld [vmem:[%s21371_s1 + $0x620] sm:$0xff]  ;;  %v10531_v55 = vld [vmem:[%s21371_s1 + $0x628] sm:$0xff] }
 0x198   : > { %16618 = vmatpush3.bf16.msra.mxu0 %v16615_v1  ;;  %13309 = vmatprep.mubr.f32.mxu1 %v18037_v16  ;;  %v16631_v1 = vpack.c.bf16 %v10907_v4, %v10906_v10  ;;  %v10915_v10 = vld [vmem:[%s21371_s1 + $0x1228] sm:$0xff]  ;;  %v15879_v4 = vpack.c.bf16 %v10531_v55, %v10530_v9  ;;  %v10922_v55 = vld [vmem:[%s21371_s1 + $0x1260] sm:$0xff] }
 0x199   : > { %14653 = vmatprep.mubr.f32.mxu0 %v18109_v40  ;;  %15852 = vmatprep.subr.bf16.mxu1 %v15851_v54  ;;  %v10539_v9 = vld [vmem:[%s21371_s1 + $0x668] sm:$0xff] }
 0x19a   : > { %13310 = vmatmul.mubr.f32.gmra.mrb[6].mxu1 %v18040_v17  ;;  %16620 = vmatprep.subr.bf16.mxu0 %v16619_v53 }
 0x19b   : > { %14654 = vmatmul.mubr.f32.gmra.mrb[6].mxu0 %v18112_v41  ;;  %15854 = vmatpush3.bf16.msra.mxu1 %v15851_v54  ;;  %v15867_v54 = vpack.c.bf16 %v10525_v63, %v10524_v6  ;;  %v10533_v6 = vld [vmem:[%s21371_s1 + $0x638] sm:$0xff]  ;;  %v10916_v63 = vld [vmem:[%s21371_s1 + $0x1230] sm:$0xff] }
 0x19c   : > { %16622 = vmatpush3.bf16.msra.mxu0 %v16619_v53  ;;  %13312 = vmatprep.mubr.f32.mxu1 %v18043_v18  ;;  %v16635_v53 = vpack.c.bf16 %v10909_v2, %v10908_v3  ;;  %v10917_v3 = vld [vmem:[%s21371_s1 + $0x1238] sm:$0xff] }
 0x19d   : > { %14656 = vmatprep.mubr.f32.mxu0 %v18115_v42  ;;  %15856 = vmatprep.subr.bf16.mxu1 %v15855_v61 }
 0x19e   : > { %13313 = vmatmul.mubr.f32.gmra.mrb[8].mxu1 %v18046_v19  ;;  %16624 = vmatprep.subr.bf16.mxu0 %v16623_v5 }
 0x19f   : > { %14657 = vmatmul.mubr.f32.gmra.mrb[8].mxu0 %v18118_v43  ;;  %15858 = vmatpush3.bf16.msra.mxu1 %v15855_v61  ;;  %v15871_v61 = vpack.c.bf16 %v10527_v52, %v10526_v59  ;;  %v10535_v59 = vld [vmem:[%s21371_s1 + $0x648] sm:$0xff]  ;;  %v10918_v52 = vld [vmem:[%s21371_s1 + $0x1240] sm:$0xff] }
 0x1a0   : > { %16626 = vmatpush3.bf16.msra.mxu0 %v16623_v5  ;;  %13315 = vmatprep.mubr.f32.mxu1 %v18049_v20  ;;  %v16639_v5 = vpack.c.bf16 %v10911_v57, %v10910_v7  ;;  %v10919_v7 = vld [vmem:[%s21371_s1 + $0x1248] sm:$0xff] }
 0x1a1   : > { %14659 = vmatprep.mubr.f32.mxu0 %v18121_v44  ;;  %15860 = vmatprep.subr.bf16.mxu1 %v15859_v51 }
 0x1a2   : > { %13316 = vmatmul.mubr.f32.gmra.mrb[10].mxu1 %v18052_v21  ;;  %16628 = vmatprep.subr.bf16.mxu0 %v16627_v58 }
 0x1a3   : > { %14660 = vmatmul.mubr.f32.gmra.mrb[10].mxu0 %v18124_v45  ;;  %15862 = vmatpush3.bf16.msra.mxu1 %v15859_v51  ;;  %v15875_v51 = vpack.c.bf16 %v10529_v60, %v10528_v62  ;;  %v10537_v62 = vld [vmem:[%s21371_s1 + $0x658] sm:$0xff]  ;;  %v10920_v60 = vld [vmem:[%s21371_s1 + $0x1250] sm:$0xff] }
 0x1a4   : > { %16630 = vmatpush3.bf16.msra.mxu0 %v16627_v58  ;;  %13318 = vmatprep.mubr.f32.mxu1 %v18055_v22  ;;  %v16643_v58 = vpack.c.bf16 %v10913_v56, %v10912_v8  ;;  %v10921_v8 = vld [vmem:[%s21371_s1 + $0x1258] sm:$0xff] }
 0x1a5   : > { %14662 = vmatprep.mubr.f32.mxu0 %v18127_v46  ;;  %15864 = vmatprep.subr.bf16.mxu1 %v15863_v0 }
 0x1a6   : > { %13319 = vmatmul.mubr.f32.gmra.mrb[12].mxu1 %v18058_v23  ;;  %16632 = vmatprep.subr.bf16.mxu0 %v16631_v1 }
 0x1a7   : > { %14663 = vmatmul.mubr.f32.gmra.mrb[12].mxu0 %v18130_v47  ;;  %15866 = vmatpush3.bf16.msra.mxu1 %v15863_v0 }
 0x1a8   : > { %16634 = vmatpush3.bf16.msra.mxu0 %v16631_v1  ;;  %13321 = vmatprep.mubr.f32.mxu1 %v18061_v24  ;;  %v10532_v1 = vld [vmem:[%s21371_s1 + $0x630] sm:$0xff] }
 0x1a9   : > { %14665 = vmatprep.mubr.f32.mxu0 %v18133_v48  ;;  %15868 = vmatprep.subr.bf16.mxu1 %v15867_v54  ;;  %v15883_v2 = vpack.c.bf16 %v10533_v6, %v10532_v1  ;;  %v10541_v1 = vld [vmem:[%s21371_s1 + $0x678] sm:$0xff]  ;;  %v10924_v6 = vld [vmem:[%s21371_s1 + $0x1270] sm:$0xff] }
 0x1aa   : > { %13322 = vmatmul.mubr.f32.gmra.mrb[14].mxu1 %v18064_v25  ;;  %16636 = vmatprep.subr.bf16.mxu0 %v16635_v53 }
 0x1ab   : > { %14666 = vmatmul.mubr.f32.gmra.mrb[14].mxu0 %v18136_v49  ;;  %15870 = vmatpush3.bf16.msra.mxu1 %v15867_v54  ;;  %v16651_v54 = vpack.c.bf16 %v10917_v3, %v10916_v63  ;;  %v10925_v63 = vld [vmem:[%s21371_s1 + $0x1278] sm:$0xff] }
 0x1ac   : > { %16638 = vmatpush3.bf16.msra.mxu0 %v16635_v53  ;;  %13356 = vmatprep.mubr.f32.mxu1 %v18022_v11  ;;  %v10914_v11 = vld [vmem:[%s21371_s1 + $0x1220] sm:$0xff] }
 0x1ad   : > { %14700 = vmatprep.mubr.f32.mxu0 %v18094_v35  ;;  %15872 = vmatprep.subr.bf16.mxu1 %v15871_v61  ;;  %v16647_v0 = vpack.c.bf16 %v10915_v10, %v10914_v11  ;;  %v10534_v53 = vld [vmem:[%s21371_s1 + $0x640] sm:$0xff]  ;;  %v10923_v11 = vld [vmem:[%s21371_s1 + $0x1268] sm:$0xff] }
 0x1ae   : > { %13357 = vmatmul.mubr.f32.vlgmr.msra.gmra.mrb[0].mxu1 %v18025_v12  ;;  %16640 = vmatprep.subr.bf16.mxu0 %v16639_v5  ;;  %v15887_v57 = vpack.c.bf16 %v10535_v59, %v10534_v53  ;;  %v10543_v53 = vld [vmem:[%s21371_s1 + $0x688] sm:$0xff]  ;;  %v10926_v59 = vld [vmem:[%s21371_s1 + $0x1280] sm:$0xff] }
 0x1af   : > { %14701 = vmatmul.mubr.f32.vlgmr.msra.gmra.mrb[0].mxu0 %v18097_v36  ;;  %15874 = vmatpush3.bf16.msra.mxu1 %v15871_v61  ;;  %v16655_v61 = vpack.c.bf16 %v10919_v7, %v10918_v52  ;;  %v10927_v52 = vld [vmem:[%s21371_s1 + $0x1288] sm:$0xff] }
 0x1b0   : > { %16642 = vmatpush3.bf16.msra.mxu0 %v16639_v5  ;;  %13359 = vmatprep.mubr.f32.mxu1 %v18028_v13  ;;  %v10536_v5 = vld [vmem:[%s21371_s1 + $0x650] sm:$0xff] }
 0x1b1   : > { %14703 = vmatprep.mubr.f32.mxu0 %v18100_v37  ;;  %15876 = vmatprep.subr.bf16.mxu1 %v15875_v51  ;;  %v15891_v56 = vpack.c.bf16 %v10537_v62, %v10536_v5  ;;  %v10545_v5 = vld [vmem:[%s21371_s1 + $0x698] sm:$0xff]  ;;  %v10928_v62 = vld [vmem:[%s21371_s1 + $0x1290] sm:$0xff] }
 0x1b2   : > { %13360 = vmatmul.mubr.f32.gmra.mrb[2].mxu1 %v18031_v14  ;;  %16644 = vmatprep.subr.bf16.mxu0 %v16643_v58 }
 0x1b3   : > { %14704 = vmatmul.mubr.f32.gmra.mrb[2].mxu0 %v18103_v38  ;;  %15878 = vmatpush3.bf16.msra.mxu1 %v15875_v51  ;;  %v16659_v51 = vpack.c.bf16 %v10921_v8, %v10920_v60  ;;  %v10929_v60 = vld [vmem:[%s21371_s1 + $0x1298] sm:$0xff] }
 0x1b4   : > { %16646 = vmatpush3.bf16.msra.mxu0 %v16643_v58  ;;  %13362 = vmatprep.mubr.f32.mxu1 %v18034_v15  ;;  %v10538_v58 = vld [vmem:[%s21371_s1 + $0x660] sm:$0xff] }
 0x1b5   : > { %14706 = vmatprep.mubr.f32.mxu0 %v18106_v39  ;;  %15880 = vmatprep.subr.bf16.mxu1 %v15879_v4  ;;  %v15895_v10 = vpack.c.bf16 %v10539_v9, %v10538_v58  ;;  %v10547_v58 = vld [vmem:[%s21371_s1 + $0x6a8] sm:$0xff] }
 0x1b6   : > { %13363 = vmatmul.mubr.f32.gmra.mrb[4].mxu1 %v18037_v16  ;;  %16648 = vmatprep.subr.bf16.mxu0 %v16647_v0  ;;  %v10931_v9 = vld [vmem:[%s21371_s1 + $0x12a8] sm:$0xff] }
 0x1b7   : > { %14707 = vmatmul.mubr.f32.gmra.mrb[4].mxu0 %v18109_v40  ;;  %15882 = vmatpush3.bf16.msra.mxu1 %v15879_v4  ;;  %v16663_v4 = vpack.c.bf16 %v10923_v11, %v10922_v55 }
 0x1b8   : > { %16650 = vmatpush3.bf16.msra.mxu0 %v16647_v0  ;;  %13365 = vmatprep.mubr.f32.mxu1 %v18040_v17  ;;  %v10540_v0 = vld [vmem:[%s21371_s1 + $0x670] sm:$0xff] }
 0x1b9   : > { %14709 = vmatprep.mubr.f32.mxu0 %v18112_v41  ;;  %15884 = vmatprep.subr.bf16.mxu1 %v15883_v2  ;;  %v15899_v3 = vpack.c.bf16 %v10541_v1, %v10540_v0  ;;  %v10932_v0 = vld [vmem:[%s21371_s1 + $0x12b0] sm:$0xff]  ;;  %v10933_v1 = vld [vmem:[%s21371_s1 + $0x12b8] sm:$0xff] }
 0x1ba   : > { %13366 = vmatmul.mubr.f32.gmra.mrb[6].mxu1 %v18043_v18  ;;  %16652 = vmatprep.subr.bf16.mxu0 %v16651_v54 }
 0x1bb   : > { %14710 = vmatmul.mubr.f32.gmra.mrb[6].mxu0 %v18115_v42  ;;  %15886 = vmatpush3.bf16.msra.mxu1 %v15883_v2  ;;  %v16667_v2 = vpack.c.bf16 %v10925_v63, %v10924_v6  ;;  %v16683_v63 = vpack.c.bf16 %v10933_v1, %v10932_v0 }
 0x1bc   : > { %16654 = vmatpush3.bf16.msra.mxu0 %v16651_v54  ;;  %13368 = vmatprep.mubr.f32.mxu1 %v18046_v19  ;;  %v10542_v54 = vld [vmem:[%s21371_s1 + $0x680] sm:$0xff] }
 0x1bd   : > { %14712 = vmatprep.mubr.f32.mxu0 %v18118_v43  ;;  %15888 = vmatprep.subr.bf16.mxu1 %v15887_v57  ;;  %v15903_v7 = vpack.c.bf16 %v10543_v53, %v10542_v54  ;;  %v10934_v54 = vld [vmem:[%s21371_s1 + $0x12c0] sm:$0xff]  ;;  %v10935_v53 = vld [vmem:[%s21371_s1 + $0x12c8] sm:$0xff] }
 0x1be   : > { %13369 = vmatmul.mubr.f32.gmra.mrb[8].mxu1 %v18049_v20  ;;  %16656 = vmatprep.subr.bf16.mxu0 %v16655_v61 }
 0x1bf   : > { %14713 = vmatmul.mubr.f32.gmra.mrb[8].mxu0 %v18121_v44  ;;  %15890 = vmatpush3.bf16.msra.mxu1 %v15887_v57  ;;  %v16671_v57 = vpack.c.bf16 %v10927_v52, %v10926_v59  ;;  %v16687_v52 = vpack.c.bf16 %v10935_v53, %v10934_v54 }
 0x1c0   : > { %16658 = vmatpush3.bf16.msra.mxu0 %v16655_v61  ;;  %13371 = vmatprep.mubr.f32.mxu1 %v18052_v21  ;;  %v10544_v61 = vld [vmem:[%s21371_s1 + $0x690] sm:$0xff] }
 0x1c1   : > { %14715 = vmatprep.mubr.f32.mxu0 %v18124_v45  ;;  %15892 = vmatprep.subr.bf16.mxu1 %v15891_v56  ;;  %v15907_v8 = vpack.c.bf16 %v10545_v5, %v10544_v61  ;;  %v10936_v61 = vld [vmem:[%s21371_s1 + $0x12d0] sm:$0xff]  ;;  %v10937_v5 = vld [vmem:[%s21371_s1 + $0x12d8] sm:$0xff] }
 0x1c2   : > { %13372 = vmatmul.mubr.f32.gmra.mrb[10].mxu1 %v18055_v22  ;;  %16660 = vmatprep.subr.bf16.mxu0 %v16659_v51 }
 0x1c3   : > { %14716 = vmatmul.mubr.f32.gmra.mrb[10].mxu0 %v18127_v46  ;;  %15894 = vmatpush3.bf16.msra.mxu1 %v15891_v56  ;;  %v16675_v56 = vpack.c.bf16 %v10929_v60, %v10928_v62  ;;  %v16691_v60 = vpack.c.bf16 %v10937_v5, %v10936_v61  ;;  %v10945_v61 = vld [vmem:[%s21371_s1 + $0x1318] sm:$0xff] }
 0x1c4   : > { %16662 = vmatpush3.bf16.msra.mxu0 %v16659_v51  ;;  %13374 = vmatprep.mubr.f32.mxu1 %v18058_v23  ;;  %v10546_v51 = vld [vmem:[%s21371_s1 + $0x6a0] sm:$0xff] }
 0x1c5   : > { %14718 = vmatprep.mubr.f32.mxu0 %v18130_v47  ;;  %15896 = vmatprep.subr.bf16.mxu1 %v15895_v10  ;;  %v15911_v55 = vpack.c.bf16 %v10547_v58, %v10546_v51  ;;  %v10938_v51 = vld [vmem:[%s21371_s1 + $0x12e0] sm:$0xff]  ;;  %v10939_v58 = vld [vmem:[%s21371_s1 + $0x12e8] sm:$0xff] }
 0x1c6   : > { %13375 = vmatmul.mubr.f32.gmra.mrb[12].mxu1 %v18061_v24  ;;  %16664 = vmatprep.subr.bf16.mxu0 %v16663_v4 }
 0x1c7   : > { %14719 = vmatmul.mubr.f32.gmra.mrb[12].mxu0 %v18133_v48  ;;  %15898 = vmatpush3.bf16.msra.mxu1 %v15895_v10  ;;  %v10548_v10 = vld [vmem:[%s21371_s1 + $0x6b0] sm:$0xff] }
 0x1c8   : > { %16666 = vmatpush3.bf16.msra.mxu0 %v16663_v4  ;;  %13377 = vmatprep.mubr.f32.mxu1 %v18064_v25  ;;  %v10549_v4 = vld [vmem:[%s21371_s1 + $0x6b8] sm:$0xff] }
 0x1c9   : > { %14721 = vmatprep.mubr.f32.mxu0 %v18136_v49  ;;  %15900 = vmatprep.subr.bf16.mxu1 %v15899_v3  ;;  %v15915_v6 = vpack.c.bf16 %v10549_v4, %v10548_v10  ;;  %v10940_v10 = vld [vmem:[%s21371_s1 + $0x12f0] sm:$0xff]  ;;  %v10941_v4 = vld [vmem:[%s21371_s1 + $0x12f8] sm:$0xff] }
 0x1ca   : > { %13378 = vmatmul.mubr.f32.gmra.mrb[14].mxu1 %v18067_v26  ;;  %16668 = vmatprep.subr.bf16.mxu0 %v16667_v2  ;;  %v16699_v1 = vpack.c.bf16 %v10941_v4, %v10940_v10 }
 0x1cb   : > { %14722 = vmatmul.mubr.f32.gmra.mrb[14].mxu0 %v18139_v50  ;;  %15902 = vmatpush3.bf16.msra.mxu1 %v15899_v3  ;;  %v10550_v3 = vld [vmem:[%s21371_s1 + $0x6c0] sm:$0xff] }
 0x1cc   : > { %16670 = vmatpush3.bf16.msra.mxu0 %v16667_v2  ;;  %13412 = vmatprep.mubr.f32.mxu1 %v18025_v12  ;;  %v10930_v12 = vld [vmem:[%s21371_s1 + $0x12a0] sm:$0xff]  ;;  %v10551_v2 = vld [vmem:[%s21371_s1 + $0x6c8] sm:$0xff] }
 0x1cd   : > { %14756 = vmatprep.mubr.f32.mxu0 %v18097_v36  ;;  %15904 = vmatprep.subr.bf16.mxu1 %v15903_v7  ;;  %v16679_v11 = vpack.c.bf16 %v10931_v9, %v10930_v12  ;;  %v15919_v59 = vpack.c.bf16 %v10551_v2, %v10550_v3  ;;  %v16695_v9 = vpack.c.bf16 %v10939_v58, %v10938_v51  ;;  %v10942_v3 = vld [vmem:[%s21371_s1 + $0x1300] sm:$0xff]  ;;  %v10943_v2 = vld [vmem:[%s21371_s1 + $0x1308] sm:$0xff] }
 0x1ce   : > { %13413 = vmatmul.mubr.f32.vlgmr.msra.gmra.mrb[0].mxu1 %v18028_v13  ;;  %16672 = vmatprep.subr.bf16.mxu0 %v16671_v57  ;;  %v16703_v53 = vpack.c.bf16 %v10943_v2, %v10942_v3 }
 0x1cf   : > { %14757 = vmatmul.mubr.f32.vlgmr.msra.gmra.mrb[0].mxu0 %v18100_v37  ;;  %15906 = vmatpush3.bf16.msra.mxu1 %v15903_v7  ;;  %v10552_v7 = vld [vmem:[%s21371_s1 + $0x6d0] sm:$0xff] }
 0x1d0   : > { %16674 = vmatpush3.bf16.msra.mxu0 %v16671_v57  ;;  %13415 = vmatprep.mubr.f32.mxu1 %v18031_v14  ;;  %v10553_v57 = vld [vmem:[%s21371_s1 + $0x6d8] sm:$0xff] }
 0x1d1   : > { %14759 = vmatprep.mubr.f32.mxu0 %v18103_v38  ;;  %15908 = vmatprep.subr.bf16.mxu1 %v15907_v8  ;;  %v15923_v62 = vpack.c.bf16 %v10553_v57, %v10552_v7  ;;  %v21400_v7 = vld [vmem:[#allocation7_spill] sm:$0xff]  ;;  %v10944_v57 = vld [vmem:[%s21371_s1 + $0x1310] sm:$0xff] }
 0x1d2   : > { %13416 = vmatmul.mubr.f32.gmra.mrb[2].mxu1 %v18034_v15  ;;  %16676 = vmatprep.subr.bf16.mxu0 %v16675_v56 }
 0x1d3   : > { %14760 = vmatmul.mubr.f32.gmra.mrb[2].mxu0 %v18106_v39  ;;  %15910 = vmatpush3.bf16.msra.mxu1 %v15907_v8  ;;  %v10554_v8 = vld [vmem:[%s21371_s1 + $0x6e0] sm:$0xff] }
 0x1d4   : > { %16678 = vmatpush3.bf16.msra.mxu0 %v16675_v56  ;;  %13418 = vmatprep.mubr.f32.mxu1 %v18037_v16  ;;  %v10555_v56 = vld [vmem:[%s21371_s1 + $0x6e8] sm:$0xff] }
 0x1d5   : > { %14762 = vmatprep.mubr.f32.mxu0 %v18109_v40  ;;  %15912 = vmatprep.subr.bf16.mxu1 %v15911_v55  ;;  %v15927_v12 = vpack.c.bf16 %v10555_v56, %v10554_v8  ;;  %v10563_v8 = vld [vmem:[%s21371_s1 + $0x728] sm:$0xff] }
 0x1d6   : > { %13419 = vmatmul.mubr.f32.gmra.mrb[4].mxu1 %v18040_v17  ;;  %16680 = vmatprep.subr.bf16.mxu0 %v16679_v11  ;;  %v10947_v56 = vld [vmem:[%s21371_s1 + $0x1328] sm:$0xff] }
 0x1d7   : > { %14763 = vmatmul.mubr.f32.gmra.mrb[4].mxu0 %v18112_v41  ;;  %15914 = vmatpush3.bf16.msra.mxu1 %v15911_v55  ;;  %v10556_v55 = vld [vmem:[%s21371_s1 + $0x6f0] sm:$0xff] }
 0x1d8   : > { %16682 = vmatpush3.bf16.msra.mxu0 %v16679_v11  ;;  %13421 = vmatprep.mubr.f32.mxu1 %v18043_v18  ;;  %v10557_v11 = vld [vmem:[%s21371_s1 + $0x6f8] sm:$0xff] }
 0x1d9   : > { %14765 = vmatprep.mubr.f32.mxu0 %v18115_v42  ;;  %15916 = vmatprep.subr.bf16.mxu1 %v15915_v6  ;;  %v15931_v0 = vpack.c.bf16 %v10557_v11, %v10556_v55  ;;  %v10948_v55 = vld [vmem:[%s21371_s1 + $0x1330] sm:$0xff]  ;;  %v10949_v11 = vld [vmem:[%s21371_s1 + $0x1338] sm:$0xff] }
 0x1da   : > { %13422 = vmatmul.mubr.f32.gmra.mrb[6].mxu1 %v18046_v19  ;;  %16684 = vmatprep.subr.bf16.mxu0 %v16683_v63  ;;  %v16715_v4 = vpack.c.bf16 %v10949_v11, %v10948_v55 }
 0x1db   : > { %14766 = vmatmul.mubr.f32.gmra.mrb[6].mxu0 %v18118_v43  ;;  %15918 = vmatpush3.bf16.msra.mxu1 %v15915_v6  ;;  %v10558_v6 = vld [vmem:[%s21371_s1 + $0x700] sm:$0xff] }
 0x1dc   : > { %16686 = vmatpush3.bf16.msra.mxu0 %v16683_v63  ;;  %13424 = vmatprep.mubr.f32.mxu1 %v18049_v20  ;;  %v10559_v63 = vld [vmem:[%s21371_s1 + $0x708] sm:$0xff] }
 0x1dd   : > { %14768 = vmatprep.mubr.f32.mxu0 %v18121_v44  ;;  %15920 = vmatprep.subr.bf16.mxu1 %v15919_v59  ;;  %v15935_v54 = vpack.c.bf16 %v10559_v63, %v10558_v6  ;;  %v10950_v6 = vld [vmem:[%s21371_s1 + $0x1340] sm:$0xff]  ;;  %v10951_v63 = vld [vmem:[%s21371_s1 + $0x1348] sm:$0xff] }
 0x1de   : > { %13425 = vmatmul.mubr.f32.gmra.mrb[8].mxu1 %v18052_v21  ;;  %16688 = vmatprep.subr.bf16.mxu0 %v16687_v52  ;;  %v16719_v2 = vpack.c.bf16 %v10951_v63, %v10950_v6 }
 0x1df   : > { %14769 = vmatmul.mubr.f32.gmra.mrb[8].mxu0 %v18124_v45  ;;  %15922 = vmatpush3.bf16.msra.mxu1 %v15919_v59  ;;  %v10560_v59 = vld [vmem:[%s21371_s1 + $0x710] sm:$0xff] }
 0x1e0   : > { %16690 = vmatpush3.bf16.msra.mxu0 %v16687_v52  ;;  %13427 = vmatprep.mubr.f32.mxu1 %v18055_v22  ;;  %v10561_v52 = vld [vmem:[%s21371_s1 + $0x718] sm:$0xff] }
 0x1e1   : > { %14771 = vmatprep.mubr.f32.mxu0 %v18127_v46  ;;  %15924 = vmatprep.subr.bf16.mxu1 %v15923_v62  ;;  %v15939_v5 = vpack.c.bf16 %v10561_v52, %v10560_v59  ;;  %v10952_v59 = vld [vmem:[%s21371_s1 + $0x1350] sm:$0xff]  ;;  %v10953_v52 = vld [vmem:[%s21371_s1 + $0x1358] sm:$0xff] }
 0x1e2   : > { %13428 = vmatmul.mubr.f32.gmra.mrb[10].mxu1 %v18058_v23  ;;  %16692 = vmatprep.subr.bf16.mxu0 %v16691_v60 }
 0x1e3   : > { %14772 = vmatmul.mubr.f32.gmra.mrb[10].mxu0 %v18130_v47  ;;  %15926 = vmatpush3.bf16.msra.mxu1 %v15923_v62  ;;  %v16707_v62 = vpack.c.bf16 %v10945_v61, %v10944_v57  ;;  %v16723_v61 = vpack.c.bf16 %v10953_v52, %v10952_v59  ;;  %v10961_v59 = vld [vmem:[%s21371_s1 + $0x1398] sm:$0xff] }
 0x1e4   : > { %16694 = vmatpush3.bf16.msra.mxu0 %v16691_v60  ;;  %13430 = vmatprep.mubr.f32.mxu1 %v18061_v24  ;;  %v10562_v60 = vld [vmem:[%s21371_s1 + $0x720] sm:$0xff] }
 0x1e5   : > { %14774 = vmatprep.mubr.f32.mxu0 %v18133_v48  ;;  %15928 = vmatprep.subr.bf16.mxu1 %v15927_v12  ;;  %v15943_v51 = vpack.c.bf16 %v10563_v8, %v10562_v60  ;;  %v10954_v60 = vld [vmem:[%s21371_s1 + $0x1360] sm:$0xff]  ;;  %v10955_v8 = vld [vmem:[%s21371_s1 + $0x1368] sm:$0xff] }
 0x1e6   : > { %13431 = vmatmul.mubr.f32.gmra.mrb[12].mxu1 %v18064_v25  ;;  %16696 = vmatprep.subr.bf16.mxu0 %v16695_v9 }
 0x1e7   : > { %14775 = vmatmul.mubr.f32.gmra.mrb[12].mxu0 %v18136_v49  ;;  %15930 = vmatpush3.bf16.msra.mxu1 %v15927_v12  ;;  %v10564_v12 = vld [vmem:[%s21371_s1 + $0x730] sm:$0xff] }
 0x1e8   : > { %16698 = vmatpush3.bf16.msra.mxu0 %v16695_v9  ;;  %13433 = vmatprep.mubr.f32.mxu1 %v18067_v26  ;;  %v10565_v9 = vld [vmem:[%s21371_s1 + $0x738] sm:$0xff] }
 0x1e9   : > { %14777 = vmatprep.mubr.f32.mxu0 %v18139_v50  ;;  %15932 = vmatprep.subr.bf16.mxu1 %v15931_v0  ;;  %v15947_v10 = vpack.c.bf16 %v10565_v9, %v10564_v12  ;;  %v10956_v12 = vld [vmem:[%s21371_s1 + $0x1370] sm:$0xff]  ;;  %v10957_v9 = vld [vmem:[%s21371_s1 + $0x1378] sm:$0xff] }
 0x1ea   : > { %13434 = vmatmul.mubr.f32.gmra.mrb[14].mxu1 %v18070_v27  ;;  %16700 = vmatprep.subr.bf16.mxu0 %v16699_v1  ;;  %v16731_v11 = vpack.c.bf16 %v10957_v9, %v10956_v12 }
 0x1eb   : > { %14778 = vmatmul.mubr.f32.gmra.mrb[14].mxu0 %v21400_v7  ;;  %15934 = vmatpush3.bf16.msra.mxu1 %v15931_v0  ;;  %v10566_v0 = vld [vmem:[%s21371_s1 + $0x740] sm:$0xff] }
 0x1ec   : > { %16702 = vmatpush3.bf16.msra.mxu0 %v16699_v1  ;;  %13468 = vmatprep.mubr.f32.mxu1 %v18028_v13  ;;  %v10946_v13 = vld [vmem:[%s21371_s1 + $0x1320] sm:$0xff]  ;;  %v10567_v1 = vld [vmem:[%s21371_s1 + $0x748] sm:$0xff] }
 0x1ed   : > { %14812 = vmatprep.mubr.f32.mxu0 %v18100_v37  ;;  %15936 = vmatprep.subr.bf16.mxu1 %v15935_v54  ;;  %v16711_v58 = vpack.c.bf16 %v10947_v56, %v10946_v13  ;;  %v15951_v3 = vpack.c.bf16 %v10567_v1, %v10566_v0  ;;  %v16727_v56 = vpack.c.bf16 %v10955_v8, %v10954_v60  ;;  %v10958_v0 = vld [vmem:[%s21371_s1 + $0x1380] sm:$0xff]  ;;  %v10959_v1 = vld [vmem:[%s21371_s1 + $0x1388] sm:$0xff] }
 0x1ee   : > { %13469 = vmatmul.mubr.f32.vlgmr.msra.gmra.mrb[0].mxu1 %v18031_v14  ;;  %16704 = vmatprep.subr.bf16.mxu0 %v16703_v53  ;;  %v16735_v63 = vpack.c.bf16 %v10959_v1, %v10958_v0 }
 0x1ef   : > { %14813 = vmatmul.mubr.f32.vlgmr.msra.gmra.mrb[0].mxu0 %v18103_v38  ;;  %15938 = vmatpush3.bf16.msra.mxu1 %v15935_v54  ;;  %v10568_v54 = vld [vmem:[%s21371_s1 + $0x750] sm:$0xff] }
 0x1f0   : > { %16706 = vmatpush3.bf16.msra.mxu0 %v16703_v53  ;;  %13471 = vmatprep.mubr.f32.mxu1 %v18034_v15  ;;  %v10569_v53 = vld [vmem:[%s21371_s1 + $0x758] sm:$0xff] }
 0x1f1   : > { %14815 = vmatprep.mubr.f32.mxu0 %v18106_v39  ;;  %15940 = vmatprep.subr.bf16.mxu1 %v15939_v5  ;;  %v15955_v57 = vpack.c.bf16 %v10569_v53, %v10568_v54  ;;  %v21401_v54 = vld [vmem:[#allocation8_spill] sm:$0xff]  ;;  %v10960_v53 = vld [vmem:[%s21371_s1 + $0x1390] sm:$0xff] }
 0x1f2   : > { %13472 = vmatmul.mubr.f32.gmra.mrb[2].mxu1 %v18037_v16  ;;  %16708 = vmatprep.subr.bf16.mxu0 %v16707_v62 }
 0x1f3   : > { %14816 = vmatmul.mubr.f32.gmra.mrb[2].mxu0 %v18109_v40  ;;  %15942 = vmatpush3.bf16.msra.mxu1 %v15939_v5  ;;  %v10570_v5 = vld [vmem:[%s21371_s1 + $0x760] sm:$0xff] }
 0x1f4   : > { %16710 = vmatpush3.bf16.msra.mxu0 %v16707_v62  ;;  %13474 = vmatprep.mubr.f32.mxu1 %v18040_v17  ;;  %v10571_v62 = vld [vmem:[%s21371_s1 + $0x768] sm:$0xff] }
 0x1f5   : > { %14818 = vmatprep.mubr.f32.mxu0 %v18112_v41  ;;  %15944 = vmatprep.subr.bf16.mxu1 %v15943_v51  ;;  %v15959_v13 = vpack.c.bf16 %v10571_v62, %v10570_v5  ;;  %v10579_v5 = vld [vmem:[%s21371_s1 + $0x7a8] sm:$0xff] }
 0x1f6   : > { %13475 = vmatmul.mubr.f32.gmra.mrb[4].mxu1 %v18043_v18  ;;  %16712 = vmatprep.subr.bf16.mxu0 %v16711_v58  ;;  %v10963_v62 = vld [vmem:[%s21371_s1 + $0x13a8] sm:$0xff] }
 0x1f7   : > { %14819 = vmatmul.mubr.f32.gmra.mrb[4].mxu0 %v18115_v42  ;;  %15946 = vmatpush3.bf16.msra.mxu1 %v15943_v51  ;;  %v10572_v51 = vld [vmem:[%s21371_s1 + $0x770] sm:$0xff] }
 0x1f8   : > { %16714 = vmatpush3.bf16.msra.mxu0 %v16711_v58  ;;  %13477 = vmatprep.mubr.f32.mxu1 %v18046_v19  ;;  %v10573_v58 = vld [vmem:[%s21371_s1 + $0x778] sm:$0xff] }
 0x1f9   : > { %14821 = vmatprep.mubr.f32.mxu0 %v18118_v43  ;;  %15948 = vmatprep.subr.bf16.mxu1 %v15947_v10  ;;  %v15963_v55 = vpack.c.bf16 %v10573_v58, %v10572_v51  ;;  %v10964_v51 = vld [vmem:[%s21371_s1 + $0x13b0] sm:$0xff]  ;;  %v10965_v58 = vld [vmem:[%s21371_s1 + $0x13b8] sm:$0xff] }
 0x1fa   : > { %13478 = vmatmul.mubr.f32.gmra.mrb[6].mxu1 %v18049_v20  ;;  %16716 = vmatprep.subr.bf16.mxu0 %v16715_v4  ;;  %v16747_v9 = vpack.c.bf16 %v10965_v58, %v10964_v51 }
 0x1fb   : > { %14822 = vmatmul.mubr.f32.gmra.mrb[6].mxu0 %v18121_v44  ;;  %15950 = vmatpush3.bf16.msra.mxu1 %v15947_v10  ;;  %v10574_v10 = vld [vmem:[%s21371_s1 + $0x780] sm:$0xff] }
 0x1fc   : > { %16718 = vmatpush3.bf16.msra.mxu0 %v16715_v4  ;;  %13480 = vmatprep.mubr.f32.mxu1 %v18052_v21  ;;  %v10575_v4 = vld [vmem:[%s21371_s1 + $0x788] sm:$0xff] }
 0x1fd   : > { %14824 = vmatprep.mubr.f32.mxu0 %v18124_v45  ;;  %15952 = vmatprep.subr.bf16.mxu1 %v15951_v3  ;;  %v15967_v6 = vpack.c.bf16 %v10575_v4, %v10574_v10  ;;  %v10966_v10 = vld [vmem:[%s21371_s1 + $0x13c0] sm:$0xff]  ;;  %v10967_v4 = vld [vmem:[%s21371_s1 + $0x13c8] sm:$0xff] }
 0x1fe   : > { %13481 = vmatmul.mubr.f32.gmra.mrb[8].mxu1 %v18055_v22  ;;  %16720 = vmatprep.subr.bf16.mxu0 %v16719_v2  ;;  %v16751_v1 = vpack.c.bf16 %v10967_v4, %v10966_v10 }
 0x1ff   : > { %14825 = vmatmul.mubr.f32.gmra.mrb[8].mxu0 %v18127_v46  ;;  %15954 = vmatpush3.bf16.msra.mxu1 %v15951_v3  ;;  %v10576_v3 = vld [vmem:[%s21371_s1 + $0x790] sm:$0xff] }
 0x200   : > { %16722 = vmatpush3.bf16.msra.mxu0 %v16719_v2  ;;  %13483 = vmatprep.mubr.f32.mxu1 %v18058_v23  ;;  %v10577_v2 = vld [vmem:[%s21371_s1 + $0x798] sm:$0xff] }
 0x201   : > { %14827 = vmatprep.mubr.f32.mxu0 %v18130_v47  ;;  %15956 = vmatprep.subr.bf16.mxu1 %v15955_v57  ;;  %v15971_v52 = vpack.c.bf16 %v10577_v2, %v10576_v3  ;;  %v10968_v3 = vld [vmem:[%s21371_s1 + $0x13d0] sm:$0xff]  ;;  %v10969_v2 = vld [vmem:[%s21371_s1 + $0x13d8] sm:$0xff] }
 0x202   : > { %13484 = vmatmul.mubr.f32.gmra.mrb[10].mxu1 %v18061_v24  ;;  %16724 = vmatprep.subr.bf16.mxu0 %v16723_v61 }
 0x203   : > { %14828 = vmatmul.mubr.f32.gmra.mrb[10].mxu0 %v18133_v48  ;;  %15958 = vmatpush3.bf16.msra.mxu1 %v15955_v57  ;;  %v16739_v57 = vpack.c.bf16 %v10961_v59, %v10960_v53  ;;  %v16755_v59 = vpack.c.bf16 %v10969_v2, %v10968_v3  ;;  %v10977_v3 = vld [vmem:[%s21371_s1 + $0x1418] sm:$0xff] }
 0x204   : > { %16726 = vmatpush3.bf16.msra.mxu0 %v16723_v61  ;;  %13486 = vmatprep.mubr.f32.mxu1 %v18064_v25  ;;  %v10578_v61 = vld [vmem:[%s21371_s1 + $0x7a0] sm:$0xff] }
 0x205   : > { %14830 = vmatprep.mubr.f32.mxu0 %v18136_v49  ;;  %15960 = vmatprep.subr.bf16.mxu1 %v15959_v13  ;;  %v15975_v60 = vpack.c.bf16 %v10579_v5, %v10578_v61  ;;  %v10970_v61 = vld [vmem:[%s21371_s1 + $0x13e0] sm:$0xff]  ;;  %v10971_v5 = vld [vmem:[%s21371_s1 + $0x13e8] sm:$0xff] }
 0x206   : > { %13487 = vmatmul.mubr.f32.gmra.mrb[12].mxu1 %v18067_v26  ;;  %16728 = vmatprep.subr.bf16.mxu0 %v16727_v56 }
 0x207   : > { %14831 = vmatmul.mubr.f32.gmra.mrb[12].mxu0 %v18139_v50  ;;  %15962 = vmatpush3.bf16.msra.mxu1 %v15959_v13  ;;  %v10580_v13 = vld [vmem:[%s21371_s1 + $0x7b0] sm:$0xff] }
 0x208   : > { %16730 = vmatpush3.bf16.msra.mxu0 %v16727_v56  ;;  %13489 = vmatprep.mubr.f32.mxu1 %v18070_v27  ;;  %v10581_v56 = vld [vmem:[%s21371_s1 + $0x7b8] sm:$0xff] }
 0x209   : > { %14833 = vmatprep.mubr.f32.mxu0 %v21400_v7  ;;  %15964 = vmatprep.subr.bf16.mxu1 %v15963_v55  ;;  %v15979_v12 = vpack.c.bf16 %v10581_v56, %v10580_v13  ;;  %v10972_v13 = vld [vmem:[%s21371_s1 + $0x13f0] sm:$0xff]  ;;  %v10973_v56 = vld [vmem:[%s21371_s1 + $0x13f8] sm:$0xff] }
 0x20a   : > { %13490 = vmatmul.mubr.f32.gmra.mrb[14].mxu1 %v18073_v28  ;;  %16732 = vmatprep.subr.bf16.mxu0 %v16731_v11  ;;  %v16763_v58 = vpack.c.bf16 %v10973_v56, %v10972_v13  ;;  %v10598_v56 = vld [vmem:[%s21371_s1 + $0x840] sm:$0xff] }
 0x20b   : > { %14834 = vmatmul.mubr.f32.gmra.mrb[14].mxu0 %v21401_v54  ;;  %15966 = vmatpush3.bf16.msra.mxu1 %v15963_v55  ;;  %v10582_v55 = vld [vmem:[%s21371_s1 + $0x7c0] sm:$0xff] }
 0x20c   : > { %16734 = vmatpush3.bf16.msra.mxu0 %v16731_v11  ;;  %13524 = vmatprep.mubr.f32.mxu1 %v18031_v14  ;;  %v10962_v14 = vld [vmem:[%s21371_s1 + $0x13a0] sm:$0xff]  ;;  %v10583_v11 = vld [vmem:[%s21371_s1 + $0x7c8] sm:$0xff] }
 0x20d   : > { %14868 = vmatprep.mubr.f32.mxu0 %v18103_v38  ;;  %15968 = vmatprep.subr.bf16.mxu1 %v15967_v6  ;;  %v16743_v8 = vpack.c.bf16 %v10963_v62, %v10962_v14  ;;  %v15983_v0 = vpack.c.bf16 %v10583_v11, %v10582_v55  ;;  %v16759_v62 = vpack.c.bf16 %v10971_v5, %v10970_v61  ;;  %v10974_v55 = vld [vmem:[%s21371_s1 + $0x1400] sm:$0xff]  ;;  %v10975_v11 = vld [vmem:[%s21371_s1 + $0x1408] sm:$0xff]  ;;  %v10596_v5 = vld [vmem:[%s21371_s1 + $0x830] sm:$0xff] }
 0x20e   : > { %13525 = vmatmul.mubr.f32.vlgmr.msra.gmra.mrb[0].mxu1 %v18034_v15  ;;  %16736 = vmatprep.subr.bf16.mxu0 %v16735_v63  ;;  %v16767_v4 = vpack.c.bf16 %v10975_v11, %v10974_v55  ;;  %v10600_v11 = vld [vmem:[%s21371_s1 + $0x850] sm:$0xff] }
 0x20f   : > { %14869 = vmatmul.mubr.f32.vlgmr.msra.gmra.mrb[0].mxu0 %v18106_v39  ;;  %15970 = vmatpush3.bf16.msra.mxu1 %v15967_v6  ;;  %v10584_v6 = vld [vmem:[%s21371_s1 + $0x7d0] sm:$0xff] }
 0x210   : > { %16738 = vmatpush3.bf16.msra.mxu0 %v16735_v63  ;;  %13527 = vmatprep.mubr.f32.mxu1 %v18037_v16  ;;  %v10585_v63 = vld [vmem:[%s21371_s1 + $0x7d8] sm:$0xff] }
 0x211   : > { %14871 = vmatprep.mubr.f32.mxu0 %v18109_v40  ;;  %15972 = vmatprep.subr.bf16.mxu1 %v15971_v52  ;;  %v15987_v53 = vpack.c.bf16 %v10585_v63, %v10584_v6  ;;  %v21402_v6 = vld [vmem:[#allocation9_spill] sm:$0xff] }
 0x212   : > { %13528 = vmatmul.mubr.f32.gmra.mrb[2].mxu1 %v18040_v17  ;;  %16740 = vmatprep.subr.bf16.mxu0 %v16739_v57  ;;  %v10976_v63 = vld [vmem:[%s21371_s1 + $0x1410] sm:$0xff] }
 0x213   : > { %14872 = vmatmul.mubr.f32.gmra.mrb[2].mxu0 %v18112_v41  ;;  %15974 = vmatpush3.bf16.msra.mxu1 %v15971_v52  ;;  %v10586_v52 = vld [vmem:[%s21371_s1 + $0x7e0] sm:$0xff] }
 0x214   : > { %16742 = vmatpush3.bf16.msra.mxu0 %v16739_v57  ;;  %13530 = vmatprep.mubr.f32.mxu1 %v18043_v18  ;;  %v10587_v57 = vld [vmem:[%s21371_s1 + $0x7e8] sm:$0xff] }
 0x215   : > { %14874 = vmatprep.mubr.f32.mxu0 %v18115_v42  ;;  %15976 = vmatprep.subr.bf16.mxu1 %v15975_v60  ;;  %v15991_v14 = vpack.c.bf16 %v10587_v57, %v10586_v52  ;;  %v10595_v52 = vld [vmem:[%s21371_s1 + $0x828] sm:$0xff] }
 0x216   : > { %13531 = vmatmul.mubr.f32.gmra.mrb[4].mxu1 %v18046_v19  ;;  %16744 = vmatprep.subr.bf16.mxu0 %v16743_v8 }
 0x217   : > { %14875 = vmatmul.mubr.f32.gmra.mrb[4].mxu0 %v18118_v43  ;;  %15978 = vmatpush3.bf16.msra.mxu1 %v15975_v60  ;;  %v10588_v60 = vld [vmem:[%s21371_s1 + $0x7f0] sm:$0xff] }
 0x218   : > { %16746 = vmatpush3.bf16.msra.mxu0 %v16743_v8  ;;  %13533 = vmatprep.mubr.f32.mxu1 %v18049_v20  ;;  %v10589_v8 = vld [vmem:[%s21371_s1 + $0x7f8] sm:$0xff] }
 0x219   : > { %14877 = vmatprep.mubr.f32.mxu0 %v18121_v44  ;;  %15980 = vmatprep.subr.bf16.mxu1 %v15979_v12  ;;  %v15995_v51 = vpack.c.bf16 %v10589_v8, %v10588_v60  ;;  %v10981_v60 = vld [vmem:[%s21371_s1 + $0x1438] sm:$0xff] }
 0x21a   : > { %13534 = vmatmul.mubr.f32.gmra.mrb[6].mxu1 %v18052_v21  ;;  %16748 = vmatprep.subr.bf16.mxu0 %v16747_v9 }
 0x21b   : > { %14878 = vmatmul.mubr.f32.gmra.mrb[6].mxu0 %v18124_v45  ;;  %15982 = vmatpush3.bf16.msra.mxu1 %v15979_v12  ;;  %v10590_v12 = vld [vmem:[%s21371_s1 + $0x800] sm:$0xff] }
 0x21c   : > { %16750 = vmatpush3.bf16.msra.mxu0 %v16747_v9  ;;  %13536 = vmatprep.mubr.f32.mxu1 %v18055_v22  ;;  %v10591_v9 = vld [vmem:[%s21371_s1 + $0x808] sm:$0xff] }
 0x21d   : > { %14880 = vmatprep.mubr.f32.mxu0 %v18127_v46  ;;  %15984 = vmatprep.subr.bf16.mxu1 %v15983_v0  ;;  %v15999_v10 = vpack.c.bf16 %v10591_v9, %v10590_v12  ;;  %v10983_v12 = vld [vmem:[%s21371_s1 + $0x1448] sm:$0xff] }
 0x21e   : > { %13537 = vmatmul.mubr.f32.gmra.mrb[8].mxu1 %v18058_v23  ;;  %16752 = vmatprep.subr.bf16.mxu0 %v16751_v1 }
 0x21f   : > { %14881 = vmatmul.mubr.f32.gmra.mrb[8].mxu0 %v18130_v47  ;;  %15986 = vmatpush3.bf16.msra.mxu1 %v15983_v0  ;;  %v10592_v0 = vld [vmem:[%s21371_s1 + $0x810] sm:$0xff] }
 0x220   : > { %16754 = vmatpush3.bf16.msra.mxu0 %v16751_v1  ;;  %13539 = vmatprep.mubr.f32.mxu1 %v18061_v24  ;;  %v10593_v1 = vld [vmem:[%s21371_s1 + $0x818] sm:$0xff] }
 0x221   : > { %14883 = vmatprep.mubr.f32.mxu0 %v18133_v48  ;;  %15988 = vmatprep.subr.bf16.mxu1 %v15987_v53  ;;  %v16003_v2 = vpack.c.bf16 %v10593_v1, %v10592_v0  ;;  %v10985_v0 = vld [vmem:[%s21371_s1 + $0x1458] sm:$0xff] }
 0x222   : > { %13540 = vmatmul.mubr.f32.gmra.mrb[10].mxu1 %v18064_v25  ;;  %16756 = vmatprep.subr.bf16.mxu0 %v16755_v59 }
 0x223   : > { %14884 = vmatmul.mubr.f32.gmra.mrb[10].mxu0 %v18136_v49  ;;  %15990 = vmatpush3.bf16.msra.mxu1 %v15987_v53  ;;  %v16771_v53 = vpack.c.bf16 %v10977_v3, %v10976_v63  ;;  %v10602_v3 = vld [vmem:[%s21371_s1 + $0x860] sm:$0xff] }
 0x224   : > { %16758 = vmatpush3.bf16.msra.mxu0 %v16755_v59  ;;  %13542 = vmatprep.mubr.f32.mxu1 %v18067_v26  ;;  %v10594_v59 = vld [vmem:[%s21371_s1 + $0x820] sm:$0xff] }
 0x225   : > { %14886 = vmatprep.mubr.f32.mxu0 %v18139_v50  ;;  %15992 = vmatprep.subr.bf16.mxu1 %v15991_v14  ;;  %v16007_v57 = vpack.c.bf16 %v10595_v52, %v10594_v59  ;;  %v10987_v59 = vld [vmem:[%s21371_s1 + $0x1468] sm:$0xff] }
 0x226   : > { %13543 = vmatmul.mubr.f32.gmra.mrb[12].mxu1 %v18070_v27  ;;  %16760 = vmatprep.subr.bf16.mxu0 %v16759_v62 }
 0x227   : > { %14887 = vmatmul.mubr.f32.gmra.mrb[12].mxu0 %v21400_v7  ;;  %15994 = vmatpush3.bf16.msra.mxu1 %v15991_v14  ;;  %v10597_v14 = vld [vmem:[%s21371_s1 + $0x838] sm:$0xff] }
 0x228   : > { %16762 = vmatpush3.bf16.msra.mxu0 %v16759_v62  ;;  %13545 = vmatprep.mubr.f32.mxu1 %v18073_v28  ;;  %v10980_v62 = vld [vmem:[%s21371_s1 + $0x1430] sm:$0xff]  ;;  %v16011_v8 = vpack.c.bf16 %v10597_v14, %v10596_v5  ;;  %v10989_v5 = vld [vmem:[%s21371_s1 + $0x1478] sm:$0xff] }
 0x229   : > { %14889 = vmatprep.mubr.f32.mxu0 %v21401_v54  ;;  %15996 = vmatprep.subr.bf16.mxu1 %v15995_v51  ;;  %v16779_v13 = vpack.c.bf16 %v10981_v60, %v10980_v62  ;;  %v10606_v60 = vld [vmem:[%s21371_s1 + $0x880] sm:$0xff] }
 0x22a   : > { %13546 = vmatmul.mubr.f32.gmra.mrb[14].mxu1 %v18076_v29  ;;  %16764 = vmatprep.subr.bf16.mxu0 %v16763_v58 }
 0x22b   : > { %14890 = vmatmul.mubr.f32.gmra.mrb[14].mxu0 %v21402_v6  ;;  %15998 = vmatpush3.bf16.msra.mxu1 %v15995_v51  ;;  %v10599_v51 = vld [vmem:[%s21371_s1 + $0x848] sm:$0xff] }
 0x22c   : > { %16766 = vmatpush3.bf16.msra.mxu0 %v16763_v58  ;;  %13580 = vmatprep.mubr.f32.mxu1 %v18034_v15  ;;  %v10978_v15 = vld [vmem:[%s21371_s1 + $0x1420] sm:$0xff]  ;;  %v16015_v9 = vpack.c.bf16 %v10599_v51, %v10598_v56  ;;  %v10991_v56 = vld [vmem:[%s21371_s1 + $0x1488] sm:$0xff] }
 0x22d   : > { %14924 = vmatprep.mubr.f32.mxu0 %v18106_v39  ;;  %16000 = vmatprep.subr.bf16.mxu1 %v15999_v10  ;;  %v10979_v39 = vld [vmem:[%s21371_s1 + $0x1428] sm:$0xff]  ;;  %v10982_v58 = vld [vmem:[%s21371_s1 + $0x1440] sm:$0xff] }
 0x22e   : > { %13581 = vmatmul.mubr.f32.vlgmr.msra.gmra.mrb[0].mxu1 %v18037_v16  ;;  %16768 = vmatprep.subr.bf16.mxu0 %v16767_v4  ;;  %v16775_v61 = vpack.c.bf16 %v10979_v39, %v10978_v15  ;;  %v16783_v55 = vpack.c.bf16 %v10983_v12, %v10982_v58  ;;  %v10604_v39 = vld [vmem:[%s21371_s1 + $0x870] sm:$0xff] }
 0x22f   : > { %14925 = vmatmul.mubr.f32.vlgmr.msra.gmra.mrb[0].mxu0 %v18109_v40  ;;  %16002 = vmatpush3.bf16.msra.mxu1 %v15999_v10  ;;  %v10601_v10 = vld [vmem:[%s21371_s1 + $0x858] sm:$0xff]  ;;  %v10608_v12 = vld [vmem:[%s21371_s1 + $0x890] sm:$0xff] }
 0x230   : > { %16770 = vmatpush3.bf16.msra.mxu0 %v16767_v4  ;;  %13583 = vmatprep.mubr.f32.mxu1 %v18040_v17  ;;  %v10984_v4 = vld [vmem:[%s21371_s1 + $0x1450] sm:$0xff]  ;;  %v16019_v1 = vpack.c.bf16 %v10601_v10, %v10600_v11  ;;  %v10993_v10 = vld [vmem:[%s21371_s1 + $0x1498] sm:$0xff] }
 0x231   : > { %14927 = vmatprep.mubr.f32.mxu0 %v18112_v41  ;;  %16004 = vmatprep.subr.bf16.mxu1 %v16003_v2  ;;  %v16787_v63 = vpack.c.bf16 %v10985_v0, %v10984_v4  ;;  %v10992_v11 = vld [vmem:[%s21371_s1 + $0x1490] sm:$0xff] }
 0x232   : > { %13584 = vmatmul.mubr.f32.gmra.mrb[2].mxu1 %v18043_v18  ;;  %16772 = vmatprep.subr.bf16.mxu0 %v16771_v53  ;;  %v16803_v0 = vpack.c.bf16 %v10993_v10, %v10992_v11  ;;  %v10618_v11 = vld [vmem:[%s21371_s1 + $0x8e0] sm:$0xff]  ;;  %v10619_v10 = vld [vmem:[%s21371_s1 + $0x8e8] sm:$0xff] }
 0x233   : > { %14928 = vmatmul.mubr.f32.gmra.mrb[2].mxu0 %v18115_v42  ;;  %16006 = vmatpush3.bf16.msra.mxu1 %v16003_v2  ;;  %v10603_v2 = vld [vmem:[%s21371_s1 + $0x868] sm:$0xff] }
 0x234   : > { %16774 = vmatpush3.bf16.msra.mxu0 %v16771_v53  ;;  %13586 = vmatprep.mubr.f32.mxu1 %v18046_v19  ;;  %v10986_v53 = vld [vmem:[%s21371_s1 + $0x1460] sm:$0xff]  ;;  %v16023_v52 = vpack.c.bf16 %v10603_v2, %v10602_v3 }
 0x235   : > { %14930 = vmatprep.mubr.f32.mxu0 %v18118_v43  ;;  %16008 = vmatprep.subr.bf16.mxu1 %v16007_v57  ;;  %v16791_v15 = vpack.c.bf16 %v10987_v59, %v10986_v53  ;;  %v10612_v53 = vld [vmem:[%s21371_s1 + $0x8b0] sm:$0xff]  ;;  %v10613_v59 = vld [vmem:[%s21371_s1 + $0x8b8] sm:$0xff] }
 0x236   : > { %13587 = vmatmul.mubr.f32.gmra.mrb[4].mxu1 %v18049_v20  ;;  %16776 = vmatprep.subr.bf16.mxu0 %v16775_v61 }
 0x237   : > { %14931 = vmatmul.mubr.f32.gmra.mrb[4].mxu0 %v18121_v44  ;;  %16010 = vmatpush3.bf16.msra.mxu1 %v16007_v57  ;;  %v10605_v57 = vld [vmem:[%s21371_s1 + $0x878] sm:$0xff] }
 0x238   : > { %16778 = vmatpush3.bf16.msra.mxu0 %v16775_v61  ;;  %13589 = vmatprep.mubr.f32.mxu1 %v18052_v21  ;;  %v10988_v61 = vld [vmem:[%s21371_s1 + $0x1470] sm:$0xff]  ;;  %v16027_v14 = vpack.c.bf16 %v10605_v57, %v10604_v39  ;;  %v16043_v39 = vpack.c.bf16 %v10613_v59, %v10612_v53 }
 0x239   : > { %14933 = vmatprep.mubr.f32.mxu0 %v18124_v45  ;;  %16012 = vmatprep.subr.bf16.mxu1 %v16011_v8  ;;  %v16795_v62 = vpack.c.bf16 %v10989_v5, %v10988_v61  ;;  %v10614_v61 = vld [vmem:[%s21371_s1 + $0x8c0] sm:$0xff]  ;;  %v10615_v5 = vld [vmem:[%s21371_s1 + $0x8c8] sm:$0xff] }
 0x23a   : > { %13590 = vmatmul.mubr.f32.gmra.mrb[6].mxu1 %v18055_v22  ;;  %16780 = vmatprep.subr.bf16.mxu0 %v16779_v13 }
 0x23b   : > { %14934 = vmatmul.mubr.f32.gmra.mrb[6].mxu0 %v18127_v46  ;;  %16014 = vmatpush3.bf16.msra.mxu1 %v16011_v8  ;;  %v10607_v8 = vld [vmem:[%s21371_s1 + $0x888] sm:$0xff] }
 0x23c   : > { %16782 = vmatpush3.bf16.msra.mxu0 %v16779_v13  ;;  %13592 = vmatprep.mubr.f32.mxu1 %v18058_v23  ;;  %v10990_v13 = vld [vmem:[%s21371_s1 + $0x1480] sm:$0xff]  ;;  %v16031_v51 = vpack.c.bf16 %v10607_v8, %v10606_v60  ;;  %v16047_v60 = vpack.c.bf16 %v10615_v5, %v10614_v61 }
 0x23d   : > { %14936 = vmatprep.mubr.f32.mxu0 %v18130_v47  ;;  %16016 = vmatprep.subr.bf16.mxu1 %v16015_v9  ;;  %v16799_v58 = vpack.c.bf16 %v10991_v56, %v10990_v13  ;;  %v10616_v13 = vld [vmem:[%s21371_s1 + $0x8d0] sm:$0xff]  ;;  %v10617_v56 = vld [vmem:[%s21371_s1 + $0x8d8] sm:$0xff] }
 0x23e   : > { %13593 = vmatmul.mubr.f32.gmra.mrb[8].mxu1 %v18061_v24  ;;  %16784 = vmatprep.subr.bf16.mxu0 %v16783_v55 }
 0x23f   : > { %14937 = vmatmul.mubr.f32.gmra.mrb[8].mxu0 %v18133_v48  ;;  %16018 = vmatpush3.bf16.msra.mxu1 %v16015_v9  ;;  %v10609_v9 = vld [vmem:[%s21371_s1 + $0x898] sm:$0xff] }
 0x240   : > { %16786 = vmatpush3.bf16.msra.mxu0 %v16783_v55  ;;  %13595 = vmatprep.mubr.f32.mxu1 %v18064_v25  ;;  %v21403_v55 = vld [vmem:[#allocation10_spill] sm:$0xff]  ;;  %v16035_v4 = vpack.c.bf16 %v10609_v9, %v10608_v12  ;;  %v16051_v12 = vpack.c.bf16 %v10617_v56, %v10616_v13 }
 0x241   : > { %14939 = vmatprep.mubr.f32.mxu0 %v18136_v49  ;;  %16020 = vmatprep.subr.bf16.mxu1 %v16019_v1  ;;  %v11009_v13 = vld [vmem:[%s21371_s1 + $0x1518] sm:$0xff] }
 0x242   : > { %13596 = vmatmul.mubr.f32.gmra.mrb[10].mxu1 %v18067_v26  ;;  %16788 = vmatprep.subr.bf16.mxu0 %v16787_v63 }
 0x243   : > { %14940 = vmatmul.mubr.f32.gmra.mrb[10].mxu0 %v18139_v50  ;;  %16022 = vmatpush3.bf16.msra.mxu1 %v16019_v1  ;;  %v10610_v1 = vld [vmem:[%s21371_s1 + $0x8a0] sm:$0xff] }
 0x244   : > { %16790 = vmatpush3.bf16.msra.mxu0 %v16787_v63  ;;  %13598 = vmatprep.mubr.f32.mxu1 %v18070_v27  ;;  %v10611_v63 = vld [vmem:[%s21371_s1 + $0x8a8] sm:$0xff] }
 0x245   : > { %14942 = vmatprep.mubr.f32.mxu0 %v21400_v7  ;;  %16024 = vmatprep.subr.bf16.mxu1 %v16023_v52  ;;  %v16039_v3 = vpack.c.bf16 %v10611_v63, %v10610_v1  ;;  %v16055_v1 = vpack.c.bf16 %v10619_v10, %v10618_v11  ;;  %v10628_v10 = vld [vmem:[%s21371_s1 + $0x930] sm:$0xff] }
 0x246   : > { %13599 = vmatmul.mubr.f32.gmra.mrb[12].mxu1 %v18073_v28  ;;  %16792 = vmatprep.subr.bf16.mxu0 %v16791_v15 }
 0x247   : > { %14943 = vmatmul.mubr.f32.gmra.mrb[12].mxu0 %v21401_v54  ;;  %16026 = vmatpush3.bf16.msra.mxu1 %v16023_v52  ;;  %v10996_v52 = vld [vmem:[%s21371_s1 + $0x14b0] sm:$0xff] }
 0x248   : > { %16794 = vmatpush3.bf16.msra.mxu0 %v16791_v15  ;;  %13601 = vmatprep.mubr.f32.mxu1 %v18076_v29  ;;  %v10997_v15 = vld [vmem:[%s21371_s1 + $0x14b8] sm:$0xff] }
 0x249   : > { %14945 = vmatprep.mubr.f32.mxu0 %v21402_v6  ;;  %16028 = vmatprep.subr.bf16.mxu1 %v16027_v14  ;;  %v16811_v57 = vpack.c.bf16 %v10997_v15, %v10996_v52  ;;  %v10622_v52 = vld [vmem:[%s21371_s1 + $0x900] sm:$0xff]  ;;  %v10623_v15 = vld [vmem:[%s21371_s1 + $0x908] sm:$0xff] }
 0x24a   : > { %13602 = vmatmul.mubr.f32.gmra.mrb[14].mxu1 %v18079_v30  ;;  %16796 = vmatprep.subr.bf16.mxu0 %v16795_v62  ;;  %v16063_v61 = vpack.c.bf16 %v10623_v15, %v10622_v52  ;;  %v10632_v15 = vld [vmem:[%s21371_s1 + $0x950] sm:$0xff] }
 0x24b   : > { %14946 = vmatmul.mubr.f32.gmra.mrb[14].mxu0 %v21403_v55  ;;  %16030 = vmatpush3.bf16.msra.mxu1 %v16027_v14  ;;  %v10998_v14 = vld [vmem:[%s21371_s1 + $0x14c0] sm:$0xff] }
 0x24c   : > { %16798 = vmatpush3.bf16.msra.mxu0 %v16795_v62  ;;  %13636 = vmatprep.mubr.f32.mxu1 %v18037_v16  ;;  %v10994_v16 = vld [vmem:[%s21371_s1 + $0x14a0] sm:$0xff]  ;;  %v10999_v62 = vld [vmem:[%s21371_s1 + $0x14c8] sm:$0xff] }
 0x24d   : > { %14980 = vmatprep.mubr.f32.mxu0 %v18109_v40  ;;  %16032 = vmatprep.subr.bf16.mxu1 %v16031_v51  ;;  %v10995_v40 = vld [vmem:[%s21371_s1 + $0x14a8] sm:$0xff]  ;;  %v16815_v8 = vpack.c.bf16 %v10999_v62, %v10998_v14  ;;  %v10624_v14 = vld [vmem:[%s21371_s1 + $0x910] sm:$0xff]  ;;  %v10625_v62 = vld [vmem:[%s21371_s1 + $0x918] sm:$0xff] }
 0x24e   : > { %13637 = vmatmul.mubr.f32.vlgmr.msra.gmra.mrb[0].mxu1 %v18040_v17  ;;  %16800 = vmatprep.subr.bf16.mxu0 %v16799_v58  ;;  %v16807_v2 = vpack.c.bf16 %v10995_v40, %v10994_v16  ;;  %v10620_v16 = vld [vmem:[%s21371_s1 + $0x8f0] sm:$0xff]  ;;  %v10621_v40 = vld [vmem:[%s21371_s1 + $0x8f8] sm:$0xff]  ;;  %v16067_v56 = vpack.c.bf16 %v10625_v62, %v10624_v14  ;;  %v10634_v62 = vld [vmem:[%s21371_s1 + $0x960] sm:$0xff] }
 0x24f   : > { %14981 = vmatmul.mubr.f32.vlgmr.msra.gmra.mrb[0].mxu0 %v18112_v41  ;;  %16034 = vmatpush3.bf16.msra.mxu1 %v16031_v51  ;;  %v11000_v51 = vld [vmem:[%s21371_s1 + $0x14d0] sm:$0xff]  ;;  %v16059_v53 = vpack.c.bf16 %v10621_v40, %v10620_v16  ;;  %v10630_v40 = vld [vmem:[%s21371_s1 + $0x940] sm:$0xff] }
 0x250   : > { %16802 = vmatpush3.bf16.msra.mxu0 %v16799_v58  ;;  %13639 = vmatprep.mubr.f32.mxu1 %v18043_v18  ;;  %v11001_v58 = vld [vmem:[%s21371_s1 + $0x14d8] sm:$0xff] }
 0x251   : > { %14983 = vmatprep.mubr.f32.mxu0 %v18115_v42  ;;  %16036 = vmatprep.subr.bf16.mxu1 %v16035_v4  ;;  %v16819_v9 = vpack.c.bf16 %v11001_v58, %v11000_v51  ;;  %v10626_v58 = vld [vmem:[%s21371_s1 + $0x920] sm:$0xff] }
 0x252   : > { %13640 = vmatmul.mubr.f32.gmra.mrb[2].mxu1 %v18046_v19  ;;  %16804 = vmatprep.subr.bf16.mxu0 %v16803_v0 }
 0x253   : > { %14984 = vmatmul.mubr.f32.gmra.mrb[2].mxu0 %v18118_v43  ;;  %16038 = vmatpush3.bf16.msra.mxu1 %v16035_v4  ;;  %v11002_v4 = vld [vmem:[%s21371_s1 + $0x14e0] sm:$0xff] }
 0x254   : > { %16806 = vmatpush3.bf16.msra.mxu0 %v16803_v0  ;;  %13642 = vmatprep.mubr.f32.mxu1 %v18049_v20  ;;  %v11003_v0 = vld [vmem:[%s21371_s1 + $0x14e8] sm:$0xff] }
 0x255   : > { %14986 = vmatprep.mubr.f32.mxu0 %v18121_v44  ;;  %16040 = vmatprep.subr.bf16.mxu1 %v16039_v3  ;;  %v16823_v63 = vpack.c.bf16 %v11003_v0, %v11002_v4  ;;  %v10629_v4 = vld [vmem:[%s21371_s1 + $0x938] sm:$0xff]  ;;  %v11012_v0 = vld [vmem:[%s21371_s1 + $0x1530] sm:$0xff] }
 0x256   : > { %13643 = vmatmul.mubr.f32.gmra.mrb[4].mxu1 %v18052_v21  ;;  %16808 = vmatprep.subr.bf16.mxu0 %v16807_v2 }
 0x257   : > { %14987 = vmatmul.mubr.f32.gmra.mrb[4].mxu0 %v18124_v45  ;;  %16042 = vmatpush3.bf16.msra.mxu1 %v16039_v3  ;;  %v11004_v3 = vld [vmem:[%s21371_s1 + $0x14f0] sm:$0xff] }
 0x258   : > { %16810 = vmatpush3.bf16.msra.mxu0 %v16807_v2  ;;  %13645 = vmatprep.mubr.f32.mxu1 %v18055_v22  ;;  %v11005_v2 = vld [vmem:[%s21371_s1 + $0x14f8] sm:$0xff] }
 0x259   : > { %14989 = vmatprep.mubr.f32.mxu0 %v18127_v46  ;;  %16044 = vmatprep.subr.bf16.mxu1 %v16043_v39  ;;  %v16827_v59 = vpack.c.bf16 %v11005_v2, %v11004_v3  ;;  %v10631_v3 = vld [vmem:[%s21371_s1 + $0x948] sm:$0xff]  ;;  %v11014_v2 = vld [vmem:[%s21371_s1 + $0x1540] sm:$0xff] }
 0x25a   : > { %13646 = vmatmul.mubr.f32.gmra.mrb[6].mxu1 %v18058_v23  ;;  %16812 = vmatprep.subr.bf16.mxu0 %v16811_v57 }
 0x25b   : > { %14990 = vmatmul.mubr.f32.gmra.mrb[6].mxu0 %v18130_v47  ;;  %16046 = vmatpush3.bf16.msra.mxu1 %v16043_v39  ;;  %v11006_v39 = vld [vmem:[%s21371_s1 + $0x1500] sm:$0xff] }
 0x25c   : > { %16814 = vmatpush3.bf16.msra.mxu0 %v16811_v57  ;;  %13648 = vmatprep.mubr.f32.mxu1 %v18061_v24  ;;  %v11007_v57 = vld [vmem:[%s21371_s1 + $0x1508] sm:$0xff] }
 0x25d   : > { %14992 = vmatprep.mubr.f32.mxu0 %v18133_v48  ;;  %16048 = vmatprep.subr.bf16.mxu1 %v16047_v60  ;;  %v16831_v5 = vpack.c.bf16 %v11007_v57, %v11006_v39  ;;  %v10633_v39 = vld [vmem:[%s21371_s1 + $0x958] sm:$0xff]  ;;  %v11016_v57 = vld [vmem:[%s21371_s1 + $0x1550] sm:$0xff] }
 0x25e   : > { %13649 = vmatmul.mubr.f32.gmra.mrb[8].mxu1 %v18064_v25  ;;  %16816 = vmatprep.subr.bf16.mxu0 %v16815_v8 }
 0x25f   : > { %14993 = vmatmul.mubr.f32.gmra.mrb[8].mxu0 %v18136_v49  ;;  %16050 = vmatpush3.bf16.msra.mxu1 %v16047_v60  ;;  %v21404_v60 = vld [vmem:[#allocation11_spill] sm:$0xff] }
 0x260   : > { %16818 = vmatpush3.bf16.msra.mxu0 %v16815_v8  ;;  %13651 = vmatprep.mubr.f32.mxu1 %v18067_v26  ;;  %v11008_v8 = vld [vmem:[%s21371_s1 + $0x1510] sm:$0xff] }
 0x261   : > { %14995 = vmatprep.mubr.f32.mxu0 %v18139_v50  ;;  %16052 = vmatprep.subr.bf16.mxu1 %v16051_v12  ;;  %v16835_v51 = vpack.c.bf16 %v11009_v13, %v11008_v8  ;;  %v10635_v8 = vld [vmem:[%s21371_s1 + $0x968] sm:$0xff]  ;;  %v11018_v13 = vld [vmem:[%s21371_s1 + $0x1560] sm:$0xff] }
 0x262   : > { %13652 = vmatmul.mubr.f32.gmra.mrb[10].mxu1 %v18070_v27  ;;  %16820 = vmatprep.subr.bf16.mxu0 %v16819_v9 }
 0x263   : > { %14996 = vmatmul.mubr.f32.gmra.mrb[10].mxu0 %v21400_v7  ;;  %16054 = vmatpush3.bf16.msra.mxu1 %v16051_v12  ;;  %v10627_v12 = vld [vmem:[%s21371_s1 + $0x928] sm:$0xff] }
 0x264   : > { %16822 = vmatpush3.bf16.msra.mxu0 %v16819_v9  ;;  %13654 = vmatprep.mubr.f32.mxu1 %v18073_v28  ;;  %v16071_v9 = vpack.c.bf16 %v10627_v12, %v10626_v58  ;;  %v10636_v12 = vld [vmem:[%s21371_s1 + $0x970] sm:$0xff] }
 0x265   : > { %14998 = vmatprep.mubr.f32.mxu0 %v21401_v54  ;;  %16056 = vmatprep.subr.bf16.mxu1 %v16055_v1 }
 0x266   : > { %13655 = vmatmul.mubr.f32.gmra.mrb[12].mxu1 %v18076_v29  ;;  %16824 = vmatprep.subr.bf16.mxu0 %v16823_v63 }
 0x267   : > { %14999 = vmatmul.mubr.f32.gmra.mrb[12].mxu0 %v21402_v6  ;;  %16058 = vmatpush3.bf16.msra.mxu1 %v16055_v1  ;;  %v11013_v1 = vld [vmem:[%s21371_s1 + $0x1538] sm:$0xff] }
 0x268   : > { %16826 = vmatpush3.bf16.msra.mxu0 %v16823_v63  ;;  %13657 = vmatprep.mubr.f32.mxu1 %v18079_v30  ;;  %v16075_v63 = vpack.c.bf16 %v10629_v4, %v10628_v10  ;;  %v16843_v16 = vpack.c.bf16 %v11013_v1, %v11012_v0  ;;  %v10638_v4 = vld [vmem:[%s21371_s1 + $0x980] sm:$0xff]  ;;  %v10639_v0 = vld [vmem:[%s21371_s1 + $0x988] sm:$0xff] }
 0x269   : > { %15001 = vmatprep.mubr.f32.mxu0 %v21403_v55  ;;  %16060 = vmatprep.subr.bf16.mxu1 %v16059_v53  ;;  %v11022_v1 = vld [vmem:[%s21371_s1 + $0x1580] sm:$0xff] }
 0x26a   : > { %13658 = vmatmul.mubr.f32.gmra.mrb[14].mxu1 %v18082_v31  ;;  %16828 = vmatprep.subr.bf16.mxu0 %v16827_v59 }
 0x26b   : > { %15002 = vmatmul.mubr.f32.gmra.mrb[14].mxu0 %v21404_v60  ;;  %16062 = vmatpush3.bf16.msra.mxu1 %v16059_v53  ;;  %v11015_v53 = vld [vmem:[%s21371_s1 + $0x1548] sm:$0xff] }
 0x26c   : > { %16830 = vmatpush3.bf16.msra.mxu0 %v16827_v59  ;;  %13692 = vmatprep.mubr.f32.mxu1 %v18040_v17  ;;  %v11010_v17 = vld [vmem:[%s21371_s1 + $0x1520] sm:$0xff]  ;;  %v16079_v59 = vpack.c.bf16 %v10631_v3, %v10630_v40  ;;  %v16847_v52 = vpack.c.bf16 %v11015_v53, %v11014_v2  ;;  %v10640_v3 = vld [vmem:[%s21371_s1 + $0x990] sm:$0xff]  ;;  %v10641_v2 = vld [vmem:[%s21371_s1 + $0x998] sm:$0xff] }
 0x26d   : > { %15036 = vmatprep.mubr.f32.mxu0 %v18112_v41  ;;  %16064 = vmatprep.subr.bf16.mxu1 %v16063_v61  ;;  %v11011_v41 = vld [vmem:[%s21371_s1 + $0x1528] sm:$0xff] }
 0x26e   : > { %13693 = vmatmul.mubr.f32.vlgmr.msra.gmra.mrb[0].mxu1 %v18043_v18  ;;  %16832 = vmatprep.subr.bf16.mxu0 %v16831_v5  ;;  %v16839_v11 = vpack.c.bf16 %v11011_v41, %v11010_v17  ;;  %v10637_v17 = vld [vmem:[%s21371_s1 + $0x978] sm:$0xff]  ;;  %v11020_v41 = vld [vmem:[%s21371_s1 + $0x1570] sm:$0xff]  ;;  %v21405_v53 = vld [vmem:[#allocation12_spill] sm:$0xff] }
 0x26f   : > { %15037 = vmatmul.mubr.f32.vlgmr.msra.gmra.mrb[0].mxu0 %v18115_v42  ;;  %16066 = vmatpush3.bf16.msra.mxu1 %v16063_v61  ;;  %v11017_v61 = vld [vmem:[%s21371_s1 + $0x1558] sm:$0xff] }
 0x270   : > { %16834 = vmatpush3.bf16.msra.mxu0 %v16831_v5  ;;  %13695 = vmatprep.mubr.f32.mxu1 %v18046_v19  ;;  %v16083_v5 = vpack.c.bf16 %v10633_v39, %v10632_v15  ;;  %v16851_v14 = vpack.c.bf16 %v11017_v61, %v11016_v57  ;;  %v16099_v15 = vpack.c.bf16 %v10641_v2, %v10640_v3  ;;  %v10642_v57 = vld [vmem:[%s21371_s1 + $0x9a0] sm:$0xff]  ;;  %v10643_v61 = vld [vmem:[%s21371_s1 + $0x9a8] sm:$0xff] }
 0x271   : > { %15039 = vmatprep.mubr.f32.mxu0 %v18118_v43  ;;  %16068 = vmatprep.subr.bf16.mxu1 %v16067_v56  ;;  %v10650_v3 = vld [vmem:[%s21371_s1 + $0x9e0] sm:$0xff]  ;;  %v10651_v2 = vld [vmem:[%s21371_s1 + $0x9e8] sm:$0xff] }
 0x272   : > { %13696 = vmatmul.mubr.f32.gmra.mrb[2].mxu1 %v18049_v20  ;;  %16836 = vmatprep.subr.bf16.mxu0 %v16835_v51 }
 0x273   : > { %15040 = vmatmul.mubr.f32.gmra.mrb[2].mxu0 %v18121_v44  ;;  %16070 = vmatpush3.bf16.msra.mxu1 %v16067_v56  ;;  %v11019_v56 = vld [vmem:[%s21371_s1 + $0x1568] sm:$0xff] }
 0x274   : > { %16838 = vmatpush3.bf16.msra.mxu0 %v16835_v51  ;;  %13698 = vmatprep.mubr.f32.mxu1 %v18052_v21  ;;  %v16087_v51 = vpack.c.bf16 %v10635_v8, %v10634_v62  ;;  %v16855_v58 = vpack.c.bf16 %v11019_v56, %v11018_v13  ;;  %v10644_v62 = vld [vmem:[%s21371_s1 + $0x9b0] sm:$0xff]  ;;  %v10645_v8 = vld [vmem:[%s21371_s1 + $0x9b8] sm:$0xff] }
 0x275   : > { %15042 = vmatprep.mubr.f32.mxu0 %v18124_v45  ;;  %16072 = vmatprep.subr.bf16.mxu1 %v16071_v9  ;;  %v11028_v13 = vld [vmem:[%s21371_s1 + $0x15b0] sm:$0xff]  ;;  %v11029_v56 = vld [vmem:[%s21371_s1 + $0x15b8] sm:$0xff] }
 0x276   : > { %13699 = vmatmul.mubr.f32.gmra.mrb[4].mxu1 %v18055_v22  ;;  %16840 = vmatprep.subr.bf16.mxu0 %v16839_v11 }
 0x277   : > { %15043 = vmatmul.mubr.f32.gmra.mrb[4].mxu0 %v18127_v46  ;;  %16074 = vmatpush3.bf16.msra.mxu1 %v16071_v9  ;;  %v11021_v9 = vld [vmem:[%s21371_s1 + $0x1578] sm:$0xff] }
 0x278   : > { %16842 = vmatpush3.bf16.msra.mxu0 %v16839_v11  ;;  %13701 = vmatprep.mubr.f32.mxu1 %v18058_v23  ;;  %v16091_v11 = vpack.c.bf16 %v10637_v17, %v10636_v12  ;;  %v16859_v10 = vpack.c.bf16 %v11021_v9, %v11020_v41  ;;  %v10646_v12 = vld [vmem:[%s21371_s1 + $0x9c0] sm:$0xff]  ;;  %v10647_v17 = vld [vmem:[%s21371_s1 + $0x9c8] sm:$0xff] }
 0x279   : > { %15045 = vmatprep.mubr.f32.mxu0 %v18130_v47  ;;  %16076 = vmatprep.subr.bf16.mxu1 %v16075_v63  ;;  %v11030_v41 = vld [vmem:[%s21371_s1 + $0x15c0] sm:$0xff]  ;;  %v11031_v9 = vld [vmem:[%s21371_s1 + $0x15c8] sm:$0xff] }
 0x27a   : > { %13702 = vmatmul.mubr.f32.gmra.mrb[6].mxu1 %v18061_v24  ;;  %16844 = vmatprep.subr.bf16.mxu0 %v16843_v16 }
 0x27b   : > { %15046 = vmatmul.mubr.f32.gmra.mrb[6].mxu0 %v18133_v48  ;;  %16078 = vmatpush3.bf16.msra.mxu1 %v16075_v63  ;;  %v11023_v63 = vld [vmem:[%s21371_s1 + $0x1588] sm:$0xff] }
 0x27c   : > { %16846 = vmatpush3.bf16.msra.mxu0 %v16843_v16  ;;  %13704 = vmatprep.mubr.f32.mxu1 %v18064_v25  ;;  %v16095_v16 = vpack.c.bf16 %v10639_v0, %v10638_v4  ;;  %v16863_v40 = vpack.c.bf16 %v11023_v63, %v11022_v1  ;;  %v10648_v4 = vld [vmem:[%s21371_s1 + $0x9d0] sm:$0xff]  ;;  %v10649_v0 = vld [vmem:[%s21371_s1 + $0x9d8] sm:$0xff] }
 0x27d   : > { %15048 = vmatprep.mubr.f32.mxu0 %v18136_v49  ;;  %16080 = vmatprep.subr.bf16.mxu1 %v16079_v59  ;;  %v11032_v1 = vld [vmem:[%s21371_s1 + $0x15d0] sm:$0xff]  ;;  %v11033_v63 = vld [vmem:[%s21371_s1 + $0x15d8] sm:$0xff] }
 0x27e   : > { %13705 = vmatmul.mubr.f32.gmra.mrb[8].mxu1 %v18067_v26  ;;  %16848 = vmatprep.subr.bf16.mxu0 %v16847_v52 }
 0x27f   : > { %15049 = vmatmul.mubr.f32.gmra.mrb[8].mxu0 %v18139_v50  ;;  %16082 = vmatpush3.bf16.msra.mxu1 %v16079_v59  ;;  %v11024_v59 = vld [vmem:[%s21371_s1 + $0x1590] sm:$0xff] }
 0x280   : > { %16850 = vmatpush3.bf16.msra.mxu0 %v16847_v52  ;;  %13707 = vmatprep.mubr.f32.mxu1 %v18070_v27  ;;  %v11025_v52 = vld [vmem:[%s21371_s1 + $0x1598] sm:$0xff] }
 0x281   : > { %15051 = vmatprep.mubr.f32.mxu0 %v21400_v7  ;;  %16084 = vmatprep.subr.bf16.mxu1 %v16083_v5  ;;  %v16867_v39 = vpack.c.bf16 %v11025_v52, %v11024_v59  ;;  %v11034_v59 = vld [vmem:[%s21371_s1 + $0x15e0] sm:$0xff]  ;;  %v11035_v52 = vld [vmem:[%s21371_s1 + $0x15e8] sm:$0xff] }
 0x282   : > { %13708 = vmatmul.mubr.f32.gmra.mrb[10].mxu1 %v18073_v28  ;;  %16852 = vmatprep.subr.bf16.mxu0 %v16851_v14 }
 0x283   : > { %15052 = vmatmul.mubr.f32.gmra.mrb[10].mxu0 %v21401_v54  ;;  %16086 = vmatpush3.bf16.msra.mxu1 %v16083_v5  ;;  %v16103_v5 = vpack.c.bf16 %v10643_v61, %v10642_v57  ;;  %v10652_v57 = vld [vmem:[%s21371_s1 + $0x9f0] sm:$0xff]  ;;  %v10653_v61 = vld [vmem:[%s21371_s1 + $0x9f8] sm:$0xff] }
 0x284   : > { %16854 = vmatpush3.bf16.msra.mxu0 %v16851_v14  ;;  %13710 = vmatprep.mubr.f32.mxu1 %v18076_v29 }
 0x285   : > { %15054 = vmatprep.mubr.f32.mxu0 %v21402_v6  ;;  %16088 = vmatprep.subr.bf16.mxu1 %v16087_v51 }
 0x286   : > { %13711 = vmatmul.mubr.f32.gmra.mrb[12].mxu1 %v18079_v30  ;;  %16856 = vmatprep.subr.bf16.mxu0 %v16855_v58 }
 0x287   : > { %15055 = vmatmul.mubr.f32.gmra.mrb[12].mxu0 %v21403_v55  ;;  %16090 = vmatpush3.bf16.msra.mxu1 %v16087_v51  ;;  %v16107_v51 = vpack.c.bf16 %v10645_v8, %v10644_v62  ;;  %v10654_v62 = vld [vmem:[%s21371_s1 + $0xa00] sm:$0xff]  ;;  %v10655_v8 = vld [vmem:[%s21371_s1 + $0xa08] sm:$0xff] }
 0x288   : > { %16858 = vmatpush3.bf16.msra.mxu0 %v16855_v58  ;;  %13713 = vmatprep.mubr.f32.mxu1 %v18082_v31  ;;  %v16875_v58 = vpack.c.bf16 %v11029_v56, %v11028_v13  ;;  %v11038_v13 = vld [vmem:[%s21371_s1 + $0x1600] sm:$0xff]  ;;  %v11039_v56 = vld [vmem:[%s21371_s1 + $0x1608] sm:$0xff] }
 0x289   : > { %15057 = vmatprep.mubr.f32.mxu0 %v21404_v60  ;;  %16092 = vmatprep.subr.bf16.mxu1 %v16091_v11 }
 0x28a   : > { %13714 = vmatmul.mubr.f32.gmra.mrb[14].mxu1 %v18085_v32  ;;  %16860 = vmatprep.subr.bf16.mxu0 %v16859_v10 }
 0x28b   : > { %15058 = vmatmul.mubr.f32.gmra.mrb[14].mxu0 %v21405_v53  ;;  %16094 = vmatpush3.bf16.msra.mxu1 %v16091_v11  ;;  %v16111_v11 = vpack.c.bf16 %v10647_v17, %v10646_v12  ;;  %v10656_v12 = vld [vmem:[%s21371_s1 + $0xa10] sm:$0xff]  ;;  %v10657_v17 = vld [vmem:[%s21371_s1 + $0xa18] sm:$0xff] }
 0x28c   : > { %16862 = vmatpush3.bf16.msra.mxu0 %v16859_v10  ;;  %13748 = vmatprep.mubr.f32.mxu1 %v18043_v18  ;;  %v11026_v18 = vld [vmem:[%s21371_s1 + $0x15a0] sm:$0xff]  ;;  %v16879_v10 = vpack.c.bf16 %v11031_v9, %v11030_v41  ;;  %v21406_v41 = vld [vmem:[#allocation13_spill] sm:$0xff] }
 0x28d   : > { %15092 = vmatprep.mubr.f32.mxu0 %v18115_v42  ;;  %16096 = vmatprep.subr.bf16.mxu1 %v16095_v16  ;;  %v11027_v42 = vld [vmem:[%s21371_s1 + $0x15a8] sm:$0xff]  ;;  %v11040_v9 = vld [vmem:[%s21371_s1 + $0x1610] sm:$0xff] }
 0x28e   : > { %13749 = vmatmul.mubr.f32.vlgmr.msra.gmra.mrb[0].mxu1 %v18046_v19  ;;  %16864 = vmatprep.subr.bf16.mxu0 %v16863_v40  ;;  %v16871_v14 = vpack.c.bf16 %v11027_v42, %v11026_v18  ;;  %v11036_v18 = vld [vmem:[%s21371_s1 + $0x15f0] sm:$0xff]  ;;  %v11037_v42 = vld [vmem:[%s21371_s1 + $0x15f8] sm:$0xff] }
 0x28f   : > { %15093 = vmatmul.mubr.f32.vlgmr.msra.gmra.mrb[0].mxu0 %v18118_v43  ;;  %16098 = vmatpush3.bf16.msra.mxu1 %v16095_v16  ;;  %v16115_v16 = vpack.c.bf16 %v10649_v0, %v10648_v4  ;;  %v10658_v0 = vld [vmem:[%s21371_s1 + $0xa20] sm:$0xff] }
 0x290   : > { %16866 = vmatpush3.bf16.msra.mxu0 %v16863_v40  ;;  %13751 = vmatprep.mubr.f32.mxu1 %v18049_v20  ;;  %v16883_v40 = vpack.c.bf16 %v11033_v63, %v11032_v1  ;;  %v10659_v1 = vld [vmem:[%s21371_s1 + $0xa28] sm:$0xff] }
 0x291   : > { %15095 = vmatprep.mubr.f32.mxu0 %v18121_v44  ;;  %16100 = vmatprep.subr.bf16.mxu1 %v16099_v15  ;;  %v16135_v63 = vpack.c.bf16 %v10659_v1, %v10658_v0  ;;  %v10669_v0 = vld [vmem:[%s21371_s1 + $0xa78] sm:$0xff]  ;;  %v11052_v1 = vld [vmem:[%s21371_s1 + $0x1670] sm:$0xff] }
 0x292   : > { %13752 = vmatmul.mubr.f32.gmra.mrb[2].mxu1 %v18052_v21  ;;  %16868 = vmatprep.subr.bf16.mxu0 %v16867_v39 }
 0x293   : > { %15096 = vmatmul.mubr.f32.gmra.mrb[2].mxu0 %v18124_v45  ;;  %16102 = vmatpush3.bf16.msra.mxu1 %v16099_v15  ;;  %v16119_v15 = vpack.c.bf16 %v10651_v2, %v10650_v3  ;;  %v10661_v3 = vld [vmem:[%s21371_s1 + $0xa38] sm:$0xff]  ;;  %v11044_v2 = vld [vmem:[%s21371_s1 + $0x1630] sm:$0xff] }
 0x294   : > { %16870 = vmatpush3.bf16.msra.mxu0 %v16867_v39  ;;  %13754 = vmatprep.mubr.f32.mxu1 %v18055_v22  ;;  %v16887_v39 = vpack.c.bf16 %v11035_v52, %v11034_v59  ;;  %v11045_v59 = vld [vmem:[%s21371_s1 + $0x1638] sm:$0xff] }
 0x295   : > { %15098 = vmatprep.mubr.f32.mxu0 %v18127_v46  ;;  %16104 = vmatprep.subr.bf16.mxu1 %v16103_v5 }
 0x296   : > { %13755 = vmatmul.mubr.f32.gmra.mrb[4].mxu1 %v18058_v23  ;;  %16872 = vmatprep.subr.bf16.mxu0 %v16871_v14 }
 0x297   : > { %15099 = vmatmul.mubr.f32.gmra.mrb[4].mxu0 %v18130_v47  ;;  %16106 = vmatpush3.bf16.msra.mxu1 %v16103_v5  ;;  %v16123_v5 = vpack.c.bf16 %v10653_v61, %v10652_v57  ;;  %v10663_v57 = vld [vmem:[%s21371_s1 + $0xa48] sm:$0xff]  ;;  %v11046_v61 = vld [vmem:[%s21371_s1 + $0x1640] sm:$0xff] }
 0x298   : > { %16874 = vmatpush3.bf16.msra.mxu0 %v16871_v14  ;;  %13757 = vmatprep.mubr.f32.mxu1 %v18061_v24  ;;  %v16891_v14 = vpack.c.bf16 %v11037_v42, %v11036_v18  ;;  %v11047_v18 = vld [vmem:[%s21371_s1 + $0x1648] sm:$0xff] }
 0x299   : > { %15101 = vmatprep.mubr.f32.mxu0 %v18133_v48  ;;  %16108 = vmatprep.subr.bf16.mxu1 %v16107_v51 }
 0x29a   : > { %13758 = vmatmul.mubr.f32.gmra.mrb[6].mxu1 %v18064_v25  ;;  %16876 = vmatprep.subr.bf16.mxu0 %v16875_v58 }
 0x29b   : > { %15102 = vmatmul.mubr.f32.gmra.mrb[6].mxu0 %v18136_v49  ;;  %16110 = vmatpush3.bf16.msra.mxu1 %v16107_v51  ;;  %v16127_v51 = vpack.c.bf16 %v10655_v8, %v10654_v62  ;;  %v10665_v62 = vld [vmem:[%s21371_s1 + $0xa58] sm:$0xff]  ;;  %v11048_v8 = vld [vmem:[%s21371_s1 + $0x1650] sm:$0xff] }
 0x29c   : > { %16878 = vmatpush3.bf16.msra.mxu0 %v16875_v58  ;;  %13760 = vmatprep.mubr.f32.mxu1 %v18067_v26  ;;  %v16895_v58 = vpack.c.bf16 %v11039_v56, %v11038_v13  ;;  %v11049_v13 = vld [vmem:[%s21371_s1 + $0x1658] sm:$0xff] }
 0x29d   : > { %15104 = vmatprep.mubr.f32.mxu0 %v18139_v50  ;;  %16112 = vmatprep.subr.bf16.mxu1 %v16111_v11 }
 0x29e   : > { %13761 = vmatmul.mubr.f32.gmra.mrb[8].mxu1 %v18070_v27  ;;  %16880 = vmatprep.subr.bf16.mxu0 %v16879_v10 }
 0x29f   : > { %15105 = vmatmul.mubr.f32.gmra.mrb[8].mxu0 %v21400_v7  ;;  %16114 = vmatpush3.bf16.msra.mxu1 %v16111_v11  ;;  %v11041_v11 = vld [vmem:[%s21371_s1 + $0x1618] sm:$0xff] }
 0x2a0   : > { %16882 = vmatpush3.bf16.msra.mxu0 %v16879_v10  ;;  %13763 = vmatprep.mubr.f32.mxu1 %v18073_v28  ;;  %v16131_v10 = vpack.c.bf16 %v10657_v17, %v10656_v12  ;;  %v16899_v4 = vpack.c.bf16 %v11041_v11, %v11040_v9  ;;  %v10667_v12 = vld [vmem:[%s21371_s1 + $0xa68] sm:$0xff]  ;;  %v11050_v17 = vld [vmem:[%s21371_s1 + $0x1660] sm:$0xff] }
 0x2a1   : > { %15107 = vmatprep.mubr.f32.mxu0 %v21401_v54  ;;  %16116 = vmatprep.subr.bf16.mxu1 %v16115_v16  ;;  %v11051_v9 = vld [vmem:[%s21371_s1 + $0x1668] sm:$0xff] }
 0x2a2   : > { %13764 = vmatmul.mubr.f32.gmra.mrb[10].mxu1 %v18076_v29  ;;  %16884 = vmatprep.subr.bf16.mxu0 %v16883_v40 }
 0x2a3   : > { %15108 = vmatmul.mubr.f32.gmra.mrb[10].mxu0 %v21402_v6  ;;  %16118 = vmatpush3.bf16.msra.mxu1 %v16115_v16 }
 0x2a4   : > { %16886 = vmatpush3.bf16.msra.mxu0 %v16883_v40  ;;  %13766 = vmatprep.mubr.f32.mxu1 %v18079_v30  ;;  %v10660_v40 = vld [vmem:[%s21371_s1 + $0xa30] sm:$0xff] }
 0x2a5   : > { %15110 = vmatprep.mubr.f32.mxu0 %v21403_v55  ;;  %16120 = vmatprep.subr.bf16.mxu1 %v16119_v15  ;;  %v16139_v52 = vpack.c.bf16 %v10661_v3, %v10660_v40  ;;  %v10671_v40 = vld [vmem:[%s21371_s1 + $0xa88] sm:$0xff]  ;;  %v11054_v3 = vld [vmem:[%s21371_s1 + $0x1680] sm:$0xff] }
 0x2a6   : > { %13767 = vmatmul.mubr.f32.gmra.mrb[12].mxu1 %v18082_v31  ;;  %16888 = vmatprep.subr.bf16.mxu0 %v16887_v39 }
 0x2a7   : > { %15111 = vmatmul.mubr.f32.gmra.mrb[12].mxu0 %v21404_v60  ;;  %16122 = vmatpush3.bf16.msra.mxu1 %v16119_v15  ;;  %v16907_v15 = vpack.c.bf16 %v11045_v59, %v11044_v2  ;;  %v11055_v2 = vld [vmem:[%s21371_s1 + $0x1688] sm:$0xff] }
 0x2a8   : > { %16890 = vmatpush3.bf16.msra.mxu0 %v16887_v39  ;;  %13769 = vmatprep.mubr.f32.mxu1 %v18085_v32  ;;  %v10662_v39 = vld [vmem:[%s21371_s1 + $0xa40] sm:$0xff] }
 0x2a9   : > { %15113 = vmatprep.mubr.f32.mxu0 %v21405_v53  ;;  %16124 = vmatprep.subr.bf16.mxu1 %v16123_v5  ;;  %v16143_v42 = vpack.c.bf16 %v10663_v57, %v10662_v39  ;;  %v10673_v39 = vld [vmem:[%s21371_s1 + $0xa98] sm:$0xff] }
 0x2aa   : > { %13770 = vmatmul.mubr.f32.gmra.mrb[14].mxu1 %v18088_v33  ;;  %16892 = vmatprep.subr.bf16.mxu0 %v16891_v14  ;;  %v21407_v57 = vld [vmem:[#allocation14_spill] sm:$0xff] }
 0x2ab   : > { %15114 = vmatmul.mubr.f32.gmra.mrb[14].mxu0 %v21406_v41  ;;  %16126 = vmatpush3.bf16.msra.mxu1 %v16123_v5  ;;  %v16911_v5 = vpack.c.bf16 %v11047_v18, %v11046_v61  ;;  %v11056_v61 = vld [vmem:[%s21371_s1 + $0x1690] sm:$0xff]  ;;  %v11057_v18 = vld [vmem:[%s21371_s1 + $0x1698] sm:$0xff] }
 0x2ac   : > { %16894 = vmatpush3.bf16.msra.mxu0 %v16891_v14  ;;  %13804 = vmatprep.mubr.f32.mxu1 %v18046_v19  ;;  %v11042_v19 = vld [vmem:[%s21371_s1 + $0x1620] sm:$0xff]  ;;  %v10664_v14 = vld [vmem:[%s21371_s1 + $0xa50] sm:$0xff] }
 0x2ad   : > { %15148 = vmatprep.mubr.f32.mxu0 %v18118_v43  ;;  %16128 = vmatprep.subr.bf16.mxu1 %v16127_v51  ;;  %v11043_v43 = vld [vmem:[%s21371_s1 + $0x1628] sm:$0xff]  ;;  %v16147_v56 = vpack.c.bf16 %v10665_v62, %v10664_v14  ;;  %v10674_v14 = vld [vmem:[%s21371_s1 + $0xaa0] sm:$0xff] }
 0x2ae   : > { %13805 = vmatmul.mubr.f32.vlgmr.msra.gmra.mrb[0].mxu1 %v18049_v20  ;;  %16896 = vmatprep.subr.bf16.mxu0 %v16895_v58  ;;  %v16903_v16 = vpack.c.bf16 %v11043_v43, %v11042_v19  ;;  %v11053_v19 = vld [vmem:[%s21371_s1 + $0x1678] sm:$0xff]  ;;  %v10675_v62 = vld [vmem:[%s21371_s1 + $0xaa8] sm:$0xff] }
 0x2af   : > { %15149 = vmatmul.mubr.f32.vlgmr.msra.gmra.mrb[0].mxu0 %v18121_v44  ;;  %16130 = vmatpush3.bf16.msra.mxu1 %v16127_v51  ;;  %v16915_v51 = vpack.c.bf16 %v11049_v13, %v11048_v8  ;;  %v16167_v8 = vpack.c.bf16 %v10675_v62, %v10674_v14  ;;  %v11068_v14 = vld [vmem:[%s21371_s1 + $0x16f0] sm:$0xff]  ;;  %v11069_v62 = vld [vmem:[%s21371_s1 + $0x16f8] sm:$0xff] }
 0x2b0   : > { %16898 = vmatpush3.bf16.msra.mxu0 %v16895_v58  ;;  %13807 = vmatprep.mubr.f32.mxu1 %v18052_v21  ;;  %v10666_v58 = vld [vmem:[%s21371_s1 + $0xa60] sm:$0xff] }
 0x2b1   : > { %15151 = vmatprep.mubr.f32.mxu0 %v18124_v45  ;;  %16132 = vmatprep.subr.bf16.mxu1 %v16131_v10  ;;  %v16151_v11 = vpack.c.bf16 %v10667_v12, %v10666_v58  ;;  %v11060_v58 = vld [vmem:[%s21371_s1 + $0x16b0] sm:$0xff]  ;;  %v11061_v12 = vld [vmem:[%s21371_s1 + $0x16b8] sm:$0xff] }
 0x2b2   : > { %13808 = vmatmul.mubr.f32.gmra.mrb[2].mxu1 %v18055_v22  ;;  %16900 = vmatprep.subr.bf16.mxu0 %v16899_v4 }
 0x2b3   : > { %15152 = vmatmul.mubr.f32.gmra.mrb[2].mxu0 %v18127_v46  ;;  %16134 = vmatpush3.bf16.msra.mxu1 %v16131_v10  ;;  %v16919_v10 = vpack.c.bf16 %v11051_v9, %v11050_v17  ;;  %v16939_v9 = vpack.c.bf16 %v11061_v12, %v11060_v58 }
 0x2b4   : > { %16902 = vmatpush3.bf16.msra.mxu0 %v16899_v4  ;;  %13810 = vmatprep.mubr.f32.mxu1 %v18058_v23  ;;  %v10668_v4 = vld [vmem:[%s21371_s1 + $0xa70] sm:$0xff] }
 0x2b5   : > { %15154 = vmatprep.mubr.f32.mxu0 %v18130_v47  ;;  %16136 = vmatprep.subr.bf16.mxu1 %v16135_v63  ;;  %v16155_v43 = vpack.c.bf16 %v10669_v0, %v10668_v4  ;;  %v11062_v4 = vld [vmem:[%s21371_s1 + $0x16c0] sm:$0xff]  ;;  %v11063_v0 = vld [vmem:[%s21371_s1 + $0x16c8] sm:$0xff] }
 0x2b6   : > { %13811 = vmatmul.mubr.f32.gmra.mrb[4].mxu1 %v18061_v24  ;;  %16904 = vmatprep.subr.bf16.mxu0 %v16903_v16 }
 0x2b7   : > { %15155 = vmatmul.mubr.f32.gmra.mrb[4].mxu0 %v18133_v48  ;;  %16138 = vmatpush3.bf16.msra.mxu1 %v16135_v63  ;;  %v16923_v63 = vpack.c.bf16 %v11053_v19, %v11052_v1  ;;  %v16943_v19 = vpack.c.bf16 %v11063_v0, %v11062_v4  ;;  %v11073_v4 = vld [vmem:[%s21371_s1 + $0x1718] sm:$0xff] }
 0x2b8   : > { %16906 = vmatpush3.bf16.msra.mxu0 %v16903_v16  ;;  %13813 = vmatprep.mubr.f32.mxu1 %v18064_v25  ;;  %v10670_v16 = vld [vmem:[%s21371_s1 + $0xa80] sm:$0xff] }
 0x2b9   : > { %15157 = vmatprep.mubr.f32.mxu0 %v18136_v49  ;;  %16140 = vmatprep.subr.bf16.mxu1 %v16139_v52  ;;  %v16159_v59 = vpack.c.bf16 %v10671_v40, %v10670_v16  ;;  %v11064_v16 = vld [vmem:[%s21371_s1 + $0x16d0] sm:$0xff]  ;;  %v11065_v40 = vld [vmem:[%s21371_s1 + $0x16d8] sm:$0xff] }
 0x2ba   : > { %13814 = vmatmul.mubr.f32.gmra.mrb[6].mxu1 %v18067_v26  ;;  %16908 = vmatprep.subr.bf16.mxu0 %v16907_v15 }
 0x2bb   : > { %15158 = vmatmul.mubr.f32.gmra.mrb[6].mxu0 %v18139_v50  ;;  %16142 = vmatpush3.bf16.msra.mxu1 %v16139_v52  ;;  %v16927_v52 = vpack.c.bf16 %v11055_v2, %v11054_v3  ;;  %v16947_v2 = vpack.c.bf16 %v11065_v40, %v11064_v16  ;;  %v10692_v40 = vld [vmem:[%s21371_s1 + $0xb30] sm:$0xff] }
 0x2bc   : > { %16910 = vmatpush3.bf16.msra.mxu0 %v16907_v15  ;;  %13816 = vmatprep.mubr.f32.mxu1 %v18070_v27  ;;  %v10672_v15 = vld [vmem:[%s21371_s1 + $0xa90] sm:$0xff] }
 0x2bd   : > { %15160 = vmatprep.mubr.f32.mxu0 %v21400_v7  ;;  %16144 = vmatprep.subr.bf16.mxu1 %v16143_v42 }
 0x2be   : > { %13817 = vmatmul.mubr.f32.gmra.mrb[8].mxu1 %v18073_v28  ;;  %16912 = vmatprep.subr.bf16.mxu0 %v16911_v5 }
 0x2bf   : > { %15161 = vmatmul.mubr.f32.gmra.mrb[8].mxu0 %v21401_v54  ;;  %16146 = vmatpush3.bf16.msra.mxu1 %v16143_v42  ;;  %v16163_v42 = vpack.c.bf16 %v10673_v39, %v10672_v15  ;;  %v11066_v15 = vld [vmem:[%s21371_s1 + $0x16e0] sm:$0xff]  ;;  %v11067_v39 = vld [vmem:[%s21371_s1 + $0x16e8] sm:$0xff] }
 0x2c0   : > { %16914 = vmatpush3.bf16.msra.mxu0 %v16911_v5  ;;  %13819 = vmatprep.mubr.f32.mxu1 %v18076_v29  ;;  %v16931_v5 = vpack.c.bf16 %v11057_v18, %v11056_v61  ;;  %v16951_v18 = vpack.c.bf16 %v11067_v39, %v11066_v15  ;;  %v10694_v39 = vld [vmem:[%s21371_s1 + $0xb40] sm:$0xff] }
 0x2c1   : > { %15163 = vmatprep.mubr.f32.mxu0 %v21402_v6  ;;  %16148 = vmatprep.subr.bf16.mxu1 %v16147_v56 }
 0x2c2   : > { %13820 = vmatmul.mubr.f32.gmra.mrb[10].mxu1 %v18079_v30  ;;  %16916 = vmatprep.subr.bf16.mxu0 %v16915_v51 }
 0x2c3   : > { %15164 = vmatmul.mubr.f32.gmra.mrb[10].mxu0 %v21403_v55  ;;  %16150 = vmatpush3.bf16.msra.mxu1 %v16147_v56  ;;  %v10676_v56 = vld [vmem:[%s21371_s1 + $0xab0] sm:$0xff] }
 0x2c4   : > { %16918 = vmatpush3.bf16.msra.mxu0 %v16915_v51  ;;  %13822 = vmatprep.mubr.f32.mxu1 %v18082_v31  ;;  %v10677_v51 = vld [vmem:[%s21371_s1 + $0xab8] sm:$0xff] }
 0x2c5   : > { %15166 = vmatprep.mubr.f32.mxu0 %v21404_v60  ;;  %16152 = vmatprep.subr.bf16.mxu1 %v16151_v11  ;;  %v16171_v17 = vpack.c.bf16 %v10677_v51, %v10676_v56  ;;  %v11070_v56 = vld [vmem:[%s21371_s1 + $0x1700] sm:$0xff]  ;;  %v11071_v51 = vld [vmem:[%s21371_s1 + $0x1708] sm:$0xff] }
 0x2c6   : > { %13823 = vmatmul.mubr.f32.gmra.mrb[12].mxu1 %v18085_v32  ;;  %16920 = vmatprep.subr.bf16.mxu0 %v16919_v10  ;;  %v16959_v12 = vpack.c.bf16 %v11071_v51, %v11070_v56  ;;  %v10698_v51 = vld [vmem:[%s21371_s1 + $0xb60] sm:$0xff] }
 0x2c7   : > { %15167 = vmatmul.mubr.f32.gmra.mrb[12].mxu0 %v21405_v53  ;;  %16154 = vmatpush3.bf16.msra.mxu1 %v16151_v11  ;;  %v10678_v11 = vld [vmem:[%s21371_s1 + $0xac0] sm:$0xff] }
 0x2c8   : > { %16922 = vmatpush3.bf16.msra.mxu0 %v16919_v10  ;;  %13825 = vmatprep.mubr.f32.mxu1 %v18088_v33  ;;  %v10679_v10 = vld [vmem:[%s21371_s1 + $0xac8] sm:$0xff] }
 0x2c9   : > { %15169 = vmatprep.mubr.f32.mxu0 %v21406_v41  ;;  %16156 = vmatprep.subr.bf16.mxu1 %v16155_v43  ;;  %v16175_v1 = vpack.c.bf16 %v10679_v10, %v10678_v11  ;;  %v21408_v11 = vld [vmem:[#allocation15_spill] sm:$0xff]  ;;  %v11072_v10 = vld [vmem:[%s21371_s1 + $0x1710] sm:$0xff] }
 0x2ca   : > { %13826 = vmatmul.mubr.f32.gmra.mrb[14].mxu1 %v18091_v34  ;;  %16924 = vmatprep.subr.bf16.mxu0 %v16923_v63 }
 0x2cb   : > { %15170 = vmatmul.mubr.f32.gmra.mrb[14].mxu0 %v21407_v57  ;;  %16158 = vmatpush3.bf16.msra.mxu1 %v16155_v43  ;;  %v10680_v43 = vld [vmem:[%s21371_s1 + $0xad0] sm:$0xff] }
 0x2cc   : > { %16926 = vmatpush3.bf16.msra.mxu0 %v16923_v63  ;;  %13860 = vmatprep.mubr.f32.mxu1 %v18049_v20  ;;  %v11058_v20 = vld [vmem:[%s21371_s1 + $0x16a0] sm:$0xff]  ;;  %v10681_v63 = vld [vmem:[%s21371_s1 + $0xad8] sm:$0xff] }
 0x2cd   : > { %15204 = vmatprep.mubr.f32.mxu0 %v18121_v44  ;;  %16160 = vmatprep.subr.bf16.mxu1 %v16159_v59  ;;  %v11059_v44 = vld [vmem:[%s21371_s1 + $0x16a8] sm:$0xff]  ;;  %v16179_v3 = vpack.c.bf16 %v10681_v63, %v10680_v43 }
 0x2ce   : > { %13861 = vmatmul.mubr.f32.vlgmr.msra.gmra.mrb[0].mxu1 %v18052_v21  ;;  %16928 = vmatprep.subr.bf16.mxu0 %v16927_v52  ;;  %v16935_v13 = vpack.c.bf16 %v11059_v44, %v11058_v20  ;;  %v16955_v44 = vpack.c.bf16 %v11069_v62, %v11068_v14  ;;  %v10691_v43 = vld [vmem:[%s21371_s1 + $0xb28] sm:$0xff]  ;;  %v10696_v62 = vld [vmem:[%s21371_s1 + $0xb50] sm:$0xff] }
 0x2cf   : > { %15205 = vmatmul.mubr.f32.vlgmr.msra.gmra.mrb[0].mxu0 %v18124_v45  ;;  %16162 = vmatpush3.bf16.msra.mxu1 %v16159_v59  ;;  %v10682_v59 = vld [vmem:[%s21371_s1 + $0xae0] sm:$0xff] }
 0x2d0   : > { %16930 = vmatpush3.bf16.msra.mxu0 %v16927_v52  ;;  %13863 = vmatprep.mubr.f32.mxu1 %v18055_v22  ;;  %v10683_v52 = vld [vmem:[%s21371_s1 + $0xae8] sm:$0xff] }
 0x2d1   : > { %15207 = vmatprep.mubr.f32.mxu0 %v18127_v46  ;;  %16164 = vmatprep.subr.bf16.mxu1 %v16163_v42  ;;  %v16183_v61 = vpack.c.bf16 %v10683_v52, %v10682_v59  ;;  %v11077_v59 = vld [vmem:[%s21371_s1 + $0x1738] sm:$0xff] }
 0x2d2   : > { %13864 = vmatmul.mubr.f32.gmra.mrb[2].mxu1 %v18058_v23  ;;  %16932 = vmatprep.subr.bf16.mxu0 %v16931_v5 }
 0x2d3   : > { %15208 = vmatmul.mubr.f32.gmra.mrb[2].mxu0 %v18130_v47  ;;  %16166 = vmatpush3.bf16.msra.mxu1 %v16163_v42  ;;  %v10684_v42 = vld [vmem:[%s21371_s1 + $0xaf0] sm:$0xff] }
 0x2d4   : > { %16934 = vmatpush3.bf16.msra.mxu0 %v16931_v5  ;;  %13866 = vmatprep.mubr.f32.mxu1 %v18061_v24  ;;  %v10685_v5 = vld [vmem:[%s21371_s1 + $0xaf8] sm:$0xff] }
 0x2d5   : > { %15210 = vmatprep.mubr.f32.mxu0 %v18133_v48  ;;  %16168 = vmatprep.subr.bf16.mxu1 %v16167_v8  ;;  %v16187_v20 = vpack.c.bf16 %v10685_v5, %v10684_v42  ;;  %v11079_v42 = vld [vmem:[%s21371_s1 + $0x1748] sm:$0xff] }
 0x2d6   : > { %13867 = vmatmul.mubr.f32.gmra.mrb[4].mxu1 %v18064_v25  ;;  %16936 = vmatprep.subr.bf16.mxu0 %v16935_v13 }
 0x2d7   : > { %15211 = vmatmul.mubr.f32.gmra.mrb[4].mxu0 %v18136_v49  ;;  %16170 = vmatpush3.bf16.msra.mxu1 %v16167_v8  ;;  %v10686_v8 = vld [vmem:[%s21371_s1 + $0xb00] sm:$0xff] }
 0x2d8   : > { %16938 = vmatpush3.bf16.msra.mxu0 %v16935_v13  ;;  %13869 = vmatprep.mubr.f32.mxu1 %v18067_v26  ;;  %v10687_v13 = vld [vmem:[%s21371_s1 + $0xb08] sm:$0xff] }
 0x2d9   : > { %15213 = vmatprep.mubr.f32.mxu0 %v18139_v50  ;;  %16172 = vmatprep.subr.bf16.mxu1 %v16171_v17  ;;  %v16191_v58 = vpack.c.bf16 %v10687_v13, %v10686_v8  ;;  %v11081_v8 = vld [vmem:[%s21371_s1 + $0x1758] sm:$0xff] }
 0x2da   : > { %13870 = vmatmul.mubr.f32.gmra.mrb[6].mxu1 %v18070_v27  ;;  %16940 = vmatprep.subr.bf16.mxu0 %v16939_v9 }
 0x2db   : > { %15214 = vmatmul.mubr.f32.gmra.mrb[6].mxu0 %v21400_v7  ;;  %16174 = vmatpush3.bf16.msra.mxu1 %v16171_v17  ;;  %v10688_v17 = vld [vmem:[%s21371_s1 + $0xb10] sm:$0xff] }
 0x2dc   : > { %16942 = vmatpush3.bf16.msra.mxu0 %v16939_v9  ;;  %13872 = vmatprep.mubr.f32.mxu1 %v18073_v28  ;;  %v10689_v9 = vld [vmem:[%s21371_s1 + $0xb18] sm:$0xff] }
 0x2dd   : > { %15216 = vmatprep.mubr.f32.mxu0 %v21401_v54  ;;  %16176 = vmatprep.subr.bf16.mxu1 %v16175_v1  ;;  %v16195_v0 = vpack.c.bf16 %v10689_v9, %v10688_v17  ;;  %v11083_v17 = vld [vmem:[%s21371_s1 + $0x1768] sm:$0xff] }
 0x2de   : > { %13873 = vmatmul.mubr.f32.gmra.mrb[8].mxu1 %v18076_v29  ;;  %16944 = vmatprep.subr.bf16.mxu0 %v16943_v19 }
 0x2df   : > { %15217 = vmatmul.mubr.f32.gmra.mrb[8].mxu0 %v21402_v6  ;;  %16178 = vmatpush3.bf16.msra.mxu1 %v16175_v1  ;;  %v16963_v1 = vpack.c.bf16 %v11073_v4, %v11072_v10  ;;  %v10700_v4 = vld [vmem:[%s21371_s1 + $0xb70] sm:$0xff] }
 0x2e0   : > { %16946 = vmatpush3.bf16.msra.mxu0 %v16943_v19  ;;  %13875 = vmatprep.mubr.f32.mxu1 %v18079_v30  ;;  %v10690_v19 = vld [vmem:[%s21371_s1 + $0xb20] sm:$0xff] }
 0x2e1   : > { %15219 = vmatprep.mubr.f32.mxu0 %v21403_v55  ;;  %16180 = vmatprep.subr.bf16.mxu1 %v16179_v3  ;;  %v16199_v63 = vpack.c.bf16 %v10691_v43, %v10690_v19  ;;  %v11085_v19 = vld [vmem:[%s21371_s1 + $0x1778] sm:$0xff] }
 0x2e2   : > { %13876 = vmatmul.mubr.f32.gmra.mrb[10].mxu1 %v18082_v31  ;;  %16948 = vmatprep.subr.bf16.mxu0 %v16947_v2 }
 0x2e3   : > { %15220 = vmatmul.mubr.f32.gmra.mrb[10].mxu0 %v21404_v60  ;;  %16182 = vmatpush3.bf16.msra.mxu1 %v16179_v3  ;;  %v10693_v3 = vld [vmem:[%s21371_s1 + $0xb38] sm:$0xff] }
 0x2e4   : > { %16950 = vmatpush3.bf16.msra.mxu0 %v16947_v2  ;;  %13878 = vmatprep.mubr.f32.mxu1 %v18085_v32  ;;  %v11076_v2 = vld [vmem:[%s21371_s1 + $0x1730] sm:$0xff]  ;;  %v16203_v52 = vpack.c.bf16 %v10693_v3, %v10692_v40  ;;  %v11087_v40 = vld [vmem:[%s21371_s1 + $0x1788] sm:$0xff] }
 0x2e5   : > { %15222 = vmatprep.mubr.f32.mxu0 %v21405_v53  ;;  %16184 = vmatprep.subr.bf16.mxu1 %v16183_v61  ;;  %v16971_v15 = vpack.c.bf16 %v11077_v59, %v11076_v2  ;;  %v10704_v59 = vld [vmem:[%s21371_s1 + $0xb90] sm:$0xff] }
 0x2e6   : > { %13879 = vmatmul.mubr.f32.gmra.mrb[12].mxu1 %v18088_v33  ;;  %16952 = vmatprep.subr.bf16.mxu0 %v16951_v18 }
 0x2e7   : > { %15223 = vmatmul.mubr.f32.gmra.mrb[12].mxu0 %v21406_v41  ;;  %16186 = vmatpush3.bf16.msra.mxu1 %v16183_v61  ;;  %v10695_v61 = vld [vmem:[%s21371_s1 + $0xb48] sm:$0xff] }
 0x2e8   : > { %16954 = vmatpush3.bf16.msra.mxu0 %v16951_v18  ;;  %13881 = vmatprep.mubr.f32.mxu1 %v18091_v34  ;;  %v11078_v18 = vld [vmem:[%s21371_s1 + $0x1740] sm:$0xff]  ;;  %v16207_v5 = vpack.c.bf16 %v10695_v61, %v10694_v39  ;;  %v11088_v39 = vld [vmem:[%s21371_s1 + $0x1790] sm:$0xff]  ;;  %v11089_v61 = vld [vmem:[%s21371_s1 + $0x1798] sm:$0xff] }
 0x2e9   : > { %15225 = vmatprep.mubr.f32.mxu0 %v21407_v57  ;;  %16188 = vmatprep.subr.bf16.mxu1 %v16187_v20  ;;  %v16975_v14 = vpack.c.bf16 %v11079_v42, %v11078_v18  ;;  %v16995_v42 = vpack.c.bf16 %v11089_v61, %v11088_v39  ;;  %v10716_v39 = vld [vmem:[%s21371_s1 + $0xbf0] sm:$0xff]  ;;  %v10717_v61 = vld [vmem:[%s21371_s1 + $0xbf8] sm:$0xff] }
 0x2ea   : > { %13882 = vmatmul.mubr.f32.gmra.mrb[14].mxu1 %v18094_v35  ;;  %16956 = vmatprep.subr.bf16.mxu0 %v16955_v44 }
 0x2eb   : > { %15226 = vmatmul.mubr.f32.gmra.mrb[14].mxu0 %v21408_v11  ;;  %16190 = vmatpush3.bf16.msra.mxu1 %v16187_v20  ;;  %v10697_v20 = vld [vmem:[%s21371_s1 + $0xb58] sm:$0xff] }
 0x2ec   : > { %16958 = vmatpush3.bf16.msra.mxu0 %v16955_v44  ;;  %13916 = vmatprep.mubr.f32.mxu1 %v18052_v21  ;;  %v11074_v21 = vld [vmem:[%s21371_s1 + $0x1720] sm:$0xff]  ;;  %v11080_v44 = vld [vmem:[%s21371_s1 + $0x1750] sm:$0xff]  ;;  %v16211_v13 = vpack.c.bf16 %v10697_v20, %v10696_v62 }
 0x2ed   : > { %15260 = vmatprep.mubr.f32.mxu0 %v18124_v45  ;;  %16192 = vmatprep.subr.bf16.mxu1 %v16191_v58  ;;  %v11075_v45 = vld [vmem:[%s21371_s1 + $0x1728] sm:$0xff]  ;;  %v16979_v56 = vpack.c.bf16 %v11081_v8, %v11080_v44  ;;  %v10708_v44 = vld [vmem:[%s21371_s1 + $0xbb0] sm:$0xff]  ;;  %v10709_v8 = vld [vmem:[%s21371_s1 + $0xbb8] sm:$0xff] }
 0x2ee   : > { %13917 = vmatmul.mubr.f32.vlgmr.msra.gmra.mrb[0].mxu1 %v18055_v22  ;;  %16960 = vmatprep.subr.bf16.mxu0 %v16959_v12  ;;  %v16967_v16 = vpack.c.bf16 %v11075_v45, %v11074_v21  ;;  %v10702_v45 = vld [vmem:[%s21371_s1 + $0xb80] sm:$0xff] }
 0x2ef   : > { %15261 = vmatmul.mubr.f32.vlgmr.msra.gmra.mrb[0].mxu0 %v18127_v46  ;;  %16194 = vmatpush3.bf16.msra.mxu1 %v16191_v58  ;;  %v10699_v58 = vld [vmem:[%s21371_s1 + $0xb68] sm:$0xff] }
 0x2f0   : > { %16962 = vmatpush3.bf16.msra.mxu0 %v16959_v12  ;;  %13919 = vmatprep.mubr.f32.mxu1 %v18058_v23  ;;  %v11082_v12 = vld [vmem:[%s21371_s1 + $0x1760] sm:$0xff]  ;;  %v16215_v9 = vpack.c.bf16 %v10699_v58, %v10698_v51  ;;  %v16235_v51 = vpack.c.bf16 %v10709_v8, %v10708_v44  ;;  %v11105_v44 = vld [vmem:[%s21371_s1 + $0x1818] sm:$0xff]  ;;  %v21410_v8 = vld [vmem:[#allocation17_spill] sm:$0xff] }
 0x2f1   : > { %15263 = vmatprep.mubr.f32.mxu0 %v18130_v47  ;;  %16196 = vmatprep.subr.bf16.mxu1 %v16195_v0  ;;  %v16983_v10 = vpack.c.bf16 %v11083_v17, %v11082_v12  ;;  %v10710_v12 = vld [vmem:[%s21371_s1 + $0xbc0] sm:$0xff]  ;;  %v10711_v17 = vld [vmem:[%s21371_s1 + $0xbc8] sm:$0xff] }
 0x2f2   : > { %13920 = vmatmul.mubr.f32.gmra.mrb[2].mxu1 %v18061_v24  ;;  %16964 = vmatprep.subr.bf16.mxu0 %v16963_v1 }
 0x2f3   : > { %15264 = vmatmul.mubr.f32.gmra.mrb[2].mxu0 %v18133_v48  ;;  %16198 = vmatpush3.bf16.msra.mxu1 %v16195_v0  ;;  %v10701_v0 = vld [vmem:[%s21371_s1 + $0xb78] sm:$0xff] }
 0x2f4   : > { %16966 = vmatpush3.bf16.msra.mxu0 %v16963_v1  ;;  %13922 = vmatprep.mubr.f32.mxu1 %v18064_v25  ;;  %v11084_v1 = vld [vmem:[%s21371_s1 + $0x1770] sm:$0xff]  ;;  %v16219_v43 = vpack.c.bf16 %v10701_v0, %v10700_v4  ;;  %v16239_v4 = vpack.c.bf16 %v10711_v17, %v10710_v12  ;;  %v11113_v12 = vld [vmem:[%s21371_s1 + $0x1858] sm:$0xff]  ;;  %v11115_v17 = vld [vmem:[%s21371_s1 + $0x1868] sm:$0xff] }
 0x2f5   : > { %15266 = vmatprep.mubr.f32.mxu0 %v18136_v49  ;;  %16200 = vmatprep.subr.bf16.mxu1 %v16199_v63  ;;  %v16987_v21 = vpack.c.bf16 %v11085_v19, %v11084_v1  ;;  %v10712_v1 = vld [vmem:[%s21371_s1 + $0xbd0] sm:$0xff]  ;;  %v10713_v19 = vld [vmem:[%s21371_s1 + $0xbd8] sm:$0xff] }
 0x2f6   : > { %13923 = vmatmul.mubr.f32.gmra.mrb[4].mxu1 %v18067_v26  ;;  %16968 = vmatprep.subr.bf16.mxu0 %v16967_v16 }
 0x2f7   : > { %15267 = vmatmul.mubr.f32.gmra.mrb[4].mxu0 %v18139_v50  ;;  %16202 = vmatpush3.bf16.msra.mxu1 %v16199_v63  ;;  %v10703_v63 = vld [vmem:[%s21371_s1 + $0xb88] sm:$0xff] }
 0x2f8   : > { %16970 = vmatpush3.bf16.msra.mxu0 %v16967_v16  ;;  %13925 = vmatprep.mubr.f32.mxu1 %v18070_v27  ;;  %v11086_v16 = vld [vmem:[%s21371_s1 + $0x1780] sm:$0xff]  ;;  %v16223_v3 = vpack.c.bf16 %v10703_v63, %v10702_v45  ;;  %v16243_v45 = vpack.c.bf16 %v10713_v19, %v10712_v1 }
 0x2f9   : > { %15269 = vmatprep.mubr.f32.mxu0 %v21400_v7  ;;  %16204 = vmatprep.subr.bf16.mxu1 %v16203_v52  ;;  %v16991_v2 = vpack.c.bf16 %v11087_v40, %v11086_v16  ;;  %v10714_v16 = vld [vmem:[%s21371_s1 + $0xbe0] sm:$0xff]  ;;  %v10715_v40 = vld [vmem:[%s21371_s1 + $0xbe8] sm:$0xff] }
 0x2fa   : > { %13926 = vmatmul.mubr.f32.gmra.mrb[6].mxu1 %v18073_v28  ;;  %16972 = vmatprep.subr.bf16.mxu0 %v16971_v15  ;;  %v21328_v1 = vld [vmem:[%s21372_s2] ss:$0 sm:$0xff] }
 0x2fb   : > { %15270 = vmatmul.mubr.f32.gmra.mrb[6].mxu0 %v21401_v54  ;;  %16206 = vmatpush3.bf16.msra.mxu1 %v16203_v52  ;;  %v10705_v52 = vld [vmem:[%s21371_s1 + $0xb98] sm:$0xff] }
 0x2fc   : > { %16974 = vmatpush3.bf16.msra.mxu0 %v16971_v15  ;;  %13928 = vmatprep.mubr.f32.mxu1 %v18076_v29  ;;  %v21409_v15 = vld [vmem:[#allocation16_spill] sm:$0xff]  ;;  %v16227_v18 = vpack.c.bf16 %v10705_v52, %v10704_v59  ;;  %v16247_v59 = vpack.c.bf16 %v10715_v40, %v10714_v16 }
 0x2fd   : > { %15272 = vmatprep.mubr.f32.mxu0 %v21402_v6  ;;  %16208 = vmatprep.subr.bf16.mxu1 %v16207_v5 }
 0x2fe   : > { %13929 = vmatmul.mubr.f32.gmra.mrb[8].mxu1 %v18079_v30  ;;  %16976 = vmatprep.subr.bf16.mxu0 %v16975_v14 }
 0x2ff   : > { %15273 = vmatmul.mubr.f32.gmra.mrb[8].mxu0 %v21403_v55  ;;  %16210 = vmatpush3.bf16.msra.mxu1 %v16207_v5  ;;  %v10706_v5 = vld [vmem:[%s21371_s1 + $0xba0] sm:$0xff] }
 0x300   : > { %16978 = vmatpush3.bf16.msra.mxu0 %v16975_v14  ;;  %13931 = vmatprep.mubr.f32.mxu1 %v18082_v31  ;;  %v10707_v14 = vld [vmem:[%s21371_s1 + $0xba8] sm:$0xff] }
 0x301   : > { %15275 = vmatprep.mubr.f32.mxu0 %v21404_v60  ;;  %16212 = vmatprep.subr.bf16.mxu1 %v16211_v13  ;;  %v16231_v62 = vpack.c.bf16 %v10707_v14, %v10706_v5  ;;  %v16251_v5 = vpack.c.bf16 %v10717_v61, %v10716_v39 }
 0x302   : > { %13932 = vmatmul.mubr.f32.gmra.mrb[10].mxu1 %v18085_v32  ;;  %16980 = vmatprep.subr.bf16.mxu0 %v16979_v56 }
 0x303   : > { %15276 = vmatmul.mubr.f32.gmra.mrb[10].mxu0 %v21405_v53  ;;  %16214 = vmatpush3.bf16.msra.mxu1 %v16211_v13  ;;  %v11092_v13 = vld [vmem:[%s21371_s1 + $0x17b0] sm:$0xff] }
 0x304   : > { %16982 = vmatpush3.bf16.msra.mxu0 %v16979_v56  ;;  %13934 = vmatprep.mubr.f32.mxu1 %v18088_v33  ;;  %v11093_v56 = vld [vmem:[%s21371_s1 + $0x17b8] sm:$0xff] }
 0x305   : > { %15278 = vmatprep.mubr.f32.mxu0 %v21406_v41  ;;  %16216 = vmatprep.subr.bf16.mxu1 %v16215_v9  ;;  %v17003_v58 = vpack.c.bf16 %v11093_v56, %v11092_v13  ;;  %v11106_v56 = vld [vmem:[%s21371_s1 + $0x1820] sm:$0xff] }
 0x306   : > { %13935 = vmatmul.mubr.f32.gmra.mrb[12].mxu1 %v18091_v34  ;;  %16984 = vmatprep.subr.bf16.mxu0 %v16983_v10 }
 0x307   : > { %15279 = vmatmul.mubr.f32.gmra.mrb[12].mxu0 %v21407_v57  ;;  %16218 = vmatpush3.bf16.msra.mxu1 %v16215_v9  ;;  %v11094_v9 = vld [vmem:[%s21371_s1 + $0x17c0] sm:$0xff] }
 0x308   : > { %16986 = vmatpush3.bf16.msra.mxu0 %v16983_v10  ;;  %13937 = vmatprep.mubr.f32.mxu1 %v18094_v35  ;;  %v11095_v10 = vld [vmem:[%s21371_s1 + $0x17c8] sm:$0xff] }
 0x309   : > { %15281 = vmatprep.mubr.f32.mxu0 %v21408_v11  ;;  %16220 = vmatprep.subr.bf16.mxu1 %v16219_v43  ;;  %v17007_v0 = vpack.c.bf16 %v11095_v10, %v11094_v9  ;;  %v11117_v9 = vld [vmem:[%s21371_s1 + $0x1878] sm:$0xff] }
 0x30a   : > { %13938 = vmatmul.mubr.f32.gmra.mrb[14].mxu1 %v18097_v36  ;;  %16988 = vmatprep.subr.bf16.mxu0 %v16987_v21 }
 0x30b   : > { %15282 = vmatmul.mubr.f32.gmra.mrb[14].mxu0 %v21409_v15  ;;  %16222 = vmatpush3.bf16.msra.mxu1 %v16219_v43  ;;  %v11096_v43 = vld [vmem:[%s21371_s1 + $0x17d0] sm:$0xff] }
 0x30c   : > { %16990 = vmatpush3.bf16.msra.mxu0 %v16987_v21  ;;  %13972 = vmatprep.mubr.f32.mxu1 %v18055_v22  ;;  %v11090_v22 = vld [vmem:[%s21371_s1 + $0x17a0] sm:$0xff]  ;;  %v11097_v21 = vld [vmem:[%s21371_s1 + $0x17d8] sm:$0xff] }
 0x30d   : > { %15316 = vmatprep.mubr.f32.mxu0 %v18127_v46  ;;  %16224 = vmatprep.subr.bf16.mxu1 %v16223_v3  ;;  %v11091_v46 = vld [vmem:[%s21371_s1 + $0x17a8] sm:$0xff]  ;;  %v17011_v63 = vpack.c.bf16 %v11097_v21, %v11096_v43 }
 0x30e   : > { %13973 = vmatmul.mubr.f32.vlgmr.msra.gmra.mrb[0].mxu1 %v18058_v23  ;;  %16992 = vmatprep.subr.bf16.mxu0 %v16991_v2  ;;  %v16999_v20 = vpack.c.bf16 %v11091_v46, %v11090_v22  ;;  %v11102_v22 = vld [vmem:[%s21371_s1 + $0x1800] sm:$0xff]  ;;  %v11103_v46 = vld [vmem:[%s21371_s1 + $0x1808] sm:$0xff] }
 0x30f   : > { %15317 = vmatmul.mubr.f32.vlgmr.msra.gmra.mrb[0].mxu0 %v18130_v47  ;;  %16226 = vmatpush3.bf16.msra.mxu1 %v16223_v3  ;;  %v11098_v3 = vld [vmem:[%s21371_s1 + $0x17e0] sm:$0xff] }
 0x310   : > { %16994 = vmatpush3.bf16.msra.mxu0 %v16991_v2  ;;  %13975 = vmatprep.mubr.f32.mxu1 %v18061_v24  ;;  %v11099_v2 = vld [vmem:[%s21371_s1 + $0x17e8] sm:$0xff] }
 0x311   : > { %15319 = vmatprep.mubr.f32.mxu0 %v18133_v48  ;;  %16228 = vmatprep.subr.bf16.mxu1 %v16227_v18  ;;  %v17015_v52 = vpack.c.bf16 %v11099_v2, %v11098_v3 }
 0x312   : > { %13976 = vmatmul.mubr.f32.gmra.mrb[2].mxu1 %v18064_v25  ;;  %16996 = vmatprep.subr.bf16.mxu0 %v16995_v42 }
 0x313   : > { %15320 = vmatmul.mubr.f32.gmra.mrb[2].mxu0 %v18136_v49  ;;  %16230 = vmatpush3.bf16.msra.mxu1 %v16227_v18  ;;  %v11100_v18 = vld [vmem:[%s21371_s1 + $0x17f0] sm:$0xff] }
 0x314   : > { %16998 = vmatpush3.bf16.msra.mxu0 %v16995_v42  ;;  %13978 = vmatprep.mubr.f32.mxu1 %v18067_v26  ;;  %v11101_v42 = vld [vmem:[%s21371_s1 + $0x17f8] sm:$0xff] }
 0x315   : > { %15322 = vmatprep.mubr.f32.mxu0 %v18139_v50  ;;  %16232 = vmatprep.subr.bf16.mxu1 %v16231_v62  ;;  %v17019_v14 = vpack.c.bf16 %v11101_v42, %v11100_v18 }
 0x316   : > { %13979 = vmatmul.mubr.f32.gmra.mrb[4].mxu1 %v18070_v27  ;;  %17000 = vmatprep.subr.bf16.mxu0 %v16999_v20 }
 0x317   : > { %15323 = vmatmul.mubr.f32.gmra.mrb[4].mxu0 %v21400_v7  ;;  %16234 = vmatpush3.bf16.msra.mxu1 %v16231_v62  ;;  %v17023_v62 = vpack.c.bf16 %v11103_v46, %v11102_v22 }
 0x318   : > { %17002 = vmatpush3.bf16.msra.mxu0 %v16999_v20  ;;  %13981 = vmatprep.mubr.f32.mxu1 %v18073_v28  ;;  %v11104_v20 = vld [vmem:[%s21371_s1 + $0x1810] sm:$0xff] }
 0x319   : > { %15325 = vmatprep.mubr.f32.mxu0 %v21401_v54  ;;  %16236 = vmatprep.subr.bf16.mxu1 %v16235_v51  ;;  %v17027_v13 = vpack.c.bf16 %v11105_v44, %v11104_v20 }
 0x31a   : > { %13982 = vmatmul.mubr.f32.gmra.mrb[6].mxu1 %v18076_v29  ;;  %17004 = vmatprep.subr.bf16.mxu0 %v17003_v58 }
 0x31b   : > { %15326 = vmatmul.mubr.f32.gmra.mrb[6].mxu0 %v21402_v6  ;;  %16238 = vmatpush3.bf16.msra.mxu1 %v16235_v51  ;;  %v11107_v51 = vld [vmem:[%s21371_s1 + $0x1828] sm:$0xff] }
 0x31c   : > { %17006 = vmatpush3.bf16.msra.mxu0 %v17003_v58  ;;  %13984 = vmatprep.mubr.f32.mxu1 %v18079_v30  ;;  %v11111_v58 = vld [vmem:[%s21371_s1 + $0x1848] sm:$0xff] }
 0x31d   : > { %15328 = vmatprep.mubr.f32.mxu0 %v21403_v55  ;;  %16240 = vmatprep.subr.bf16.mxu1 %v16239_v4 }
 0x31e   : > { %13985 = vmatmul.mubr.f32.gmra.mrb[8].mxu1 %v18082_v31  ;;  %17008 = vmatprep.subr.bf16.mxu0 %v17007_v0 }
 0x31f   : > { %15329 = vmatmul.mubr.f32.gmra.mrb[8].mxu0 %v21404_v60  ;;  %16242 = vmatpush3.bf16.msra.mxu1 %v16239_v4 }
 0x320   : > { %17010 = vmatpush3.bf16.msra.mxu0 %v17007_v0  ;;  %13987 = vmatprep.mubr.f32.mxu1 %v18085_v32 }
 0x321   : > { %15331 = vmatprep.mubr.f32.mxu0 %v21405_v53  ;;  %16244 = vmatprep.subr.bf16.mxu1 %v16243_v45 }
 0x322   : > { %13988 = vmatmul.mubr.f32.gmra.mrb[10].mxu1 %v18088_v33  ;;  %17012 = vmatprep.subr.bf16.mxu0 %v17011_v63 }
 0x323   : > { %15332 = vmatmul.mubr.f32.gmra.mrb[10].mxu0 %v21406_v41  ;;  %16246 = vmatpush3.bf16.msra.mxu1 %v16243_v45 }
 0x324   : > { %17014 = vmatpush3.bf16.msra.mxu0 %v17011_v63  ;;  %13990 = vmatprep.mubr.f32.mxu1 %v18091_v34 }
 0x325   : > { %15334 = vmatprep.mubr.f32.mxu0 %v21407_v57  ;;  %16248 = vmatprep.subr.bf16.mxu1 %v16247_v59 }
 0x326   : > { %13991 = vmatmul.mubr.f32.gmra.mrb[12].mxu1 %v18094_v35  ;;  %17016 = vmatprep.subr.bf16.mxu0 %v17015_v52 }
 0x327   : > { %15335 = vmatmul.mubr.f32.gmra.mrb[12].mxu0 %v21408_v11  ;;  %16250 = vmatpush3.bf16.msra.mxu1 %v16247_v59 }
 0x328   : > { %17018 = vmatpush3.bf16.msra.mxu0 %v17015_v52  ;;  %13993 = vmatprep.mubr.f32.mxu1 %v18097_v36 }
 0x329   : > { %15337 = vmatprep.mubr.f32.mxu0 %v21409_v15  ;;  %16252 = vmatprep.subr.bf16.mxu1 %v16251_v5 }
 0x32a   : > { %13994 = vmatmul.mubr.f32.gmra.mrb[14].mxu1 %v18100_v37  ;;  %17020 = vmatprep.subr.bf16.mxu0 %v17019_v14 }
 0x32b   : > { %15338 = vmatmul.mubr.f32.gmra.mrb[14].mxu0 %v21410_v8  ;;  %16254 = vmatpush3.bf16.msra.mxu1 %v16251_v5 }
 0x32c   : > { %17022 = vmatpush3.bf16.msra.mxu0 %v17019_v14  ;;  %14028 = vmatprep.mubr.f32.mxu1 %v18058_v23  ;;  %v17031_v23 = vpack.c.bf16 %v11107_v51, %v11106_v56 }
 0x32d   : > { %15372 = vmatprep.mubr.f32.mxu0 %v18130_v47  ;;  %17024 = vmatprep.subr.bf16.mxu0 %v17023_v62  ;;  %v11109_v47 = vld [vmem:[%s21371_s1 + $0x1838] sm:$0xff] }
 0x32e   : > { %14029 = vmatmul.mubr.f32.vlgmr.msra.gmra.mrb[0].mxu1 %v18061_v24  ;;  %v11108_v24 = vld [vmem:[%s21371_s1 + $0x1830] sm:$0xff] }
 0x32f   : > { %15373 = vmatmul.mubr.f32.vlgmr.msra.gmra.mrb[0].mxu0 %v18133_v48  ;;  %14031 = vmatprep.mubr.f32.mxu1 %v18064_v25  ;;  %v17035_v25 = vpack.c.bf16 %v11109_v47, %v11108_v24 }
 0x330   : > { %17026 = vmatpush3.bf16.msra.mxu0 %v17023_v62  ;;  %15375 = vmatprep.mubr.f32.mxu0 %v18136_v49 }
 0x331   : > { %17028 = vmatprep.subr.bf16.mxu0 %v17027_v13 }
 0x332   : > { %14032 = vmatmul.mubr.f32.gmra.mrb[2].mxu1 %v18067_v26  ;;  %v11110_v26 = vld [vmem:[%s21371_s1 + $0x1840] sm:$0xff] }
 0x333   : > { %15376 = vmatmul.mubr.f32.gmra.mrb[2].mxu0 %v18139_v50  ;;  %14034 = vmatprep.mubr.f32.mxu1 %v18070_v27  ;;  %v17039_v27 = vpack.c.bf16 %v11111_v58, %v11110_v26 }
 0x334   : > { %17030 = vmatpush3.bf16.msra.mxu0 %v17027_v13  ;;  %15378 = vmatprep.mubr.f32.mxu0 %v21400_v7 }
 0x335   : > { %17032 = vmatprep.subr.bf16.mxu0 %v17031_v23 }
 0x336   : > { %14035 = vmatmul.mubr.f32.gmra.mrb[4].mxu1 %v18073_v28  ;;  %v11112_v28 = vld [vmem:[%s21371_s1 + $0x1850] sm:$0xff] }
 0x337   : > { %15379 = vmatmul.mubr.f32.gmra.mrb[4].mxu0 %v21401_v54  ;;  %14037 = vmatprep.mubr.f32.mxu1 %v18076_v29  ;;  %v17043_v29 = vpack.c.bf16 %v11113_v12, %v11112_v28 }
 0x338   : > { %17034 = vmatpush3.bf16.msra.mxu0 %v17031_v23  ;;  %15381 = vmatprep.mubr.f32.mxu0 %v21402_v6 }
 0x339   : > { %17036 = vmatprep.subr.bf16.mxu0 %v17035_v25 }
 0x33a   : > { %14038 = vmatmul.mubr.f32.gmra.mrb[6].mxu1 %v18079_v30  ;;  %v11114_v30 = vld [vmem:[%s21371_s1 + $0x1860] sm:$0xff] }
 0x33b   : > { %15382 = vmatmul.mubr.f32.gmra.mrb[6].mxu0 %v21403_v55  ;;  %14040 = vmatprep.mubr.f32.mxu1 %v18082_v31  ;;  %v17047_v31 = vpack.c.bf16 %v11115_v17, %v11114_v30 }
 0x33c   : > { %17038 = vmatpush3.bf16.msra.mxu0 %v17035_v25  ;;  %15384 = vmatprep.mubr.f32.mxu0 %v21404_v60 }
 0x33d   : > { %17040 = vmatprep.subr.bf16.mxu0 %v17039_v27 }
 0x33e   : > { %14041 = vmatmul.mubr.f32.gmra.mrb[8].mxu1 %v18085_v32  ;;  %v11116_v32 = vld [vmem:[%s21371_s1 + $0x1870] sm:$0xff] }
 0x33f   : > { %15385 = vmatmul.mubr.f32.gmra.mrb[8].mxu0 %v21405_v53  ;;  %14043 = vmatprep.mubr.f32.mxu1 %v18088_v33  ;;  %v17051_v33 = vpack.c.bf16 %v11117_v9, %v11116_v32 }
 0x340   : > { %17042 = vmatpush3.bf16.msra.mxu0 %v17039_v27  ;;  %15387 = vmatprep.mubr.f32.mxu0 %v21406_v41 }
 0x341   : > { %17044 = vmatprep.subr.bf16.mxu0 %v17043_v29 }
 0x342   : > { %14044 = vmatmul.mubr.f32.gmra.mrb[10].mxu1 %v18091_v34  ;;  %v21411_v34 = vld [vmem:[#allocation18_spill] sm:$0xff] }
 0x343   : > { %15388 = vmatmul.mubr.f32.gmra.mrb[10].mxu0 %v21407_v57  ;;  %14046 = vmatprep.mubr.f32.mxu1 %v18094_v35  ;;  %v21412_v35 = vld [vmem:[#allocation19_spill] sm:$0xff] }
 0x344   : > { %17046 = vmatpush3.bf16.msra.mxu0 %v17043_v29  ;;  %15390 = vmatprep.mubr.f32.mxu0 %v21408_v11 }
 0x345   : > { %17048 = vmatprep.subr.bf16.mxu0 %v17047_v31 }
 0x346   : > { %14047 = vmatmul.mubr.f32.gmra.mrb[12].mxu1 %v18097_v36  ;;  %v17932_v36 = vmov 0.0|0.0  }
 0x347   : > { %15391 = vmatmul.mubr.f32.gmra.mrb[12].mxu0 %v21409_v15  ;;  %14049 = vmatprep.mubr.f32.mxu1 %v18100_v37  ;;  %v17934_v37 = vmov 0.0  }
 0x348   : > { %17050 = vmatpush3.bf16.msra.mxu0 %v17047_v31  ;;  %15393 = vmatprep.mubr.f32.mxu0 %v21410_v8 }
 0x349   : > { %17052 = vmatprep.subr.bf16.mxu0 %v17051_v33  ;;  %17055 = vmatprep.subr.bf16.mxu1 %v17932_v36 }
 0x34a   : > { %14050 = vmatmul.mubr.f32.gmra.mrb[14].mxu1 %v18103_v38 }
 0x34b   : > { %15394 = vmatmul.mubr.f32.gmra.mrb[14].mxu0 %v21411_v34  ;;  %15484 = vmatprep.mubr.msk.f32.mxu1 %vm17933_vm0, %v17934_v37 }
 0x34c   : > { %17054 = vmatpush3.bf16.msra.mxu0 %v17051_v33  ;;  %15428 = vmatprep.mubr.f32.mxu0 %v18133_v48 }
 0x34f   : > { %15429 = vmatmul.mubr.f32.vlgmr.msra.gmra.mrb[0].mxu0 %v18136_v49 }
 0x350   : > { %15431 = vmatprep.mubr.f32.mxu0 %v18139_v50 }
 0x353   : > { %15432 = vmatmul.mubr.f32.gmra.mrb[2].mxu0 %v21400_v7 }
 0x354   : > { %15434 = vmatprep.mubr.f32.mxu0 %v21401_v54 }
 0x357   : > { %15435 = vmatmul.mubr.f32.gmra.mrb[4].mxu0 %v21402_v6 }
 0x358   : > { %15437 = vmatprep.mubr.f32.mxu0 %v21403_v55 }
 0x35b   : > { %15438 = vmatmul.mubr.f32.gmra.mrb[6].mxu0 %v21404_v60 }
 0x35c   : > { %15440 = vmatprep.mubr.f32.mxu0 %v21405_v53 }
 0x35f   : > { %15441 = vmatmul.mubr.f32.gmra.mrb[8].mxu0 %v21406_v41 }
 0x360   : > { %15443 = vmatprep.mubr.f32.mxu0 %v21407_v57 }
 0x363   : > { %15444 = vmatmul.mubr.f32.gmra.mrb[10].mxu0 %v21408_v11 }
 0x364   : > { %15446 = vmatprep.mubr.f32.mxu0 %v21409_v15 }
 0x367   : > { %15447 = vmatmul.mubr.f32.gmra.mrb[12].mxu0 %v21410_v8 }
 0x368   : > { %15449 = vmatprep.mubr.f32.mxu0 %v21411_v34 }
 0x36b   : > { %15450 = vmatmul.mubr.f32.gmra.mrb[14].mxu0 %v21412_v35 }
 0x401   : > { %v14030_v38 = vpop.f32.mrb[0].mxu1 }
 0x402   : > { %v5056_v48 = vpop.f32.mrb[1].mxu1 }
 0x405   : > { %v14033_v49 = vpop.f32.mrb[2].mxu1 }
 0x406   : > { %v5066_v50 = vpop.f32.mrb[3].mxu1 }
 0x409   : > { %v14036_v7 = vpop.f32.mrb[4].mxu1 }
 0x40a   : > { %v5076_v54 = vpop.f32.mrb[5].mxu1 }
 0x40d   : > { %v14039_v6 = vpop.f32.mrb[6].mxu1 }
 0x40e   : > { %v5086_v55 = vpop.f32.mrb[7].mxu1 }
 0x411   : > { %v14042_v60 = vpop.f32.mrb[8].mxu1 }
 0x412   : > { %v5096_v53 = vpop.f32.mrb[9].mxu1 }
 0x415   : > { %v14045_v41 = vpop.f32.mrb[10].mxu1 }
 0x416   : > { %v5106_v57 = vpop.f32.mrb[11].mxu1 }
 0x419   : > { %v21317_v11 = vpop.f32.mrb[12].mxu1 }
 0x41a   : > { %v21319_v15 = vpop.f32.mrb[13].mxu1 }
 0x41d   : > { %v21321_v10 = vpop.f32.mrb[14].mxu1 }
 0x41e   : > { %v21323_v4 = vpop.f32.mrb[15].mxu1 }
 0x422   : > { %v15430_v0 = vpop.f32.mrb[0].mxu0 }
 0x423   : > { %v17079_v19 = vadd.f32 %v15430_v0, %v14030_v38  ;;  %v9906_v43 = vpop.f32.mrb[1].mxu0 }
 0x424   : > { %v17080_v21 = vadd.f32 %v9906_v43, %v5056_v48 }
 0x425   : > { %v10009_v45 = vadd.f32 %v17079_v19, %v21328_v1 }
 0x426   : > { %v10008_v63 = vadd.f32 %v17080_v21, %v21328_v1  ;;  %v15433_v16 = vpop.f32.mrb[2].mxu0 }
 0x427   : > { %17874 = vtanh.f32 %v10009_v45  ;;  %v17081_v40 = vadd.f32 %v15433_v16, %v14033_v49  ;;  %v9916_v3 = vpop.f32.mrb[3].mxu0 }
 0x428   : > { %17876 = vtanh.f32 %v10008_v63  ;;  %v17082_v2 = vadd.f32 %v9916_v3, %v5066_v50 }
 0x429   : > { %v10011_v59 = vadd.f32 %v17081_v40, %v21328_v1 }
 0x42a   : > { %v10010_v52 = vadd.f32 %v17082_v2, %v21328_v1  ;;  %v15436_v39 = vpop.f32.mrb[4].mxu0 }
 0x42b   : > { %17878 = vtanh.f32 %v10011_v59  ;;  %v17083_v61 = vadd.f32 %v15436_v39, %v14036_v7  ;;  %v9926_v18 = vpop.f32.mrb[5].mxu0 }
 0x42c   : > { %17880 = vtanh.f32 %v10010_v52  ;;  %v17084_v42 = vadd.f32 %v9926_v18, %v5076_v54 }
 0x42d   : > { %v10013_v5 = vadd.f32 %v17083_v61, %v21328_v1 }
 0x42e   : > { %v10012_v14 = vadd.f32 %v17084_v42, %v21328_v1  ;;  %v15439_v22 = vpop.f32.mrb[6].mxu0 }
 0x42f   : > { %17882 = vtanh.f32 %v10013_v5  ;;  %v17085_v46 = vadd.f32 %v15439_v22, %v14039_v6  ;;  %v9936_v62 = vpop.f32.mrb[7].mxu0 }
 0x430   : > { %17884 = vtanh.f32 %v10012_v14  ;;  %v17086_v20 = vadd.f32 %v9936_v62, %v5086_v55 }
 0x431   : > { %v17875_v44 = vpop.eup %17874  ;;  %v10015_v8 = vadd.f32 %v17085_v46, %v21328_v1 }
 0x432   : > { %v17877_v13 = vpop.eup %17876  ;;  %v10014_v56 = vadd.f32 %v17086_v20, %v21328_v1  ;;  %v15442_v51 = vpop.f32.mrb[8].mxu0 }
 0x433   : > { %17886 = vtanh.f32 %v10015_v8  ;;  %v17087_v23 = vadd.f32 %v15442_v51, %v14042_v60  ;;  %v9946_v24 = vpop.f32.mrb[9].mxu0  ;;  %v17056_v47 = vpack.c.bf16 %v17875_v44, %v17877_v13 }
 0x434   : > { %17888 = vtanh.f32 %v10014_v56  ;;  %v17088_v25 = vadd.f32 %v9946_v24, %v5096_v53 }
 0x435   : > { %v17879_v26 = vpop.eup %17878  ;;  %v10017_v58 = vadd.f32 %v17087_v23, %v21328_v1  ;;  %17057 = vmatpush3.bf16.xpose.msra.mxu1 %v17056_v47 }
 0x436   : > { %v17881_v27 = vpop.eup %17880  ;;  %v10016_v28 = vadd.f32 %v17088_v25, %v21328_v1  ;;  %v15445_v12 = vpop.f32.mrb[10].mxu0  ;;  %17058 = vmatprep.subr.bf16.mxu1 %v17932_v36 }
 0x437   : > { %17890 = vtanh.f32 %v10017_v58  ;;  %v17089_v29 = vadd.f32 %v15445_v12, %v14045_v41  ;;  %v9956_v30 = vpop.f32.mrb[11].mxu0  ;;  %v17059_v17 = vpack.c.bf16 %v17879_v26, %v17881_v27 }
 0x438   : > { %17892 = vtanh.f32 %v10016_v28  ;;  %v17090_v31 = vadd.f32 %v9956_v30, %v5106_v57 }
 0x439   : > { %v17883_v32 = vpop.eup %17882  ;;  %v10019_v9 = vadd.f32 %v17089_v29, %v21328_v1 }
 0x43a   : > { %v17885_v33 = vpop.eup %17884  ;;  %v10018_v34 = vadd.f32 %v17090_v31, %v21328_v1  ;;  %v15448_v35 = vpop.f32.mrb[12].mxu0 }
 0x43b   : > { %17894 = vtanh.f32 %v10019_v9  ;;  %v17091_v37 = vadd.f32 %v15448_v35, %v21317_v11  ;;  %v9966_v38 = vpop.f32.mrb[13].mxu0  ;;  %v17062_v48 = vpack.c.bf16 %v17883_v32, %v17885_v33 }
 0x43c   : > { %17896 = vtanh.f32 %v10018_v34  ;;  %v17092_v49 = vadd.f32 %v9966_v38, %v21319_v15 }
 0x43d   : > { %v17887_v50 = vpop.eup %17886  ;;  %v10021_v7 = vadd.f32 %v17091_v37, %v21328_v1  ;;  %17060 = vmatpush3.bf16.xpose.msra.mxu1 %v17059_v17 }
 0x43e   : > { %v17889_v54 = vpop.eup %17888  ;;  %v10020_v6 = vadd.f32 %v17092_v49, %v21328_v1  ;;  %v15451_v55 = vpop.f32.mrb[14].mxu0  ;;  %17061 = vmatprep.subr.bf16.mxu1 %v17932_v36 }
 0x43f   : > { %17898 = vtanh.f32 %v10021_v7  ;;  %v17093_v60 = vadd.f32 %v15451_v55, %v21321_v10  ;;  %v9976_v53 = vpop.f32.mrb[15].mxu0  ;;  %v17065_v41 = vpack.c.bf16 %v17887_v50, %v17889_v54 }
 0x440   : > { %17900 = vtanh.f32 %v10020_v6  ;;  %v17094_v57 = vadd.f32 %v9976_v53, %v21323_v4 }
 0x441   : > { %v17891_v11 = vpop.eup %17890  ;;  %v10023_v15 = vadd.f32 %v17093_v60, %v21328_v1 }
 0x442   : > { %v17893_v0 = vpop.eup %17892  ;;  %v10022_v19 = vadd.f32 %v17094_v57, %v21328_v1  ;;  %v10040_v1 = vld [vmem:[%s21373_s3] sm:$0x3] }
 0x443   : > { %17902 = vtanh.f32 %v10023_v15  ;;  %v17068_v43 = vpack.c.bf16 %v17891_v11, %v17893_v0 }
 0x444   : > { %17904 = vtanh.f32 %v10022_v19 }
 0x445   : > { %v17895_v21 = vpop.eup %17894  ;;  %17063 = vmatpush3.bf16.xpose.msra.mxu1 %v17062_v48 }
 0x446   : > { %v17897_v45 = vpop.eup %17896  ;;  %17064 = vmatprep.subr.bf16.mxu1 %v17932_v36 }
 0x447   : > { %v17071_v10 = vpack.c.bf16 %v17895_v21, %v17897_v45 }
 0x449   : > { %v17899_v63 = vpop.eup %17898 }
 0x44a   : > { %v17901_v16 = vpop.eup %17900 }
 0x44b   : > { %v17074_v40 = vpack.c.bf16 %v17899_v63, %v17901_v16 }
 0x44d   : > { %v17903_v4 = vpop.eup %17902  ;;  %17066 = vmatpush3.bf16.xpose.msra.mxu1 %v17065_v41 }
 0x44e   : > { %v17905_v3 = vpop.eup %17904  ;;  %17067 = vmatprep.subr.bf16.mxu1 %v17932_v36 }
 0x44f   : > { %v17077_v2 = vpack.c.bf16 %v17903_v4, %v17905_v3 }
 0x455   : > { %17069 = vmatpush3.bf16.xpose.msra.mxu1 %v17068_v43 }
 0x456   : > { %17070 = vmatprep.subr.bf16.mxu1 %v17932_v36 }
 0x45d   : > { %17072 = vmatpush3.bf16.xpose.msra.mxu1 %v17071_v10 }
 0x45e   : > { %17073 = vmatprep.subr.bf16.mxu1 %v17932_v36 }
 0x465   : > { %17075 = vmatpush3.bf16.xpose.msra.mxu1 %v17074_v40 }
 0x466   : > { %17076 = vmatprep.subr.bf16.mxu1 %v17932_v36 }
 0x46d   : > { %17078 = vmatpush3.bf16.xpose.msra.mxu1 %v17077_v2 }
 0x474   : > { %15485 = vmatmul.mubr.f32.vlgmr.msra.gmra.mrb[16].mxu1 %v10040_v1 }
 0x547   : > { %v10107_v59 = vpop.f32.mrb[16].mxu1 }
 0x548   : > { %10111 = vst [vmem:[%s18013_s26] sm:$0x3] %v10107_v59  ;;  %v15486_v52 = vpop.f32.mrb[17].mxu1 }
 0x549 PF: > { %s14_s17 = sadd.s32 1, %s17930_s17   ;;  %s21413_s15 = smov %s17926_s16 }
 0x54a   : > { %p11_p5 = scmp.ge.s32.totalorder %s14_s17, 4   ;;  %s21414_s16 = smov %s21416_s18 }
 0x54c   :  { %13 = sbr.rel (!%p11_p5) target bundleno = 2 (0x2), region = 206 }
 0x553   :  { %10137 = vsyncmov [#allocation3] }
 0x556   :  { %s10138_s11 = vpop.sfrf %10137 }
 0x557   :  { %p11121_p6 = scmp.ne.s32.totalorder %s10138_s11, 0 }
 0x559   :  { %10142 = shalt.err (%p11121_p6)  }
 0x55a   :  { %10144 = vsyncmov [#allocation3 + $0x1] }
 0x55d   :  { %s10145_s26 = vpop.sfrf %10144 }
 0x55e   :  { %p11122_p7 = scmp.ne.s32.totalorder %s10145_s26, 0 }
 0x560   :  { %10149 = shalt.err (%p11122_p7)  }

</bundles_post_ra>
